<compile_context>
chip_gen: v7x
topology: tpu7x:2x2x1
jax: 0.10.0
libtpu: 0.0.40
codegen_flags: <defaults>
</compile_context>

<pallas_src>
import math

import numpy as np
import jax
import jax.numpy as jnp
from jax.experimental import pallas as pl
from jax.experimental.pallas import tpu as pltpu


_CIN_PAD = 8  # conv1's single input channel is zero-padded to 8 (sublane tile)


def _layer_specs(nf, fl):
    return (
        ('conv1', 1, nf, fl), ('conv2', nf, nf, fl),
        ('conv3', nf, 2 * nf, fl), ('conv4', 2 * nf, 2 * nf, fl),
        ('conv5', 2 * nf, 4 * nf, fl), ('conv6', 4 * nf, 4 * nf, fl),
        ('conv7', 4 * nf, 4 * nf, fl), ('conv8', 4 * nf, 4 * nf, fl),
        ('conv9', 8 * nf, 2 * nf, fl), ('conv10', 2 * nf, 2 * nf, fl),
        ('conv11', 4 * nf, nf, fl), ('conv12', nf, nf, fl),
        ('conv13', 2 * nf, nf, fl), ('conv14', nf, nf, fl),
        ('final_conv', nf, 1, 1),
    )


# ----------------------------------------------------------------------------
# Host-side constants (pure numpy, trace-time; all tiny).
# ----------------------------------------------------------------------------
def _tap_masks(h, w, fl):
    """mask[t, 0, p] = 1 iff dest pixel p has an in-bounds source for tap t."""
    pad = fl // 2
    msk = np.zeros((fl * fl, 1, h * w), np.float32)
    for ky in range(fl):
        for kx in range(fl):
            t = ky * fl + kx
            for hh in range(h):
                for ww in range(w):
                    if 0 <= hh + ky - pad < h and 0 <= ww + kx - pad < w:
                        msk[t, 0, hh * w + ww] = 1.0
    return msk


def _pool_compact_mat(h, w):
    """(H*W, H*W/4) 0/1 matrix selecting the even-row/even-col positions."""
    ho, wo = h // 2, w // 2
    c = np.zeros((h * w, ho * wo), np.float32)
    for yo in range(ho):
        for xo in range(wo):
            c[(2 * yo) * w + (2 * xo), yo * wo + xo] = 1.0
    return c


def _interp_matrix(n):
    """Bilinear x2 interpolation matrix, align_corners=True (nn.Upsample)."""
    no = 2 * n
    m = np.zeros((no, n), np.float32)
    for i in range(no):
        pos = i * (n - 1) / (no - 1)
        i0 = min(int(np.floor(pos)), n - 2)
        f = pos - i0
        m[i, i0] += 1.0 - f
        m[i, i0 + 1] += f
    return m


def _upsample_mat(h, w):
    """(H*W, 4*H*W) so that  up = act @ U  upsamples the flattened image."""
    return np.kron(_interp_matrix(h), _interp_matrix(w)).T.astype(np.float32)


# ----------------------------------------------------------------------------
# Parameters (PyTorch (O, I, kH, kW) layout, he_normal fan_out, zero bias).
# ----------------------------------------------------------------------------
def init_unet_params(key, n_filters, FL):
    params = {}
    specs = _layer_specs(n_filters, FL)
    keys = jax.random.split(key, len(specs))
    for k, (name, cin, cout, fl) in zip(keys, specs):
        std = math.sqrt(2.0 / (cout * fl * fl))
        w = std * jax.random.normal(k, (cout, cin, fl, fl), jnp.float32)
        params[name] = (w, jnp.zeros((cout,), jnp.float32))
    return params


def _pack_taps(w):
    """(O, I, kH, kW) -> (kH*kW, O, I) bf16; tap index t = ky*kW + kx."""
    o, i, kh, kw = w.shape
    return jnp.transpose(w, (2, 3, 0, 1)).reshape(kh * kw, o, i).astype(
        jnp.bfloat16)


# ----------------------------------------------------------------------------
# The fused Pallas kernel (one grid step = whole UNet forward on one sample).
# ----------------------------------------------------------------------------
def _make_unet_kernel(h, w, fl):
    pad = fl // 2
    lv = ((h, w), (h // 2, w // 2), (h // 4, w // 4), (h // 8, w // 8))

    def conv_relu(parts, w_refs, b_ref, mask_ref, wdim):
        """'same' conv + bias + ReLU; channel-concat inputs stay as parts.

        Each of the fl*fl taps = lane shift of the zero-padded activation,
        times a 0/1 border mask, then a small bf16 MXU matmul accumulated in
        f32 (no O(M^2) gather matmuls, no im2col slab materialization).
        """
        pw = pad * wdim + pad
        m = parts[0].shape[1]
        pads = []
        for a in parts:
            z = jnp.zeros((a.shape[0], pw), a.dtype)
            pads.append(jnp.concatenate([z, a, z], axis=1))
        acc = None
        for ky in range(fl):
            for kx in range(fl):
                t = ky * fl + kx
                d = (ky - pad) * wdim + (kx - pad)
                mrow = mask_ref[t]                        # (1, m) bf16
                for a_pad, w_ref in zip(pads, w_refs):
                    tap = a_pad[:, pw + d:pw + d + m] * mrow
                    r = jnp.dot(w_ref[t], tap,
                                preferred_element_type=jnp.float32)
                    acc = r if acc is None else acc + r
        return jnp.maximum(acc + b_ref[...], 0.0).astype(jnp.bfloat16)

    def maxpool(a, cp_ref, wdim):
        """2x2/stride-2: two lane shifts + max, then one 0/1 compaction matmul."""
        c, m = a.shape
        z = jnp.zeros((c, wdim), a.dtype)
        ap = jnp.concatenate([a, z], axis=1)
        m1 = jnp.maximum(a, ap[:, 1:m + 1])               # horizontal pair max
        m1p = jnp.concatenate([m1, z], axis=1)
        m2 = jnp.maximum(m1, m1p[:, wdim:wdim + m])       # vertical pair max
        return jnp.dot(m2, cp_ref[...],
                       preferred_element_type=jnp.float32).astype(jnp.bfloat16)

    def upsample(a, up_ref):
        """x2 bilinear (align_corners=True) = one matmul with kron(Mh, Mw)."""
        return jnp.dot(a, up_ref[...],
                       preferred_element_type=jnp.float32).astype(jnp.bfloat16)

    def kernel(*refs):
        x_ref = refs[0]
        mk = refs[1:5]            # border masks, resolution levels 0..3
        cp = refs[5:8]            # pool compaction matrices, levels 0..2
        up = refs[8:11]           # upsample matrices for levels 3->2, 2->1, 1->0
        o_ref = refs[-1]
        it = iter(refs[11:-1])    # packed (per-tap) weights / biases

        w0, w1, w2, w3 = lv[0][1], lv[1][1], lv[2][1], lv[3][1]

        def conv1p(a, mask_ref, wdim):            # plain conv layer
            wr = next(it)
            br = next(it)
            return conv_relu([a], [wr], br, mask_ref, wdim)

        def conv2p(skip, u_, mask_ref, wdim):     # conv on cat((skip, u), dim=1)
            ws = next(it)
            wu = next(it)
            br = next(it)
            return conv_relu([skip, u_], [ws, wu], br, mask_ref, wdim)

        x = x_ref[0].astype(jnp.bfloat16)          # (8, H*W) bf16

        a1 = conv1p(x, mk[0], w0)
        a1 = conv1p(a1, mk[0], w0)
        a1p = maxpool(a1, cp[0], w0)
        a2 = conv1p(a1p, mk[1], w1)
        a2 = conv1p(a2, mk[1], w1)
        a2p = maxpool(a2, cp[1], w1)
        a3 = conv1p(a2p, mk[2], w2)
        a3 = conv1p(a3, mk[2], w2)
        a3p = maxpool(a3, cp[2], w2)
        u = conv1p(a3p, mk[3], w3)
        u = conv1p(u, mk[3], w3)
        u = upsample(u, up[0])
        # TODO(synk): nn.Dropout is identity here (inference semantics).
        u = conv2p(a3, u, mk[2], w2)
        u = conv1p(u, mk[2], w2)
        u = upsample(u, up[1])
        u = conv2p(a2, u, mk[1], w1)
        u = conv1p(u, mk[1], w1)
        u = upsample(u, up[2])
        u = conv2p(a1, u, mk[0], w0)
        u = conv1p(u, mk[0], w0)

        # Final 1x1 conv + sigmoid: sublane reduce instead of a 1-row MXU
        # matmul; single lane-dense store.
        wf = next(it)                              # (nf, 1) f32
        bf = next(it)                              # (1, 1)  f32
        logits = jnp.sum(u.astype(jnp.float32) * wf[...],
                         axis=0, keepdims=True) + bf[...]
        o_ref[...] = jax.nn.sigmoid(logits)[None]

    return kernel


def _const_spec(arr):
    if arr.ndim == 2:
        return pl.BlockSpec(arr.shape, lambda i: (0, 0))
    return pl.BlockSpec(arr.shape, lambda i: (0, 0, 0))


# ----------------------------------------------------------------------------
# Public entry point: NCHW in -> NCHW out, one fused pallas_call, batch grid.
# ----------------------------------------------------------------------------
@jax.jit
def unet_forward(params, x_nchw):
    n, cin0, h, w = x_nchw.shape
    nf = params['conv1'][0].shape[0]
    fl = params['conv1'][0].shape[2]
    assert cin0 == 1 and fl % 2 == 1
    assert h % 8 == 0 and w % 8 == 0 and nf % 8 == 0
    m = h * w
    lv = ((h, w), (h // 2, w // 2), (h // 4, w // 4), (h // 8, w // 8))

    # Small constant operands (trace-time numpy), all bf16.
    masks = [jnp.asarray(_tap_masks(hh, ww, fl), jnp.bfloat16) for hh, ww in lv]
    pools = [jnp.asarray(_pool_compact_mat(hh, ww), jnp.bfloat16)
             for hh, ww in lv[:3]]
    ups = [jnp.asarray(_upsample_mat(hh, ww), jnp.bfloat16)
           for hh, ww in (lv[3], lv[2], lv[1])]

    # Packed per-tap weights / biases (forward order).  The decoder convs keep
    # the skip / upsampled channel halves as separate weight slabs so the
    # kernel never materializes the channel concat.
    wb = []

    def add_conv(name, split=None):
        wt, bias = params[name]
        if name == 'conv1':   # pad the single input channel up to 8 channels
            wt = jnp.pad(wt, ((0, 0), (0, _CIN_PAD - 1), (0, 0), (0, 0)))
        if split is None:
            wb.append(_pack_taps(wt))
        else:
            wb.append(_pack_taps(wt[:, :split]))
            wb.append(_pack_taps(wt[:, split:]))
        wb.append(bias.reshape(-1, 1).astype(jnp.float32))

    for name in ('conv1', 'conv2', 'conv3', 'conv4',
                 'conv5', 'conv6', 'conv7', 'conv8'):
        add_conv(name)
    add_conv('conv9', split=4 * nf)
    add_conv('conv10')
    add_conv('conv11', split=2 * nf)
    add_conv('conv12')
    add_conv('conv13', split=nf)
    add_conv('conv14')
    wfin, bfin = params['final_conv']
    wb.append(wfin.reshape(nf, 1).astype(jnp.float32))
    wb.append(bfin.reshape(1, 1).astype(jnp.float32))

    # Input: NCHW -> (N, 8, H*W); channel 0 = image, 1..7 = 0.
    xs = x_nchw.reshape(n, 1, m).astype(jnp.float32)
    xs = jnp.pad(xs, ((0, 0), (0, _CIN_PAD - 1), (0, 0)))

    consts = masks + pools + ups + wb
    in_specs = ([pl.BlockSpec((1, _CIN_PAD, m), lambda i: (i, 0, 0))]
                + [_const_spec(c) for c in consts])

    out = pl.pallas_call(
        _make_unet_kernel(h, w, fl),
        out_shape=jax.ShapeDtypeStruct((n, 1, m), jnp.float32),
        grid=(n,),                      # one sample per program (v7x megacore)
        in_specs=in_specs,
        out_specs=pl.BlockSpec((1, 1, m), lambda i: (i, 0, 0)),
        compiler_params=pltpu.CompilerParams(
            dimension_semantics=("parallel",),
            vmem_limit_bytes=32 * 1024 * 1024),
    )(xs, *consts)
    return out.reshape(n, 1, h, w)


# ----------------------------------------------------------------------------
# Pure-JAX/XLA reference (NCHW, f32), used only for a correctness check.
# ----------------------------------------------------------------------------
def unet_reference(params, x):
    def conv(name, t, relu=True):
        wt, b = params[name]
        fl = wt.shape[2]
        pad = fl // 2
        y = jax.lax.conv_general_dilated(
            t, wt, window_strides=(1, 1), padding=((pad, pad), (pad, pad)),
            dimension_numbers=('NCHW', 'OIHW', 'NCHW'))
        y = y + b.reshape(1, -1, 1, 1)
        return jnp.maximum(y, 0.0) if relu else y

    def pool(t):
        nn_, c, hh, ww = t.shape
        return t.reshape(nn_, c, hh // 2, 2, ww // 2, 2).max(axis=(3, 5))

    def ups(t):
        _, _, hh, ww = t.shape
        mh = jnp.asarray(_interp_matrix(hh))
        mw = jnp.asarray(_interp_matrix(ww))
        return jnp.einsum('ih,jw,nchw->ncij', mh, mw, t)

    a1 = conv('conv1', x)
    a1 = conv('conv2', a1)
    a1p = pool(a1)
    a2 = conv('conv3', a1p)
    a2 = conv('conv4', a2)
    a2p = pool(a2)
    a3 = conv('conv5', a2p)
    a3 = conv('conv6', a3)
    a3p = pool(a3)
    u = conv('conv7', a3p)
    u = conv('conv8', u)
    u = jnp.concatenate((a3, ups(u)), axis=1)
    u = conv('conv9', u)
    u = conv('conv10', u)
    u = jnp.concatenate((a2, ups(u)), axis=1)
    u = conv('conv11', u)
    u = conv('conv12', u)
    u = jnp.concatenate((a1, ups(u)), axis=1)
    u = conv('conv13', u)
    u = conv('conv14', u)
    u = conv('final_conv', u, relu=False)
    return jax.nn.sigmoid(u)


if __name__ == "__main__":
    # Small shapes consistent with the module: dim=16, n_filters=8, FL=3.
    N, dim, n_filters, FL = 2, 16, 8, 3

    key = jax.random.PRNGKey(0)
    k_in, k_par = jax.random.split(key)
    x = jax.random.normal(k_in, (N, 1, dim, dim), jnp.float32)   # NCHW input
    params = init_unet_params(k_par, n_filters, FL)

    out = jax.block_until_ready(unet_forward(params, x))
    assert out.shape == (N, 1, dim, dim), out.shape
    assert bool(jnp.all((out >= 0.0) & (out <= 1.0)))

    ref = jax.block_until_ready(unet_reference(params, x))
    err = float(jnp.max(jnp.abs(out - ref)))
    assert err < 6e-2, err     # bf16 weights/activations, f32 accumulation

    print("KERNEL_OK")
</pallas_src>

<mosaic_0001>
module attributes {stable_mosaic.version = 11 : i64} {
  func.func @kernel(%arg0: i32, %arg1: memref<1x8x256xf32, #tpu.memory_space<vmem>>, %arg2: memref<9x1x256xbf16, #tpu.memory_space<vmem>>, %arg3: memref<9x1x64xbf16, #tpu.memory_space<vmem>>, %arg4: memref<9x1x16xbf16, #tpu.memory_space<vmem>>, %arg5: memref<9x1x4xbf16, #tpu.memory_space<vmem>>, %arg6: memref<256x64xbf16, #tpu.memory_space<vmem>>, %arg7: memref<64x16xbf16, #tpu.memory_space<vmem>>, %arg8: memref<16x4xbf16, #tpu.memory_space<vmem>>, %arg9: memref<4x16xbf16, #tpu.memory_space<vmem>>, %arg10: memref<16x64xbf16, #tpu.memory_space<vmem>>, %arg11: memref<64x256xbf16, #tpu.memory_space<vmem>>, %arg12: memref<9x8x8xbf16, #tpu.memory_space<vmem>>, %arg13: memref<8x1xf32, #tpu.memory_space<vmem>>, %arg14: memref<9x8x8xbf16, #tpu.memory_space<vmem>>, %arg15: memref<8x1xf32, #tpu.memory_space<vmem>>, %arg16: memref<9x16x8xbf16, #tpu.memory_space<vmem>>, %arg17: memref<16x1xf32, #tpu.memory_space<vmem>>, %arg18: memref<9x16x16xbf16, #tpu.memory_space<vmem>>, %arg19: memref<16x1xf32, #tpu.memory_space<vmem>>, %arg20: memref<9x32x16xbf16, #tpu.memory_space<vmem>>, %arg21: memref<32x1xf32, #tpu.memory_space<vmem>>, %arg22: memref<9x32x32xbf16, #tpu.memory_space<vmem>>, %arg23: memref<32x1xf32, #tpu.memory_space<vmem>>, %arg24: memref<9x32x32xbf16, #tpu.memory_space<vmem>>, %arg25: memref<32x1xf32, #tpu.memory_space<vmem>>, %arg26: memref<9x32x32xbf16, #tpu.memory_space<vmem>>, %arg27: memref<32x1xf32, #tpu.memory_space<vmem>>, %arg28: memref<9x16x32xbf16, #tpu.memory_space<vmem>>, %arg29: memref<9x16x32xbf16, #tpu.memory_space<vmem>>, %arg30: memref<16x1xf32, #tpu.memory_space<vmem>>, %arg31: memref<9x16x16xbf16, #tpu.memory_space<vmem>>, %arg32: memref<16x1xf32, #tpu.memory_space<vmem>>, %arg33: memref<9x8x16xbf16, #tpu.memory_space<vmem>>, %arg34: memref<9x8x16xbf16, #tpu.memory_space<vmem>>, %arg35: memref<8x1xf32, #tpu.memory_space<vmem>>, %arg36: memref<9x8x8xbf16, #tpu.memory_space<vmem>>, %arg37: memref<8x1xf32, #tpu.memory_space<vmem>>, %arg38: memref<9x8x8xbf16, #tpu.memory_space<vmem>>, %arg39: memref<9x8x8xbf16, #tpu.memory_space<vmem>>, %arg40: memref<8x1xf32, #tpu.memory_space<vmem>>, %arg41: memref<9x8x8xbf16, #tpu.memory_space<vmem>>, %arg42: memref<8x1xf32, #tpu.memory_space<vmem>>, %arg43: memref<8x1xf32, #tpu.memory_space<vmem>>, %arg44: memref<1x1xf32, #tpu.memory_space<vmem>>, %arg45: memref<1x1x256xf32, #tpu.memory_space<vmem>>) attributes {dimension_semantics = [#tpu.dimension_semantics<parallel>], iteration_bounds = array<i64: 2>, scalar_prefetch = 0 : i64, scratch_operands = 0 : i64, tpu.core_type = #tpu.core_type<tc>, window_params = [{transform_indices = @transform_0, window_bounds = array<i64: 1, 8, 256>}, {pipeline_mode = #tpu.pipeline_mode<synchronous>, transform_indices = @transform_1, window_bounds = array<i64: 9, 1, 256>}, {pipeline_mode = #tpu.pipeline_mode<synchronous>, transform_indices = @transform_2, window_bounds = array<i64: 9, 1, 64>}, {pipeline_mode = #tpu.pipeline_mode<synchronous>, transform_indices = @transform_3, window_bounds = array<i64: 9, 1, 16>}, {pipeline_mode = #tpu.pipeline_mode<synchronous>, transform_indices = @transform_4, window_bounds = array<i64: 9, 1, 4>}, {pipeline_mode = #tpu.pipeline_mode<synchronous>, transform_indices = @transform_5, window_bounds = array<i64: 256, 64>}, {pipeline_mode = #tpu.pipeline_mode<synchronous>, transform_indices = @transform_6, window_bounds = array<i64: 64, 16>}, {pipeline_mode = #tpu.pipeline_mode<synchronous>, transform_indices = @transform_7, window_bounds = array<i64: 16, 4>}, {pipeline_mode = #tpu.pipeline_mode<synchronous>, transform_indices = @transform_8, window_bounds = array<i64: 4, 16>}, {pipeline_mode = #tpu.pipeline_mode<synchronous>, transform_indices = @transform_9, window_bounds = array<i64: 16, 64>}, {pipeline_mode = #tpu.pipeline_mode<synchronous>, transform_indices = @transform_10, window_bounds = array<i64: 64, 256>}, {pipeline_mode = #tpu.pipeline_mode<synchronous>, transform_indices = @transform_11, window_bounds = array<i64: 9, 8, 8>}, {pipeline_mode = #tpu.pipeline_mode<synchronous>, transform_indices = @transform_12, window_bounds = array<i64: 8, 1>}, {pipeline_mode = #tpu.pipeline_mode<synchronous>, transform_indices = @transform_13, window_bounds = array<i64: 9, 8, 8>}, {pipeline_mode = #tpu.pipeline_mode<synchronous>, transform_indices = @transform_14, window_bounds = array<i64: 8, 1>}, {pipeline_mode = #tpu.pipeline_mode<synchronous>, transform_indices = @transform_15, window_bounds = array<i64: 9, 16, 8>}, {pipeline_mode = #tpu.pipeline_mode<synchronous>, transform_indices = @transform_16, window_bounds = array<i64: 16, 1>}, {pipeline_mode = #tpu.pipeline_mode<synchronous>, transform_indices = @transform_17, window_bounds = array<i64: 9, 16, 16>}, {pipeline_mode = #tpu.pipeline_mode<synchronous>, transform_indices = @transform_18, window_bounds = array<i64: 16, 1>}, {pipeline_mode = #tpu.pipeline_mode<synchronous>, transform_indices = @transform_19, window_bounds = array<i64: 9, 32, 16>}, {pipeline_mode = #tpu.pipeline_mode<synchronous>, transform_indices = @transform_20, window_bounds = array<i64: 32, 1>}, {pipeline_mode = #tpu.pipeline_mode<synchronous>, transform_indices = @transform_21, window_bounds = array<i64: 9, 32, 32>}, {pipeline_mode = #tpu.pipeline_mode<synchronous>, transform_indices = @transform_22, window_bounds = array<i64: 32, 1>}, {pipeline_mode = #tpu.pipeline_mode<synchronous>, transform_indices = @transform_23, window_bounds = array<i64: 9, 32, 32>}, {pipeline_mode = #tpu.pipeline_mode<synchronous>, transform_indices = @transform_24, window_bounds = array<i64: 32, 1>}, {pipeline_mode = #tpu.pipeline_mode<synchronous>, transform_indices = @transform_25, window_bounds = array<i64: 9, 32, 32>}, {pipeline_mode = #tpu.pipeline_mode<synchronous>, transform_indices = @transform_26, window_bounds = array<i64: 32, 1>}, {pipeline_mode = #tpu.pipeline_mode<synchronous>, transform_indices = @transform_27, window_bounds = array<i64: 9, 16, 32>}, {pipeline_mode = #tpu.pipeline_mode<synchronous>, transform_indices = @transform_28, window_bounds = array<i64: 9, 16, 32>}, {pipeline_mode = #tpu.pipeline_mode<synchronous>, transform_indices = @transform_29, window_bounds = array<i64: 16, 1>}, {pipeline_mode = #tpu.pipeline_mode<synchronous>, transform_indices = @transform_30, window_bounds = array<i64: 9, 16, 16>}, {pipeline_mode = #tpu.pipeline_mode<synchronous>, transform_indices = @transform_31, window_bounds = array<i64: 16, 1>}, {pipeline_mode = #tpu.pipeline_mode<synchronous>, transform_indices = @transform_32, window_bounds = array<i64: 9, 8, 16>}, {pipeline_mode = #tpu.pipeline_mode<synchronous>, transform_indices = @transform_33, window_bounds = array<i64: 9, 8, 16>}, {pipeline_mode = #tpu.pipeline_mode<synchronous>, transform_indices = @transform_34, window_bounds = array<i64: 8, 1>}, {pipeline_mode = #tpu.pipeline_mode<synchronous>, transform_indices = @transform_35, window_bounds = array<i64: 9, 8, 8>}, {pipeline_mode = #tpu.pipeline_mode<synchronous>, transform_indices = @transform_36, window_bounds = array<i64: 8, 1>}, {pipeline_mode = #tpu.pipeline_mode<synchronous>, transform_indices = @transform_37, window_bounds = array<i64: 9, 8, 8>}, {pipeline_mode = #tpu.pipeline_mode<synchronous>, transform_indices = @transform_38, window_bounds = array<i64: 9, 8, 8>}, {pipeline_mode = #tpu.pipeline_mode<synchronous>, transform_indices = @transform_39, window_bounds = array<i64: 8, 1>}, {pipeline_mode = #tpu.pipeline_mode<synchronous>, transform_indices = @transform_40, window_bounds = array<i64: 9, 8, 8>}, {pipeline_mode = #tpu.pipeline_mode<synchronous>, transform_indices = @transform_41, window_bounds = array<i64: 8, 1>}, {pipeline_mode = #tpu.pipeline_mode<synchronous>, transform_indices = @transform_42, window_bounds = array<i64: 8, 1>}, {pipeline_mode = #tpu.pipeline_mode<synchronous>, transform_indices = @transform_43, window_bounds = array<i64: 1, 1>}, {transform_indices = @transform_44, window_bounds = array<i64: 1, 1, 256>}]} {
    %c0 = arith.constant 0 : index
    %c0_0 = arith.constant 0 : index
    %c0_1 = arith.constant 0 : index
    %0 = vector.load %arg1[%c0, %c0_0, %c0_1] : memref<1x8x256xf32, #tpu.memory_space<vmem>>, vector<1x8x256xf32>
    %1 = vector.shape_cast %0 : vector<1x8x256xf32> to vector<8x256xf32>
    %2 = arith.truncf %1 : vector<8x256xf32> to vector<8x256xbf16>
    %cst = arith.constant 0.000000e+00 : bf16
    %3 = vector.broadcast %cst : bf16 to vector<8x17xbf16>
    %4 = tpu.concatenate %3, %2, %3 in 1 : vector<8x17xbf16>, vector<8x256xbf16>, vector<8x17xbf16> -> vector<8x290xbf16>
    %c0_2 = arith.constant 0 : index
    %c0_3 = arith.constant 0 : index
    %c0_4 = arith.constant 0 : index
    %5 = vector.load %arg2[%c0_2, %c0_3, %c0_4] : memref<9x1x256xbf16, #tpu.memory_space<vmem>>, vector<1x1x256xbf16>
    %6 = vector.shape_cast %5 : vector<1x1x256xbf16> to vector<1x256xbf16>
    %7 = vector.extract_strided_slice %4 {offsets = [0, 0], sizes = [8, 256], strides = [1, 1]} : vector<8x290xbf16> to vector<8x256xbf16>
    %8 = vector.broadcast %6 : vector<1x256xbf16> to vector<8x256xbf16>
    %9 = arith.mulf %7, %8 : vector<8x256xbf16>
    %c0_5 = arith.constant 0 : index
    %c0_6 = arith.constant 0 : index
    %c0_7 = arith.constant 0 : index
    %10 = vector.load %arg12[%c0_5, %c0_6, %c0_7] : memref<9x8x8xbf16, #tpu.memory_space<vmem>>, vector<1x8x8xbf16>
    %11 = vector.shape_cast %10 : vector<1x8x8xbf16> to vector<8x8xbf16>
    %cst_8 = arith.constant dense<0.000000e+00> : vector<8x256xf32>
    %12 = tpu.matmul %11, %9, %cst_8 {dimension_numbers = #tpu.dot_dimension_numbers<[1], [0], [0], [1], [0, 0, 1, 1], [], []>} : vector<8x8xbf16>, vector<8x256xbf16>, vector<8x256xf32> -> vector<8x256xf32>
    %c1 = arith.constant 1 : index
    %c0_9 = arith.constant 0 : index
    %c0_10 = arith.constant 0 : index
    %13 = vector.load %arg2[%c1, %c0_9, %c0_10] : memref<9x1x256xbf16, #tpu.memory_space<vmem>>, vector<1x1x256xbf16>
    %14 = vector.shape_cast %13 : vector<1x1x256xbf16> to vector<1x256xbf16>
    %15 = vector.extract_strided_slice %4 {offsets = [0, 1], sizes = [8, 256], strides = [1, 1]} : vector<8x290xbf16> to vector<8x256xbf16>
    %16 = vector.broadcast %14 : vector<1x256xbf16> to vector<8x256xbf16>
    %17 = arith.mulf %15, %16 : vector<8x256xbf16>
    %c1_11 = arith.constant 1 : index
    %c0_12 = arith.constant 0 : index
    %c0_13 = arith.constant 0 : index
    %18 = vector.load %arg12[%c1_11, %c0_12, %c0_13] : memref<9x8x8xbf16, #tpu.memory_space<vmem>>, vector<1x8x8xbf16>
    %19 = vector.shape_cast %18 : vector<1x8x8xbf16> to vector<8x8xbf16>
    %cst_14 = arith.constant dense<0.000000e+00> : vector<8x256xf32>
    %20 = tpu.matmul %19, %17, %cst_14 {dimension_numbers = #tpu.dot_dimension_numbers<[1], [0], [0], [1], [0, 0, 1, 1], [], []>} : vector<8x8xbf16>, vector<8x256xbf16>, vector<8x256xf32> -> vector<8x256xf32>
    %21 = arith.addf %12, %20 : vector<8x256xf32>
    %c2 = arith.constant 2 : index
    %c0_15 = arith.constant 0 : index
    %c0_16 = arith.constant 0 : index
    %22 = vector.load %arg2[%c2, %c0_15, %c0_16] : memref<9x1x256xbf16, #tpu.memory_space<vmem>>, vector<1x1x256xbf16>
    %23 = vector.shape_cast %22 : vector<1x1x256xbf16> to vector<1x256xbf16>
    %24 = vector.extract_strided_slice %4 {offsets = [0, 2], sizes = [8, 256], strides = [1, 1]} : vector<8x290xbf16> to vector<8x256xbf16>
    %25 = vector.broadcast %23 : vector<1x256xbf16> to vector<8x256xbf16>
    %26 = arith.mulf %24, %25 : vector<8x256xbf16>
    %c2_17 = arith.constant 2 : index
    %c0_18 = arith.constant 0 : index
    %c0_19 = arith.constant 0 : index
    %27 = vector.load %arg12[%c2_17, %c0_18, %c0_19] : memref<9x8x8xbf16, #tpu.memory_space<vmem>>, vector<1x8x8xbf16>
    %28 = vector.shape_cast %27 : vector<1x8x8xbf16> to vector<8x8xbf16>
    %cst_20 = arith.constant dense<0.000000e+00> : vector<8x256xf32>
    %29 = tpu.matmul %28, %26, %cst_20 {dimension_numbers = #tpu.dot_dimension_numbers<[1], [0], [0], [1], [0, 0, 1, 1], [], []>} : vector<8x8xbf16>, vector<8x256xbf16>, vector<8x256xf32> -> vector<8x256xf32>
    %30 = arith.addf %21, %29 : vector<8x256xf32>
    %c3 = arith.constant 3 : index
    %c0_21 = arith.constant 0 : index
    %c0_22 = arith.constant 0 : index
    %31 = vector.load %arg2[%c3, %c0_21, %c0_22] : memref<9x1x256xbf16, #tpu.memory_space<vmem>>, vector<1x1x256xbf16>
    %32 = vector.shape_cast %31 : vector<1x1x256xbf16> to vector<1x256xbf16>
    %33 = vector.extract_strided_slice %4 {offsets = [0, 16], sizes = [8, 256], strides = [1, 1]} : vector<8x290xbf16> to vector<8x256xbf16>
    %34 = vector.broadcast %32 : vector<1x256xbf16> to vector<8x256xbf16>
    %35 = arith.mulf %33, %34 : vector<8x256xbf16>
    %c3_23 = arith.constant 3 : index
    %c0_24 = arith.constant 0 : index
    %c0_25 = arith.constant 0 : index
    %36 = vector.load %arg12[%c3_23, %c0_24, %c0_25] : memref<9x8x8xbf16, #tpu.memory_space<vmem>>, vector<1x8x8xbf16>
    %37 = vector.shape_cast %36 : vector<1x8x8xbf16> to vector<8x8xbf16>
    %cst_26 = arith.constant dense<0.000000e+00> : vector<8x256xf32>
    %38 = tpu.matmul %37, %35, %cst_26 {dimension_numbers = #tpu.dot_dimension_numbers<[1], [0], [0], [1], [0, 0, 1, 1], [], []>} : vector<8x8xbf16>, vector<8x256xbf16>, vector<8x256xf32> -> vector<8x256xf32>
    %39 = arith.addf %30, %38 : vector<8x256xf32>
    %c4 = arith.constant 4 : index
    %c0_27 = arith.constant 0 : index
    %c0_28 = arith.constant 0 : index
    %40 = vector.load %arg2[%c4, %c0_27, %c0_28] : memref<9x1x256xbf16, #tpu.memory_space<vmem>>, vector<1x1x256xbf16>
    %41 = vector.shape_cast %40 : vector<1x1x256xbf16> to vector<1x256xbf16>
    %42 = vector.extract_strided_slice %4 {offsets = [0, 17], sizes = [8, 256], strides = [1, 1]} : vector<8x290xbf16> to vector<8x256xbf16>
    %43 = vector.broadcast %41 : vector<1x256xbf16> to vector<8x256xbf16>
    %44 = arith.mulf %42, %43 : vector<8x256xbf16>
    %c4_29 = arith.constant 4 : index
    %c0_30 = arith.constant 0 : index
    %c0_31 = arith.constant 0 : index
    %45 = vector.load %arg12[%c4_29, %c0_30, %c0_31] : memref<9x8x8xbf16, #tpu.memory_space<vmem>>, vector<1x8x8xbf16>
    %46 = vector.shape_cast %45 : vector<1x8x8xbf16> to vector<8x8xbf16>
    %cst_32 = arith.constant dense<0.000000e+00> : vector<8x256xf32>
    %47 = tpu.matmul %46, %44, %cst_32 {dimension_numbers = #tpu.dot_dimension_numbers<[1], [0], [0], [1], [0, 0, 1, 1], [], []>} : vector<8x8xbf16>, vector<8x256xbf16>, vector<8x256xf32> -> vector<8x256xf32>
    %48 = arith.addf %39, %47 : vector<8x256xf32>
    %c5 = arith.constant 5 : index
    %c0_33 = arith.constant 0 : index
    %c0_34 = arith.constant 0 : index
    %49 = vector.load %arg2[%c5, %c0_33, %c0_34] : memref<9x1x256xbf16, #tpu.memory_space<vmem>>, vector<1x1x256xbf16>
    %50 = vector.shape_cast %49 : vector<1x1x256xbf16> to vector<1x256xbf16>
    %51 = vector.extract_strided_slice %4 {offsets = [0, 18], sizes = [8, 256], strides = [1, 1]} : vector<8x290xbf16> to vector<8x256xbf16>
    %52 = vector.broadcast %50 : vector<1x256xbf16> to vector<8x256xbf16>
    %53 = arith.mulf %51, %52 : vector<8x256xbf16>
    %c5_35 = arith.constant 5 : index
    %c0_36 = arith.constant 0 : index
    %c0_37 = arith.constant 0 : index
    %54 = vector.load %arg12[%c5_35, %c0_36, %c0_37] : memref<9x8x8xbf16, #tpu.memory_space<vmem>>, vector<1x8x8xbf16>
    %55 = vector.shape_cast %54 : vector<1x8x8xbf16> to vector<8x8xbf16>
    %cst_38 = arith.constant dense<0.000000e+00> : vector<8x256xf32>
    %56 = tpu.matmul %55, %53, %cst_38 {dimension_numbers = #tpu.dot_dimension_numbers<[1], [0], [0], [1], [0, 0, 1, 1], [], []>} : vector<8x8xbf16>, vector<8x256xbf16>, vector<8x256xf32> -> vector<8x256xf32>
    %57 = arith.addf %48, %56 : vector<8x256xf32>
    %c6 = arith.constant 6 : index
    %c0_39 = arith.constant 0 : index
    %c0_40 = arith.constant 0 : index
    %58 = vector.load %arg2[%c6, %c0_39, %c0_40] : memref<9x1x256xbf16, #tpu.memory_space<vmem>>, vector<1x1x256xbf16>
    %59 = vector.shape_cast %58 : vector<1x1x256xbf16> to vector<1x256xbf16>
    %60 = vector.extract_strided_slice %4 {offsets = [0, 32], sizes = [8, 256], strides = [1, 1]} : vector<8x290xbf16> to vector<8x256xbf16>
    %61 = vector.broadcast %59 : vector<1x256xbf16> to vector<8x256xbf16>
    %62 = arith.mulf %60, %61 : vector<8x256xbf16>
    %c6_41 = arith.constant 6 : index
    %c0_42 = arith.constant 0 : index
    %c0_43 = arith.constant 0 : index
    %63 = vector.load %arg12[%c6_41, %c0_42, %c0_43] : memref<9x8x8xbf16, #tpu.memory_space<vmem>>, vector<1x8x8xbf16>
    %64 = vector.shape_cast %63 : vector<1x8x8xbf16> to vector<8x8xbf16>
    %cst_44 = arith.constant dense<0.000000e+00> : vector<8x256xf32>
    %65 = tpu.matmul %64, %62, %cst_44 {dimension_numbers = #tpu.dot_dimension_numbers<[1], [0], [0], [1], [0, 0, 1, 1], [], []>} : vector<8x8xbf16>, vector<8x256xbf16>, vector<8x256xf32> -> vector<8x256xf32>
    %66 = arith.addf %57, %65 : vector<8x256xf32>
    %c7 = arith.constant 7 : index
    %c0_45 = arith.constant 0 : index
    %c0_46 = arith.constant 0 : index
    %67 = vector.load %arg2[%c7, %c0_45, %c0_46] : memref<9x1x256xbf16, #tpu.memory_space<vmem>>, vector<1x1x256xbf16>
    %68 = vector.shape_cast %67 : vector<1x1x256xbf16> to vector<1x256xbf16>
    %69 = vector.extract_strided_slice %4 {offsets = [0, 33], sizes = [8, 256], strides = [1, 1]} : vector<8x290xbf16> to vector<8x256xbf16>
    %70 = vector.broadcast %68 : vector<1x256xbf16> to vector<8x256xbf16>
    %71 = arith.mulf %69, %70 : vector<8x256xbf16>
    %c7_47 = arith.constant 7 : index
    %c0_48 = arith.constant 0 : index
    %c0_49 = arith.constant 0 : index
    %72 = vector.load %arg12[%c7_47, %c0_48, %c0_49] : memref<9x8x8xbf16, #tpu.memory_space<vmem>>, vector<1x8x8xbf16>
    %73 = vector.shape_cast %72 : vector<1x8x8xbf16> to vector<8x8xbf16>
    %cst_50 = arith.constant dense<0.000000e+00> : vector<8x256xf32>
    %74 = tpu.matmul %73, %71, %cst_50 {dimension_numbers = #tpu.dot_dimension_numbers<[1], [0], [0], [1], [0, 0, 1, 1], [], []>} : vector<8x8xbf16>, vector<8x256xbf16>, vector<8x256xf32> -> vector<8x256xf32>
    %75 = arith.addf %66, %74 : vector<8x256xf32>
    %c8 = arith.constant 8 : index
    %c0_51 = arith.constant 0 : index
    %c0_52 = arith.constant 0 : index
    %76 = vector.load %arg2[%c8, %c0_51, %c0_52] : memref<9x1x256xbf16, #tpu.memory_space<vmem>>, vector<1x1x256xbf16>
    %77 = vector.shape_cast %76 : vector<1x1x256xbf16> to vector<1x256xbf16>
    %78 = vector.extract_strided_slice %4 {offsets = [0, 34], sizes = [8, 256], strides = [1, 1]} : vector<8x290xbf16> to vector<8x256xbf16>
    %79 = vector.broadcast %77 : vector<1x256xbf16> to vector<8x256xbf16>
    %80 = arith.mulf %78, %79 : vector<8x256xbf16>
    %c8_53 = arith.constant 8 : index
    %c0_54 = arith.constant 0 : index
    %c0_55 = arith.constant 0 : index
    %81 = vector.load %arg12[%c8_53, %c0_54, %c0_55] : memref<9x8x8xbf16, #tpu.memory_space<vmem>>, vector<1x8x8xbf16>
    %82 = vector.shape_cast %81 : vector<1x8x8xbf16> to vector<8x8xbf16>
    %cst_56 = arith.constant dense<0.000000e+00> : vector<8x256xf32>
    %83 = tpu.matmul %82, %80, %cst_56 {dimension_numbers = #tpu.dot_dimension_numbers<[1], [0], [0], [1], [0, 0, 1, 1], [], []>} : vector<8x8xbf16>, vector<8x256xbf16>, vector<8x256xf32> -> vector<8x256xf32>
    %84 = arith.addf %75, %83 : vector<8x256xf32>
    %c0_57 = arith.constant 0 : index
    %c0_58 = arith.constant 0 : index
    %85 = vector.load %arg13[%c0_57, %c0_58] : memref<8x1xf32, #tpu.memory_space<vmem>>, vector<8x1xf32>
    %86 = vector.broadcast %85 : vector<8x1xf32> to vector<8x256xf32>
    %87 = arith.addf %84, %86 : vector<8x256xf32>
    %cst_59 = arith.constant 0.000000e+00 : f32
    %88 = vector.broadcast %cst_59 : f32 to vector<8x256xf32>
    %89 = arith.maximumf %87, %88 : vector<8x256xf32>
    %90 = arith.truncf %89 : vector<8x256xf32> to vector<8x256xbf16>
    %cst_60 = arith.constant 0.000000e+00 : bf16
    %91 = vector.broadcast %cst_60 : bf16 to vector<8x17xbf16>
    %92 = tpu.concatenate %91, %90, %91 in 1 : vector<8x17xbf16>, vector<8x256xbf16>, vector<8x17xbf16> -> vector<8x290xbf16>
    %c0_61 = arith.constant 0 : index
    %c0_62 = arith.constant 0 : index
    %c0_63 = arith.constant 0 : index
    %93 = vector.load %arg2[%c0_61, %c0_62, %c0_63] : memref<9x1x256xbf16, #tpu.memory_space<vmem>>, vector<1x1x256xbf16>
    %94 = vector.shape_cast %93 : vector<1x1x256xbf16> to vector<1x256xbf16>
    %95 = vector.extract_strided_slice %92 {offsets = [0, 0], sizes = [8, 256], strides = [1, 1]} : vector<8x290xbf16> to vector<8x256xbf16>
    %96 = vector.broadcast %94 : vector<1x256xbf16> to vector<8x256xbf16>
    %97 = arith.mulf %95, %96 : vector<8x256xbf16>
    %c0_64 = arith.constant 0 : index
    %c0_65 = arith.constant 0 : index
    %c0_66 = arith.constant 0 : index
    %98 = vector.load %arg14[%c0_64, %c0_65, %c0_66] : memref<9x8x8xbf16, #tpu.memory_space<vmem>>, vector<1x8x8xbf16>
    %99 = vector.shape_cast %98 : vector<1x8x8xbf16> to vector<8x8xbf16>
    %cst_67 = arith.constant dense<0.000000e+00> : vector<8x256xf32>
    %100 = tpu.matmul %99, %97, %cst_67 {dimension_numbers = #tpu.dot_dimension_numbers<[1], [0], [0], [1], [0, 0, 1, 1], [], []>} : vector<8x8xbf16>, vector<8x256xbf16>, vector<8x256xf32> -> vector<8x256xf32>
    %c1_68 = arith.constant 1 : index
    %c0_69 = arith.constant 0 : index
    %c0_70 = arith.constant 0 : index
    %101 = vector.load %arg2[%c1_68, %c0_69, %c0_70] : memref<9x1x256xbf16, #tpu.memory_space<vmem>>, vector<1x1x256xbf16>
    %102 = vector.shape_cast %101 : vector<1x1x256xbf16> to vector<1x256xbf16>
    %103 = vector.extract_strided_slice %92 {offsets = [0, 1], sizes = [8, 256], strides = [1, 1]} : vector<8x290xbf16> to vector<8x256xbf16>
    %104 = vector.broadcast %102 : vector<1x256xbf16> to vector<8x256xbf16>
    %105 = arith.mulf %103, %104 : vector<8x256xbf16>
    %c1_71 = arith.constant 1 : index
    %c0_72 = arith.constant 0 : index
    %c0_73 = arith.constant 0 : index
    %106 = vector.load %arg14[%c1_71, %c0_72, %c0_73] : memref<9x8x8xbf16, #tpu.memory_space<vmem>>, vector<1x8x8xbf16>
    %107 = vector.shape_cast %106 : vector<1x8x8xbf16> to vector<8x8xbf16>
    %cst_74 = arith.constant dense<0.000000e+00> : vector<8x256xf32>
    %108 = tpu.matmul %107, %105, %cst_74 {dimension_numbers = #tpu.dot_dimension_numbers<[1], [0], [0], [1], [0, 0, 1, 1], [], []>} : vector<8x8xbf16>, vector<8x256xbf16>, vector<8x256xf32> -> vector<8x256xf32>
    %109 = arith.addf %100, %108 : vector<8x256xf32>
    %c2_75 = arith.constant 2 : index
    %c0_76 = arith.constant 0 : index
    %c0_77 = arith.constant 0 : index
    %110 = vector.load %arg2[%c2_75, %c0_76, %c0_77] : memref<9x1x256xbf16, #tpu.memory_space<vmem>>, vector<1x1x256xbf16>
    %111 = vector.shape_cast %110 : vector<1x1x256xbf16> to vector<1x256xbf16>
    %112 = vector.extract_strided_slice %92 {offsets = [0, 2], sizes = [8, 256], strides = [1, 1]} : vector<8x290xbf16> to vector<8x256xbf16>
    %113 = vector.broadcast %111 : vector<1x256xbf16> to vector<8x256xbf16>
    %114 = arith.mulf %112, %113 : vector<8x256xbf16>
    %c2_78 = arith.constant 2 : index
    %c0_79 = arith.constant 0 : index
    %c0_80 = arith.constant 0 : index
    %115 = vector.load %arg14[%c2_78, %c0_79, %c0_80] : memref<9x8x8xbf16, #tpu.memory_space<vmem>>, vector<1x8x8xbf16>
    %116 = vector.shape_cast %115 : vector<1x8x8xbf16> to vector<8x8xbf16>
    %cst_81 = arith.constant dense<0.000000e+00> : vector<8x256xf32>
    %117 = tpu.matmul %116, %114, %cst_81 {dimension_numbers = #tpu.dot_dimension_numbers<[1], [0], [0], [1], [0, 0, 1, 1], [], []>} : vector<8x8xbf16>, vector<8x256xbf16>, vector<8x256xf32> -> vector<8x256xf32>
    %118 = arith.addf %109, %117 : vector<8x256xf32>
    %c3_82 = arith.constant 3 : index
    %c0_83 = arith.constant 0 : index
    %c0_84 = arith.constant 0 : index
    %119 = vector.load %arg2[%c3_82, %c0_83, %c0_84] : memref<9x1x256xbf16, #tpu.memory_space<vmem>>, vector<1x1x256xbf16>
    %120 = vector.shape_cast %119 : vector<1x1x256xbf16> to vector<1x256xbf16>
    %121 = vector.extract_strided_slice %92 {offsets = [0, 16], sizes = [8, 256], strides = [1, 1]} : vector<8x290xbf16> to vector<8x256xbf16>
    %122 = vector.broadcast %120 : vector<1x256xbf16> to vector<8x256xbf16>
    %123 = arith.mulf %121, %122 : vector<8x256xbf16>
    %c3_85 = arith.constant 3 : index
    %c0_86 = arith.constant 0 : index
    %c0_87 = arith.constant 0 : index
    %124 = vector.load %arg14[%c3_85, %c0_86, %c0_87] : memref<9x8x8xbf16, #tpu.memory_space<vmem>>, vector<1x8x8xbf16>
    %125 = vector.shape_cast %124 : vector<1x8x8xbf16> to vector<8x8xbf16>
    %cst_88 = arith.constant dense<0.000000e+00> : vector<8x256xf32>
    %126 = tpu.matmul %125, %123, %cst_88 {dimension_numbers = #tpu.dot_dimension_numbers<[1], [0], [0], [1], [0, 0, 1, 1], [], []>} : vector<8x8xbf16>, vector<8x256xbf16>, vector<8x256xf32> -> vector<8x256xf32>
    %127 = arith.addf %118, %126 : vector<8x256xf32>
    %c4_89 = arith.constant 4 : index
    %c0_90 = arith.constant 0 : index
    %c0_91 = arith.constant 0 : index
    %128 = vector.load %arg2[%c4_89, %c0_90, %c0_91] : memref<9x1x256xbf16, #tpu.memory_space<vmem>>, vector<1x1x256xbf16>
    %129 = vector.shape_cast %128 : vector<1x1x256xbf16> to vector<1x256xbf16>
    %130 = vector.extract_strided_slice %92 {offsets = [0, 17], sizes = [8, 256], strides = [1, 1]} : vector<8x290xbf16> to vector<8x256xbf16>
    %131 = vector.broadcast %129 : vector<1x256xbf16> to vector<8x256xbf16>
    %132 = arith.mulf %130, %131 : vector<8x256xbf16>
    %c4_92 = arith.constant 4 : index
    %c0_93 = arith.constant 0 : index
    %c0_94 = arith.constant 0 : index
    %133 = vector.load %arg14[%c4_92, %c0_93, %c0_94] : memref<9x8x8xbf16, #tpu.memory_space<vmem>>, vector<1x8x8xbf16>
    %134 = vector.shape_cast %133 : vector<1x8x8xbf16> to vector<8x8xbf16>
    %cst_95 = arith.constant dense<0.000000e+00> : vector<8x256xf32>
    %135 = tpu.matmul %134, %132, %cst_95 {dimension_numbers = #tpu.dot_dimension_numbers<[1], [0], [0], [1], [0, 0, 1, 1], [], []>} : vector<8x8xbf16>, vector<8x256xbf16>, vector<8x256xf32> -> vector<8x256xf32>
    %136 = arith.addf %127, %135 : vector<8x256xf32>
    %c5_96 = arith.constant 5 : index
    %c0_97 = arith.constant 0 : index
    %c0_98 = arith.constant 0 : index
    %137 = vector.load %arg2[%c5_96, %c0_97, %c0_98] : memref<9x1x256xbf16, #tpu.memory_space<vmem>>, vector<1x1x256xbf16>
    %138 = vector.shape_cast %137 : vector<1x1x256xbf16> to vector<1x256xbf16>
    %139 = vector.extract_strided_slice %92 {offsets = [0, 18], sizes = [8, 256], strides = [1, 1]} : vector<8x290xbf16> to vector<8x256xbf16>
    %140 = vector.broadcast %138 : vector<1x256xbf16> to vector<8x256xbf16>
    %141 = arith.mulf %139, %140 : vector<8x256xbf16>
    %c5_99 = arith.constant 5 : index
    %c0_100 = arith.constant 0 : index
    %c0_101 = arith.constant 0 : index
    %142 = vector.load %arg14[%c5_99, %c0_100, %c0_101] : memref<9x8x8xbf16, #tpu.memory_space<vmem>>, vector<1x8x8xbf16>
    %143 = vector.shape_cast %142 : vector<1x8x8xbf16> to vector<8x8xbf16>
    %cst_102 = arith.constant dense<0.000000e+00> : vector<8x256xf32>
    %144 = tpu.matmul %143, %141, %cst_102 {dimension_numbers = #tpu.dot_dimension_numbers<[1], [0], [0], [1], [0, 0, 1, 1], [], []>} : vector<8x8xbf16>, vector<8x256xbf16>, vector<8x256xf32> -> vector<8x256xf32>
    %145 = arith.addf %136, %144 : vector<8x256xf32>
    %c6_103 = arith.constant 6 : index
    %c0_104 = arith.constant 0 : index
    %c0_105 = arith.constant 0 : index
    %146 = vector.load %arg2[%c6_103, %c0_104, %c0_105] : memref<9x1x256xbf16, #tpu.memory_space<vmem>>, vector<1x1x256xbf16>
    %147 = vector.shape_cast %146 : vector<1x1x256xbf16> to vector<1x256xbf16>
    %148 = vector.extract_strided_slice %92 {offsets = [0, 32], sizes = [8, 256], strides = [1, 1]} : vector<8x290xbf16> to vector<8x256xbf16>
    %149 = vector.broadcast %147 : vector<1x256xbf16> to vector<8x256xbf16>
    %150 = arith.mulf %148, %149 : vector<8x256xbf16>
    %c6_106 = arith.constant 6 : index
    %c0_107 = arith.constant 0 : index
    %c0_108 = arith.constant 0 : index
    %151 = vector.load %arg14[%c6_106, %c0_107, %c0_108] : memref<9x8x8xbf16, #tpu.memory_space<vmem>>, vector<1x8x8xbf16>
    %152 = vector.shape_cast %151 : vector<1x8x8xbf16> to vector<8x8xbf16>
    %cst_109 = arith.constant dense<0.000000e+00> : vector<8x256xf32>
    %153 = tpu.matmul %152, %150, %cst_109 {dimension_numbers = #tpu.dot_dimension_numbers<[1], [0], [0], [1], [0, 0, 1, 1], [], []>} : vector<8x8xbf16>, vector<8x256xbf16>, vector<8x256xf32> -> vector<8x256xf32>
    %154 = arith.addf %145, %153 : vector<8x256xf32>
    %c7_110 = arith.constant 7 : index
    %c0_111 = arith.constant 0 : index
    %c0_112 = arith.constant 0 : index
    %155 = vector.load %arg2[%c7_110, %c0_111, %c0_112] : memref<9x1x256xbf16, #tpu.memory_space<vmem>>, vector<1x1x256xbf16>
    %156 = vector.shape_cast %155 : vector<1x1x256xbf16> to vector<1x256xbf16>
    %157 = vector.extract_strided_slice %92 {offsets = [0, 33], sizes = [8, 256], strides = [1, 1]} : vector<8x290xbf16> to vector<8x256xbf16>
    %158 = vector.broadcast %156 : vector<1x256xbf16> to vector<8x256xbf16>
    %159 = arith.mulf %157, %158 : vector<8x256xbf16>
    %c7_113 = arith.constant 7 : index
    %c0_114 = arith.constant 0 : index
    %c0_115 = arith.constant 0 : index
    %160 = vector.load %arg14[%c7_113, %c0_114, %c0_115] : memref<9x8x8xbf16, #tpu.memory_space<vmem>>, vector<1x8x8xbf16>
    %161 = vector.shape_cast %160 : vector<1x8x8xbf16> to vector<8x8xbf16>
    %cst_116 = arith.constant dense<0.000000e+00> : vector<8x256xf32>
    %162 = tpu.matmul %161, %159, %cst_116 {dimension_numbers = #tpu.dot_dimension_numbers<[1], [0], [0], [1], [0, 0, 1, 1], [], []>} : vector<8x8xbf16>, vector<8x256xbf16>, vector<8x256xf32> -> vector<8x256xf32>
    %163 = arith.addf %154, %162 : vector<8x256xf32>
    %c8_117 = arith.constant 8 : index
    %c0_118 = arith.constant 0 : index
    %c0_119 = arith.constant 0 : index
    %164 = vector.load %arg2[%c8_117, %c0_118, %c0_119] : memref<9x1x256xbf16, #tpu.memory_space<vmem>>, vector<1x1x256xbf16>
    %165 = vector.shape_cast %164 : vector<1x1x256xbf16> to vector<1x256xbf16>
    %166 = vector.extract_strided_slice %92 {offsets = [0, 34], sizes = [8, 256], strides = [1, 1]} : vector<8x290xbf16> to vector<8x256xbf16>
    %167 = vector.broadcast %165 : vector<1x256xbf16> to vector<8x256xbf16>
    %168 = arith.mulf %166, %167 : vector<8x256xbf16>
    %c8_120 = arith.constant 8 : index
    %c0_121 = arith.constant 0 : index
    %c0_122 = arith.constant 0 : index
    %169 = vector.load %arg14[%c8_120, %c0_121, %c0_122] : memref<9x8x8xbf16, #tpu.memory_space<vmem>>, vector<1x8x8xbf16>
    %170 = vector.shape_cast %169 : vector<1x8x8xbf16> to vector<8x8xbf16>
    %cst_123 = arith.constant dense<0.000000e+00> : vector<8x256xf32>
    %171 = tpu.matmul %170, %168, %cst_123 {dimension_numbers = #tpu.dot_dimension_numbers<[1], [0], [0], [1], [0, 0, 1, 1], [], []>} : vector<8x8xbf16>, vector<8x256xbf16>, vector<8x256xf32> -> vector<8x256xf32>
    %172 = arith.addf %163, %171 : vector<8x256xf32>
    %c0_124 = arith.constant 0 : index
    %c0_125 = arith.constant 0 : index
    %173 = vector.load %arg15[%c0_124, %c0_125] : memref<8x1xf32, #tpu.memory_space<vmem>>, vector<8x1xf32>
    %174 = vector.broadcast %173 : vector<8x1xf32> to vector<8x256xf32>
    %175 = arith.addf %172, %174 : vector<8x256xf32>
    %cst_126 = arith.constant 0.000000e+00 : f32
    %176 = vector.broadcast %cst_126 : f32 to vector<8x256xf32>
    %177 = arith.maximumf %175, %176 : vector<8x256xf32>
    %178 = arith.truncf %177 : vector<8x256xf32> to vector<8x256xbf16>
    %cst_127 = arith.constant 0.000000e+00 : bf16
    %179 = vector.broadcast %cst_127 : bf16 to vector<8x16xbf16>
    %180 = tpu.concatenate %178, %179 in 1 : vector<8x256xbf16>, vector<8x16xbf16> -> vector<8x272xbf16>
    %181 = vector.extract_strided_slice %180 {offsets = [0, 1], sizes = [8, 256], strides = [1, 1]} : vector<8x272xbf16> to vector<8x256xbf16>
    %182 = arith.maximumf %178, %181 : vector<8x256xbf16>
    %183 = tpu.concatenate %182, %179 in 1 : vector<8x256xbf16>, vector<8x16xbf16> -> vector<8x272xbf16>
    %184 = vector.extract_strided_slice %183 {offsets = [0, 16], sizes = [8, 256], strides = [1, 1]} : vector<8x272xbf16> to vector<8x256xbf16>
    %185 = arith.maximumf %182, %184 : vector<8x256xbf16>
    %c0_128 = arith.constant 0 : index
    %c0_129 = arith.constant 0 : index
    %186 = vector.load %arg6[%c0_128, %c0_129] : memref<256x64xbf16, #tpu.memory_space<vmem>>, vector<256x64xbf16>
    %cst_130 = arith.constant dense<0.000000e+00> : vector<8x64xf32>
    %187 = tpu.matmul %185, %186, %cst_130 {dimension_numbers = #tpu.dot_dimension_numbers<[1], [0], [0], [1], [0, 0, 1, 1], [], []>} : vector<8x256xbf16>, vector<256x64xbf16>, vector<8x64xf32> -> vector<8x64xf32>
    %188 = arith.truncf %187 : vector<8x64xf32> to vector<8x64xbf16>
    %cst_131 = arith.constant 0.000000e+00 : bf16
    %189 = vector.broadcast %cst_131 : bf16 to vector<8x9xbf16>
    %190 = tpu.concatenate %189, %188, %189 in 1 : vector<8x9xbf16>, vector<8x64xbf16>, vector<8x9xbf16> -> vector<8x82xbf16>
    %c0_132 = arith.constant 0 : index
    %c0_133 = arith.constant 0 : index
    %c0_134 = arith.constant 0 : index
    %191 = vector.load %arg3[%c0_132, %c0_133, %c0_134] : memref<9x1x64xbf16, #tpu.memory_space<vmem>>, vector<1x1x64xbf16>
    %192 = vector.shape_cast %191 : vector<1x1x64xbf16> to vector<1x64xbf16>
    %193 = vector.extract_strided_slice %190 {offsets = [0, 0], sizes = [8, 64], strides = [1, 1]} : vector<8x82xbf16> to vector<8x64xbf16>
    %194 = vector.broadcast %192 : vector<1x64xbf16> to vector<8x64xbf16>
    %195 = arith.mulf %193, %194 : vector<8x64xbf16>
    %c0_135 = arith.constant 0 : index
    %c0_136 = arith.constant 0 : index
    %c0_137 = arith.constant 0 : index
    %196 = vector.load %arg16[%c0_135, %c0_136, %c0_137] : memref<9x16x8xbf16, #tpu.memory_space<vmem>>, vector<1x16x8xbf16>
    %197 = vector.shape_cast %196 : vector<1x16x8xbf16> to vector<16x8xbf16>
    %cst_138 = arith.constant dense<0.000000e+00> : vector<16x64xf32>
    %198 = tpu.matmul %197, %195, %cst_138 {dimension_numbers = #tpu.dot_dimension_numbers<[1], [0], [0], [1], [0, 0, 1, 1], [], []>} : vector<16x8xbf16>, vector<8x64xbf16>, vector<16x64xf32> -> vector<16x64xf32>
    %c1_139 = arith.constant 1 : index
    %c0_140 = arith.constant 0 : index
    %c0_141 = arith.constant 0 : index
    %199 = vector.load %arg3[%c1_139, %c0_140, %c0_141] : memref<9x1x64xbf16, #tpu.memory_space<vmem>>, vector<1x1x64xbf16>
    %200 = vector.shape_cast %199 : vector<1x1x64xbf16> to vector<1x64xbf16>
    %201 = vector.extract_strided_slice %190 {offsets = [0, 1], sizes = [8, 64], strides = [1, 1]} : vector<8x82xbf16> to vector<8x64xbf16>
    %202 = vector.broadcast %200 : vector<1x64xbf16> to vector<8x64xbf16>
    %203 = arith.mulf %201, %202 : vector<8x64xbf16>
    %c1_142 = arith.constant 1 : index
    %c0_143 = arith.constant 0 : index
    %c0_144 = arith.constant 0 : index
    %204 = vector.load %arg16[%c1_142, %c0_143, %c0_144] : memref<9x16x8xbf16, #tpu.memory_space<vmem>>, vector<1x16x8xbf16>
    %205 = vector.shape_cast %204 : vector<1x16x8xbf16> to vector<16x8xbf16>
    %cst_145 = arith.constant dense<0.000000e+00> : vector<16x64xf32>
    %206 = tpu.matmul %205, %203, %cst_145 {dimension_numbers = #tpu.dot_dimension_numbers<[1], [0], [0], [1], [0, 0, 1, 1], [], []>} : vector<16x8xbf16>, vector<8x64xbf16>, vector<16x64xf32> -> vector<16x64xf32>
    %207 = arith.addf %198, %206 : vector<16x64xf32>
    %c2_146 = arith.constant 2 : index
    %c0_147 = arith.constant 0 : index
    %c0_148 = arith.constant 0 : index
    %208 = vector.load %arg3[%c2_146, %c0_147, %c0_148] : memref<9x1x64xbf16, #tpu.memory_space<vmem>>, vector<1x1x64xbf16>
    %209 = vector.shape_cast %208 : vector<1x1x64xbf16> to vector<1x64xbf16>
    %210 = vector.extract_strided_slice %190 {offsets = [0, 2], sizes = [8, 64], strides = [1, 1]} : vector<8x82xbf16> to vector<8x64xbf16>
    %211 = vector.broadcast %209 : vector<1x64xbf16> to vector<8x64xbf16>
    %212 = arith.mulf %210, %211 : vector<8x64xbf16>
    %c2_149 = arith.constant 2 : index
    %c0_150 = arith.constant 0 : index
    %c0_151 = arith.constant 0 : index
    %213 = vector.load %arg16[%c2_149, %c0_150, %c0_151] : memref<9x16x8xbf16, #tpu.memory_space<vmem>>, vector<1x16x8xbf16>
    %214 = vector.shape_cast %213 : vector<1x16x8xbf16> to vector<16x8xbf16>
    %cst_152 = arith.constant dense<0.000000e+00> : vector<16x64xf32>
    %215 = tpu.matmul %214, %212, %cst_152 {dimension_numbers = #tpu.dot_dimension_numbers<[1], [0], [0], [1], [0, 0, 1, 1], [], []>} : vector<16x8xbf16>, vector<8x64xbf16>, vector<16x64xf32> -> vector<16x64xf32>
    %216 = arith.addf %207, %215 : vector<16x64xf32>
    %c3_153 = arith.constant 3 : index
    %c0_154 = arith.constant 0 : index
    %c0_155 = arith.constant 0 : index
    %217 = vector.load %arg3[%c3_153, %c0_154, %c0_155] : memref<9x1x64xbf16, #tpu.memory_space<vmem>>, vector<1x1x64xbf16>
    %218 = vector.shape_cast %217 : vector<1x1x64xbf16> to vector<1x64xbf16>
    %219 = vector.extract_strided_slice %190 {offsets = [0, 8], sizes = [8, 64], strides = [1, 1]} : vector<8x82xbf16> to vector<8x64xbf16>
    %220 = vector.broadcast %218 : vector<1x64xbf16> to vector<8x64xbf16>
    %221 = arith.mulf %219, %220 : vector<8x64xbf16>
    %c3_156 = arith.constant 3 : index
    %c0_157 = arith.constant 0 : index
    %c0_158 = arith.constant 0 : index
    %222 = vector.load %arg16[%c3_156, %c0_157, %c0_158] : memref<9x16x8xbf16, #tpu.memory_space<vmem>>, vector<1x16x8xbf16>
    %223 = vector.shape_cast %222 : vector<1x16x8xbf16> to vector<16x8xbf16>
    %cst_159 = arith.constant dense<0.000000e+00> : vector<16x64xf32>
    %224 = tpu.matmul %223, %221, %cst_159 {dimension_numbers = #tpu.dot_dimension_numbers<[1], [0], [0], [1], [0, 0, 1, 1], [], []>} : vector<16x8xbf16>, vector<8x64xbf16>, vector<16x64xf32> -> vector<16x64xf32>
    %225 = arith.addf %216, %224 : vector<16x64xf32>
    %c4_160 = arith.constant 4 : index
    %c0_161 = arith.constant 0 : index
    %c0_162 = arith.constant 0 : index
    %226 = vector.load %arg3[%c4_160, %c0_161, %c0_162] : memref<9x1x64xbf16, #tpu.memory_space<vmem>>, vector<1x1x64xbf16>
    %227 = vector.shape_cast %226 : vector<1x1x64xbf16> to vector<1x64xbf16>
    %228 = vector.extract_strided_slice %190 {offsets = [0, 9], sizes = [8, 64], strides = [1, 1]} : vector<8x82xbf16> to vector<8x64xbf16>
    %229 = vector.broadcast %227 : vector<1x64xbf16> to vector<8x64xbf16>
    %230 = arith.mulf %228, %229 : vector<8x64xbf16>
    %c4_163 = arith.constant 4 : index
    %c0_164 = arith.constant 0 : index
    %c0_165 = arith.constant 0 : index
    %231 = vector.load %arg16[%c4_163, %c0_164, %c0_165] : memref<9x16x8xbf16, #tpu.memory_space<vmem>>, vector<1x16x8xbf16>
    %232 = vector.shape_cast %231 : vector<1x16x8xbf16> to vector<16x8xbf16>
    %cst_166 = arith.constant dense<0.000000e+00> : vector<16x64xf32>
    %233 = tpu.matmul %232, %230, %cst_166 {dimension_numbers = #tpu.dot_dimension_numbers<[1], [0], [0], [1], [0, 0, 1, 1], [], []>} : vector<16x8xbf16>, vector<8x64xbf16>, vector<16x64xf32> -> vector<16x64xf32>
    %234 = arith.addf %225, %233 : vector<16x64xf32>
    %c5_167 = arith.constant 5 : index
    %c0_168 = arith.constant 0 : index
    %c0_169 = arith.constant 0 : index
    %235 = vector.load %arg3[%c5_167, %c0_168, %c0_169] : memref<9x1x64xbf16, #tpu.memory_space<vmem>>, vector<1x1x64xbf16>
    %236 = vector.shape_cast %235 : vector<1x1x64xbf16> to vector<1x64xbf16>
    %237 = vector.extract_strided_slice %190 {offsets = [0, 10], sizes = [8, 64], strides = [1, 1]} : vector<8x82xbf16> to vector<8x64xbf16>
    %238 = vector.broadcast %236 : vector<1x64xbf16> to vector<8x64xbf16>
    %239 = arith.mulf %237, %238 : vector<8x64xbf16>
    %c5_170 = arith.constant 5 : index
    %c0_171 = arith.constant 0 : index
    %c0_172 = arith.constant 0 : index
    %240 = vector.load %arg16[%c5_170, %c0_171, %c0_172] : memref<9x16x8xbf16, #tpu.memory_space<vmem>>, vector<1x16x8xbf16>
    %241 = vector.shape_cast %240 : vector<1x16x8xbf16> to vector<16x8xbf16>
    %cst_173 = arith.constant dense<0.000000e+00> : vector<16x64xf32>
    %242 = tpu.matmul %241, %239, %cst_173 {dimension_numbers = #tpu.dot_dimension_numbers<[1], [0], [0], [1], [0, 0, 1, 1], [], []>} : vector<16x8xbf16>, vector<8x64xbf16>, vector<16x64xf32> -> vector<16x64xf32>
    %243 = arith.addf %234, %242 : vector<16x64xf32>
    %c6_174 = arith.constant 6 : index
    %c0_175 = arith.constant 0 : index
    %c0_176 = arith.constant 0 : index
    %244 = vector.load %arg3[%c6_174, %c0_175, %c0_176] : memref<9x1x64xbf16, #tpu.memory_space<vmem>>, vector<1x1x64xbf16>
    %245 = vector.shape_cast %244 : vector<1x1x64xbf16> to vector<1x64xbf16>
    %246 = vector.extract_strided_slice %190 {offsets = [0, 16], sizes = [8, 64], strides = [1, 1]} : vector<8x82xbf16> to vector<8x64xbf16>
    %247 = vector.broadcast %245 : vector<1x64xbf16> to vector<8x64xbf16>
    %248 = arith.mulf %246, %247 : vector<8x64xbf16>
    %c6_177 = arith.constant 6 : index
    %c0_178 = arith.constant 0 : index
    %c0_179 = arith.constant 0 : index
    %249 = vector.load %arg16[%c6_177, %c0_178, %c0_179] : memref<9x16x8xbf16, #tpu.memory_space<vmem>>, vector<1x16x8xbf16>
    %250 = vector.shape_cast %249 : vector<1x16x8xbf16> to vector<16x8xbf16>
    %cst_180 = arith.constant dense<0.000000e+00> : vector<16x64xf32>
    %251 = tpu.matmul %250, %248, %cst_180 {dimension_numbers = #tpu.dot_dimension_numbers<[1], [0], [0], [1], [0, 0, 1, 1], [], []>} : vector<16x8xbf16>, vector<8x64xbf16>, vector<16x64xf32> -> vector<16x64xf32>
    %252 = arith.addf %243, %251 : vector<16x64xf32>
    %c7_181 = arith.constant 7 : index
    %c0_182 = arith.constant 0 : index
    %c0_183 = arith.constant 0 : index
    %253 = vector.load %arg3[%c7_181, %c0_182, %c0_183] : memref<9x1x64xbf16, #tpu.memory_space<vmem>>, vector<1x1x64xbf16>
    %254 = vector.shape_cast %253 : vector<1x1x64xbf16> to vector<1x64xbf16>
    %255 = vector.extract_strided_slice %190 {offsets = [0, 17], sizes = [8, 64], strides = [1, 1]} : vector<8x82xbf16> to vector<8x64xbf16>
    %256 = vector.broadcast %254 : vector<1x64xbf16> to vector<8x64xbf16>
    %257 = arith.mulf %255, %256 : vector<8x64xbf16>
    %c7_184 = arith.constant 7 : index
    %c0_185 = arith.constant 0 : index
    %c0_186 = arith.constant 0 : index
    %258 = vector.load %arg16[%c7_184, %c0_185, %c0_186] : memref<9x16x8xbf16, #tpu.memory_space<vmem>>, vector<1x16x8xbf16>
    %259 = vector.shape_cast %258 : vector<1x16x8xbf16> to vector<16x8xbf16>
    %cst_187 = arith.constant dense<0.000000e+00> : vector<16x64xf32>
    %260 = tpu.matmul %259, %257, %cst_187 {dimension_numbers = #tpu.dot_dimension_numbers<[1], [0], [0], [1], [0, 0, 1, 1], [], []>} : vector<16x8xbf16>, vector<8x64xbf16>, vector<16x64xf32> -> vector<16x64xf32>
    %261 = arith.addf %252, %260 : vector<16x64xf32>
    %c8_188 = arith.constant 8 : index
    %c0_189 = arith.constant 0 : index
    %c0_190 = arith.constant 0 : index
    %262 = vector.load %arg3[%c8_188, %c0_189, %c0_190] : memref<9x1x64xbf16, #tpu.memory_space<vmem>>, vector<1x1x64xbf16>
    %263 = vector.shape_cast %262 : vector<1x1x64xbf16> to vector<1x64xbf16>
    %264 = vector.extract_strided_slice %190 {offsets = [0, 18], sizes = [8, 64], strides = [1, 1]} : vector<8x82xbf16> to vector<8x64xbf16>
    %265 = vector.broadcast %263 : vector<1x64xbf16> to vector<8x64xbf16>
    %266 = arith.mulf %264, %265 : vector<8x64xbf16>
    %c8_191 = arith.constant 8 : index
    %c0_192 = arith.constant 0 : index
    %c0_193 = arith.constant 0 : index
    %267 = vector.load %arg16[%c8_191, %c0_192, %c0_193] : memref<9x16x8xbf16, #tpu.memory_space<vmem>>, vector<1x16x8xbf16>
    %268 = vector.shape_cast %267 : vector<1x16x8xbf16> to vector<16x8xbf16>
    %cst_194 = arith.constant dense<0.000000e+00> : vector<16x64xf32>
    %269 = tpu.matmul %268, %266, %cst_194 {dimension_numbers = #tpu.dot_dimension_numbers<[1], [0], [0], [1], [0, 0, 1, 1], [], []>} : vector<16x8xbf16>, vector<8x64xbf16>, vector<16x64xf32> -> vector<16x64xf32>
    %270 = arith.addf %261, %269 : vector<16x64xf32>
    %c0_195 = arith.constant 0 : index
    %c0_196 = arith.constant 0 : index
    %271 = vector.load %arg17[%c0_195, %c0_196] : memref<16x1xf32, #tpu.memory_space<vmem>>, vector<16x1xf32>
    %272 = vector.broadcast %271 : vector<16x1xf32> to vector<16x64xf32>
    %273 = arith.addf %270, %272 : vector<16x64xf32>
    %cst_197 = arith.constant 0.000000e+00 : f32
    %274 = vector.broadcast %cst_197 : f32 to vector<16x64xf32>
    %275 = arith.maximumf %273, %274 : vector<16x64xf32>
    %276 = arith.truncf %275 : vector<16x64xf32> to vector<16x64xbf16>
    %cst_198 = arith.constant 0.000000e+00 : bf16
    %277 = vector.broadcast %cst_198 : bf16 to vector<16x9xbf16>
    %278 = tpu.concatenate %277, %276, %277 in 1 : vector<16x9xbf16>, vector<16x64xbf16>, vector<16x9xbf16> -> vector<16x82xbf16>
    %c0_199 = arith.constant 0 : index
    %c0_200 = arith.constant 0 : index
    %c0_201 = arith.constant 0 : index
    %279 = vector.load %arg3[%c0_199, %c0_200, %c0_201] : memref<9x1x64xbf16, #tpu.memory_space<vmem>>, vector<1x1x64xbf16>
    %280 = vector.shape_cast %279 : vector<1x1x64xbf16> to vector<1x64xbf16>
    %281 = vector.extract_strided_slice %278 {offsets = [0, 0], sizes = [16, 64], strides = [1, 1]} : vector<16x82xbf16> to vector<16x64xbf16>
    %282 = vector.broadcast %280 : vector<1x64xbf16> to vector<16x64xbf16>
    %283 = arith.mulf %281, %282 : vector<16x64xbf16>
    %c0_202 = arith.constant 0 : index
    %c0_203 = arith.constant 0 : index
    %c0_204 = arith.constant 0 : index
    %284 = vector.load %arg18[%c0_202, %c0_203, %c0_204] : memref<9x16x16xbf16, #tpu.memory_space<vmem>>, vector<1x16x16xbf16>
    %285 = vector.shape_cast %284 : vector<1x16x16xbf16> to vector<16x16xbf16>
    %cst_205 = arith.constant dense<0.000000e+00> : vector<16x64xf32>
    %286 = tpu.matmul %285, %283, %cst_205 {dimension_numbers = #tpu.dot_dimension_numbers<[1], [0], [0], [1], [0, 0, 1, 1], [], []>} : vector<16x16xbf16>, vector<16x64xbf16>, vector<16x64xf32> -> vector<16x64xf32>
    %c1_206 = arith.constant 1 : index
    %c0_207 = arith.constant 0 : index
    %c0_208 = arith.constant 0 : index
    %287 = vector.load %arg3[%c1_206, %c0_207, %c0_208] : memref<9x1x64xbf16, #tpu.memory_space<vmem>>, vector<1x1x64xbf16>
    %288 = vector.shape_cast %287 : vector<1x1x64xbf16> to vector<1x64xbf16>
    %289 = vector.extract_strided_slice %278 {offsets = [0, 1], sizes = [16, 64], strides = [1, 1]} : vector<16x82xbf16> to vector<16x64xbf16>
    %290 = vector.broadcast %288 : vector<1x64xbf16> to vector<16x64xbf16>
    %291 = arith.mulf %289, %290 : vector<16x64xbf16>
    %c1_209 = arith.constant 1 : index
    %c0_210 = arith.constant 0 : index
    %c0_211 = arith.constant 0 : index
    %292 = vector.load %arg18[%c1_209, %c0_210, %c0_211] : memref<9x16x16xbf16, #tpu.memory_space<vmem>>, vector<1x16x16xbf16>
    %293 = vector.shape_cast %292 : vector<1x16x16xbf16> to vector<16x16xbf16>
    %cst_212 = arith.constant dense<0.000000e+00> : vector<16x64xf32>
    %294 = tpu.matmul %293, %291, %cst_212 {dimension_numbers = #tpu.dot_dimension_numbers<[1], [0], [0], [1], [0, 0, 1, 1], [], []>} : vector<16x16xbf16>, vector<16x64xbf16>, vector<16x64xf32> -> vector<16x64xf32>
    %295 = arith.addf %286, %294 : vector<16x64xf32>
    %c2_213 = arith.constant 2 : index
    %c0_214 = arith.constant 0 : index
    %c0_215 = arith.constant 0 : index
    %296 = vector.load %arg3[%c2_213, %c0_214, %c0_215] : memref<9x1x64xbf16, #tpu.memory_space<vmem>>, vector<1x1x64xbf16>
    %297 = vector.shape_cast %296 : vector<1x1x64xbf16> to vector<1x64xbf16>
    %298 = vector.extract_strided_slice %278 {offsets = [0, 2], sizes = [16, 64], strides = [1, 1]} : vector<16x82xbf16> to vector<16x64xbf16>
    %299 = vector.broadcast %297 : vector<1x64xbf16> to vector<16x64xbf16>
    %300 = arith.mulf %298, %299 : vector<16x64xbf16>
    %c2_216 = arith.constant 2 : index
    %c0_217 = arith.constant 0 : index
    %c0_218 = arith.constant 0 : index
    %301 = vector.load %arg18[%c2_216, %c0_217, %c0_218] : memref<9x16x16xbf16, #tpu.memory_space<vmem>>, vector<1x16x16xbf16>
    %302 = vector.shape_cast %301 : vector<1x16x16xbf16> to vector<16x16xbf16>
    %cst_219 = arith.constant dense<0.000000e+00> : vector<16x64xf32>
    %303 = tpu.matmul %302, %300, %cst_219 {dimension_numbers = #tpu.dot_dimension_numbers<[1], [0], [0], [1], [0, 0, 1, 1], [], []>} : vector<16x16xbf16>, vector<16x64xbf16>, vector<16x64xf32> -> vector<16x64xf32>
    %304 = arith.addf %295, %303 : vector<16x64xf32>
    %c3_220 = arith.constant 3 : index
    %c0_221 = arith.constant 0 : index
    %c0_222 = arith.constant 0 : index
    %305 = vector.load %arg3[%c3_220, %c0_221, %c0_222] : memref<9x1x64xbf16, #tpu.memory_space<vmem>>, vector<1x1x64xbf16>
    %306 = vector.shape_cast %305 : vector<1x1x64xbf16> to vector<1x64xbf16>
    %307 = vector.extract_strided_slice %278 {offsets = [0, 8], sizes = [16, 64], strides = [1, 1]} : vector<16x82xbf16> to vector<16x64xbf16>
    %308 = vector.broadcast %306 : vector<1x64xbf16> to vector<16x64xbf16>
    %309 = arith.mulf %307, %308 : vector<16x64xbf16>
    %c3_223 = arith.constant 3 : index
    %c0_224 = arith.constant 0 : index
    %c0_225 = arith.constant 0 : index
    %310 = vector.load %arg18[%c3_223, %c0_224, %c0_225] : memref<9x16x16xbf16, #tpu.memory_space<vmem>>, vector<1x16x16xbf16>
    %311 = vector.shape_cast %310 : vector<1x16x16xbf16> to vector<16x16xbf16>
    %cst_226 = arith.constant dense<0.000000e+00> : vector<16x64xf32>
    %312 = tpu.matmul %311, %309, %cst_226 {dimension_numbers = #tpu.dot_dimension_numbers<[1], [0], [0], [1], [0, 0, 1, 1], [], []>} : vector<16x16xbf16>, vector<16x64xbf16>, vector<16x64xf32> -> vector<16x64xf32>
    %313 = arith.addf %304, %312 : vector<16x64xf32>
    %c4_227 = arith.constant 4 : index
    %c0_228 = arith.constant 0 : index
    %c0_229 = arith.constant 0 : index
    %314 = vector.load %arg3[%c4_227, %c0_228, %c0_229] : memref<9x1x64xbf16, #tpu.memory_space<vmem>>, vector<1x1x64xbf16>
    %315 = vector.shape_cast %314 : vector<1x1x64xbf16> to vector<1x64xbf16>
    %316 = vector.extract_strided_slice %278 {offsets = [0, 9], sizes = [16, 64], strides = [1, 1]} : vector<16x82xbf16> to vector<16x64xbf16>
    %317 = vector.broadcast %315 : vector<1x64xbf16> to vector<16x64xbf16>
    %318 = arith.mulf %316, %317 : vector<16x64xbf16>
    %c4_230 = arith.constant 4 : index
    %c0_231 = arith.constant 0 : index
    %c0_232 = arith.constant 0 : index
    %319 = vector.load %arg18[%c4_230, %c0_231, %c0_232] : memref<9x16x16xbf16, #tpu.memory_space<vmem>>, vector<1x16x16xbf16>
    %320 = vector.shape_cast %319 : vector<1x16x16xbf16> to vector<16x16xbf16>
    %cst_233 = arith.constant dense<0.000000e+00> : vector<16x64xf32>
    %321 = tpu.matmul %320, %318, %cst_233 {dimension_numbers = #tpu.dot_dimension_numbers<[1], [0], [0], [1], [0, 0, 1, 1], [], []>} : vector<16x16xbf16>, vector<16x64xbf16>, vector<16x64xf32> -> vector<16x64xf32>
    %322 = arith.addf %313, %321 : vector<16x64xf32>
    %c5_234 = arith.constant 5 : index
    %c0_235 = arith.constant 0 : index
    %c0_236 = arith.constant 0 : index
    %323 = vector.load %arg3[%c5_234, %c0_235, %c0_236] : memref<9x1x64xbf16, #tpu.memory_space<vmem>>, vector<1x1x64xbf16>
    %324 = vector.shape_cast %323 : vector<1x1x64xbf16> to vector<1x64xbf16>
    %325 = vector.extract_strided_slice %278 {offsets = [0, 10], sizes = [16, 64], strides = [1, 1]} : vector<16x82xbf16> to vector<16x64xbf16>
    %326 = vector.broadcast %324 : vector<1x64xbf16> to vector<16x64xbf16>
    %327 = arith.mulf %325, %326 : vector<16x64xbf16>
    %c5_237 = arith.constant 5 : index
    %c0_238 = arith.constant 0 : index
    %c0_239 = arith.constant 0 : index
    %328 = vector.load %arg18[%c5_237, %c0_238, %c0_239] : memref<9x16x16xbf16, #tpu.memory_space<vmem>>, vector<1x16x16xbf16>
    %329 = vector.shape_cast %328 : vector<1x16x16xbf16> to vector<16x16xbf16>
    %cst_240 = arith.constant dense<0.000000e+00> : vector<16x64xf32>
    %330 = tpu.matmul %329, %327, %cst_240 {dimension_numbers = #tpu.dot_dimension_numbers<[1], [0], [0], [1], [0, 0, 1, 1], [], []>} : vector<16x16xbf16>, vector<16x64xbf16>, vector<16x64xf32> -> vector<16x64xf32>
    %331 = arith.addf %322, %330 : vector<16x64xf32>
    %c6_241 = arith.constant 6 : index
    %c0_242 = arith.constant 0 : index
    %c0_243 = arith.constant 0 : index
    %332 = vector.load %arg3[%c6_241, %c0_242, %c0_243] : memref<9x1x64xbf16, #tpu.memory_space<vmem>>, vector<1x1x64xbf16>
    %333 = vector.shape_cast %332 : vector<1x1x64xbf16> to vector<1x64xbf16>
    %334 = vector.extract_strided_slice %278 {offsets = [0, 16], sizes = [16, 64], strides = [1, 1]} : vector<16x82xbf16> to vector<16x64xbf16>
    %335 = vector.broadcast %333 : vector<1x64xbf16> to vector<16x64xbf16>
    %336 = arith.mulf %334, %335 : vector<16x64xbf16>
    %c6_244 = arith.constant 6 : index
    %c0_245 = arith.constant 0 : index
    %c0_246 = arith.constant 0 : index
    %337 = vector.load %arg18[%c6_244, %c0_245, %c0_246] : memref<9x16x16xbf16, #tpu.memory_space<vmem>>, vector<1x16x16xbf16>
    %338 = vector.shape_cast %337 : vector<1x16x16xbf16> to vector<16x16xbf16>
    %cst_247 = arith.constant dense<0.000000e+00> : vector<16x64xf32>
    %339 = tpu.matmul %338, %336, %cst_247 {dimension_numbers = #tpu.dot_dimension_numbers<[1], [0], [0], [1], [0, 0, 1, 1], [], []>} : vector<16x16xbf16>, vector<16x64xbf16>, vector<16x64xf32> -> vector<16x64xf32>
    %340 = arith.addf %331, %339 : vector<16x64xf32>
    %c7_248 = arith.constant 7 : index
    %c0_249 = arith.constant 0 : index
    %c0_250 = arith.constant 0 : index
    %341 = vector.load %arg3[%c7_248, %c0_249, %c0_250] : memref<9x1x64xbf16, #tpu.memory_space<vmem>>, vector<1x1x64xbf16>
    %342 = vector.shape_cast %341 : vector<1x1x64xbf16> to vector<1x64xbf16>
    %343 = vector.extract_strided_slice %278 {offsets = [0, 17], sizes = [16, 64], strides = [1, 1]} : vector<16x82xbf16> to vector<16x64xbf16>
    %344 = vector.broadcast %342 : vector<1x64xbf16> to vector<16x64xbf16>
    %345 = arith.mulf %343, %344 : vector<16x64xbf16>
    %c7_251 = arith.constant 7 : index
    %c0_252 = arith.constant 0 : index
    %c0_253 = arith.constant 0 : index
    %346 = vector.load %arg18[%c7_251, %c0_252, %c0_253] : memref<9x16x16xbf16, #tpu.memory_space<vmem>>, vector<1x16x16xbf16>
    %347 = vector.shape_cast %346 : vector<1x16x16xbf16> to vector<16x16xbf16>
    %cst_254 = arith.constant dense<0.000000e+00> : vector<16x64xf32>
    %348 = tpu.matmul %347, %345, %cst_254 {dimension_numbers = #tpu.dot_dimension_numbers<[1], [0], [0], [1], [0, 0, 1, 1], [], []>} : vector<16x16xbf16>, vector<16x64xbf16>, vector<16x64xf32> -> vector<16x64xf32>
    %349 = arith.addf %340, %348 : vector<16x64xf32>
    %c8_255 = arith.constant 8 : index
    %c0_256 = arith.constant 0 : index
    %c0_257 = arith.constant 0 : index
    %350 = vector.load %arg3[%c8_255, %c0_256, %c0_257] : memref<9x1x64xbf16, #tpu.memory_space<vmem>>, vector<1x1x64xbf16>
    %351 = vector.shape_cast %350 : vector<1x1x64xbf16> to vector<1x64xbf16>
    %352 = vector.extract_strided_slice %278 {offsets = [0, 18], sizes = [16, 64], strides = [1, 1]} : vector<16x82xbf16> to vector<16x64xbf16>
    %353 = vector.broadcast %351 : vector<1x64xbf16> to vector<16x64xbf16>
    %354 = arith.mulf %352, %353 : vector<16x64xbf16>
    %c8_258 = arith.constant 8 : index
    %c0_259 = arith.constant 0 : index
    %c0_260 = arith.constant 0 : index
    %355 = vector.load %arg18[%c8_258, %c0_259, %c0_260] : memref<9x16x16xbf16, #tpu.memory_space<vmem>>, vector<1x16x16xbf16>
    %356 = vector.shape_cast %355 : vector<1x16x16xbf16> to vector<16x16xbf16>
    %cst_261 = arith.constant dense<0.000000e+00> : vector<16x64xf32>
    %357 = tpu.matmul %356, %354, %cst_261 {dimension_numbers = #tpu.dot_dimension_numbers<[1], [0], [0], [1], [0, 0, 1, 1], [], []>} : vector<16x16xbf16>, vector<16x64xbf16>, vector<16x64xf32> -> vector<16x64xf32>
    %358 = arith.addf %349, %357 : vector<16x64xf32>
    %c0_262 = arith.constant 0 : index
    %c0_263 = arith.constant 0 : index
    %359 = vector.load %arg19[%c0_262, %c0_263] : memref<16x1xf32, #tpu.memory_space<vmem>>, vector<16x1xf32>
    %360 = vector.broadcast %359 : vector<16x1xf32> to vector<16x64xf32>
    %361 = arith.addf %358, %360 : vector<16x64xf32>
    %cst_264 = arith.constant 0.000000e+00 : f32
    %362 = vector.broadcast %cst_264 : f32 to vector<16x64xf32>
    %363 = arith.maximumf %361, %362 : vector<16x64xf32>
    %364 = arith.truncf %363 : vector<16x64xf32> to vector<16x64xbf16>
    %cst_265 = arith.constant 0.000000e+00 : bf16
    %365 = vector.broadcast %cst_265 : bf16 to vector<16x8xbf16>
    %366 = tpu.concatenate %364, %365 in 1 : vector<16x64xbf16>, vector<16x8xbf16> -> vector<16x72xbf16>
    %367 = vector.extract_strided_slice %366 {offsets = [0, 1], sizes = [16, 64], strides = [1, 1]} : vector<16x72xbf16> to vector<16x64xbf16>
    %368 = arith.maximumf %364, %367 : vector<16x64xbf16>
    %369 = tpu.concatenate %368, %365 in 1 : vector<16x64xbf16>, vector<16x8xbf16> -> vector<16x72xbf16>
    %370 = vector.extract_strided_slice %369 {offsets = [0, 8], sizes = [16, 64], strides = [1, 1]} : vector<16x72xbf16> to vector<16x64xbf16>
    %371 = arith.maximumf %368, %370 : vector<16x64xbf16>
    %c0_266 = arith.constant 0 : index
    %c0_267 = arith.constant 0 : index
    %372 = vector.load %arg7[%c0_266, %c0_267] : memref<64x16xbf16, #tpu.memory_space<vmem>>, vector<64x16xbf16>
    %cst_268 = arith.constant dense<0.000000e+00> : vector<16x16xf32>
    %373 = tpu.matmul %371, %372, %cst_268 {dimension_numbers = #tpu.dot_dimension_numbers<[1], [0], [0], [1], [0, 0, 1, 1], [], []>} : vector<16x64xbf16>, vector<64x16xbf16>, vector<16x16xf32> -> vector<16x16xf32>
    %374 = arith.truncf %373 : vector<16x16xf32> to vector<16x16xbf16>
    %cst_269 = arith.constant 0.000000e+00 : bf16
    %375 = vector.broadcast %cst_269 : bf16 to vector<16x5xbf16>
    %376 = tpu.concatenate %375, %374, %375 in 1 : vector<16x5xbf16>, vector<16x16xbf16>, vector<16x5xbf16> -> vector<16x26xbf16>
    %c0_270 = arith.constant 0 : index
    %c0_271 = arith.constant 0 : index
    %c0_272 = arith.constant 0 : index
    %377 = vector.load %arg4[%c0_270, %c0_271, %c0_272] : memref<9x1x16xbf16, #tpu.memory_space<vmem>>, vector<1x1x16xbf16>
    %378 = vector.shape_cast %377 : vector<1x1x16xbf16> to vector<1x16xbf16>
    %379 = vector.extract_strided_slice %376 {offsets = [0, 0], sizes = [16, 16], strides = [1, 1]} : vector<16x26xbf16> to vector<16x16xbf16>
    %380 = vector.broadcast %378 : vector<1x16xbf16> to vector<16x16xbf16>
    %381 = arith.mulf %379, %380 : vector<16x16xbf16>
    %c0_273 = arith.constant 0 : index
    %c0_274 = arith.constant 0 : index
    %c0_275 = arith.constant 0 : index
    %382 = vector.load %arg20[%c0_273, %c0_274, %c0_275] : memref<9x32x16xbf16, #tpu.memory_space<vmem>>, vector<1x32x16xbf16>
    %383 = vector.shape_cast %382 : vector<1x32x16xbf16> to vector<32x16xbf16>
    %cst_276 = arith.constant dense<0.000000e+00> : vector<32x16xf32>
    %384 = tpu.matmul %383, %381, %cst_276 {dimension_numbers = #tpu.dot_dimension_numbers<[1], [0], [0], [1], [0, 0, 1, 1], [], []>} : vector<32x16xbf16>, vector<16x16xbf16>, vector<32x16xf32> -> vector<32x16xf32>
    %c1_277 = arith.constant 1 : index
    %c0_278 = arith.constant 0 : index
    %c0_279 = arith.constant 0 : index
    %385 = vector.load %arg4[%c1_277, %c0_278, %c0_279] : memref<9x1x16xbf16, #tpu.memory_space<vmem>>, vector<1x1x16xbf16>
    %386 = vector.shape_cast %385 : vector<1x1x16xbf16> to vector<1x16xbf16>
    %387 = vector.extract_strided_slice %376 {offsets = [0, 1], sizes = [16, 16], strides = [1, 1]} : vector<16x26xbf16> to vector<16x16xbf16>
    %388 = vector.broadcast %386 : vector<1x16xbf16> to vector<16x16xbf16>
    %389 = arith.mulf %387, %388 : vector<16x16xbf16>
    %c1_280 = arith.constant 1 : index
    %c0_281 = arith.constant 0 : index
    %c0_282 = arith.constant 0 : index
    %390 = vector.load %arg20[%c1_280, %c0_281, %c0_282] : memref<9x32x16xbf16, #tpu.memory_space<vmem>>, vector<1x32x16xbf16>
    %391 = vector.shape_cast %390 : vector<1x32x16xbf16> to vector<32x16xbf16>
    %cst_283 = arith.constant dense<0.000000e+00> : vector<32x16xf32>
    %392 = tpu.matmul %391, %389, %cst_283 {dimension_numbers = #tpu.dot_dimension_numbers<[1], [0], [0], [1], [0, 0, 1, 1], [], []>} : vector<32x16xbf16>, vector<16x16xbf16>, vector<32x16xf32> -> vector<32x16xf32>
    %393 = arith.addf %384, %392 : vector<32x16xf32>
    %c2_284 = arith.constant 2 : index
    %c0_285 = arith.constant 0 : index
    %c0_286 = arith.constant 0 : index
    %394 = vector.load %arg4[%c2_284, %c0_285, %c0_286] : memref<9x1x16xbf16, #tpu.memory_space<vmem>>, vector<1x1x16xbf16>
    %395 = vector.shape_cast %394 : vector<1x1x16xbf16> to vector<1x16xbf16>
    %396 = vector.extract_strided_slice %376 {offsets = [0, 2], sizes = [16, 16], strides = [1, 1]} : vector<16x26xbf16> to vector<16x16xbf16>
    %397 = vector.broadcast %395 : vector<1x16xbf16> to vector<16x16xbf16>
    %398 = arith.mulf %396, %397 : vector<16x16xbf16>
    %c2_287 = arith.constant 2 : index
    %c0_288 = arith.constant 0 : index
    %c0_289 = arith.constant 0 : index
    %399 = vector.load %arg20[%c2_287, %c0_288, %c0_289] : memref<9x32x16xbf16, #tpu.memory_space<vmem>>, vector<1x32x16xbf16>
    %400 = vector.shape_cast %399 : vector<1x32x16xbf16> to vector<32x16xbf16>
    %cst_290 = arith.constant dense<0.000000e+00> : vector<32x16xf32>
    %401 = tpu.matmul %400, %398, %cst_290 {dimension_numbers = #tpu.dot_dimension_numbers<[1], [0], [0], [1], [0, 0, 1, 1], [], []>} : vector<32x16xbf16>, vector<16x16xbf16>, vector<32x16xf32> -> vector<32x16xf32>
    %402 = arith.addf %393, %401 : vector<32x16xf32>
    %c3_291 = arith.constant 3 : index
    %c0_292 = arith.constant 0 : index
    %c0_293 = arith.constant 0 : index
    %403 = vector.load %arg4[%c3_291, %c0_292, %c0_293] : memref<9x1x16xbf16, #tpu.memory_space<vmem>>, vector<1x1x16xbf16>
    %404 = vector.shape_cast %403 : vector<1x1x16xbf16> to vector<1x16xbf16>
    %405 = vector.extract_strided_slice %376 {offsets = [0, 4], sizes = [16, 16], strides = [1, 1]} : vector<16x26xbf16> to vector<16x16xbf16>
    %406 = vector.broadcast %404 : vector<1x16xbf16> to vector<16x16xbf16>
    %407 = arith.mulf %405, %406 : vector<16x16xbf16>
    %c3_294 = arith.constant 3 : index
    %c0_295 = arith.constant 0 : index
    %c0_296 = arith.constant 0 : index
    %408 = vector.load %arg20[%c3_294, %c0_295, %c0_296] : memref<9x32x16xbf16, #tpu.memory_space<vmem>>, vector<1x32x16xbf16>
    %409 = vector.shape_cast %408 : vector<1x32x16xbf16> to vector<32x16xbf16>
    %cst_297 = arith.constant dense<0.000000e+00> : vector<32x16xf32>
    %410 = tpu.matmul %409, %407, %cst_297 {dimension_numbers = #tpu.dot_dimension_numbers<[1], [0], [0], [1], [0, 0, 1, 1], [], []>} : vector<32x16xbf16>, vector<16x16xbf16>, vector<32x16xf32> -> vector<32x16xf32>
    %411 = arith.addf %402, %410 : vector<32x16xf32>
    %c4_298 = arith.constant 4 : index
    %c0_299 = arith.constant 0 : index
    %c0_300 = arith.constant 0 : index
    %412 = vector.load %arg4[%c4_298, %c0_299, %c0_300] : memref<9x1x16xbf16, #tpu.memory_space<vmem>>, vector<1x1x16xbf16>
    %413 = vector.shape_cast %412 : vector<1x1x16xbf16> to vector<1x16xbf16>
    %414 = vector.extract_strided_slice %376 {offsets = [0, 5], sizes = [16, 16], strides = [1, 1]} : vector<16x26xbf16> to vector<16x16xbf16>
    %415 = vector.broadcast %413 : vector<1x16xbf16> to vector<16x16xbf16>
    %416 = arith.mulf %414, %415 : vector<16x16xbf16>
    %c4_301 = arith.constant 4 : index
    %c0_302 = arith.constant 0 : index
    %c0_303 = arith.constant 0 : index
    %417 = vector.load %arg20[%c4_301, %c0_302, %c0_303] : memref<9x32x16xbf16, #tpu.memory_space<vmem>>, vector<1x32x16xbf16>
    %418 = vector.shape_cast %417 : vector<1x32x16xbf16> to vector<32x16xbf16>
    %cst_304 = arith.constant dense<0.000000e+00> : vector<32x16xf32>
    %419 = tpu.matmul %418, %416, %cst_304 {dimension_numbers = #tpu.dot_dimension_numbers<[1], [0], [0], [1], [0, 0, 1, 1], [], []>} : vector<32x16xbf16>, vector<16x16xbf16>, vector<32x16xf32> -> vector<32x16xf32>
    %420 = arith.addf %411, %419 : vector<32x16xf32>
    %c5_305 = arith.constant 5 : index
    %c0_306 = arith.constant 0 : index
    %c0_307 = arith.constant 0 : index
    %421 = vector.load %arg4[%c5_305, %c0_306, %c0_307] : memref<9x1x16xbf16, #tpu.memory_space<vmem>>, vector<1x1x16xbf16>
    %422 = vector.shape_cast %421 : vector<1x1x16xbf16> to vector<1x16xbf16>
    %423 = vector.extract_strided_slice %376 {offsets = [0, 6], sizes = [16, 16], strides = [1, 1]} : vector<16x26xbf16> to vector<16x16xbf16>
    %424 = vector.broadcast %422 : vector<1x16xbf16> to vector<16x16xbf16>
    %425 = arith.mulf %423, %424 : vector<16x16xbf16>
    %c5_308 = arith.constant 5 : index
    %c0_309 = arith.constant 0 : index
    %c0_310 = arith.constant 0 : index
    %426 = vector.load %arg20[%c5_308, %c0_309, %c0_310] : memref<9x32x16xbf16, #tpu.memory_space<vmem>>, vector<1x32x16xbf16>
    %427 = vector.shape_cast %426 : vector<1x32x16xbf16> to vector<32x16xbf16>
    %cst_311 = arith.constant dense<0.000000e+00> : vector<32x16xf32>
    %428 = tpu.matmul %427, %425, %cst_311 {dimension_numbers = #tpu.dot_dimension_numbers<[1], [0], [0], [1], [0, 0, 1, 1], [], []>} : vector<32x16xbf16>, vector<16x16xbf16>, vector<32x16xf32> -> vector<32x16xf32>
    %429 = arith.addf %420, %428 : vector<32x16xf32>
    %c6_312 = arith.constant 6 : index
    %c0_313 = arith.constant 0 : index
    %c0_314 = arith.constant 0 : index
    %430 = vector.load %arg4[%c6_312, %c0_313, %c0_314] : memref<9x1x16xbf16, #tpu.memory_space<vmem>>, vector<1x1x16xbf16>
    %431 = vector.shape_cast %430 : vector<1x1x16xbf16> to vector<1x16xbf16>
    %432 = vector.extract_strided_slice %376 {offsets = [0, 8], sizes = [16, 16], strides = [1, 1]} : vector<16x26xbf16> to vector<16x16xbf16>
    %433 = vector.broadcast %431 : vector<1x16xbf16> to vector<16x16xbf16>
    %434 = arith.mulf %432, %433 : vector<16x16xbf16>
    %c6_315 = arith.constant 6 : index
    %c0_316 = arith.constant 0 : index
    %c0_317 = arith.constant 0 : index
    %435 = vector.load %arg20[%c6_315, %c0_316, %c0_317] : memref<9x32x16xbf16, #tpu.memory_space<vmem>>, vector<1x32x16xbf16>
    %436 = vector.shape_cast %435 : vector<1x32x16xbf16> to vector<32x16xbf16>
    %cst_318 = arith.constant dense<0.000000e+00> : vector<32x16xf32>
    %437 = tpu.matmul %436, %434, %cst_318 {dimension_numbers = #tpu.dot_dimension_numbers<[1], [0], [0], [1], [0, 0, 1, 1], [], []>} : vector<32x16xbf16>, vector<16x16xbf16>, vector<32x16xf32> -> vector<32x16xf32>
    %438 = arith.addf %429, %437 : vector<32x16xf32>
    %c7_319 = arith.constant 7 : index
    %c0_320 = arith.constant 0 : index
    %c0_321 = arith.constant 0 : index
    %439 = vector.load %arg4[%c7_319, %c0_320, %c0_321] : memref<9x1x16xbf16, #tpu.memory_space<vmem>>, vector<1x1x16xbf16>
    %440 = vector.shape_cast %439 : vector<1x1x16xbf16> to vector<1x16xbf16>
    %441 = vector.extract_strided_slice %376 {offsets = [0, 9], sizes = [16, 16], strides = [1, 1]} : vector<16x26xbf16> to vector<16x16xbf16>
    %442 = vector.broadcast %440 : vector<1x16xbf16> to vector<16x16xbf16>
    %443 = arith.mulf %441, %442 : vector<16x16xbf16>
    %c7_322 = arith.constant 7 : index
    %c0_323 = arith.constant 0 : index
    %c0_324 = arith.constant 0 : index
    %444 = vector.load %arg20[%c7_322, %c0_323, %c0_324] : memref<9x32x16xbf16, #tpu.memory_space<vmem>>, vector<1x32x16xbf16>
    %445 = vector.shape_cast %444 : vector<1x32x16xbf16> to vector<32x16xbf16>
    %cst_325 = arith.constant dense<0.000000e+00> : vector<32x16xf32>
    %446 = tpu.matmul %445, %443, %cst_325 {dimension_numbers = #tpu.dot_dimension_numbers<[1], [0], [0], [1], [0, 0, 1, 1], [], []>} : vector<32x16xbf16>, vector<16x16xbf16>, vector<32x16xf32> -> vector<32x16xf32>
    %447 = arith.addf %438, %446 : vector<32x16xf32>
    %c8_326 = arith.constant 8 : index
    %c0_327 = arith.constant 0 : index
    %c0_328 = arith.constant 0 : index
    %448 = vector.load %arg4[%c8_326, %c0_327, %c0_328] : memref<9x1x16xbf16, #tpu.memory_space<vmem>>, vector<1x1x16xbf16>
    %449 = vector.shape_cast %448 : vector<1x1x16xbf16> to vector<1x16xbf16>
    %450 = vector.extract_strided_slice %376 {offsets = [0, 10], sizes = [16, 16], strides = [1, 1]} : vector<16x26xbf16> to vector<16x16xbf16>
    %451 = vector.broadcast %449 : vector<1x16xbf16> to vector<16x16xbf16>
    %452 = arith.mulf %450, %451 : vector<16x16xbf16>
    %c8_329 = arith.constant 8 : index
    %c0_330 = arith.constant 0 : index
    %c0_331 = arith.constant 0 : index
    %453 = vector.load %arg20[%c8_329, %c0_330, %c0_331] : memref<9x32x16xbf16, #tpu.memory_space<vmem>>, vector<1x32x16xbf16>
    %454 = vector.shape_cast %453 : vector<1x32x16xbf16> to vector<32x16xbf16>
    %cst_332 = arith.constant dense<0.000000e+00> : vector<32x16xf32>
    %455 = tpu.matmul %454, %452, %cst_332 {dimension_numbers = #tpu.dot_dimension_numbers<[1], [0], [0], [1], [0, 0, 1, 1], [], []>} : vector<32x16xbf16>, vector<16x16xbf16>, vector<32x16xf32> -> vector<32x16xf32>
    %456 = arith.addf %447, %455 : vector<32x16xf32>
    %c0_333 = arith.constant 0 : index
    %c0_334 = arith.constant 0 : index
    %457 = vector.load %arg21[%c0_333, %c0_334] : memref<32x1xf32, #tpu.memory_space<vmem>>, vector<32x1xf32>
    %458 = vector.broadcast %457 : vector<32x1xf32> to vector<32x16xf32>
    %459 = arith.addf %456, %458 : vector<32x16xf32>
    %cst_335 = arith.constant 0.000000e+00 : f32
    %460 = vector.broadcast %cst_335 : f32 to vector<32x16xf32>
    %461 = arith.maximumf %459, %460 : vector<32x16xf32>
    %462 = arith.truncf %461 : vector<32x16xf32> to vector<32x16xbf16>
    %cst_336 = arith.constant 0.000000e+00 : bf16
    %463 = vector.broadcast %cst_336 : bf16 to vector<32x5xbf16>
    %464 = tpu.concatenate %463, %462, %463 in 1 : vector<32x5xbf16>, vector<32x16xbf16>, vector<32x5xbf16> -> vector<32x26xbf16>
    %c0_337 = arith.constant 0 : index
    %c0_338 = arith.constant 0 : index
    %c0_339 = arith.constant 0 : index
    %465 = vector.load %arg4[%c0_337, %c0_338, %c0_339] : memref<9x1x16xbf16, #tpu.memory_space<vmem>>, vector<1x1x16xbf16>
    %466 = vector.shape_cast %465 : vector<1x1x16xbf16> to vector<1x16xbf16>
    %467 = vector.extract_strided_slice %464 {offsets = [0, 0], sizes = [32, 16], strides = [1, 1]} : vector<32x26xbf16> to vector<32x16xbf16>
    %468 = vector.broadcast %466 : vector<1x16xbf16> to vector<32x16xbf16>
    %469 = arith.mulf %467, %468 : vector<32x16xbf16>
    %c0_340 = arith.constant 0 : index
    %c0_341 = arith.constant 0 : index
    %c0_342 = arith.constant 0 : index
    %470 = vector.load %arg22[%c0_340, %c0_341, %c0_342] : memref<9x32x32xbf16, #tpu.memory_space<vmem>>, vector<1x32x32xbf16>
    %471 = vector.shape_cast %470 : vector<1x32x32xbf16> to vector<32x32xbf16>
    %cst_343 = arith.constant dense<0.000000e+00> : vector<32x16xf32>
    %472 = tpu.matmul %471, %469, %cst_343 {dimension_numbers = #tpu.dot_dimension_numbers<[1], [0], [0], [1], [0, 0, 1, 1], [], []>} : vector<32x32xbf16>, vector<32x16xbf16>, vector<32x16xf32> -> vector<32x16xf32>
    %c1_344 = arith.constant 1 : index
    %c0_345 = arith.constant 0 : index
    %c0_346 = arith.constant 0 : index
    %473 = vector.load %arg4[%c1_344, %c0_345, %c0_346] : memref<9x1x16xbf16, #tpu.memory_space<vmem>>, vector<1x1x16xbf16>
    %474 = vector.shape_cast %473 : vector<1x1x16xbf16> to vector<1x16xbf16>
    %475 = vector.extract_strided_slice %464 {offsets = [0, 1], sizes = [32, 16], strides = [1, 1]} : vector<32x26xbf16> to vector<32x16xbf16>
    %476 = vector.broadcast %474 : vector<1x16xbf16> to vector<32x16xbf16>
    %477 = arith.mulf %475, %476 : vector<32x16xbf16>
    %c1_347 = arith.constant 1 : index
    %c0_348 = arith.constant 0 : index
    %c0_349 = arith.constant 0 : index
    %478 = vector.load %arg22[%c1_347, %c0_348, %c0_349] : memref<9x32x32xbf16, #tpu.memory_space<vmem>>, vector<1x32x32xbf16>
    %479 = vector.shape_cast %478 : vector<1x32x32xbf16> to vector<32x32xbf16>
    %cst_350 = arith.constant dense<0.000000e+00> : vector<32x16xf32>
    %480 = tpu.matmul %479, %477, %cst_350 {dimension_numbers = #tpu.dot_dimension_numbers<[1], [0], [0], [1], [0, 0, 1, 1], [], []>} : vector<32x32xbf16>, vector<32x16xbf16>, vector<32x16xf32> -> vector<32x16xf32>
    %481 = arith.addf %472, %480 : vector<32x16xf32>
    %c2_351 = arith.constant 2 : index
    %c0_352 = arith.constant 0 : index
    %c0_353 = arith.constant 0 : index
    %482 = vector.load %arg4[%c2_351, %c0_352, %c0_353] : memref<9x1x16xbf16, #tpu.memory_space<vmem>>, vector<1x1x16xbf16>
    %483 = vector.shape_cast %482 : vector<1x1x16xbf16> to vector<1x16xbf16>
    %484 = vector.extract_strided_slice %464 {offsets = [0, 2], sizes = [32, 16], strides = [1, 1]} : vector<32x26xbf16> to vector<32x16xbf16>
    %485 = vector.broadcast %483 : vector<1x16xbf16> to vector<32x16xbf16>
    %486 = arith.mulf %484, %485 : vector<32x16xbf16>
    %c2_354 = arith.constant 2 : index
    %c0_355 = arith.constant 0 : index
    %c0_356 = arith.constant 0 : index
    %487 = vector.load %arg22[%c2_354, %c0_355, %c0_356] : memref<9x32x32xbf16, #tpu.memory_space<vmem>>, vector<1x32x32xbf16>
    %488 = vector.shape_cast %487 : vector<1x32x32xbf16> to vector<32x32xbf16>
    %cst_357 = arith.constant dense<0.000000e+00> : vector<32x16xf32>
    %489 = tpu.matmul %488, %486, %cst_357 {dimension_numbers = #tpu.dot_dimension_numbers<[1], [0], [0], [1], [0, 0, 1, 1], [], []>} : vector<32x32xbf16>, vector<32x16xbf16>, vector<32x16xf32> -> vector<32x16xf32>
    %490 = arith.addf %481, %489 : vector<32x16xf32>
    %c3_358 = arith.constant 3 : index
    %c0_359 = arith.constant 0 : index
    %c0_360 = arith.constant 0 : index
    %491 = vector.load %arg4[%c3_358, %c0_359, %c0_360] : memref<9x1x16xbf16, #tpu.memory_space<vmem>>, vector<1x1x16xbf16>
    %492 = vector.shape_cast %491 : vector<1x1x16xbf16> to vector<1x16xbf16>
    %493 = vector.extract_strided_slice %464 {offsets = [0, 4], sizes = [32, 16], strides = [1, 1]} : vector<32x26xbf16> to vector<32x16xbf16>
    %494 = vector.broadcast %492 : vector<1x16xbf16> to vector<32x16xbf16>
    %495 = arith.mulf %493, %494 : vector<32x16xbf16>
    %c3_361 = arith.constant 3 : index
    %c0_362 = arith.constant 0 : index
    %c0_363 = arith.constant 0 : index
    %496 = vector.load %arg22[%c3_361, %c0_362, %c0_363] : memref<9x32x32xbf16, #tpu.memory_space<vmem>>, vector<1x32x32xbf16>
    %497 = vector.shape_cast %496 : vector<1x32x32xbf16> to vector<32x32xbf16>
    %cst_364 = arith.constant dense<0.000000e+00> : vector<32x16xf32>
    %498 = tpu.matmul %497, %495, %cst_364 {dimension_numbers = #tpu.dot_dimension_numbers<[1], [0], [0], [1], [0, 0, 1, 1], [], []>} : vector<32x32xbf16>, vector<32x16xbf16>, vector<32x16xf32> -> vector<32x16xf32>
    %499 = arith.addf %490, %498 : vector<32x16xf32>
    %c4_365 = arith.constant 4 : index
    %c0_366 = arith.constant 0 : index
    %c0_367 = arith.constant 0 : index
    %500 = vector.load %arg4[%c4_365, %c0_366, %c0_367] : memref<9x1x16xbf16, #tpu.memory_space<vmem>>, vector<1x1x16xbf16>
    %501 = vector.shape_cast %500 : vector<1x1x16xbf16> to vector<1x16xbf16>
    %502 = vector.extract_strided_slice %464 {offsets = [0, 5], sizes = [32, 16], strides = [1, 1]} : vector<32x26xbf16> to vector<32x16xbf16>
    %503 = vector.broadcast %501 : vector<1x16xbf16> to vector<32x16xbf16>
    %504 = arith.mulf %502, %503 : vector<32x16xbf16>
    %c4_368 = arith.constant 4 : index
    %c0_369 = arith.constant 0 : index
    %c0_370 = arith.constant 0 : index
    %505 = vector.load %arg22[%c4_368, %c0_369, %c0_370] : memref<9x32x32xbf16, #tpu.memory_space<vmem>>, vector<1x32x32xbf16>
    %506 = vector.shape_cast %505 : vector<1x32x32xbf16> to vector<32x32xbf16>
    %cst_371 = arith.constant dense<0.000000e+00> : vector<32x16xf32>
    %507 = tpu.matmul %506, %504, %cst_371 {dimension_numbers = #tpu.dot_dimension_numbers<[1], [0], [0], [1], [0, 0, 1, 1], [], []>} : vector<32x32xbf16>, vector<32x16xbf16>, vector<32x16xf32> -> vector<32x16xf32>
    %508 = arith.addf %499, %507 : vector<32x16xf32>
    %c5_372 = arith.constant 5 : index
    %c0_373 = arith.constant 0 : index
    %c0_374 = arith.constant 0 : index
    %509 = vector.load %arg4[%c5_372, %c0_373, %c0_374] : memref<9x1x16xbf16, #tpu.memory_space<vmem>>, vector<1x1x16xbf16>
    %510 = vector.shape_cast %509 : vector<1x1x16xbf16> to vector<1x16xbf16>
    %511 = vector.extract_strided_slice %464 {offsets = [0, 6], sizes = [32, 16], strides = [1, 1]} : vector<32x26xbf16> to vector<32x16xbf16>
    %512 = vector.broadcast %510 : vector<1x16xbf16> to vector<32x16xbf16>
    %513 = arith.mulf %511, %512 : vector<32x16xbf16>
    %c5_375 = arith.constant 5 : index
    %c0_376 = arith.constant 0 : index
    %c0_377 = arith.constant 0 : index
    %514 = vector.load %arg22[%c5_375, %c0_376, %c0_377] : memref<9x32x32xbf16, #tpu.memory_space<vmem>>, vector<1x32x32xbf16>
    %515 = vector.shape_cast %514 : vector<1x32x32xbf16> to vector<32x32xbf16>
    %cst_378 = arith.constant dense<0.000000e+00> : vector<32x16xf32>
    %516 = tpu.matmul %515, %513, %cst_378 {dimension_numbers = #tpu.dot_dimension_numbers<[1], [0], [0], [1], [0, 0, 1, 1], [], []>} : vector<32x32xbf16>, vector<32x16xbf16>, vector<32x16xf32> -> vector<32x16xf32>
    %517 = arith.addf %508, %516 : vector<32x16xf32>
    %c6_379 = arith.constant 6 : index
    %c0_380 = arith.constant 0 : index
    %c0_381 = arith.constant 0 : index
    %518 = vector.load %arg4[%c6_379, %c0_380, %c0_381] : memref<9x1x16xbf16, #tpu.memory_space<vmem>>, vector<1x1x16xbf16>
    %519 = vector.shape_cast %518 : vector<1x1x16xbf16> to vector<1x16xbf16>
    %520 = vector.extract_strided_slice %464 {offsets = [0, 8], sizes = [32, 16], strides = [1, 1]} : vector<32x26xbf16> to vector<32x16xbf16>
    %521 = vector.broadcast %519 : vector<1x16xbf16> to vector<32x16xbf16>
    %522 = arith.mulf %520, %521 : vector<32x16xbf16>
    %c6_382 = arith.constant 6 : index
    %c0_383 = arith.constant 0 : index
    %c0_384 = arith.constant 0 : index
    %523 = vector.load %arg22[%c6_382, %c0_383, %c0_384] : memref<9x32x32xbf16, #tpu.memory_space<vmem>>, vector<1x32x32xbf16>
    %524 = vector.shape_cast %523 : vector<1x32x32xbf16> to vector<32x32xbf16>
    %cst_385 = arith.constant dense<0.000000e+00> : vector<32x16xf32>
    %525 = tpu.matmul %524, %522, %cst_385 {dimension_numbers = #tpu.dot_dimension_numbers<[1], [0], [0], [1], [0, 0, 1, 1], [], []>} : vector<32x32xbf16>, vector<32x16xbf16>, vector<32x16xf32> -> vector<32x16xf32>
    %526 = arith.addf %517, %525 : vector<32x16xf32>
    %c7_386 = arith.constant 7 : index
    %c0_387 = arith.constant 0 : index
    %c0_388 = arith.constant 0 : index
    %527 = vector.load %arg4[%c7_386, %c0_387, %c0_388] : memref<9x1x16xbf16, #tpu.memory_space<vmem>>, vector<1x1x16xbf16>
    %528 = vector.shape_cast %527 : vector<1x1x16xbf16> to vector<1x16xbf16>
    %529 = vector.extract_strided_slice %464 {offsets = [0, 9], sizes = [32, 16], strides = [1, 1]} : vector<32x26xbf16> to vector<32x16xbf16>
    %530 = vector.broadcast %528 : vector<1x16xbf16> to vector<32x16xbf16>
    %531 = arith.mulf %529, %530 : vector<32x16xbf16>
    %c7_389 = arith.constant 7 : index
    %c0_390 = arith.constant 0 : index
    %c0_391 = arith.constant 0 : index
    %532 = vector.load %arg22[%c7_389, %c0_390, %c0_391] : memref<9x32x32xbf16, #tpu.memory_space<vmem>>, vector<1x32x32xbf16>
    %533 = vector.shape_cast %532 : vector<1x32x32xbf16> to vector<32x32xbf16>
    %cst_392 = arith.constant dense<0.000000e+00> : vector<32x16xf32>
    %534 = tpu.matmul %533, %531, %cst_392 {dimension_numbers = #tpu.dot_dimension_numbers<[1], [0], [0], [1], [0, 0, 1, 1], [], []>} : vector<32x32xbf16>, vector<32x16xbf16>, vector<32x16xf32> -> vector<32x16xf32>
    %535 = arith.addf %526, %534 : vector<32x16xf32>
    %c8_393 = arith.constant 8 : index
    %c0_394 = arith.constant 0 : index
    %c0_395 = arith.constant 0 : index
    %536 = vector.load %arg4[%c8_393, %c0_394, %c0_395] : memref<9x1x16xbf16, #tpu.memory_space<vmem>>, vector<1x1x16xbf16>
    %537 = vector.shape_cast %536 : vector<1x1x16xbf16> to vector<1x16xbf16>
    %538 = vector.extract_strided_slice %464 {offsets = [0, 10], sizes = [32, 16], strides = [1, 1]} : vector<32x26xbf16> to vector<32x16xbf16>
    %539 = vector.broadcast %537 : vector<1x16xbf16> to vector<32x16xbf16>
    %540 = arith.mulf %538, %539 : vector<32x16xbf16>
    %c8_396 = arith.constant 8 : index
    %c0_397 = arith.constant 0 : index
    %c0_398 = arith.constant 0 : index
    %541 = vector.load %arg22[%c8_396, %c0_397, %c0_398] : memref<9x32x32xbf16, #tpu.memory_space<vmem>>, vector<1x32x32xbf16>
    %542 = vector.shape_cast %541 : vector<1x32x32xbf16> to vector<32x32xbf16>
    %cst_399 = arith.constant dense<0.000000e+00> : vector<32x16xf32>
    %543 = tpu.matmul %542, %540, %cst_399 {dimension_numbers = #tpu.dot_dimension_numbers<[1], [0], [0], [1], [0, 0, 1, 1], [], []>} : vector<32x32xbf16>, vector<32x16xbf16>, vector<32x16xf32> -> vector<32x16xf32>
    %544 = arith.addf %535, %543 : vector<32x16xf32>
    %c0_400 = arith.constant 0 : index
    %c0_401 = arith.constant 0 : index
    %545 = vector.load %arg23[%c0_400, %c0_401] : memref<32x1xf32, #tpu.memory_space<vmem>>, vector<32x1xf32>
    %546 = vector.broadcast %545 : vector<32x1xf32> to vector<32x16xf32>
    %547 = arith.addf %544, %546 : vector<32x16xf32>
    %cst_402 = arith.constant 0.000000e+00 : f32
    %548 = vector.broadcast %cst_402 : f32 to vector<32x16xf32>
    %549 = arith.maximumf %547, %548 : vector<32x16xf32>
    %550 = arith.truncf %549 : vector<32x16xf32> to vector<32x16xbf16>
    %cst_403 = arith.constant 0.000000e+00 : bf16
    %551 = vector.broadcast %cst_403 : bf16 to vector<32x4xbf16>
    %552 = tpu.concatenate %550, %551 in 1 : vector<32x16xbf16>, vector<32x4xbf16> -> vector<32x20xbf16>
    %553 = vector.extract_strided_slice %552 {offsets = [0, 1], sizes = [32, 16], strides = [1, 1]} : vector<32x20xbf16> to vector<32x16xbf16>
    %554 = arith.maximumf %550, %553 : vector<32x16xbf16>
    %555 = tpu.concatenate %554, %551 in 1 : vector<32x16xbf16>, vector<32x4xbf16> -> vector<32x20xbf16>
    %556 = vector.extract_strided_slice %555 {offsets = [0, 4], sizes = [32, 16], strides = [1, 1]} : vector<32x20xbf16> to vector<32x16xbf16>
    %557 = arith.maximumf %554, %556 : vector<32x16xbf16>
    %c0_404 = arith.constant 0 : index
    %c0_405 = arith.constant 0 : index
    %558 = vector.load %arg8[%c0_404, %c0_405] : memref<16x4xbf16, #tpu.memory_space<vmem>>, vector<16x4xbf16>
    %cst_406 = arith.constant dense<0.000000e+00> : vector<32x4xf32>
    %559 = tpu.matmul %557, %558, %cst_406 {dimension_numbers = #tpu.dot_dimension_numbers<[1], [0], [0], [1], [0, 0, 1, 1], [], []>} : vector<32x16xbf16>, vector<16x4xbf16>, vector<32x4xf32> -> vector<32x4xf32>
    %560 = arith.truncf %559 : vector<32x4xf32> to vector<32x4xbf16>
    %cst_407 = arith.constant 0.000000e+00 : bf16
    %561 = vector.broadcast %cst_407 : bf16 to vector<32x3xbf16>
    %562 = tpu.concatenate %561, %560, %561 in 1 : vector<32x3xbf16>, vector<32x4xbf16>, vector<32x3xbf16> -> vector<32x10xbf16>
    %c0_408 = arith.constant 0 : index
    %c0_409 = arith.constant 0 : index
    %c0_410 = arith.constant 0 : index
    %563 = vector.load %arg5[%c0_408, %c0_409, %c0_410] : memref<9x1x4xbf16, #tpu.memory_space<vmem>>, vector<1x1x4xbf16>
    %564 = vector.shape_cast %563 : vector<1x1x4xbf16> to vector<1x4xbf16>
    %565 = vector.extract_strided_slice %562 {offsets = [0, 0], sizes = [32, 4], strides = [1, 1]} : vector<32x10xbf16> to vector<32x4xbf16>
    %566 = vector.broadcast %564 : vector<1x4xbf16> to vector<32x4xbf16>
    %567 = arith.mulf %565, %566 : vector<32x4xbf16>
    %c0_411 = arith.constant 0 : index
    %c0_412 = arith.constant 0 : index
    %c0_413 = arith.constant 0 : index
    %568 = vector.load %arg24[%c0_411, %c0_412, %c0_413] : memref<9x32x32xbf16, #tpu.memory_space<vmem>>, vector<1x32x32xbf16>
    %569 = vector.shape_cast %568 : vector<1x32x32xbf16> to vector<32x32xbf16>
    %cst_414 = arith.constant dense<0.000000e+00> : vector<32x4xf32>
    %570 = tpu.matmul %569, %567, %cst_414 {dimension_numbers = #tpu.dot_dimension_numbers<[1], [0], [0], [1], [0, 0, 1, 1], [], []>} : vector<32x32xbf16>, vector<32x4xbf16>, vector<32x4xf32> -> vector<32x4xf32>
    %c1_415 = arith.constant 1 : index
    %c0_416 = arith.constant 0 : index
    %c0_417 = arith.constant 0 : index
    %571 = vector.load %arg5[%c1_415, %c0_416, %c0_417] : memref<9x1x4xbf16, #tpu.memory_space<vmem>>, vector<1x1x4xbf16>
    %572 = vector.shape_cast %571 : vector<1x1x4xbf16> to vector<1x4xbf16>
    %573 = vector.extract_strided_slice %562 {offsets = [0, 1], sizes = [32, 4], strides = [1, 1]} : vector<32x10xbf16> to vector<32x4xbf16>
    %574 = vector.broadcast %572 : vector<1x4xbf16> to vector<32x4xbf16>
    %575 = arith.mulf %573, %574 : vector<32x4xbf16>
    %c1_418 = arith.constant 1 : index
    %c0_419 = arith.constant 0 : index
    %c0_420 = arith.constant 0 : index
    %576 = vector.load %arg24[%c1_418, %c0_419, %c0_420] : memref<9x32x32xbf16, #tpu.memory_space<vmem>>, vector<1x32x32xbf16>
    %577 = vector.shape_cast %576 : vector<1x32x32xbf16> to vector<32x32xbf16>
    %cst_421 = arith.constant dense<0.000000e+00> : vector<32x4xf32>
    %578 = tpu.matmul %577, %575, %cst_421 {dimension_numbers = #tpu.dot_dimension_numbers<[1], [0], [0], [1], [0, 0, 1, 1], [], []>} : vector<32x32xbf16>, vector<32x4xbf16>, vector<32x4xf32> -> vector<32x4xf32>
    %579 = arith.addf %570, %578 : vector<32x4xf32>
    %c2_422 = arith.constant 2 : index
    %c0_423 = arith.constant 0 : index
    %c0_424 = arith.constant 0 : index
    %580 = vector.load %arg5[%c2_422, %c0_423, %c0_424] : memref<9x1x4xbf16, #tpu.memory_space<vmem>>, vector<1x1x4xbf16>
    %581 = vector.shape_cast %580 : vector<1x1x4xbf16> to vector<1x4xbf16>
    %582 = vector.extract_strided_slice %562 {offsets = [0, 2], sizes = [32, 4], strides = [1, 1]} : vector<32x10xbf16> to vector<32x4xbf16>
    %583 = vector.broadcast %581 : vector<1x4xbf16> to vector<32x4xbf16>
    %584 = arith.mulf %582, %583 : vector<32x4xbf16>
    %c2_425 = arith.constant 2 : index
    %c0_426 = arith.constant 0 : index
    %c0_427 = arith.constant 0 : index
    %585 = vector.load %arg24[%c2_425, %c0_426, %c0_427] : memref<9x32x32xbf16, #tpu.memory_space<vmem>>, vector<1x32x32xbf16>
    %586 = vector.shape_cast %585 : vector<1x32x32xbf16> to vector<32x32xbf16>
    %cst_428 = arith.constant dense<0.000000e+00> : vector<32x4xf32>
    %587 = tpu.matmul %586, %584, %cst_428 {dimension_numbers = #tpu.dot_dimension_numbers<[1], [0], [0], [1], [0, 0, 1, 1], [], []>} : vector<32x32xbf16>, vector<32x4xbf16>, vector<32x4xf32> -> vector<32x4xf32>
    %588 = arith.addf %579, %587 : vector<32x4xf32>
    %c3_429 = arith.constant 3 : index
    %c0_430 = arith.constant 0 : index
    %c0_431 = arith.constant 0 : index
    %589 = vector.load %arg5[%c3_429, %c0_430, %c0_431] : memref<9x1x4xbf16, #tpu.memory_space<vmem>>, vector<1x1x4xbf16>
    %590 = vector.shape_cast %589 : vector<1x1x4xbf16> to vector<1x4xbf16>
    %591 = vector.extract_strided_slice %562 {offsets = [0, 2], sizes = [32, 4], strides = [1, 1]} : vector<32x10xbf16> to vector<32x4xbf16>
    %592 = vector.broadcast %590 : vector<1x4xbf16> to vector<32x4xbf16>
    %593 = arith.mulf %591, %592 : vector<32x4xbf16>
    %c3_432 = arith.constant 3 : index
    %c0_433 = arith.constant 0 : index
    %c0_434 = arith.constant 0 : index
    %594 = vector.load %arg24[%c3_432, %c0_433, %c0_434] : memref<9x32x32xbf16, #tpu.memory_space<vmem>>, vector<1x32x32xbf16>
    %595 = vector.shape_cast %594 : vector<1x32x32xbf16> to vector<32x32xbf16>
    %cst_435 = arith.constant dense<0.000000e+00> : vector<32x4xf32>
    %596 = tpu.matmul %595, %593, %cst_435 {dimension_numbers = #tpu.dot_dimension_numbers<[1], [0], [0], [1], [0, 0, 1, 1], [], []>} : vector<32x32xbf16>, vector<32x4xbf16>, vector<32x4xf32> -> vector<32x4xf32>
    %597 = arith.addf %588, %596 : vector<32x4xf32>
    %c4_436 = arith.constant 4 : index
    %c0_437 = arith.constant 0 : index
    %c0_438 = arith.constant 0 : index
    %598 = vector.load %arg5[%c4_436, %c0_437, %c0_438] : memref<9x1x4xbf16, #tpu.memory_space<vmem>>, vector<1x1x4xbf16>
    %599 = vector.shape_cast %598 : vector<1x1x4xbf16> to vector<1x4xbf16>
    %600 = vector.extract_strided_slice %562 {offsets = [0, 3], sizes = [32, 4], strides = [1, 1]} : vector<32x10xbf16> to vector<32x4xbf16>
    %601 = vector.broadcast %599 : vector<1x4xbf16> to vector<32x4xbf16>
    %602 = arith.mulf %600, %601 : vector<32x4xbf16>
    %c4_439 = arith.constant 4 : index
    %c0_440 = arith.constant 0 : index
    %c0_441 = arith.constant 0 : index
    %603 = vector.load %arg24[%c4_439, %c0_440, %c0_441] : memref<9x32x32xbf16, #tpu.memory_space<vmem>>, vector<1x32x32xbf16>
    %604 = vector.shape_cast %603 : vector<1x32x32xbf16> to vector<32x32xbf16>
    %cst_442 = arith.constant dense<0.000000e+00> : vector<32x4xf32>
    %605 = tpu.matmul %604, %602, %cst_442 {dimension_numbers = #tpu.dot_dimension_numbers<[1], [0], [0], [1], [0, 0, 1, 1], [], []>} : vector<32x32xbf16>, vector<32x4xbf16>, vector<32x4xf32> -> vector<32x4xf32>
    %606 = arith.addf %597, %605 : vector<32x4xf32>
    %c5_443 = arith.constant 5 : index
    %c0_444 = arith.constant 0 : index
    %c0_445 = arith.constant 0 : index
    %607 = vector.load %arg5[%c5_443, %c0_444, %c0_445] : memref<9x1x4xbf16, #tpu.memory_space<vmem>>, vector<1x1x4xbf16>
    %608 = vector.shape_cast %607 : vector<1x1x4xbf16> to vector<1x4xbf16>
    %609 = vector.extract_strided_slice %562 {offsets = [0, 4], sizes = [32, 4], strides = [1, 1]} : vector<32x10xbf16> to vector<32x4xbf16>
    %610 = vector.broadcast %608 : vector<1x4xbf16> to vector<32x4xbf16>
    %611 = arith.mulf %609, %610 : vector<32x4xbf16>
    %c5_446 = arith.constant 5 : index
    %c0_447 = arith.constant 0 : index
    %c0_448 = arith.constant 0 : index
    %612 = vector.load %arg24[%c5_446, %c0_447, %c0_448] : memref<9x32x32xbf16, #tpu.memory_space<vmem>>, vector<1x32x32xbf16>
    %613 = vector.shape_cast %612 : vector<1x32x32xbf16> to vector<32x32xbf16>
    %cst_449 = arith.constant dense<0.000000e+00> : vector<32x4xf32>
    %614 = tpu.matmul %613, %611, %cst_449 {dimension_numbers = #tpu.dot_dimension_numbers<[1], [0], [0], [1], [0, 0, 1, 1], [], []>} : vector<32x32xbf16>, vector<32x4xbf16>, vector<32x4xf32> -> vector<32x4xf32>
    %615 = arith.addf %606, %614 : vector<32x4xf32>
    %c6_450 = arith.constant 6 : index
    %c0_451 = arith.constant 0 : index
    %c0_452 = arith.constant 0 : index
    %616 = vector.load %arg5[%c6_450, %c0_451, %c0_452] : memref<9x1x4xbf16, #tpu.memory_space<vmem>>, vector<1x1x4xbf16>
    %617 = vector.shape_cast %616 : vector<1x1x4xbf16> to vector<1x4xbf16>
    %618 = vector.extract_strided_slice %562 {offsets = [0, 4], sizes = [32, 4], strides = [1, 1]} : vector<32x10xbf16> to vector<32x4xbf16>
    %619 = vector.broadcast %617 : vector<1x4xbf16> to vector<32x4xbf16>
    %620 = arith.mulf %618, %619 : vector<32x4xbf16>
    %c6_453 = arith.constant 6 : index
    %c0_454 = arith.constant 0 : index
    %c0_455 = arith.constant 0 : index
    %621 = vector.load %arg24[%c6_453, %c0_454, %c0_455] : memref<9x32x32xbf16, #tpu.memory_space<vmem>>, vector<1x32x32xbf16>
    %622 = vector.shape_cast %621 : vector<1x32x32xbf16> to vector<32x32xbf16>
    %cst_456 = arith.constant dense<0.000000e+00> : vector<32x4xf32>
    %623 = tpu.matmul %622, %620, %cst_456 {dimension_numbers = #tpu.dot_dimension_numbers<[1], [0], [0], [1], [0, 0, 1, 1], [], []>} : vector<32x32xbf16>, vector<32x4xbf16>, vector<32x4xf32> -> vector<32x4xf32>
    %624 = arith.addf %615, %623 : vector<32x4xf32>
    %c7_457 = arith.constant 7 : index
    %c0_458 = arith.constant 0 : index
    %c0_459 = arith.constant 0 : index
    %625 = vector.load %arg5[%c7_457, %c0_458, %c0_459] : memref<9x1x4xbf16, #tpu.memory_space<vmem>>, vector<1x1x4xbf16>
    %626 = vector.shape_cast %625 : vector<1x1x4xbf16> to vector<1x4xbf16>
    %627 = vector.extract_strided_slice %562 {offsets = [0, 5], sizes = [32, 4], strides = [1, 1]} : vector<32x10xbf16> to vector<32x4xbf16>
    %628 = vector.broadcast %626 : vector<1x4xbf16> to vector<32x4xbf16>
    %629 = arith.mulf %627, %628 : vector<32x4xbf16>
    %c7_460 = arith.constant 7 : index
    %c0_461 = arith.constant 0 : index
    %c0_462 = arith.constant 0 : index
    %630 = vector.load %arg24[%c7_460, %c0_461, %c0_462] : memref<9x32x32xbf16, #tpu.memory_space<vmem>>, vector<1x32x32xbf16>
    %631 = vector.shape_cast %630 : vector<1x32x32xbf16> to vector<32x32xbf16>
    %cst_463 = arith.constant dense<0.000000e+00> : vector<32x4xf32>
    %632 = tpu.matmul %631, %629, %cst_463 {dimension_numbers = #tpu.dot_dimension_numbers<[1], [0], [0], [1], [0, 0, 1, 1], [], []>} : vector<32x32xbf16>, vector<32x4xbf16>, vector<32x4xf32> -> vector<32x4xf32>
    %633 = arith.addf %624, %632 : vector<32x4xf32>
    %c8_464 = arith.constant 8 : index
    %c0_465 = arith.constant 0 : index
    %c0_466 = arith.constant 0 : index
    %634 = vector.load %arg5[%c8_464, %c0_465, %c0_466] : memref<9x1x4xbf16, #tpu.memory_space<vmem>>, vector<1x1x4xbf16>
    %635 = vector.shape_cast %634 : vector<1x1x4xbf16> to vector<1x4xbf16>
    %636 = vector.extract_strided_slice %562 {offsets = [0, 6], sizes = [32, 4], strides = [1, 1]} : vector<32x10xbf16> to vector<32x4xbf16>
    %637 = vector.broadcast %635 : vector<1x4xbf16> to vector<32x4xbf16>
    %638 = arith.mulf %636, %637 : vector<32x4xbf16>
    %c8_467 = arith.constant 8 : index
    %c0_468 = arith.constant 0 : index
    %c0_469 = arith.constant 0 : index
    %639 = vector.load %arg24[%c8_467, %c0_468, %c0_469] : memref<9x32x32xbf16, #tpu.memory_space<vmem>>, vector<1x32x32xbf16>
    %640 = vector.shape_cast %639 : vector<1x32x32xbf16> to vector<32x32xbf16>
    %cst_470 = arith.constant dense<0.000000e+00> : vector<32x4xf32>
    %641 = tpu.matmul %640, %638, %cst_470 {dimension_numbers = #tpu.dot_dimension_numbers<[1], [0], [0], [1], [0, 0, 1, 1], [], []>} : vector<32x32xbf16>, vector<32x4xbf16>, vector<32x4xf32> -> vector<32x4xf32>
    %642 = arith.addf %633, %641 : vector<32x4xf32>
    %c0_471 = arith.constant 0 : index
    %c0_472 = arith.constant 0 : index
    %643 = vector.load %arg25[%c0_471, %c0_472] : memref<32x1xf32, #tpu.memory_space<vmem>>, vector<32x1xf32>
    %644 = vector.broadcast %643 : vector<32x1xf32> to vector<32x4xf32>
    %645 = arith.addf %642, %644 : vector<32x4xf32>
    %cst_473 = arith.constant 0.000000e+00 : f32
    %646 = vector.broadcast %cst_473 : f32 to vector<32x4xf32>
    %647 = arith.maximumf %645, %646 : vector<32x4xf32>
    %648 = arith.truncf %647 : vector<32x4xf32> to vector<32x4xbf16>
    %cst_474 = arith.constant 0.000000e+00 : bf16
    %649 = vector.broadcast %cst_474 : bf16 to vector<32x3xbf16>
    %650 = tpu.concatenate %649, %648, %649 in 1 : vector<32x3xbf16>, vector<32x4xbf16>, vector<32x3xbf16> -> vector<32x10xbf16>
    %c0_475 = arith.constant 0 : index
    %c0_476 = arith.constant 0 : index
    %c0_477 = arith.constant 0 : index
    %651 = vector.load %arg5[%c0_475, %c0_476, %c0_477] : memref<9x1x4xbf16, #tpu.memory_space<vmem>>, vector<1x1x4xbf16>
    %652 = vector.shape_cast %651 : vector<1x1x4xbf16> to vector<1x4xbf16>
    %653 = vector.extract_strided_slice %650 {offsets = [0, 0], sizes = [32, 4], strides = [1, 1]} : vector<32x10xbf16> to vector<32x4xbf16>
    %654 = vector.broadcast %652 : vector<1x4xbf16> to vector<32x4xbf16>
    %655 = arith.mulf %653, %654 : vector<32x4xbf16>
    %c0_478 = arith.constant 0 : index
    %c0_479 = arith.constant 0 : index
    %c0_480 = arith.constant 0 : index
    %656 = vector.load %arg26[%c0_478, %c0_479, %c0_480] : memref<9x32x32xbf16, #tpu.memory_space<vmem>>, vector<1x32x32xbf16>
    %657 = vector.shape_cast %656 : vector<1x32x32xbf16> to vector<32x32xbf16>
    %cst_481 = arith.constant dense<0.000000e+00> : vector<32x4xf32>
    %658 = tpu.matmul %657, %655, %cst_481 {dimension_numbers = #tpu.dot_dimension_numbers<[1], [0], [0], [1], [0, 0, 1, 1], [], []>} : vector<32x32xbf16>, vector<32x4xbf16>, vector<32x4xf32> -> vector<32x4xf32>
    %c1_482 = arith.constant 1 : index
    %c0_483 = arith.constant 0 : index
    %c0_484 = arith.constant 0 : index
    %659 = vector.load %arg5[%c1_482, %c0_483, %c0_484] : memref<9x1x4xbf16, #tpu.memory_space<vmem>>, vector<1x1x4xbf16>
    %660 = vector.shape_cast %659 : vector<1x1x4xbf16> to vector<1x4xbf16>
    %661 = vector.extract_strided_slice %650 {offsets = [0, 1], sizes = [32, 4], strides = [1, 1]} : vector<32x10xbf16> to vector<32x4xbf16>
    %662 = vector.broadcast %660 : vector<1x4xbf16> to vector<32x4xbf16>
    %663 = arith.mulf %661, %662 : vector<32x4xbf16>
    %c1_485 = arith.constant 1 : index
    %c0_486 = arith.constant 0 : index
    %c0_487 = arith.constant 0 : index
    %664 = vector.load %arg26[%c1_485, %c0_486, %c0_487] : memref<9x32x32xbf16, #tpu.memory_space<vmem>>, vector<1x32x32xbf16>
    %665 = vector.shape_cast %664 : vector<1x32x32xbf16> to vector<32x32xbf16>
    %cst_488 = arith.constant dense<0.000000e+00> : vector<32x4xf32>
    %666 = tpu.matmul %665, %663, %cst_488 {dimension_numbers = #tpu.dot_dimension_numbers<[1], [0], [0], [1], [0, 0, 1, 1], [], []>} : vector<32x32xbf16>, vector<32x4xbf16>, vector<32x4xf32> -> vector<32x4xf32>
    %667 = arith.addf %658, %666 : vector<32x4xf32>
    %c2_489 = arith.constant 2 : index
    %c0_490 = arith.constant 0 : index
    %c0_491 = arith.constant 0 : index
    %668 = vector.load %arg5[%c2_489, %c0_490, %c0_491] : memref<9x1x4xbf16, #tpu.memory_space<vmem>>, vector<1x1x4xbf16>
    %669 = vector.shape_cast %668 : vector<1x1x4xbf16> to vector<1x4xbf16>
    %670 = vector.extract_strided_slice %650 {offsets = [0, 2], sizes = [32, 4], strides = [1, 1]} : vector<32x10xbf16> to vector<32x4xbf16>
    %671 = vector.broadcast %669 : vector<1x4xbf16> to vector<32x4xbf16>
    %672 = arith.mulf %670, %671 : vector<32x4xbf16>
    %c2_492 = arith.constant 2 : index
    %c0_493 = arith.constant 0 : index
    %c0_494 = arith.constant 0 : index
    %673 = vector.load %arg26[%c2_492, %c0_493, %c0_494] : memref<9x32x32xbf16, #tpu.memory_space<vmem>>, vector<1x32x32xbf16>
    %674 = vector.shape_cast %673 : vector<1x32x32xbf16> to vector<32x32xbf16>
    %cst_495 = arith.constant dense<0.000000e+00> : vector<32x4xf32>
    %675 = tpu.matmul %674, %672, %cst_495 {dimension_numbers = #tpu.dot_dimension_numbers<[1], [0], [0], [1], [0, 0, 1, 1], [], []>} : vector<32x32xbf16>, vector<32x4xbf16>, vector<32x4xf32> -> vector<32x4xf32>
    %676 = arith.addf %667, %675 : vector<32x4xf32>
    %c3_496 = arith.constant 3 : index
    %c0_497 = arith.constant 0 : index
    %c0_498 = arith.constant 0 : index
    %677 = vector.load %arg5[%c3_496, %c0_497, %c0_498] : memref<9x1x4xbf16, #tpu.memory_space<vmem>>, vector<1x1x4xbf16>
    %678 = vector.shape_cast %677 : vector<1x1x4xbf16> to vector<1x4xbf16>
    %679 = vector.extract_strided_slice %650 {offsets = [0, 2], sizes = [32, 4], strides = [1, 1]} : vector<32x10xbf16> to vector<32x4xbf16>
    %680 = vector.broadcast %678 : vector<1x4xbf16> to vector<32x4xbf16>
    %681 = arith.mulf %679, %680 : vector<32x4xbf16>
    %c3_499 = arith.constant 3 : index
    %c0_500 = arith.constant 0 : index
    %c0_501 = arith.constant 0 : index
    %682 = vector.load %arg26[%c3_499, %c0_500, %c0_501] : memref<9x32x32xbf16, #tpu.memory_space<vmem>>, vector<1x32x32xbf16>
    %683 = vector.shape_cast %682 : vector<1x32x32xbf16> to vector<32x32xbf16>
    %cst_502 = arith.constant dense<0.000000e+00> : vector<32x4xf32>
    %684 = tpu.matmul %683, %681, %cst_502 {dimension_numbers = #tpu.dot_dimension_numbers<[1], [0], [0], [1], [0, 0, 1, 1], [], []>} : vector<32x32xbf16>, vector<32x4xbf16>, vector<32x4xf32> -> vector<32x4xf32>
    %685 = arith.addf %676, %684 : vector<32x4xf32>
    %c4_503 = arith.constant 4 : index
    %c0_504 = arith.constant 0 : index
    %c0_505 = arith.constant 0 : index
    %686 = vector.load %arg5[%c4_503, %c0_504, %c0_505] : memref<9x1x4xbf16, #tpu.memory_space<vmem>>, vector<1x1x4xbf16>
    %687 = vector.shape_cast %686 : vector<1x1x4xbf16> to vector<1x4xbf16>
    %688 = vector.extract_strided_slice %650 {offsets = [0, 3], sizes = [32, 4], strides = [1, 1]} : vector<32x10xbf16> to vector<32x4xbf16>
    %689 = vector.broadcast %687 : vector<1x4xbf16> to vector<32x4xbf16>
    %690 = arith.mulf %688, %689 : vector<32x4xbf16>
    %c4_506 = arith.constant 4 : index
    %c0_507 = arith.constant 0 : index
    %c0_508 = arith.constant 0 : index
    %691 = vector.load %arg26[%c4_506, %c0_507, %c0_508] : memref<9x32x32xbf16, #tpu.memory_space<vmem>>, vector<1x32x32xbf16>
    %692 = vector.shape_cast %691 : vector<1x32x32xbf16> to vector<32x32xbf16>
    %cst_509 = arith.constant dense<0.000000e+00> : vector<32x4xf32>
    %693 = tpu.matmul %692, %690, %cst_509 {dimension_numbers = #tpu.dot_dimension_numbers<[1], [0], [0], [1], [0, 0, 1, 1], [], []>} : vector<32x32xbf16>, vector<32x4xbf16>, vector<32x4xf32> -> vector<32x4xf32>
    %694 = arith.addf %685, %693 : vector<32x4xf32>
    %c5_510 = arith.constant 5 : index
    %c0_511 = arith.constant 0 : index
    %c0_512 = arith.constant 0 : index
    %695 = vector.load %arg5[%c5_510, %c0_511, %c0_512] : memref<9x1x4xbf16, #tpu.memory_space<vmem>>, vector<1x1x4xbf16>
    %696 = vector.shape_cast %695 : vector<1x1x4xbf16> to vector<1x4xbf16>
    %697 = vector.extract_strided_slice %650 {offsets = [0, 4], sizes = [32, 4], strides = [1, 1]} : vector<32x10xbf16> to vector<32x4xbf16>
    %698 = vector.broadcast %696 : vector<1x4xbf16> to vector<32x4xbf16>
    %699 = arith.mulf %697, %698 : vector<32x4xbf16>
    %c5_513 = arith.constant 5 : index
    %c0_514 = arith.constant 0 : index
    %c0_515 = arith.constant 0 : index
    %700 = vector.load %arg26[%c5_513, %c0_514, %c0_515] : memref<9x32x32xbf16, #tpu.memory_space<vmem>>, vector<1x32x32xbf16>
    %701 = vector.shape_cast %700 : vector<1x32x32xbf16> to vector<32x32xbf16>
    %cst_516 = arith.constant dense<0.000000e+00> : vector<32x4xf32>
    %702 = tpu.matmul %701, %699, %cst_516 {dimension_numbers = #tpu.dot_dimension_numbers<[1], [0], [0], [1], [0, 0, 1, 1], [], []>} : vector<32x32xbf16>, vector<32x4xbf16>, vector<32x4xf32> -> vector<32x4xf32>
    %703 = arith.addf %694, %702 : vector<32x4xf32>
    %c6_517 = arith.constant 6 : index
    %c0_518 = arith.constant 0 : index
    %c0_519 = arith.constant 0 : index
    %704 = vector.load %arg5[%c6_517, %c0_518, %c0_519] : memref<9x1x4xbf16, #tpu.memory_space<vmem>>, vector<1x1x4xbf16>
    %705 = vector.shape_cast %704 : vector<1x1x4xbf16> to vector<1x4xbf16>
    %706 = vector.extract_strided_slice %650 {offsets = [0, 4], sizes = [32, 4], strides = [1, 1]} : vector<32x10xbf16> to vector<32x4xbf16>
    %707 = vector.broadcast %705 : vector<1x4xbf16> to vector<32x4xbf16>
    %708 = arith.mulf %706, %707 : vector<32x4xbf16>
    %c6_520 = arith.constant 6 : index
    %c0_521 = arith.constant 0 : index
    %c0_522 = arith.constant 0 : index
    %709 = vector.load %arg26[%c6_520, %c0_521, %c0_522] : memref<9x32x32xbf16, #tpu.memory_space<vmem>>, vector<1x32x32xbf16>
    %710 = vector.shape_cast %709 : vector<1x32x32xbf16> to vector<32x32xbf16>
    %cst_523 = arith.constant dense<0.000000e+00> : vector<32x4xf32>
    %711 = tpu.matmul %710, %708, %cst_523 {dimension_numbers = #tpu.dot_dimension_numbers<[1], [0], [0], [1], [0, 0, 1, 1], [], []>} : vector<32x32xbf16>, vector<32x4xbf16>, vector<32x4xf32> -> vector<32x4xf32>
    %712 = arith.addf %703, %711 : vector<32x4xf32>
    %c7_524 = arith.constant 7 : index
    %c0_525 = arith.constant 0 : index
    %c0_526 = arith.constant 0 : index
    %713 = vector.load %arg5[%c7_524, %c0_525, %c0_526] : memref<9x1x4xbf16, #tpu.memory_space<vmem>>, vector<1x1x4xbf16>
    %714 = vector.shape_cast %713 : vector<1x1x4xbf16> to vector<1x4xbf16>
    %715 = vector.extract_strided_slice %650 {offsets = [0, 5], sizes = [32, 4], strides = [1, 1]} : vector<32x10xbf16> to vector<32x4xbf16>
    %716 = vector.broadcast %714 : vector<1x4xbf16> to vector<32x4xbf16>
    %717 = arith.mulf %715, %716 : vector<32x4xbf16>
    %c7_527 = arith.constant 7 : index
    %c0_528 = arith.constant 0 : index
    %c0_529 = arith.constant 0 : index
    %718 = vector.load %arg26[%c7_527, %c0_528, %c0_529] : memref<9x32x32xbf16, #tpu.memory_space<vmem>>, vector<1x32x32xbf16>
    %719 = vector.shape_cast %718 : vector<1x32x32xbf16> to vector<32x32xbf16>
    %cst_530 = arith.constant dense<0.000000e+00> : vector<32x4xf32>
    %720 = tpu.matmul %719, %717, %cst_530 {dimension_numbers = #tpu.dot_dimension_numbers<[1], [0], [0], [1], [0, 0, 1, 1], [], []>} : vector<32x32xbf16>, vector<32x4xbf16>, vector<32x4xf32> -> vector<32x4xf32>
    %721 = arith.addf %712, %720 : vector<32x4xf32>
    %c8_531 = arith.constant 8 : index
    %c0_532 = arith.constant 0 : index
    %c0_533 = arith.constant 0 : index
    %722 = vector.load %arg5[%c8_531, %c0_532, %c0_533] : memref<9x1x4xbf16, #tpu.memory_space<vmem>>, vector<1x1x4xbf16>
    %723 = vector.shape_cast %722 : vector<1x1x4xbf16> to vector<1x4xbf16>
    %724 = vector.extract_strided_slice %650 {offsets = [0, 6], sizes = [32, 4], strides = [1, 1]} : vector<32x10xbf16> to vector<32x4xbf16>
    %725 = vector.broadcast %723 : vector<1x4xbf16> to vector<32x4xbf16>
    %726 = arith.mulf %724, %725 : vector<32x4xbf16>
    %c8_534 = arith.constant 8 : index
    %c0_535 = arith.constant 0 : index
    %c0_536 = arith.constant 0 : index
    %727 = vector.load %arg26[%c8_534, %c0_535, %c0_536] : memref<9x32x32xbf16, #tpu.memory_space<vmem>>, vector<1x32x32xbf16>
    %728 = vector.shape_cast %727 : vector<1x32x32xbf16> to vector<32x32xbf16>
    %cst_537 = arith.constant dense<0.000000e+00> : vector<32x4xf32>
    %729 = tpu.matmul %728, %726, %cst_537 {dimension_numbers = #tpu.dot_dimension_numbers<[1], [0], [0], [1], [0, 0, 1, 1], [], []>} : vector<32x32xbf16>, vector<32x4xbf16>, vector<32x4xf32> -> vector<32x4xf32>
    %730 = arith.addf %721, %729 : vector<32x4xf32>
    %c0_538 = arith.constant 0 : index
    %c0_539 = arith.constant 0 : index
    %731 = vector.load %arg27[%c0_538, %c0_539] : memref<32x1xf32, #tpu.memory_space<vmem>>, vector<32x1xf32>
    %732 = vector.broadcast %731 : vector<32x1xf32> to vector<32x4xf32>
    %733 = arith.addf %730, %732 : vector<32x4xf32>
    %cst_540 = arith.constant 0.000000e+00 : f32
    %734 = vector.broadcast %cst_540 : f32 to vector<32x4xf32>
    %735 = arith.maximumf %733, %734 : vector<32x4xf32>
    %736 = arith.truncf %735 : vector<32x4xf32> to vector<32x4xbf16>
    %c0_541 = arith.constant 0 : index
    %c0_542 = arith.constant 0 : index
    %737 = vector.load %arg9[%c0_541, %c0_542] : memref<4x16xbf16, #tpu.memory_space<vmem>>, vector<4x16xbf16>
    %cst_543 = arith.constant dense<0.000000e+00> : vector<32x16xf32>
    %738 = tpu.matmul %736, %737, %cst_543 {dimension_numbers = #tpu.dot_dimension_numbers<[1], [0], [0], [1], [0, 0, 1, 1], [], []>} : vector<32x4xbf16>, vector<4x16xbf16>, vector<32x16xf32> -> vector<32x16xf32>
    %739 = arith.truncf %738 : vector<32x16xf32> to vector<32x16xbf16>
    %cst_544 = arith.constant 0.000000e+00 : bf16
    %740 = vector.broadcast %cst_544 : bf16 to vector<32x5xbf16>
    %741 = tpu.concatenate %740, %550, %740 in 1 : vector<32x5xbf16>, vector<32x16xbf16>, vector<32x5xbf16> -> vector<32x26xbf16>
    %cst_545 = arith.constant 0.000000e+00 : bf16
    %742 = vector.broadcast %cst_545 : bf16 to vector<32x5xbf16>
    %743 = tpu.concatenate %742, %739, %742 in 1 : vector<32x5xbf16>, vector<32x16xbf16>, vector<32x5xbf16> -> vector<32x26xbf16>
    %c0_546 = arith.constant 0 : index
    %c0_547 = arith.constant 0 : index
    %c0_548 = arith.constant 0 : index
    %744 = vector.load %arg4[%c0_546, %c0_547, %c0_548] : memref<9x1x16xbf16, #tpu.memory_space<vmem>>, vector<1x1x16xbf16>
    %745 = vector.shape_cast %744 : vector<1x1x16xbf16> to vector<1x16xbf16>
    %746 = vector.extract_strided_slice %741 {offsets = [0, 0], sizes = [32, 16], strides = [1, 1]} : vector<32x26xbf16> to vector<32x16xbf16>
    %747 = vector.broadcast %745 : vector<1x16xbf16> to vector<32x16xbf16>
    %748 = arith.mulf %746, %747 : vector<32x16xbf16>
    %c0_549 = arith.constant 0 : index
    %c0_550 = arith.constant 0 : index
    %c0_551 = arith.constant 0 : index
    %749 = vector.load %arg28[%c0_549, %c0_550, %c0_551] : memref<9x16x32xbf16, #tpu.memory_space<vmem>>, vector<1x16x32xbf16>
    %750 = vector.shape_cast %749 : vector<1x16x32xbf16> to vector<16x32xbf16>
    %cst_552 = arith.constant dense<0.000000e+00> : vector<16x16xf32>
    %751 = tpu.matmul %750, %748, %cst_552 {dimension_numbers = #tpu.dot_dimension_numbers<[1], [0], [0], [1], [0, 0, 1, 1], [], []>} : vector<16x32xbf16>, vector<32x16xbf16>, vector<16x16xf32> -> vector<16x16xf32>
    %752 = vector.extract_strided_slice %743 {offsets = [0, 0], sizes = [32, 16], strides = [1, 1]} : vector<32x26xbf16> to vector<32x16xbf16>
    %753 = vector.broadcast %745 : vector<1x16xbf16> to vector<32x16xbf16>
    %754 = arith.mulf %752, %753 : vector<32x16xbf16>
    %c0_553 = arith.constant 0 : index
    %c0_554 = arith.constant 0 : index
    %c0_555 = arith.constant 0 : index
    %755 = vector.load %arg29[%c0_553, %c0_554, %c0_555] : memref<9x16x32xbf16, #tpu.memory_space<vmem>>, vector<1x16x32xbf16>
    %756 = vector.shape_cast %755 : vector<1x16x32xbf16> to vector<16x32xbf16>
    %cst_556 = arith.constant dense<0.000000e+00> : vector<16x16xf32>
    %757 = tpu.matmul %756, %754, %cst_556 {dimension_numbers = #tpu.dot_dimension_numbers<[1], [0], [0], [1], [0, 0, 1, 1], [], []>} : vector<16x32xbf16>, vector<32x16xbf16>, vector<16x16xf32> -> vector<16x16xf32>
    %758 = arith.addf %751, %757 : vector<16x16xf32>
    %c1_557 = arith.constant 1 : index
    %c0_558 = arith.constant 0 : index
    %c0_559 = arith.constant 0 : index
    %759 = vector.load %arg4[%c1_557, %c0_558, %c0_559] : memref<9x1x16xbf16, #tpu.memory_space<vmem>>, vector<1x1x16xbf16>
    %760 = vector.shape_cast %759 : vector<1x1x16xbf16> to vector<1x16xbf16>
    %761 = vector.extract_strided_slice %741 {offsets = [0, 1], sizes = [32, 16], strides = [1, 1]} : vector<32x26xbf16> to vector<32x16xbf16>
    %762 = vector.broadcast %760 : vector<1x16xbf16> to vector<32x16xbf16>
    %763 = arith.mulf %761, %762 : vector<32x16xbf16>
    %c1_560 = arith.constant 1 : index
    %c0_561 = arith.constant 0 : index
    %c0_562 = arith.constant 0 : index
    %764 = vector.load %arg28[%c1_560, %c0_561, %c0_562] : memref<9x16x32xbf16, #tpu.memory_space<vmem>>, vector<1x16x32xbf16>
    %765 = vector.shape_cast %764 : vector<1x16x32xbf16> to vector<16x32xbf16>
    %cst_563 = arith.constant dense<0.000000e+00> : vector<16x16xf32>
    %766 = tpu.matmul %765, %763, %cst_563 {dimension_numbers = #tpu.dot_dimension_numbers<[1], [0], [0], [1], [0, 0, 1, 1], [], []>} : vector<16x32xbf16>, vector<32x16xbf16>, vector<16x16xf32> -> vector<16x16xf32>
    %767 = arith.addf %758, %766 : vector<16x16xf32>
    %768 = vector.extract_strided_slice %743 {offsets = [0, 1], sizes = [32, 16], strides = [1, 1]} : vector<32x26xbf16> to vector<32x16xbf16>
    %769 = vector.broadcast %760 : vector<1x16xbf16> to vector<32x16xbf16>
    %770 = arith.mulf %768, %769 : vector<32x16xbf16>
    %c1_564 = arith.constant 1 : index
    %c0_565 = arith.constant 0 : index
    %c0_566 = arith.constant 0 : index
    %771 = vector.load %arg29[%c1_564, %c0_565, %c0_566] : memref<9x16x32xbf16, #tpu.memory_space<vmem>>, vector<1x16x32xbf16>
    %772 = vector.shape_cast %771 : vector<1x16x32xbf16> to vector<16x32xbf16>
    %cst_567 = arith.constant dense<0.000000e+00> : vector<16x16xf32>
    %773 = tpu.matmul %772, %770, %cst_567 {dimension_numbers = #tpu.dot_dimension_numbers<[1], [0], [0], [1], [0, 0, 1, 1], [], []>} : vector<16x32xbf16>, vector<32x16xbf16>, vector<16x16xf32> -> vector<16x16xf32>
    %774 = arith.addf %767, %773 : vector<16x16xf32>
    %c2_568 = arith.constant 2 : index
    %c0_569 = arith.constant 0 : index
    %c0_570 = arith.constant 0 : index
    %775 = vector.load %arg4[%c2_568, %c0_569, %c0_570] : memref<9x1x16xbf16, #tpu.memory_space<vmem>>, vector<1x1x16xbf16>
    %776 = vector.shape_cast %775 : vector<1x1x16xbf16> to vector<1x16xbf16>
    %777 = vector.extract_strided_slice %741 {offsets = [0, 2], sizes = [32, 16], strides = [1, 1]} : vector<32x26xbf16> to vector<32x16xbf16>
    %778 = vector.broadcast %776 : vector<1x16xbf16> to vector<32x16xbf16>
    %779 = arith.mulf %777, %778 : vector<32x16xbf16>
    %c2_571 = arith.constant 2 : index
    %c0_572 = arith.constant 0 : index
    %c0_573 = arith.constant 0 : index
    %780 = vector.load %arg28[%c2_571, %c0_572, %c0_573] : memref<9x16x32xbf16, #tpu.memory_space<vmem>>, vector<1x16x32xbf16>
    %781 = vector.shape_cast %780 : vector<1x16x32xbf16> to vector<16x32xbf16>
    %cst_574 = arith.constant dense<0.000000e+00> : vector<16x16xf32>
    %782 = tpu.matmul %781, %779, %cst_574 {dimension_numbers = #tpu.dot_dimension_numbers<[1], [0], [0], [1], [0, 0, 1, 1], [], []>} : vector<16x32xbf16>, vector<32x16xbf16>, vector<16x16xf32> -> vector<16x16xf32>
    %783 = arith.addf %774, %782 : vector<16x16xf32>
    %784 = vector.extract_strided_slice %743 {offsets = [0, 2], sizes = [32, 16], strides = [1, 1]} : vector<32x26xbf16> to vector<32x16xbf16>
    %785 = vector.broadcast %776 : vector<1x16xbf16> to vector<32x16xbf16>
    %786 = arith.mulf %784, %785 : vector<32x16xbf16>
    %c2_575 = arith.constant 2 : index
    %c0_576 = arith.constant 0 : index
    %c0_577 = arith.constant 0 : index
    %787 = vector.load %arg29[%c2_575, %c0_576, %c0_577] : memref<9x16x32xbf16, #tpu.memory_space<vmem>>, vector<1x16x32xbf16>
    %788 = vector.shape_cast %787 : vector<1x16x32xbf16> to vector<16x32xbf16>
    %cst_578 = arith.constant dense<0.000000e+00> : vector<16x16xf32>
    %789 = tpu.matmul %788, %786, %cst_578 {dimension_numbers = #tpu.dot_dimension_numbers<[1], [0], [0], [1], [0, 0, 1, 1], [], []>} : vector<16x32xbf16>, vector<32x16xbf16>, vector<16x16xf32> -> vector<16x16xf32>
    %790 = arith.addf %783, %789 : vector<16x16xf32>
    %c3_579 = arith.constant 3 : index
    %c0_580 = arith.constant 0 : index
    %c0_581 = arith.constant 0 : index
    %791 = vector.load %arg4[%c3_579, %c0_580, %c0_581] : memref<9x1x16xbf16, #tpu.memory_space<vmem>>, vector<1x1x16xbf16>
    %792 = vector.shape_cast %791 : vector<1x1x16xbf16> to vector<1x16xbf16>
    %793 = vector.extract_strided_slice %741 {offsets = [0, 4], sizes = [32, 16], strides = [1, 1]} : vector<32x26xbf16> to vector<32x16xbf16>
    %794 = vector.broadcast %792 : vector<1x16xbf16> to vector<32x16xbf16>
    %795 = arith.mulf %793, %794 : vector<32x16xbf16>
    %c3_582 = arith.constant 3 : index
    %c0_583 = arith.constant 0 : index
    %c0_584 = arith.constant 0 : index
    %796 = vector.load %arg28[%c3_582, %c0_583, %c0_584] : memref<9x16x32xbf16, #tpu.memory_space<vmem>>, vector<1x16x32xbf16>
    %797 = vector.shape_cast %796 : vector<1x16x32xbf16> to vector<16x32xbf16>
    %cst_585 = arith.constant dense<0.000000e+00> : vector<16x16xf32>
    %798 = tpu.matmul %797, %795, %cst_585 {dimension_numbers = #tpu.dot_dimension_numbers<[1], [0], [0], [1], [0, 0, 1, 1], [], []>} : vector<16x32xbf16>, vector<32x16xbf16>, vector<16x16xf32> -> vector<16x16xf32>
    %799 = arith.addf %790, %798 : vector<16x16xf32>
    %800 = vector.extract_strided_slice %743 {offsets = [0, 4], sizes = [32, 16], strides = [1, 1]} : vector<32x26xbf16> to vector<32x16xbf16>
    %801 = vector.broadcast %792 : vector<1x16xbf16> to vector<32x16xbf16>
    %802 = arith.mulf %800, %801 : vector<32x16xbf16>
    %c3_586 = arith.constant 3 : index
    %c0_587 = arith.constant 0 : index
    %c0_588 = arith.constant 0 : index
    %803 = vector.load %arg29[%c3_586, %c0_587, %c0_588] : memref<9x16x32xbf16, #tpu.memory_space<vmem>>, vector<1x16x32xbf16>
    %804 = vector.shape_cast %803 : vector<1x16x32xbf16> to vector<16x32xbf16>
    %cst_589 = arith.constant dense<0.000000e+00> : vector<16x16xf32>
    %805 = tpu.matmul %804, %802, %cst_589 {dimension_numbers = #tpu.dot_dimension_numbers<[1], [0], [0], [1], [0, 0, 1, 1], [], []>} : vector<16x32xbf16>, vector<32x16xbf16>, vector<16x16xf32> -> vector<16x16xf32>
    %806 = arith.addf %799, %805 : vector<16x16xf32>
    %c4_590 = arith.constant 4 : index
    %c0_591 = arith.constant 0 : index
    %c0_592 = arith.constant 0 : index
    %807 = vector.load %arg4[%c4_590, %c0_591, %c0_592] : memref<9x1x16xbf16, #tpu.memory_space<vmem>>, vector<1x1x16xbf16>
    %808 = vector.shape_cast %807 : vector<1x1x16xbf16> to vector<1x16xbf16>
    %809 = vector.extract_strided_slice %741 {offsets = [0, 5], sizes = [32, 16], strides = [1, 1]} : vector<32x26xbf16> to vector<32x16xbf16>
    %810 = vector.broadcast %808 : vector<1x16xbf16> to vector<32x16xbf16>
    %811 = arith.mulf %809, %810 : vector<32x16xbf16>
    %c4_593 = arith.constant 4 : index
    %c0_594 = arith.constant 0 : index
    %c0_595 = arith.constant 0 : index
    %812 = vector.load %arg28[%c4_593, %c0_594, %c0_595] : memref<9x16x32xbf16, #tpu.memory_space<vmem>>, vector<1x16x32xbf16>
    %813 = vector.shape_cast %812 : vector<1x16x32xbf16> to vector<16x32xbf16>
    %cst_596 = arith.constant dense<0.000000e+00> : vector<16x16xf32>
    %814 = tpu.matmul %813, %811, %cst_596 {dimension_numbers = #tpu.dot_dimension_numbers<[1], [0], [0], [1], [0, 0, 1, 1], [], []>} : vector<16x32xbf16>, vector<32x16xbf16>, vector<16x16xf32> -> vector<16x16xf32>
    %815 = arith.addf %806, %814 : vector<16x16xf32>
    %816 = vector.extract_strided_slice %743 {offsets = [0, 5], sizes = [32, 16], strides = [1, 1]} : vector<32x26xbf16> to vector<32x16xbf16>
    %817 = vector.broadcast %808 : vector<1x16xbf16> to vector<32x16xbf16>
    %818 = arith.mulf %816, %817 : vector<32x16xbf16>
    %c4_597 = arith.constant 4 : index
    %c0_598 = arith.constant 0 : index
    %c0_599 = arith.constant 0 : index
    %819 = vector.load %arg29[%c4_597, %c0_598, %c0_599] : memref<9x16x32xbf16, #tpu.memory_space<vmem>>, vector<1x16x32xbf16>
    %820 = vector.shape_cast %819 : vector<1x16x32xbf16> to vector<16x32xbf16>
    %cst_600 = arith.constant dense<0.000000e+00> : vector<16x16xf32>
    %821 = tpu.matmul %820, %818, %cst_600 {dimension_numbers = #tpu.dot_dimension_numbers<[1], [0], [0], [1], [0, 0, 1, 1], [], []>} : vector<16x32xbf16>, vector<32x16xbf16>, vector<16x16xf32> -> vector<16x16xf32>
    %822 = arith.addf %815, %821 : vector<16x16xf32>
    %c5_601 = arith.constant 5 : index
    %c0_602 = arith.constant 0 : index
    %c0_603 = arith.constant 0 : index
    %823 = vector.load %arg4[%c5_601, %c0_602, %c0_603] : memref<9x1x16xbf16, #tpu.memory_space<vmem>>, vector<1x1x16xbf16>
    %824 = vector.shape_cast %823 : vector<1x1x16xbf16> to vector<1x16xbf16>
    %825 = vector.extract_strided_slice %741 {offsets = [0, 6], sizes = [32, 16], strides = [1, 1]} : vector<32x26xbf16> to vector<32x16xbf16>
    %826 = vector.broadcast %824 : vector<1x16xbf16> to vector<32x16xbf16>
    %827 = arith.mulf %825, %826 : vector<32x16xbf16>
    %c5_604 = arith.constant 5 : index
    %c0_605 = arith.constant 0 : index
    %c0_606 = arith.constant 0 : index
    %828 = vector.load %arg28[%c5_604, %c0_605, %c0_606] : memref<9x16x32xbf16, #tpu.memory_space<vmem>>, vector<1x16x32xbf16>
    %829 = vector.shape_cast %828 : vector<1x16x32xbf16> to vector<16x32xbf16>
    %cst_607 = arith.constant dense<0.000000e+00> : vector<16x16xf32>
    %830 = tpu.matmul %829, %827, %cst_607 {dimension_numbers = #tpu.dot_dimension_numbers<[1], [0], [0], [1], [0, 0, 1, 1], [], []>} : vector<16x32xbf16>, vector<32x16xbf16>, vector<16x16xf32> -> vector<16x16xf32>
    %831 = arith.addf %822, %830 : vector<16x16xf32>
    %832 = vector.extract_strided_slice %743 {offsets = [0, 6], sizes = [32, 16], strides = [1, 1]} : vector<32x26xbf16> to vector<32x16xbf16>
    %833 = vector.broadcast %824 : vector<1x16xbf16> to vector<32x16xbf16>
    %834 = arith.mulf %832, %833 : vector<32x16xbf16>
    %c5_608 = arith.constant 5 : index
    %c0_609 = arith.constant 0 : index
    %c0_610 = arith.constant 0 : index
    %835 = vector.load %arg29[%c5_608, %c0_609, %c0_610] : memref<9x16x32xbf16, #tpu.memory_space<vmem>>, vector<1x16x32xbf16>
    %836 = vector.shape_cast %835 : vector<1x16x32xbf16> to vector<16x32xbf16>
    %cst_611 = arith.constant dense<0.000000e+00> : vector<16x16xf32>
    %837 = tpu.matmul %836, %834, %cst_611 {dimension_numbers = #tpu.dot_dimension_numbers<[1], [0], [0], [1], [0, 0, 1, 1], [], []>} : vector<16x32xbf16>, vector<32x16xbf16>, vector<16x16xf32> -> vector<16x16xf32>
    %838 = arith.addf %831, %837 : vector<16x16xf32>
    %c6_612 = arith.constant 6 : index
    %c0_613 = arith.constant 0 : index
    %c0_614 = arith.constant 0 : index
    %839 = vector.load %arg4[%c6_612, %c0_613, %c0_614] : memref<9x1x16xbf16, #tpu.memory_space<vmem>>, vector<1x1x16xbf16>
    %840 = vector.shape_cast %839 : vector<1x1x16xbf16> to vector<1x16xbf16>
    %841 = vector.extract_strided_slice %741 {offsets = [0, 8], sizes = [32, 16], strides = [1, 1]} : vector<32x26xbf16> to vector<32x16xbf16>
    %842 = vector.broadcast %840 : vector<1x16xbf16> to vector<32x16xbf16>
    %843 = arith.mulf %841, %842 : vector<32x16xbf16>
    %c6_615 = arith.constant 6 : index
    %c0_616 = arith.constant 0 : index
    %c0_617 = arith.constant 0 : index
    %844 = vector.load %arg28[%c6_615, %c0_616, %c0_617] : memref<9x16x32xbf16, #tpu.memory_space<vmem>>, vector<1x16x32xbf16>
    %845 = vector.shape_cast %844 : vector<1x16x32xbf16> to vector<16x32xbf16>
    %cst_618 = arith.constant dense<0.000000e+00> : vector<16x16xf32>
    %846 = tpu.matmul %845, %843, %cst_618 {dimension_numbers = #tpu.dot_dimension_numbers<[1], [0], [0], [1], [0, 0, 1, 1], [], []>} : vector<16x32xbf16>, vector<32x16xbf16>, vector<16x16xf32> -> vector<16x16xf32>
    %847 = arith.addf %838, %846 : vector<16x16xf32>
    %848 = vector.extract_strided_slice %743 {offsets = [0, 8], sizes = [32, 16], strides = [1, 1]} : vector<32x26xbf16> to vector<32x16xbf16>
    %849 = vector.broadcast %840 : vector<1x16xbf16> to vector<32x16xbf16>
    %850 = arith.mulf %848, %849 : vector<32x16xbf16>
    %c6_619 = arith.constant 6 : index
    %c0_620 = arith.constant 0 : index
    %c0_621 = arith.constant 0 : index
    %851 = vector.load %arg29[%c6_619, %c0_620, %c0_621] : memref<9x16x32xbf16, #tpu.memory_space<vmem>>, vector<1x16x32xbf16>
    %852 = vector.shape_cast %851 : vector<1x16x32xbf16> to vector<16x32xbf16>
    %cst_622 = arith.constant dense<0.000000e+00> : vector<16x16xf32>
    %853 = tpu.matmul %852, %850, %cst_622 {dimension_numbers = #tpu.dot_dimension_numbers<[1], [0], [0], [1], [0, 0, 1, 1], [], []>} : vector<16x32xbf16>, vector<32x16xbf16>, vector<16x16xf32> -> vector<16x16xf32>
    %854 = arith.addf %847, %853 : vector<16x16xf32>
    %c7_623 = arith.constant 7 : index
    %c0_624 = arith.constant 0 : index
    %c0_625 = arith.constant 0 : index
    %855 = vector.load %arg4[%c7_623, %c0_624, %c0_625] : memref<9x1x16xbf16, #tpu.memory_space<vmem>>, vector<1x1x16xbf16>
    %856 = vector.shape_cast %855 : vector<1x1x16xbf16> to vector<1x16xbf16>
    %857 = vector.extract_strided_slice %741 {offsets = [0, 9], sizes = [32, 16], strides = [1, 1]} : vector<32x26xbf16> to vector<32x16xbf16>
    %858 = vector.broadcast %856 : vector<1x16xbf16> to vector<32x16xbf16>
    %859 = arith.mulf %857, %858 : vector<32x16xbf16>
    %c7_626 = arith.constant 7 : index
    %c0_627 = arith.constant 0 : index
    %c0_628 = arith.constant 0 : index
    %860 = vector.load %arg28[%c7_626, %c0_627, %c0_628] : memref<9x16x32xbf16, #tpu.memory_space<vmem>>, vector<1x16x32xbf16>
    %861 = vector.shape_cast %860 : vector<1x16x32xbf16> to vector<16x32xbf16>
    %cst_629 = arith.constant dense<0.000000e+00> : vector<16x16xf32>
    %862 = tpu.matmul %861, %859, %cst_629 {dimension_numbers = #tpu.dot_dimension_numbers<[1], [0], [0], [1], [0, 0, 1, 1], [], []>} : vector<16x32xbf16>, vector<32x16xbf16>, vector<16x16xf32> -> vector<16x16xf32>
    %863 = arith.addf %854, %862 : vector<16x16xf32>
    %864 = vector.extract_strided_slice %743 {offsets = [0, 9], sizes = [32, 16], strides = [1, 1]} : vector<32x26xbf16> to vector<32x16xbf16>
    %865 = vector.broadcast %856 : vector<1x16xbf16> to vector<32x16xbf16>
    %866 = arith.mulf %864, %865 : vector<32x16xbf16>
    %c7_630 = arith.constant 7 : index
    %c0_631 = arith.constant 0 : index
    %c0_632 = arith.constant 0 : index
    %867 = vector.load %arg29[%c7_630, %c0_631, %c0_632] : memref<9x16x32xbf16, #tpu.memory_space<vmem>>, vector<1x16x32xbf16>
    %868 = vector.shape_cast %867 : vector<1x16x32xbf16> to vector<16x32xbf16>
    %cst_633 = arith.constant dense<0.000000e+00> : vector<16x16xf32>
    %869 = tpu.matmul %868, %866, %cst_633 {dimension_numbers = #tpu.dot_dimension_numbers<[1], [0], [0], [1], [0, 0, 1, 1], [], []>} : vector<16x32xbf16>, vector<32x16xbf16>, vector<16x16xf32> -> vector<16x16xf32>
    %870 = arith.addf %863, %869 : vector<16x16xf32>
    %c8_634 = arith.constant 8 : index
    %c0_635 = arith.constant 0 : index
    %c0_636 = arith.constant 0 : index
    %871 = vector.load %arg4[%c8_634, %c0_635, %c0_636] : memref<9x1x16xbf16, #tpu.memory_space<vmem>>, vector<1x1x16xbf16>
    %872 = vector.shape_cast %871 : vector<1x1x16xbf16> to vector<1x16xbf16>
    %873 = vector.extract_strided_slice %741 {offsets = [0, 10], sizes = [32, 16], strides = [1, 1]} : vector<32x26xbf16> to vector<32x16xbf16>
    %874 = vector.broadcast %872 : vector<1x16xbf16> to vector<32x16xbf16>
    %875 = arith.mulf %873, %874 : vector<32x16xbf16>
    %c8_637 = arith.constant 8 : index
    %c0_638 = arith.constant 0 : index
    %c0_639 = arith.constant 0 : index
    %876 = vector.load %arg28[%c8_637, %c0_638, %c0_639] : memref<9x16x32xbf16, #tpu.memory_space<vmem>>, vector<1x16x32xbf16>
    %877 = vector.shape_cast %876 : vector<1x16x32xbf16> to vector<16x32xbf16>
    %cst_640 = arith.constant dense<0.000000e+00> : vector<16x16xf32>
    %878 = tpu.matmul %877, %875, %cst_640 {dimension_numbers = #tpu.dot_dimension_numbers<[1], [0], [0], [1], [0, 0, 1, 1], [], []>} : vector<16x32xbf16>, vector<32x16xbf16>, vector<16x16xf32> -> vector<16x16xf32>
    %879 = arith.addf %870, %878 : vector<16x16xf32>
    %880 = vector.extract_strided_slice %743 {offsets = [0, 10], sizes = [32, 16], strides = [1, 1]} : vector<32x26xbf16> to vector<32x16xbf16>
    %881 = vector.broadcast %872 : vector<1x16xbf16> to vector<32x16xbf16>
    %882 = arith.mulf %880, %881 : vector<32x16xbf16>
    %c8_641 = arith.constant 8 : index
    %c0_642 = arith.constant 0 : index
    %c0_643 = arith.constant 0 : index
    %883 = vector.load %arg29[%c8_641, %c0_642, %c0_643] : memref<9x16x32xbf16, #tpu.memory_space<vmem>>, vector<1x16x32xbf16>
    %884 = vector.shape_cast %883 : vector<1x16x32xbf16> to vector<16x32xbf16>
    %cst_644 = arith.constant dense<0.000000e+00> : vector<16x16xf32>
    %885 = tpu.matmul %884, %882, %cst_644 {dimension_numbers = #tpu.dot_dimension_numbers<[1], [0], [0], [1], [0, 0, 1, 1], [], []>} : vector<16x32xbf16>, vector<32x16xbf16>, vector<16x16xf32> -> vector<16x16xf32>
    %886 = arith.addf %879, %885 : vector<16x16xf32>
    %c0_645 = arith.constant 0 : index
    %c0_646 = arith.constant 0 : index
    %887 = vector.load %arg30[%c0_645, %c0_646] : memref<16x1xf32, #tpu.memory_space<vmem>>, vector<16x1xf32>
    %888 = vector.broadcast %887 : vector<16x1xf32> to vector<16x16xf32>
    %889 = arith.addf %886, %888 : vector<16x16xf32>
    %cst_647 = arith.constant 0.000000e+00 : f32
    %890 = vector.broadcast %cst_647 : f32 to vector<16x16xf32>
    %891 = arith.maximumf %889, %890 : vector<16x16xf32>
    %892 = arith.truncf %891 : vector<16x16xf32> to vector<16x16xbf16>
    %cst_648 = arith.constant 0.000000e+00 : bf16
    %893 = vector.broadcast %cst_648 : bf16 to vector<16x5xbf16>
    %894 = tpu.concatenate %893, %892, %893 in 1 : vector<16x5xbf16>, vector<16x16xbf16>, vector<16x5xbf16> -> vector<16x26xbf16>
    %c0_649 = arith.constant 0 : index
    %c0_650 = arith.constant 0 : index
    %c0_651 = arith.constant 0 : index
    %895 = vector.load %arg4[%c0_649, %c0_650, %c0_651] : memref<9x1x16xbf16, #tpu.memory_space<vmem>>, vector<1x1x16xbf16>
    %896 = vector.shape_cast %895 : vector<1x1x16xbf16> to vector<1x16xbf16>
    %897 = vector.extract_strided_slice %894 {offsets = [0, 0], sizes = [16, 16], strides = [1, 1]} : vector<16x26xbf16> to vector<16x16xbf16>
    %898 = vector.broadcast %896 : vector<1x16xbf16> to vector<16x16xbf16>
    %899 = arith.mulf %897, %898 : vector<16x16xbf16>
    %c0_652 = arith.constant 0 : index
    %c0_653 = arith.constant 0 : index
    %c0_654 = arith.constant 0 : index
    %900 = vector.load %arg31[%c0_652, %c0_653, %c0_654] : memref<9x16x16xbf16, #tpu.memory_space<vmem>>, vector<1x16x16xbf16>
    %901 = vector.shape_cast %900 : vector<1x16x16xbf16> to vector<16x16xbf16>
    %cst_655 = arith.constant dense<0.000000e+00> : vector<16x16xf32>
    %902 = tpu.matmul %901, %899, %cst_655 {dimension_numbers = #tpu.dot_dimension_numbers<[1], [0], [0], [1], [0, 0, 1, 1], [], []>} : vector<16x16xbf16>, vector<16x16xbf16>, vector<16x16xf32> -> vector<16x16xf32>
    %c1_656 = arith.constant 1 : index
    %c0_657 = arith.constant 0 : index
    %c0_658 = arith.constant 0 : index
    %903 = vector.load %arg4[%c1_656, %c0_657, %c0_658] : memref<9x1x16xbf16, #tpu.memory_space<vmem>>, vector<1x1x16xbf16>
    %904 = vector.shape_cast %903 : vector<1x1x16xbf16> to vector<1x16xbf16>
    %905 = vector.extract_strided_slice %894 {offsets = [0, 1], sizes = [16, 16], strides = [1, 1]} : vector<16x26xbf16> to vector<16x16xbf16>
    %906 = vector.broadcast %904 : vector<1x16xbf16> to vector<16x16xbf16>
    %907 = arith.mulf %905, %906 : vector<16x16xbf16>
    %c1_659 = arith.constant 1 : index
    %c0_660 = arith.constant 0 : index
    %c0_661 = arith.constant 0 : index
    %908 = vector.load %arg31[%c1_659, %c0_660, %c0_661] : memref<9x16x16xbf16, #tpu.memory_space<vmem>>, vector<1x16x16xbf16>
    %909 = vector.shape_cast %908 : vector<1x16x16xbf16> to vector<16x16xbf16>
    %cst_662 = arith.constant dense<0.000000e+00> : vector<16x16xf32>
    %910 = tpu.matmul %909, %907, %cst_662 {dimension_numbers = #tpu.dot_dimension_numbers<[1], [0], [0], [1], [0, 0, 1, 1], [], []>} : vector<16x16xbf16>, vector<16x16xbf16>, vector<16x16xf32> -> vector<16x16xf32>
    %911 = arith.addf %902, %910 : vector<16x16xf32>
    %c2_663 = arith.constant 2 : index
    %c0_664 = arith.constant 0 : index
    %c0_665 = arith.constant 0 : index
    %912 = vector.load %arg4[%c2_663, %c0_664, %c0_665] : memref<9x1x16xbf16, #tpu.memory_space<vmem>>, vector<1x1x16xbf16>
    %913 = vector.shape_cast %912 : vector<1x1x16xbf16> to vector<1x16xbf16>
    %914 = vector.extract_strided_slice %894 {offsets = [0, 2], sizes = [16, 16], strides = [1, 1]} : vector<16x26xbf16> to vector<16x16xbf16>
    %915 = vector.broadcast %913 : vector<1x16xbf16> to vector<16x16xbf16>
    %916 = arith.mulf %914, %915 : vector<16x16xbf16>
    %c2_666 = arith.constant 2 : index
    %c0_667 = arith.constant 0 : index
    %c0_668 = arith.constant 0 : index
    %917 = vector.load %arg31[%c2_666, %c0_667, %c0_668] : memref<9x16x16xbf16, #tpu.memory_space<vmem>>, vector<1x16x16xbf16>
    %918 = vector.shape_cast %917 : vector<1x16x16xbf16> to vector<16x16xbf16>
    %cst_669 = arith.constant dense<0.000000e+00> : vector<16x16xf32>
    %919 = tpu.matmul %918, %916, %cst_669 {dimension_numbers = #tpu.dot_dimension_numbers<[1], [0], [0], [1], [0, 0, 1, 1], [], []>} : vector<16x16xbf16>, vector<16x16xbf16>, vector<16x16xf32> -> vector<16x16xf32>
    %920 = arith.addf %911, %919 : vector<16x16xf32>
    %c3_670 = arith.constant 3 : index
    %c0_671 = arith.constant 0 : index
    %c0_672 = arith.constant 0 : index
    %921 = vector.load %arg4[%c3_670, %c0_671, %c0_672] : memref<9x1x16xbf16, #tpu.memory_space<vmem>>, vector<1x1x16xbf16>
    %922 = vector.shape_cast %921 : vector<1x1x16xbf16> to vector<1x16xbf16>
    %923 = vector.extract_strided_slice %894 {offsets = [0, 4], sizes = [16, 16], strides = [1, 1]} : vector<16x26xbf16> to vector<16x16xbf16>
    %924 = vector.broadcast %922 : vector<1x16xbf16> to vector<16x16xbf16>
    %925 = arith.mulf %923, %924 : vector<16x16xbf16>
    %c3_673 = arith.constant 3 : index
    %c0_674 = arith.constant 0 : index
    %c0_675 = arith.constant 0 : index
    %926 = vector.load %arg31[%c3_673, %c0_674, %c0_675] : memref<9x16x16xbf16, #tpu.memory_space<vmem>>, vector<1x16x16xbf16>
    %927 = vector.shape_cast %926 : vector<1x16x16xbf16> to vector<16x16xbf16>
    %cst_676 = arith.constant dense<0.000000e+00> : vector<16x16xf32>
    %928 = tpu.matmul %927, %925, %cst_676 {dimension_numbers = #tpu.dot_dimension_numbers<[1], [0], [0], [1], [0, 0, 1, 1], [], []>} : vector<16x16xbf16>, vector<16x16xbf16>, vector<16x16xf32> -> vector<16x16xf32>
    %929 = arith.addf %920, %928 : vector<16x16xf32>
    %c4_677 = arith.constant 4 : index
    %c0_678 = arith.constant 0 : index
    %c0_679 = arith.constant 0 : index
    %930 = vector.load %arg4[%c4_677, %c0_678, %c0_679] : memref<9x1x16xbf16, #tpu.memory_space<vmem>>, vector<1x1x16xbf16>
    %931 = vector.shape_cast %930 : vector<1x1x16xbf16> to vector<1x16xbf16>
    %932 = vector.extract_strided_slice %894 {offsets = [0, 5], sizes = [16, 16], strides = [1, 1]} : vector<16x26xbf16> to vector<16x16xbf16>
    %933 = vector.broadcast %931 : vector<1x16xbf16> to vector<16x16xbf16>
    %934 = arith.mulf %932, %933 : vector<16x16xbf16>
    %c4_680 = arith.constant 4 : index
    %c0_681 = arith.constant 0 : index
    %c0_682 = arith.constant 0 : index
    %935 = vector.load %arg31[%c4_680, %c0_681, %c0_682] : memref<9x16x16xbf16, #tpu.memory_space<vmem>>, vector<1x16x16xbf16>
    %936 = vector.shape_cast %935 : vector<1x16x16xbf16> to vector<16x16xbf16>
    %cst_683 = arith.constant dense<0.000000e+00> : vector<16x16xf32>
    %937 = tpu.matmul %936, %934, %cst_683 {dimension_numbers = #tpu.dot_dimension_numbers<[1], [0], [0], [1], [0, 0, 1, 1], [], []>} : vector<16x16xbf16>, vector<16x16xbf16>, vector<16x16xf32> -> vector<16x16xf32>
    %938 = arith.addf %929, %937 : vector<16x16xf32>
    %c5_684 = arith.constant 5 : index
    %c0_685 = arith.constant 0 : index
    %c0_686 = arith.constant 0 : index
    %939 = vector.load %arg4[%c5_684, %c0_685, %c0_686] : memref<9x1x16xbf16, #tpu.memory_space<vmem>>, vector<1x1x16xbf16>
    %940 = vector.shape_cast %939 : vector<1x1x16xbf16> to vector<1x16xbf16>
    %941 = vector.extract_strided_slice %894 {offsets = [0, 6], sizes = [16, 16], strides = [1, 1]} : vector<16x26xbf16> to vector<16x16xbf16>
    %942 = vector.broadcast %940 : vector<1x16xbf16> to vector<16x16xbf16>
    %943 = arith.mulf %941, %942 : vector<16x16xbf16>
    %c5_687 = arith.constant 5 : index
    %c0_688 = arith.constant 0 : index
    %c0_689 = arith.constant 0 : index
    %944 = vector.load %arg31[%c5_687, %c0_688, %c0_689] : memref<9x16x16xbf16, #tpu.memory_space<vmem>>, vector<1x16x16xbf16>
    %945 = vector.shape_cast %944 : vector<1x16x16xbf16> to vector<16x16xbf16>
    %cst_690 = arith.constant dense<0.000000e+00> : vector<16x16xf32>
    %946 = tpu.matmul %945, %943, %cst_690 {dimension_numbers = #tpu.dot_dimension_numbers<[1], [0], [0], [1], [0, 0, 1, 1], [], []>} : vector<16x16xbf16>, vector<16x16xbf16>, vector<16x16xf32> -> vector<16x16xf32>
    %947 = arith.addf %938, %946 : vector<16x16xf32>
    %c6_691 = arith.constant 6 : index
    %c0_692 = arith.constant 0 : index
    %c0_693 = arith.constant 0 : index
    %948 = vector.load %arg4[%c6_691, %c0_692, %c0_693] : memref<9x1x16xbf16, #tpu.memory_space<vmem>>, vector<1x1x16xbf16>
    %949 = vector.shape_cast %948 : vector<1x1x16xbf16> to vector<1x16xbf16>
    %950 = vector.extract_strided_slice %894 {offsets = [0, 8], sizes = [16, 16], strides = [1, 1]} : vector<16x26xbf16> to vector<16x16xbf16>
    %951 = vector.broadcast %949 : vector<1x16xbf16> to vector<16x16xbf16>
    %952 = arith.mulf %950, %951 : vector<16x16xbf16>
    %c6_694 = arith.constant 6 : index
    %c0_695 = arith.constant 0 : index
    %c0_696 = arith.constant 0 : index
    %953 = vector.load %arg31[%c6_694, %c0_695, %c0_696] : memref<9x16x16xbf16, #tpu.memory_space<vmem>>, vector<1x16x16xbf16>
    %954 = vector.shape_cast %953 : vector<1x16x16xbf16> to vector<16x16xbf16>
    %cst_697 = arith.constant dense<0.000000e+00> : vector<16x16xf32>
    %955 = tpu.matmul %954, %952, %cst_697 {dimension_numbers = #tpu.dot_dimension_numbers<[1], [0], [0], [1], [0, 0, 1, 1], [], []>} : vector<16x16xbf16>, vector<16x16xbf16>, vector<16x16xf32> -> vector<16x16xf32>
    %956 = arith.addf %947, %955 : vector<16x16xf32>
    %c7_698 = arith.constant 7 : index
    %c0_699 = arith.constant 0 : index
    %c0_700 = arith.constant 0 : index
    %957 = vector.load %arg4[%c7_698, %c0_699, %c0_700] : memref<9x1x16xbf16, #tpu.memory_space<vmem>>, vector<1x1x16xbf16>
    %958 = vector.shape_cast %957 : vector<1x1x16xbf16> to vector<1x16xbf16>
    %959 = vector.extract_strided_slice %894 {offsets = [0, 9], sizes = [16, 16], strides = [1, 1]} : vector<16x26xbf16> to vector<16x16xbf16>
    %960 = vector.broadcast %958 : vector<1x16xbf16> to vector<16x16xbf16>
    %961 = arith.mulf %959, %960 : vector<16x16xbf16>
    %c7_701 = arith.constant 7 : index
    %c0_702 = arith.constant 0 : index
    %c0_703 = arith.constant 0 : index
    %962 = vector.load %arg31[%c7_701, %c0_702, %c0_703] : memref<9x16x16xbf16, #tpu.memory_space<vmem>>, vector<1x16x16xbf16>
    %963 = vector.shape_cast %962 : vector<1x16x16xbf16> to vector<16x16xbf16>
    %cst_704 = arith.constant dense<0.000000e+00> : vector<16x16xf32>
    %964 = tpu.matmul %963, %961, %cst_704 {dimension_numbers = #tpu.dot_dimension_numbers<[1], [0], [0], [1], [0, 0, 1, 1], [], []>} : vector<16x16xbf16>, vector<16x16xbf16>, vector<16x16xf32> -> vector<16x16xf32>
    %965 = arith.addf %956, %964 : vector<16x16xf32>
    %c8_705 = arith.constant 8 : index
    %c0_706 = arith.constant 0 : index
    %c0_707 = arith.constant 0 : index
    %966 = vector.load %arg4[%c8_705, %c0_706, %c0_707] : memref<9x1x16xbf16, #tpu.memory_space<vmem>>, vector<1x1x16xbf16>
    %967 = vector.shape_cast %966 : vector<1x1x16xbf16> to vector<1x16xbf16>
    %968 = vector.extract_strided_slice %894 {offsets = [0, 10], sizes = [16, 16], strides = [1, 1]} : vector<16x26xbf16> to vector<16x16xbf16>
    %969 = vector.broadcast %967 : vector<1x16xbf16> to vector<16x16xbf16>
    %970 = arith.mulf %968, %969 : vector<16x16xbf16>
    %c8_708 = arith.constant 8 : index
    %c0_709 = arith.constant 0 : index
    %c0_710 = arith.constant 0 : index
    %971 = vector.load %arg31[%c8_708, %c0_709, %c0_710] : memref<9x16x16xbf16, #tpu.memory_space<vmem>>, vector<1x16x16xbf16>
    %972 = vector.shape_cast %971 : vector<1x16x16xbf16> to vector<16x16xbf16>
    %cst_711 = arith.constant dense<0.000000e+00> : vector<16x16xf32>
    %973 = tpu.matmul %972, %970, %cst_711 {dimension_numbers = #tpu.dot_dimension_numbers<[1], [0], [0], [1], [0, 0, 1, 1], [], []>} : vector<16x16xbf16>, vector<16x16xbf16>, vector<16x16xf32> -> vector<16x16xf32>
    %974 = arith.addf %965, %973 : vector<16x16xf32>
    %c0_712 = arith.constant 0 : index
    %c0_713 = arith.constant 0 : index
    %975 = vector.load %arg32[%c0_712, %c0_713] : memref<16x1xf32, #tpu.memory_space<vmem>>, vector<16x1xf32>
    %976 = vector.broadcast %975 : vector<16x1xf32> to vector<16x16xf32>
    %977 = arith.addf %974, %976 : vector<16x16xf32>
    %cst_714 = arith.constant 0.000000e+00 : f32
    %978 = vector.broadcast %cst_714 : f32 to vector<16x16xf32>
    %979 = arith.maximumf %977, %978 : vector<16x16xf32>
    %980 = arith.truncf %979 : vector<16x16xf32> to vector<16x16xbf16>
    %c0_715 = arith.constant 0 : index
    %c0_716 = arith.constant 0 : index
    %981 = vector.load %arg10[%c0_715, %c0_716] : memref<16x64xbf16, #tpu.memory_space<vmem>>, vector<16x64xbf16>
    %cst_717 = arith.constant dense<0.000000e+00> : vector<16x64xf32>
    %982 = tpu.matmul %980, %981, %cst_717 {dimension_numbers = #tpu.dot_dimension_numbers<[1], [0], [0], [1], [0, 0, 1, 1], [], []>} : vector<16x16xbf16>, vector<16x64xbf16>, vector<16x64xf32> -> vector<16x64xf32>
    %983 = arith.truncf %982 : vector<16x64xf32> to vector<16x64xbf16>
    %cst_718 = arith.constant 0.000000e+00 : bf16
    %984 = vector.broadcast %cst_718 : bf16 to vector<16x9xbf16>
    %985 = tpu.concatenate %984, %364, %984 in 1 : vector<16x9xbf16>, vector<16x64xbf16>, vector<16x9xbf16> -> vector<16x82xbf16>
    %cst_719 = arith.constant 0.000000e+00 : bf16
    %986 = vector.broadcast %cst_719 : bf16 to vector<16x9xbf16>
    %987 = tpu.concatenate %986, %983, %986 in 1 : vector<16x9xbf16>, vector<16x64xbf16>, vector<16x9xbf16> -> vector<16x82xbf16>
    %c0_720 = arith.constant 0 : index
    %c0_721 = arith.constant 0 : index
    %c0_722 = arith.constant 0 : index
    %988 = vector.load %arg3[%c0_720, %c0_721, %c0_722] : memref<9x1x64xbf16, #tpu.memory_space<vmem>>, vector<1x1x64xbf16>
    %989 = vector.shape_cast %988 : vector<1x1x64xbf16> to vector<1x64xbf16>
    %990 = vector.extract_strided_slice %985 {offsets = [0, 0], sizes = [16, 64], strides = [1, 1]} : vector<16x82xbf16> to vector<16x64xbf16>
    %991 = vector.broadcast %989 : vector<1x64xbf16> to vector<16x64xbf16>
    %992 = arith.mulf %990, %991 : vector<16x64xbf16>
    %c0_723 = arith.constant 0 : index
    %c0_724 = arith.constant 0 : index
    %c0_725 = arith.constant 0 : index
    %993 = vector.load %arg33[%c0_723, %c0_724, %c0_725] : memref<9x8x16xbf16, #tpu.memory_space<vmem>>, vector<1x8x16xbf16>
    %994 = vector.shape_cast %993 : vector<1x8x16xbf16> to vector<8x16xbf16>
    %cst_726 = arith.constant dense<0.000000e+00> : vector<8x64xf32>
    %995 = tpu.matmul %994, %992, %cst_726 {dimension_numbers = #tpu.dot_dimension_numbers<[1], [0], [0], [1], [0, 0, 1, 1], [], []>} : vector<8x16xbf16>, vector<16x64xbf16>, vector<8x64xf32> -> vector<8x64xf32>
    %996 = vector.extract_strided_slice %987 {offsets = [0, 0], sizes = [16, 64], strides = [1, 1]} : vector<16x82xbf16> to vector<16x64xbf16>
    %997 = vector.broadcast %989 : vector<1x64xbf16> to vector<16x64xbf16>
    %998 = arith.mulf %996, %997 : vector<16x64xbf16>
    %c0_727 = arith.constant 0 : index
    %c0_728 = arith.constant 0 : index
    %c0_729 = arith.constant 0 : index
    %999 = vector.load %arg34[%c0_727, %c0_728, %c0_729] : memref<9x8x16xbf16, #tpu.memory_space<vmem>>, vector<1x8x16xbf16>
    %1000 = vector.shape_cast %999 : vector<1x8x16xbf16> to vector<8x16xbf16>
    %cst_730 = arith.constant dense<0.000000e+00> : vector<8x64xf32>
    %1001 = tpu.matmul %1000, %998, %cst_730 {dimension_numbers = #tpu.dot_dimension_numbers<[1], [0], [0], [1], [0, 0, 1, 1], [], []>} : vector<8x16xbf16>, vector<16x64xbf16>, vector<8x64xf32> -> vector<8x64xf32>
    %1002 = arith.addf %995, %1001 : vector<8x64xf32>
    %c1_731 = arith.constant 1 : index
    %c0_732 = arith.constant 0 : index
    %c0_733 = arith.constant 0 : index
    %1003 = vector.load %arg3[%c1_731, %c0_732, %c0_733] : memref<9x1x64xbf16, #tpu.memory_space<vmem>>, vector<1x1x64xbf16>
    %1004 = vector.shape_cast %1003 : vector<1x1x64xbf16> to vector<1x64xbf16>
    %1005 = vector.extract_strided_slice %985 {offsets = [0, 1], sizes = [16, 64], strides = [1, 1]} : vector<16x82xbf16> to vector<16x64xbf16>
    %1006 = vector.broadcast %1004 : vector<1x64xbf16> to vector<16x64xbf16>
    %1007 = arith.mulf %1005, %1006 : vector<16x64xbf16>
    %c1_734 = arith.constant 1 : index
    %c0_735 = arith.constant 0 : index
    %c0_736 = arith.constant 0 : index
    %1008 = vector.load %arg33[%c1_734, %c0_735, %c0_736] : memref<9x8x16xbf16, #tpu.memory_space<vmem>>, vector<1x8x16xbf16>
    %1009 = vector.shape_cast %1008 : vector<1x8x16xbf16> to vector<8x16xbf16>
    %cst_737 = arith.constant dense<0.000000e+00> : vector<8x64xf32>
    %1010 = tpu.matmul %1009, %1007, %cst_737 {dimension_numbers = #tpu.dot_dimension_numbers<[1], [0], [0], [1], [0, 0, 1, 1], [], []>} : vector<8x16xbf16>, vector<16x64xbf16>, vector<8x64xf32> -> vector<8x64xf32>
    %1011 = arith.addf %1002, %1010 : vector<8x64xf32>
    %1012 = vector.extract_strided_slice %987 {offsets = [0, 1], sizes = [16, 64], strides = [1, 1]} : vector<16x82xbf16> to vector<16x64xbf16>
    %1013 = vector.broadcast %1004 : vector<1x64xbf16> to vector<16x64xbf16>
    %1014 = arith.mulf %1012, %1013 : vector<16x64xbf16>
    %c1_738 = arith.constant 1 : index
    %c0_739 = arith.constant 0 : index
    %c0_740 = arith.constant 0 : index
    %1015 = vector.load %arg34[%c1_738, %c0_739, %c0_740] : memref<9x8x16xbf16, #tpu.memory_space<vmem>>, vector<1x8x16xbf16>
    %1016 = vector.shape_cast %1015 : vector<1x8x16xbf16> to vector<8x16xbf16>
    %cst_741 = arith.constant dense<0.000000e+00> : vector<8x64xf32>
    %1017 = tpu.matmul %1016, %1014, %cst_741 {dimension_numbers = #tpu.dot_dimension_numbers<[1], [0], [0], [1], [0, 0, 1, 1], [], []>} : vector<8x16xbf16>, vector<16x64xbf16>, vector<8x64xf32> -> vector<8x64xf32>
    %1018 = arith.addf %1011, %1017 : vector<8x64xf32>
    %c2_742 = arith.constant 2 : index
    %c0_743 = arith.constant 0 : index
    %c0_744 = arith.constant 0 : index
    %1019 = vector.load %arg3[%c2_742, %c0_743, %c0_744] : memref<9x1x64xbf16, #tpu.memory_space<vmem>>, vector<1x1x64xbf16>
    %1020 = vector.shape_cast %1019 : vector<1x1x64xbf16> to vector<1x64xbf16>
    %1021 = vector.extract_strided_slice %985 {offsets = [0, 2], sizes = [16, 64], strides = [1, 1]} : vector<16x82xbf16> to vector<16x64xbf16>
    %1022 = vector.broadcast %1020 : vector<1x64xbf16> to vector<16x64xbf16>
    %1023 = arith.mulf %1021, %1022 : vector<16x64xbf16>
    %c2_745 = arith.constant 2 : index
    %c0_746 = arith.constant 0 : index
    %c0_747 = arith.constant 0 : index
    %1024 = vector.load %arg33[%c2_745, %c0_746, %c0_747] : memref<9x8x16xbf16, #tpu.memory_space<vmem>>, vector<1x8x16xbf16>
    %1025 = vector.shape_cast %1024 : vector<1x8x16xbf16> to vector<8x16xbf16>
    %cst_748 = arith.constant dense<0.000000e+00> : vector<8x64xf32>
    %1026 = tpu.matmul %1025, %1023, %cst_748 {dimension_numbers = #tpu.dot_dimension_numbers<[1], [0], [0], [1], [0, 0, 1, 1], [], []>} : vector<8x16xbf16>, vector<16x64xbf16>, vector<8x64xf32> -> vector<8x64xf32>
    %1027 = arith.addf %1018, %1026 : vector<8x64xf32>
    %1028 = vector.extract_strided_slice %987 {offsets = [0, 2], sizes = [16, 64], strides = [1, 1]} : vector<16x82xbf16> to vector<16x64xbf16>
    %1029 = vector.broadcast %1020 : vector<1x64xbf16> to vector<16x64xbf16>
    %1030 = arith.mulf %1028, %1029 : vector<16x64xbf16>
    %c2_749 = arith.constant 2 : index
    %c0_750 = arith.constant 0 : index
    %c0_751 = arith.constant 0 : index
    %1031 = vector.load %arg34[%c2_749, %c0_750, %c0_751] : memref<9x8x16xbf16, #tpu.memory_space<vmem>>, vector<1x8x16xbf16>
    %1032 = vector.shape_cast %1031 : vector<1x8x16xbf16> to vector<8x16xbf16>
    %cst_752 = arith.constant dense<0.000000e+00> : vector<8x64xf32>
    %1033 = tpu.matmul %1032, %1030, %cst_752 {dimension_numbers = #tpu.dot_dimension_numbers<[1], [0], [0], [1], [0, 0, 1, 1], [], []>} : vector<8x16xbf16>, vector<16x64xbf16>, vector<8x64xf32> -> vector<8x64xf32>
    %1034 = arith.addf %1027, %1033 : vector<8x64xf32>
    %c3_753 = arith.constant 3 : index
    %c0_754 = arith.constant 0 : index
    %c0_755 = arith.constant 0 : index
    %1035 = vector.load %arg3[%c3_753, %c0_754, %c0_755] : memref<9x1x64xbf16, #tpu.memory_space<vmem>>, vector<1x1x64xbf16>
    %1036 = vector.shape_cast %1035 : vector<1x1x64xbf16> to vector<1x64xbf16>
    %1037 = vector.extract_strided_slice %985 {offsets = [0, 8], sizes = [16, 64], strides = [1, 1]} : vector<16x82xbf16> to vector<16x64xbf16>
    %1038 = vector.broadcast %1036 : vector<1x64xbf16> to vector<16x64xbf16>
    %1039 = arith.mulf %1037, %1038 : vector<16x64xbf16>
    %c3_756 = arith.constant 3 : index
    %c0_757 = arith.constant 0 : index
    %c0_758 = arith.constant 0 : index
    %1040 = vector.load %arg33[%c3_756, %c0_757, %c0_758] : memref<9x8x16xbf16, #tpu.memory_space<vmem>>, vector<1x8x16xbf16>
    %1041 = vector.shape_cast %1040 : vector<1x8x16xbf16> to vector<8x16xbf16>
    %cst_759 = arith.constant dense<0.000000e+00> : vector<8x64xf32>
    %1042 = tpu.matmul %1041, %1039, %cst_759 {dimension_numbers = #tpu.dot_dimension_numbers<[1], [0], [0], [1], [0, 0, 1, 1], [], []>} : vector<8x16xbf16>, vector<16x64xbf16>, vector<8x64xf32> -> vector<8x64xf32>
    %1043 = arith.addf %1034, %1042 : vector<8x64xf32>
    %1044 = vector.extract_strided_slice %987 {offsets = [0, 8], sizes = [16, 64], strides = [1, 1]} : vector<16x82xbf16> to vector<16x64xbf16>
    %1045 = vector.broadcast %1036 : vector<1x64xbf16> to vector<16x64xbf16>
    %1046 = arith.mulf %1044, %1045 : vector<16x64xbf16>
    %c3_760 = arith.constant 3 : index
    %c0_761 = arith.constant 0 : index
    %c0_762 = arith.constant 0 : index
    %1047 = vector.load %arg34[%c3_760, %c0_761, %c0_762] : memref<9x8x16xbf16, #tpu.memory_space<vmem>>, vector<1x8x16xbf16>
    %1048 = vector.shape_cast %1047 : vector<1x8x16xbf16> to vector<8x16xbf16>
    %cst_763 = arith.constant dense<0.000000e+00> : vector<8x64xf32>
    %1049 = tpu.matmul %1048, %1046, %cst_763 {dimension_numbers = #tpu.dot_dimension_numbers<[1], [0], [0], [1], [0, 0, 1, 1], [], []>} : vector<8x16xbf16>, vector<16x64xbf16>, vector<8x64xf32> -> vector<8x64xf32>
    %1050 = arith.addf %1043, %1049 : vector<8x64xf32>
    %c4_764 = arith.constant 4 : index
    %c0_765 = arith.constant 0 : index
    %c0_766 = arith.constant 0 : index
    %1051 = vector.load %arg3[%c4_764, %c0_765, %c0_766] : memref<9x1x64xbf16, #tpu.memory_space<vmem>>, vector<1x1x64xbf16>
    %1052 = vector.shape_cast %1051 : vector<1x1x64xbf16> to vector<1x64xbf16>
    %1053 = vector.extract_strided_slice %985 {offsets = [0, 9], sizes = [16, 64], strides = [1, 1]} : vector<16x82xbf16> to vector<16x64xbf16>
    %1054 = vector.broadcast %1052 : vector<1x64xbf16> to vector<16x64xbf16>
    %1055 = arith.mulf %1053, %1054 : vector<16x64xbf16>
    %c4_767 = arith.constant 4 : index
    %c0_768 = arith.constant 0 : index
    %c0_769 = arith.constant 0 : index
    %1056 = vector.load %arg33[%c4_767, %c0_768, %c0_769] : memref<9x8x16xbf16, #tpu.memory_space<vmem>>, vector<1x8x16xbf16>
    %1057 = vector.shape_cast %1056 : vector<1x8x16xbf16> to vector<8x16xbf16>
    %cst_770 = arith.constant dense<0.000000e+00> : vector<8x64xf32>
    %1058 = tpu.matmul %1057, %1055, %cst_770 {dimension_numbers = #tpu.dot_dimension_numbers<[1], [0], [0], [1], [0, 0, 1, 1], [], []>} : vector<8x16xbf16>, vector<16x64xbf16>, vector<8x64xf32> -> vector<8x64xf32>
    %1059 = arith.addf %1050, %1058 : vector<8x64xf32>
    %1060 = vector.extract_strided_slice %987 {offsets = [0, 9], sizes = [16, 64], strides = [1, 1]} : vector<16x82xbf16> to vector<16x64xbf16>
    %1061 = vector.broadcast %1052 : vector<1x64xbf16> to vector<16x64xbf16>
    %1062 = arith.mulf %1060, %1061 : vector<16x64xbf16>
    %c4_771 = arith.constant 4 : index
    %c0_772 = arith.constant 0 : index
    %c0_773 = arith.constant 0 : index
    %1063 = vector.load %arg34[%c4_771, %c0_772, %c0_773] : memref<9x8x16xbf16, #tpu.memory_space<vmem>>, vector<1x8x16xbf16>
    %1064 = vector.shape_cast %1063 : vector<1x8x16xbf16> to vector<8x16xbf16>
    %cst_774 = arith.constant dense<0.000000e+00> : vector<8x64xf32>
    %1065 = tpu.matmul %1064, %1062, %cst_774 {dimension_numbers = #tpu.dot_dimension_numbers<[1], [0], [0], [1], [0, 0, 1, 1], [], []>} : vector<8x16xbf16>, vector<16x64xbf16>, vector<8x64xf32> -> vector<8x64xf32>
    %1066 = arith.addf %1059, %1065 : vector<8x64xf32>
    %c5_775 = arith.constant 5 : index
    %c0_776 = arith.constant 0 : index
    %c0_777 = arith.constant 0 : index
    %1067 = vector.load %arg3[%c5_775, %c0_776, %c0_777] : memref<9x1x64xbf16, #tpu.memory_space<vmem>>, vector<1x1x64xbf16>
    %1068 = vector.shape_cast %1067 : vector<1x1x64xbf16> to vector<1x64xbf16>
    %1069 = vector.extract_strided_slice %985 {offsets = [0, 10], sizes = [16, 64], strides = [1, 1]} : vector<16x82xbf16> to vector<16x64xbf16>
    %1070 = vector.broadcast %1068 : vector<1x64xbf16> to vector<16x64xbf16>
    %1071 = arith.mulf %1069, %1070 : vector<16x64xbf16>
    %c5_778 = arith.constant 5 : index
    %c0_779 = arith.constant 0 : index
    %c0_780 = arith.constant 0 : index
    %1072 = vector.load %arg33[%c5_778, %c0_779, %c0_780] : memref<9x8x16xbf16, #tpu.memory_space<vmem>>, vector<1x8x16xbf16>
    %1073 = vector.shape_cast %1072 : vector<1x8x16xbf16> to vector<8x16xbf16>
    %cst_781 = arith.constant dense<0.000000e+00> : vector<8x64xf32>
    %1074 = tpu.matmul %1073, %1071, %cst_781 {dimension_numbers = #tpu.dot_dimension_numbers<[1], [0], [0], [1], [0, 0, 1, 1], [], []>} : vector<8x16xbf16>, vector<16x64xbf16>, vector<8x64xf32> -> vector<8x64xf32>
    %1075 = arith.addf %1066, %1074 : vector<8x64xf32>
    %1076 = vector.extract_strided_slice %987 {offsets = [0, 10], sizes = [16, 64], strides = [1, 1]} : vector<16x82xbf16> to vector<16x64xbf16>
    %1077 = vector.broadcast %1068 : vector<1x64xbf16> to vector<16x64xbf16>
    %1078 = arith.mulf %1076, %1077 : vector<16x64xbf16>
    %c5_782 = arith.constant 5 : index
    %c0_783 = arith.constant 0 : index
    %c0_784 = arith.constant 0 : index
    %1079 = vector.load %arg34[%c5_782, %c0_783, %c0_784] : memref<9x8x16xbf16, #tpu.memory_space<vmem>>, vector<1x8x16xbf16>
    %1080 = vector.shape_cast %1079 : vector<1x8x16xbf16> to vector<8x16xbf16>
    %cst_785 = arith.constant dense<0.000000e+00> : vector<8x64xf32>
    %1081 = tpu.matmul %1080, %1078, %cst_785 {dimension_numbers = #tpu.dot_dimension_numbers<[1], [0], [0], [1], [0, 0, 1, 1], [], []>} : vector<8x16xbf16>, vector<16x64xbf16>, vector<8x64xf32> -> vector<8x64xf32>
    %1082 = arith.addf %1075, %1081 : vector<8x64xf32>
    %c6_786 = arith.constant 6 : index
    %c0_787 = arith.constant 0 : index
    %c0_788 = arith.constant 0 : index
    %1083 = vector.load %arg3[%c6_786, %c0_787, %c0_788] : memref<9x1x64xbf16, #tpu.memory_space<vmem>>, vector<1x1x64xbf16>
    %1084 = vector.shape_cast %1083 : vector<1x1x64xbf16> to vector<1x64xbf16>
    %1085 = vector.extract_strided_slice %985 {offsets = [0, 16], sizes = [16, 64], strides = [1, 1]} : vector<16x82xbf16> to vector<16x64xbf16>
    %1086 = vector.broadcast %1084 : vector<1x64xbf16> to vector<16x64xbf16>
    %1087 = arith.mulf %1085, %1086 : vector<16x64xbf16>
    %c6_789 = arith.constant 6 : index
    %c0_790 = arith.constant 0 : index
    %c0_791 = arith.constant 0 : index
    %1088 = vector.load %arg33[%c6_789, %c0_790, %c0_791] : memref<9x8x16xbf16, #tpu.memory_space<vmem>>, vector<1x8x16xbf16>
    %1089 = vector.shape_cast %1088 : vector<1x8x16xbf16> to vector<8x16xbf16>
    %cst_792 = arith.constant dense<0.000000e+00> : vector<8x64xf32>
    %1090 = tpu.matmul %1089, %1087, %cst_792 {dimension_numbers = #tpu.dot_dimension_numbers<[1], [0], [0], [1], [0, 0, 1, 1], [], []>} : vector<8x16xbf16>, vector<16x64xbf16>, vector<8x64xf32> -> vector<8x64xf32>
    %1091 = arith.addf %1082, %1090 : vector<8x64xf32>
    %1092 = vector.extract_strided_slice %987 {offsets = [0, 16], sizes = [16, 64], strides = [1, 1]} : vector<16x82xbf16> to vector<16x64xbf16>
    %1093 = vector.broadcast %1084 : vector<1x64xbf16> to vector<16x64xbf16>
    %1094 = arith.mulf %1092, %1093 : vector<16x64xbf16>
    %c6_793 = arith.constant 6 : index
    %c0_794 = arith.constant 0 : index
    %c0_795 = arith.constant 0 : index
    %1095 = vector.load %arg34[%c6_793, %c0_794, %c0_795] : memref<9x8x16xbf16, #tpu.memory_space<vmem>>, vector<1x8x16xbf16>
    %1096 = vector.shape_cast %1095 : vector<1x8x16xbf16> to vector<8x16xbf16>
    %cst_796 = arith.constant dense<0.000000e+00> : vector<8x64xf32>
    %1097 = tpu.matmul %1096, %1094, %cst_796 {dimension_numbers = #tpu.dot_dimension_numbers<[1], [0], [0], [1], [0, 0, 1, 1], [], []>} : vector<8x16xbf16>, vector<16x64xbf16>, vector<8x64xf32> -> vector<8x64xf32>
    %1098 = arith.addf %1091, %1097 : vector<8x64xf32>
    %c7_797 = arith.constant 7 : index
    %c0_798 = arith.constant 0 : index
    %c0_799 = arith.constant 0 : index
    %1099 = vector.load %arg3[%c7_797, %c0_798, %c0_799] : memref<9x1x64xbf16, #tpu.memory_space<vmem>>, vector<1x1x64xbf16>
    %1100 = vector.shape_cast %1099 : vector<1x1x64xbf16> to vector<1x64xbf16>
    %1101 = vector.extract_strided_slice %985 {offsets = [0, 17], sizes = [16, 64], strides = [1, 1]} : vector<16x82xbf16> to vector<16x64xbf16>
    %1102 = vector.broadcast %1100 : vector<1x64xbf16> to vector<16x64xbf16>
    %1103 = arith.mulf %1101, %1102 : vector<16x64xbf16>
    %c7_800 = arith.constant 7 : index
    %c0_801 = arith.constant 0 : index
    %c0_802 = arith.constant 0 : index
    %1104 = vector.load %arg33[%c7_800, %c0_801, %c0_802] : memref<9x8x16xbf16, #tpu.memory_space<vmem>>, vector<1x8x16xbf16>
    %1105 = vector.shape_cast %1104 : vector<1x8x16xbf16> to vector<8x16xbf16>
    %cst_803 = arith.constant dense<0.000000e+00> : vector<8x64xf32>
    %1106 = tpu.matmul %1105, %1103, %cst_803 {dimension_numbers = #tpu.dot_dimension_numbers<[1], [0], [0], [1], [0, 0, 1, 1], [], []>} : vector<8x16xbf16>, vector<16x64xbf16>, vector<8x64xf32> -> vector<8x64xf32>
    %1107 = arith.addf %1098, %1106 : vector<8x64xf32>
    %1108 = vector.extract_strided_slice %987 {offsets = [0, 17], sizes = [16, 64], strides = [1, 1]} : vector<16x82xbf16> to vector<16x64xbf16>
    %1109 = vector.broadcast %1100 : vector<1x64xbf16> to vector<16x64xbf16>
    %1110 = arith.mulf %1108, %1109 : vector<16x64xbf16>
    %c7_804 = arith.constant 7 : index
    %c0_805 = arith.constant 0 : index
    %c0_806 = arith.constant 0 : index
    %1111 = vector.load %arg34[%c7_804, %c0_805, %c0_806] : memref<9x8x16xbf16, #tpu.memory_space<vmem>>, vector<1x8x16xbf16>
    %1112 = vector.shape_cast %1111 : vector<1x8x16xbf16> to vector<8x16xbf16>
    %cst_807 = arith.constant dense<0.000000e+00> : vector<8x64xf32>
    %1113 = tpu.matmul %1112, %1110, %cst_807 {dimension_numbers = #tpu.dot_dimension_numbers<[1], [0], [0], [1], [0, 0, 1, 1], [], []>} : vector<8x16xbf16>, vector<16x64xbf16>, vector<8x64xf32> -> vector<8x64xf32>
    %1114 = arith.addf %1107, %1113 : vector<8x64xf32>
    %c8_808 = arith.constant 8 : index
    %c0_809 = arith.constant 0 : index
    %c0_810 = arith.constant 0 : index
    %1115 = vector.load %arg3[%c8_808, %c0_809, %c0_810] : memref<9x1x64xbf16, #tpu.memory_space<vmem>>, vector<1x1x64xbf16>
    %1116 = vector.shape_cast %1115 : vector<1x1x64xbf16> to vector<1x64xbf16>
    %1117 = vector.extract_strided_slice %985 {offsets = [0, 18], sizes = [16, 64], strides = [1, 1]} : vector<16x82xbf16> to vector<16x64xbf16>
    %1118 = vector.broadcast %1116 : vector<1x64xbf16> to vector<16x64xbf16>
    %1119 = arith.mulf %1117, %1118 : vector<16x64xbf16>
    %c8_811 = arith.constant 8 : index
    %c0_812 = arith.constant 0 : index
    %c0_813 = arith.constant 0 : index
    %1120 = vector.load %arg33[%c8_811, %c0_812, %c0_813] : memref<9x8x16xbf16, #tpu.memory_space<vmem>>, vector<1x8x16xbf16>
    %1121 = vector.shape_cast %1120 : vector<1x8x16xbf16> to vector<8x16xbf16>
    %cst_814 = arith.constant dense<0.000000e+00> : vector<8x64xf32>
    %1122 = tpu.matmul %1121, %1119, %cst_814 {dimension_numbers = #tpu.dot_dimension_numbers<[1], [0], [0], [1], [0, 0, 1, 1], [], []>} : vector<8x16xbf16>, vector<16x64xbf16>, vector<8x64xf32> -> vector<8x64xf32>
    %1123 = arith.addf %1114, %1122 : vector<8x64xf32>
    %1124 = vector.extract_strided_slice %987 {offsets = [0, 18], sizes = [16, 64], strides = [1, 1]} : vector<16x82xbf16> to vector<16x64xbf16>
    %1125 = vector.broadcast %1116 : vector<1x64xbf16> to vector<16x64xbf16>
    %1126 = arith.mulf %1124, %1125 : vector<16x64xbf16>
    %c8_815 = arith.constant 8 : index
    %c0_816 = arith.constant 0 : index
    %c0_817 = arith.constant 0 : index
    %1127 = vector.load %arg34[%c8_815, %c0_816, %c0_817] : memref<9x8x16xbf16, #tpu.memory_space<vmem>>, vector<1x8x16xbf16>
    %1128 = vector.shape_cast %1127 : vector<1x8x16xbf16> to vector<8x16xbf16>
    %cst_818 = arith.constant dense<0.000000e+00> : vector<8x64xf32>
    %1129 = tpu.matmul %1128, %1126, %cst_818 {dimension_numbers = #tpu.dot_dimension_numbers<[1], [0], [0], [1], [0, 0, 1, 1], [], []>} : vector<8x16xbf16>, vector<16x64xbf16>, vector<8x64xf32> -> vector<8x64xf32>
    %1130 = arith.addf %1123, %1129 : vector<8x64xf32>
    %c0_819 = arith.constant 0 : index
    %c0_820 = arith.constant 0 : index
    %1131 = vector.load %arg35[%c0_819, %c0_820] : memref<8x1xf32, #tpu.memory_space<vmem>>, vector<8x1xf32>
    %1132 = vector.broadcast %1131 : vector<8x1xf32> to vector<8x64xf32>
    %1133 = arith.addf %1130, %1132 : vector<8x64xf32>
    %cst_821 = arith.constant 0.000000e+00 : f32
    %1134 = vector.broadcast %cst_821 : f32 to vector<8x64xf32>
    %1135 = arith.maximumf %1133, %1134 : vector<8x64xf32>
    %1136 = arith.truncf %1135 : vector<8x64xf32> to vector<8x64xbf16>
    %cst_822 = arith.constant 0.000000e+00 : bf16
    %1137 = vector.broadcast %cst_822 : bf16 to vector<8x9xbf16>
    %1138 = tpu.concatenate %1137, %1136, %1137 in 1 : vector<8x9xbf16>, vector<8x64xbf16>, vector<8x9xbf16> -> vector<8x82xbf16>
    %c0_823 = arith.constant 0 : index
    %c0_824 = arith.constant 0 : index
    %c0_825 = arith.constant 0 : index
    %1139 = vector.load %arg3[%c0_823, %c0_824, %c0_825] : memref<9x1x64xbf16, #tpu.memory_space<vmem>>, vector<1x1x64xbf16>
    %1140 = vector.shape_cast %1139 : vector<1x1x64xbf16> to vector<1x64xbf16>
    %1141 = vector.extract_strided_slice %1138 {offsets = [0, 0], sizes = [8, 64], strides = [1, 1]} : vector<8x82xbf16> to vector<8x64xbf16>
    %1142 = vector.broadcast %1140 : vector<1x64xbf16> to vector<8x64xbf16>
    %1143 = arith.mulf %1141, %1142 : vector<8x64xbf16>
    %c0_826 = arith.constant 0 : index
    %c0_827 = arith.constant 0 : index
    %c0_828 = arith.constant 0 : index
    %1144 = vector.load %arg36[%c0_826, %c0_827, %c0_828] : memref<9x8x8xbf16, #tpu.memory_space<vmem>>, vector<1x8x8xbf16>
    %1145 = vector.shape_cast %1144 : vector<1x8x8xbf16> to vector<8x8xbf16>
    %cst_829 = arith.constant dense<0.000000e+00> : vector<8x64xf32>
    %1146 = tpu.matmul %1145, %1143, %cst_829 {dimension_numbers = #tpu.dot_dimension_numbers<[1], [0], [0], [1], [0, 0, 1, 1], [], []>} : vector<8x8xbf16>, vector<8x64xbf16>, vector<8x64xf32> -> vector<8x64xf32>
    %c1_830 = arith.constant 1 : index
    %c0_831 = arith.constant 0 : index
    %c0_832 = arith.constant 0 : index
    %1147 = vector.load %arg3[%c1_830, %c0_831, %c0_832] : memref<9x1x64xbf16, #tpu.memory_space<vmem>>, vector<1x1x64xbf16>
    %1148 = vector.shape_cast %1147 : vector<1x1x64xbf16> to vector<1x64xbf16>
    %1149 = vector.extract_strided_slice %1138 {offsets = [0, 1], sizes = [8, 64], strides = [1, 1]} : vector<8x82xbf16> to vector<8x64xbf16>
    %1150 = vector.broadcast %1148 : vector<1x64xbf16> to vector<8x64xbf16>
    %1151 = arith.mulf %1149, %1150 : vector<8x64xbf16>
    %c1_833 = arith.constant 1 : index
    %c0_834 = arith.constant 0 : index
    %c0_835 = arith.constant 0 : index
    %1152 = vector.load %arg36[%c1_833, %c0_834, %c0_835] : memref<9x8x8xbf16, #tpu.memory_space<vmem>>, vector<1x8x8xbf16>
    %1153 = vector.shape_cast %1152 : vector<1x8x8xbf16> to vector<8x8xbf16>
    %cst_836 = arith.constant dense<0.000000e+00> : vector<8x64xf32>
    %1154 = tpu.matmul %1153, %1151, %cst_836 {dimension_numbers = #tpu.dot_dimension_numbers<[1], [0], [0], [1], [0, 0, 1, 1], [], []>} : vector<8x8xbf16>, vector<8x64xbf16>, vector<8x64xf32> -> vector<8x64xf32>
    %1155 = arith.addf %1146, %1154 : vector<8x64xf32>
    %c2_837 = arith.constant 2 : index
    %c0_838 = arith.constant 0 : index
    %c0_839 = arith.constant 0 : index
    %1156 = vector.load %arg3[%c2_837, %c0_838, %c0_839] : memref<9x1x64xbf16, #tpu.memory_space<vmem>>, vector<1x1x64xbf16>
    %1157 = vector.shape_cast %1156 : vector<1x1x64xbf16> to vector<1x64xbf16>
    %1158 = vector.extract_strided_slice %1138 {offsets = [0, 2], sizes = [8, 64], strides = [1, 1]} : vector<8x82xbf16> to vector<8x64xbf16>
    %1159 = vector.broadcast %1157 : vector<1x64xbf16> to vector<8x64xbf16>
    %1160 = arith.mulf %1158, %1159 : vector<8x64xbf16>
    %c2_840 = arith.constant 2 : index
    %c0_841 = arith.constant 0 : index
    %c0_842 = arith.constant 0 : index
    %1161 = vector.load %arg36[%c2_840, %c0_841, %c0_842] : memref<9x8x8xbf16, #tpu.memory_space<vmem>>, vector<1x8x8xbf16>
    %1162 = vector.shape_cast %1161 : vector<1x8x8xbf16> to vector<8x8xbf16>
    %cst_843 = arith.constant dense<0.000000e+00> : vector<8x64xf32>
    %1163 = tpu.matmul %1162, %1160, %cst_843 {dimension_numbers = #tpu.dot_dimension_numbers<[1], [0], [0], [1], [0, 0, 1, 1], [], []>} : vector<8x8xbf16>, vector<8x64xbf16>, vector<8x64xf32> -> vector<8x64xf32>
    %1164 = arith.addf %1155, %1163 : vector<8x64xf32>
    %c3_844 = arith.constant 3 : index
    %c0_845 = arith.constant 0 : index
    %c0_846 = arith.constant 0 : index
    %1165 = vector.load %arg3[%c3_844, %c0_845, %c0_846] : memref<9x1x64xbf16, #tpu.memory_space<vmem>>, vector<1x1x64xbf16>
    %1166 = vector.shape_cast %1165 : vector<1x1x64xbf16> to vector<1x64xbf16>
    %1167 = vector.extract_strided_slice %1138 {offsets = [0, 8], sizes = [8, 64], strides = [1, 1]} : vector<8x82xbf16> to vector<8x64xbf16>
    %1168 = vector.broadcast %1166 : vector<1x64xbf16> to vector<8x64xbf16>
    %1169 = arith.mulf %1167, %1168 : vector<8x64xbf16>
    %c3_847 = arith.constant 3 : index
    %c0_848 = arith.constant 0 : index
    %c0_849 = arith.constant 0 : index
    %1170 = vector.load %arg36[%c3_847, %c0_848, %c0_849] : memref<9x8x8xbf16, #tpu.memory_space<vmem>>, vector<1x8x8xbf16>
    %1171 = vector.shape_cast %1170 : vector<1x8x8xbf16> to vector<8x8xbf16>
    %cst_850 = arith.constant dense<0.000000e+00> : vector<8x64xf32>
    %1172 = tpu.matmul %1171, %1169, %cst_850 {dimension_numbers = #tpu.dot_dimension_numbers<[1], [0], [0], [1], [0, 0, 1, 1], [], []>} : vector<8x8xbf16>, vector<8x64xbf16>, vector<8x64xf32> -> vector<8x64xf32>
    %1173 = arith.addf %1164, %1172 : vector<8x64xf32>
    %c4_851 = arith.constant 4 : index
    %c0_852 = arith.constant 0 : index
    %c0_853 = arith.constant 0 : index
    %1174 = vector.load %arg3[%c4_851, %c0_852, %c0_853] : memref<9x1x64xbf16, #tpu.memory_space<vmem>>, vector<1x1x64xbf16>
    %1175 = vector.shape_cast %1174 : vector<1x1x64xbf16> to vector<1x64xbf16>
    %1176 = vector.extract_strided_slice %1138 {offsets = [0, 9], sizes = [8, 64], strides = [1, 1]} : vector<8x82xbf16> to vector<8x64xbf16>
    %1177 = vector.broadcast %1175 : vector<1x64xbf16> to vector<8x64xbf16>
    %1178 = arith.mulf %1176, %1177 : vector<8x64xbf16>
    %c4_854 = arith.constant 4 : index
    %c0_855 = arith.constant 0 : index
    %c0_856 = arith.constant 0 : index
    %1179 = vector.load %arg36[%c4_854, %c0_855, %c0_856] : memref<9x8x8xbf16, #tpu.memory_space<vmem>>, vector<1x8x8xbf16>
    %1180 = vector.shape_cast %1179 : vector<1x8x8xbf16> to vector<8x8xbf16>
    %cst_857 = arith.constant dense<0.000000e+00> : vector<8x64xf32>
    %1181 = tpu.matmul %1180, %1178, %cst_857 {dimension_numbers = #tpu.dot_dimension_numbers<[1], [0], [0], [1], [0, 0, 1, 1], [], []>} : vector<8x8xbf16>, vector<8x64xbf16>, vector<8x64xf32> -> vector<8x64xf32>
    %1182 = arith.addf %1173, %1181 : vector<8x64xf32>
    %c5_858 = arith.constant 5 : index
    %c0_859 = arith.constant 0 : index
    %c0_860 = arith.constant 0 : index
    %1183 = vector.load %arg3[%c5_858, %c0_859, %c0_860] : memref<9x1x64xbf16, #tpu.memory_space<vmem>>, vector<1x1x64xbf16>
    %1184 = vector.shape_cast %1183 : vector<1x1x64xbf16> to vector<1x64xbf16>
    %1185 = vector.extract_strided_slice %1138 {offsets = [0, 10], sizes = [8, 64], strides = [1, 1]} : vector<8x82xbf16> to vector<8x64xbf16>
    %1186 = vector.broadcast %1184 : vector<1x64xbf16> to vector<8x64xbf16>
    %1187 = arith.mulf %1185, %1186 : vector<8x64xbf16>
    %c5_861 = arith.constant 5 : index
    %c0_862 = arith.constant 0 : index
    %c0_863 = arith.constant 0 : index
    %1188 = vector.load %arg36[%c5_861, %c0_862, %c0_863] : memref<9x8x8xbf16, #tpu.memory_space<vmem>>, vector<1x8x8xbf16>
    %1189 = vector.shape_cast %1188 : vector<1x8x8xbf16> to vector<8x8xbf16>
    %cst_864 = arith.constant dense<0.000000e+00> : vector<8x64xf32>
    %1190 = tpu.matmul %1189, %1187, %cst_864 {dimension_numbers = #tpu.dot_dimension_numbers<[1], [0], [0], [1], [0, 0, 1, 1], [], []>} : vector<8x8xbf16>, vector<8x64xbf16>, vector<8x64xf32> -> vector<8x64xf32>
    %1191 = arith.addf %1182, %1190 : vector<8x64xf32>
    %c6_865 = arith.constant 6 : index
    %c0_866 = arith.constant 0 : index
    %c0_867 = arith.constant 0 : index
    %1192 = vector.load %arg3[%c6_865, %c0_866, %c0_867] : memref<9x1x64xbf16, #tpu.memory_space<vmem>>, vector<1x1x64xbf16>
    %1193 = vector.shape_cast %1192 : vector<1x1x64xbf16> to vector<1x64xbf16>
    %1194 = vector.extract_strided_slice %1138 {offsets = [0, 16], sizes = [8, 64], strides = [1, 1]} : vector<8x82xbf16> to vector<8x64xbf16>
    %1195 = vector.broadcast %1193 : vector<1x64xbf16> to vector<8x64xbf16>
    %1196 = arith.mulf %1194, %1195 : vector<8x64xbf16>
    %c6_868 = arith.constant 6 : index
    %c0_869 = arith.constant 0 : index
    %c0_870 = arith.constant 0 : index
    %1197 = vector.load %arg36[%c6_868, %c0_869, %c0_870] : memref<9x8x8xbf16, #tpu.memory_space<vmem>>, vector<1x8x8xbf16>
    %1198 = vector.shape_cast %1197 : vector<1x8x8xbf16> to vector<8x8xbf16>
    %cst_871 = arith.constant dense<0.000000e+00> : vector<8x64xf32>
    %1199 = tpu.matmul %1198, %1196, %cst_871 {dimension_numbers = #tpu.dot_dimension_numbers<[1], [0], [0], [1], [0, 0, 1, 1], [], []>} : vector<8x8xbf16>, vector<8x64xbf16>, vector<8x64xf32> -> vector<8x64xf32>
    %1200 = arith.addf %1191, %1199 : vector<8x64xf32>
    %c7_872 = arith.constant 7 : index
    %c0_873 = arith.constant 0 : index
    %c0_874 = arith.constant 0 : index
    %1201 = vector.load %arg3[%c7_872, %c0_873, %c0_874] : memref<9x1x64xbf16, #tpu.memory_space<vmem>>, vector<1x1x64xbf16>
    %1202 = vector.shape_cast %1201 : vector<1x1x64xbf16> to vector<1x64xbf16>
    %1203 = vector.extract_strided_slice %1138 {offsets = [0, 17], sizes = [8, 64], strides = [1, 1]} : vector<8x82xbf16> to vector<8x64xbf16>
    %1204 = vector.broadcast %1202 : vector<1x64xbf16> to vector<8x64xbf16>
    %1205 = arith.mulf %1203, %1204 : vector<8x64xbf16>
    %c7_875 = arith.constant 7 : index
    %c0_876 = arith.constant 0 : index
    %c0_877 = arith.constant 0 : index
    %1206 = vector.load %arg36[%c7_875, %c0_876, %c0_877] : memref<9x8x8xbf16, #tpu.memory_space<vmem>>, vector<1x8x8xbf16>
    %1207 = vector.shape_cast %1206 : vector<1x8x8xbf16> to vector<8x8xbf16>
    %cst_878 = arith.constant dense<0.000000e+00> : vector<8x64xf32>
    %1208 = tpu.matmul %1207, %1205, %cst_878 {dimension_numbers = #tpu.dot_dimension_numbers<[1], [0], [0], [1], [0, 0, 1, 1], [], []>} : vector<8x8xbf16>, vector<8x64xbf16>, vector<8x64xf32> -> vector<8x64xf32>
    %1209 = arith.addf %1200, %1208 : vector<8x64xf32>
    %c8_879 = arith.constant 8 : index
    %c0_880 = arith.constant 0 : index
    %c0_881 = arith.constant 0 : index
    %1210 = vector.load %arg3[%c8_879, %c0_880, %c0_881] : memref<9x1x64xbf16, #tpu.memory_space<vmem>>, vector<1x1x64xbf16>
    %1211 = vector.shape_cast %1210 : vector<1x1x64xbf16> to vector<1x64xbf16>
    %1212 = vector.extract_strided_slice %1138 {offsets = [0, 18], sizes = [8, 64], strides = [1, 1]} : vector<8x82xbf16> to vector<8x64xbf16>
    %1213 = vector.broadcast %1211 : vector<1x64xbf16> to vector<8x64xbf16>
    %1214 = arith.mulf %1212, %1213 : vector<8x64xbf16>
    %c8_882 = arith.constant 8 : index
    %c0_883 = arith.constant 0 : index
    %c0_884 = arith.constant 0 : index
    %1215 = vector.load %arg36[%c8_882, %c0_883, %c0_884] : memref<9x8x8xbf16, #tpu.memory_space<vmem>>, vector<1x8x8xbf16>
    %1216 = vector.shape_cast %1215 : vector<1x8x8xbf16> to vector<8x8xbf16>
    %cst_885 = arith.constant dense<0.000000e+00> : vector<8x64xf32>
    %1217 = tpu.matmul %1216, %1214, %cst_885 {dimension_numbers = #tpu.dot_dimension_numbers<[1], [0], [0], [1], [0, 0, 1, 1], [], []>} : vector<8x8xbf16>, vector<8x64xbf16>, vector<8x64xf32> -> vector<8x64xf32>
    %1218 = arith.addf %1209, %1217 : vector<8x64xf32>
    %c0_886 = arith.constant 0 : index
    %c0_887 = arith.constant 0 : index
    %1219 = vector.load %arg37[%c0_886, %c0_887] : memref<8x1xf32, #tpu.memory_space<vmem>>, vector<8x1xf32>
    %1220 = vector.broadcast %1219 : vector<8x1xf32> to vector<8x64xf32>
    %1221 = arith.addf %1218, %1220 : vector<8x64xf32>
    %cst_888 = arith.constant 0.000000e+00 : f32
    %1222 = vector.broadcast %cst_888 : f32 to vector<8x64xf32>
    %1223 = arith.maximumf %1221, %1222 : vector<8x64xf32>
    %1224 = arith.truncf %1223 : vector<8x64xf32> to vector<8x64xbf16>
    %c0_889 = arith.constant 0 : index
    %c0_890 = arith.constant 0 : index
    %1225 = vector.load %arg11[%c0_889, %c0_890] : memref<64x256xbf16, #tpu.memory_space<vmem>>, vector<64x256xbf16>
    %cst_891 = arith.constant dense<0.000000e+00> : vector<8x256xf32>
    %1226 = tpu.matmul %1224, %1225, %cst_891 {dimension_numbers = #tpu.dot_dimension_numbers<[1], [0], [0], [1], [0, 0, 1, 1], [], []>} : vector<8x64xbf16>, vector<64x256xbf16>, vector<8x256xf32> -> vector<8x256xf32>
    %1227 = arith.truncf %1226 : vector<8x256xf32> to vector<8x256xbf16>
    %cst_892 = arith.constant 0.000000e+00 : bf16
    %1228 = vector.broadcast %cst_892 : bf16 to vector<8x17xbf16>
    %1229 = tpu.concatenate %1228, %178, %1228 in 1 : vector<8x17xbf16>, vector<8x256xbf16>, vector<8x17xbf16> -> vector<8x290xbf16>
    %cst_893 = arith.constant 0.000000e+00 : bf16
    %1230 = vector.broadcast %cst_893 : bf16 to vector<8x17xbf16>
    %1231 = tpu.concatenate %1230, %1227, %1230 in 1 : vector<8x17xbf16>, vector<8x256xbf16>, vector<8x17xbf16> -> vector<8x290xbf16>
    %c0_894 = arith.constant 0 : index
    %c0_895 = arith.constant 0 : index
    %c0_896 = arith.constant 0 : index
    %1232 = vector.load %arg2[%c0_894, %c0_895, %c0_896] : memref<9x1x256xbf16, #tpu.memory_space<vmem>>, vector<1x1x256xbf16>
    %1233 = vector.shape_cast %1232 : vector<1x1x256xbf16> to vector<1x256xbf16>
    %1234 = vector.extract_strided_slice %1229 {offsets = [0, 0], sizes = [8, 256], strides = [1, 1]} : vector<8x290xbf16> to vector<8x256xbf16>
    %1235 = vector.broadcast %1233 : vector<1x256xbf16> to vector<8x256xbf16>
    %1236 = arith.mulf %1234, %1235 : vector<8x256xbf16>
    %c0_897 = arith.constant 0 : index
    %c0_898 = arith.constant 0 : index
    %c0_899 = arith.constant 0 : index
    %1237 = vector.load %arg38[%c0_897, %c0_898, %c0_899] : memref<9x8x8xbf16, #tpu.memory_space<vmem>>, vector<1x8x8xbf16>
    %1238 = vector.shape_cast %1237 : vector<1x8x8xbf16> to vector<8x8xbf16>
    %cst_900 = arith.constant dense<0.000000e+00> : vector<8x256xf32>
    %1239 = tpu.matmul %1238, %1236, %cst_900 {dimension_numbers = #tpu.dot_dimension_numbers<[1], [0], [0], [1], [0, 0, 1, 1], [], []>} : vector<8x8xbf16>, vector<8x256xbf16>, vector<8x256xf32> -> vector<8x256xf32>
    %1240 = vector.extract_strided_slice %1231 {offsets = [0, 0], sizes = [8, 256], strides = [1, 1]} : vector<8x290xbf16> to vector<8x256xbf16>
    %1241 = vector.broadcast %1233 : vector<1x256xbf16> to vector<8x256xbf16>
    %1242 = arith.mulf %1240, %1241 : vector<8x256xbf16>
    %c0_901 = arith.constant 0 : index
    %c0_902 = arith.constant 0 : index
    %c0_903 = arith.constant 0 : index
    %1243 = vector.load %arg39[%c0_901, %c0_902, %c0_903] : memref<9x8x8xbf16, #tpu.memory_space<vmem>>, vector<1x8x8xbf16>
    %1244 = vector.shape_cast %1243 : vector<1x8x8xbf16> to vector<8x8xbf16>
    %cst_904 = arith.constant dense<0.000000e+00> : vector<8x256xf32>
    %1245 = tpu.matmul %1244, %1242, %cst_904 {dimension_numbers = #tpu.dot_dimension_numbers<[1], [0], [0], [1], [0, 0, 1, 1], [], []>} : vector<8x8xbf16>, vector<8x256xbf16>, vector<8x256xf32> -> vector<8x256xf32>
    %1246 = arith.addf %1239, %1245 : vector<8x256xf32>
    %c1_905 = arith.constant 1 : index
    %c0_906 = arith.constant 0 : index
    %c0_907 = arith.constant 0 : index
    %1247 = vector.load %arg2[%c1_905, %c0_906, %c0_907] : memref<9x1x256xbf16, #tpu.memory_space<vmem>>, vector<1x1x256xbf16>
    %1248 = vector.shape_cast %1247 : vector<1x1x256xbf16> to vector<1x256xbf16>
    %1249 = vector.extract_strided_slice %1229 {offsets = [0, 1], sizes = [8, 256], strides = [1, 1]} : vector<8x290xbf16> to vector<8x256xbf16>
    %1250 = vector.broadcast %1248 : vector<1x256xbf16> to vector<8x256xbf16>
    %1251 = arith.mulf %1249, %1250 : vector<8x256xbf16>
    %c1_908 = arith.constant 1 : index
    %c0_909 = arith.constant 0 : index
    %c0_910 = arith.constant 0 : index
    %1252 = vector.load %arg38[%c1_908, %c0_909, %c0_910] : memref<9x8x8xbf16, #tpu.memory_space<vmem>>, vector<1x8x8xbf16>
    %1253 = vector.shape_cast %1252 : vector<1x8x8xbf16> to vector<8x8xbf16>
    %cst_911 = arith.constant dense<0.000000e+00> : vector<8x256xf32>
    %1254 = tpu.matmul %1253, %1251, %cst_911 {dimension_numbers = #tpu.dot_dimension_numbers<[1], [0], [0], [1], [0, 0, 1, 1], [], []>} : vector<8x8xbf16>, vector<8x256xbf16>, vector<8x256xf32> -> vector<8x256xf32>
    %1255 = arith.addf %1246, %1254 : vector<8x256xf32>
    %1256 = vector.extract_strided_slice %1231 {offsets = [0, 1], sizes = [8, 256], strides = [1, 1]} : vector<8x290xbf16> to vector<8x256xbf16>
    %1257 = vector.broadcast %1248 : vector<1x256xbf16> to vector<8x256xbf16>
    %1258 = arith.mulf %1256, %1257 : vector<8x256xbf16>
    %c1_912 = arith.constant 1 : index
    %c0_913 = arith.constant 0 : index
    %c0_914 = arith.constant 0 : index
    %1259 = vector.load %arg39[%c1_912, %c0_913, %c0_914] : memref<9x8x8xbf16, #tpu.memory_space<vmem>>, vector<1x8x8xbf16>
    %1260 = vector.shape_cast %1259 : vector<1x8x8xbf16> to vector<8x8xbf16>
    %cst_915 = arith.constant dense<0.000000e+00> : vector<8x256xf32>
    %1261 = tpu.matmul %1260, %1258, %cst_915 {dimension_numbers = #tpu.dot_dimension_numbers<[1], [0], [0], [1], [0, 0, 1, 1], [], []>} : vector<8x8xbf16>, vector<8x256xbf16>, vector<8x256xf32> -> vector<8x256xf32>
    %1262 = arith.addf %1255, %1261 : vector<8x256xf32>
    %c2_916 = arith.constant 2 : index
    %c0_917 = arith.constant 0 : index
    %c0_918 = arith.constant 0 : index
    %1263 = vector.load %arg2[%c2_916, %c0_917, %c0_918] : memref<9x1x256xbf16, #tpu.memory_space<vmem>>, vector<1x1x256xbf16>
    %1264 = vector.shape_cast %1263 : vector<1x1x256xbf16> to vector<1x256xbf16>
    %1265 = vector.extract_strided_slice %1229 {offsets = [0, 2], sizes = [8, 256], strides = [1, 1]} : vector<8x290xbf16> to vector<8x256xbf16>
    %1266 = vector.broadcast %1264 : vector<1x256xbf16> to vector<8x256xbf16>
    %1267 = arith.mulf %1265, %1266 : vector<8x256xbf16>
    %c2_919 = arith.constant 2 : index
    %c0_920 = arith.constant 0 : index
    %c0_921 = arith.constant 0 : index
    %1268 = vector.load %arg38[%c2_919, %c0_920, %c0_921] : memref<9x8x8xbf16, #tpu.memory_space<vmem>>, vector<1x8x8xbf16>
    %1269 = vector.shape_cast %1268 : vector<1x8x8xbf16> to vector<8x8xbf16>
    %cst_922 = arith.constant dense<0.000000e+00> : vector<8x256xf32>
    %1270 = tpu.matmul %1269, %1267, %cst_922 {dimension_numbers = #tpu.dot_dimension_numbers<[1], [0], [0], [1], [0, 0, 1, 1], [], []>} : vector<8x8xbf16>, vector<8x256xbf16>, vector<8x256xf32> -> vector<8x256xf32>
    %1271 = arith.addf %1262, %1270 : vector<8x256xf32>
    %1272 = vector.extract_strided_slice %1231 {offsets = [0, 2], sizes = [8, 256], strides = [1, 1]} : vector<8x290xbf16> to vector<8x256xbf16>
    %1273 = vector.broadcast %1264 : vector<1x256xbf16> to vector<8x256xbf16>
    %1274 = arith.mulf %1272, %1273 : vector<8x256xbf16>
    %c2_923 = arith.constant 2 : index
    %c0_924 = arith.constant 0 : index
    %c0_925 = arith.constant 0 : index
    %1275 = vector.load %arg39[%c2_923, %c0_924, %c0_925] : memref<9x8x8xbf16, #tpu.memory_space<vmem>>, vector<1x8x8xbf16>
    %1276 = vector.shape_cast %1275 : vector<1x8x8xbf16> to vector<8x8xbf16>
    %cst_926 = arith.constant dense<0.000000e+00> : vector<8x256xf32>
    %1277 = tpu.matmul %1276, %1274, %cst_926 {dimension_numbers = #tpu.dot_dimension_numbers<[1], [0], [0], [1], [0, 0, 1, 1], [], []>} : vector<8x8xbf16>, vector<8x256xbf16>, vector<8x256xf32> -> vector<8x256xf32>
    %1278 = arith.addf %1271, %1277 : vector<8x256xf32>
    %c3_927 = arith.constant 3 : index
    %c0_928 = arith.constant 0 : index
    %c0_929 = arith.constant 0 : index
    %1279 = vector.load %arg2[%c3_927, %c0_928, %c0_929] : memref<9x1x256xbf16, #tpu.memory_space<vmem>>, vector<1x1x256xbf16>
    %1280 = vector.shape_cast %1279 : vector<1x1x256xbf16> to vector<1x256xbf16>
    %1281 = vector.extract_strided_slice %1229 {offsets = [0, 16], sizes = [8, 256], strides = [1, 1]} : vector<8x290xbf16> to vector<8x256xbf16>
    %1282 = vector.broadcast %1280 : vector<1x256xbf16> to vector<8x256xbf16>
    %1283 = arith.mulf %1281, %1282 : vector<8x256xbf16>
    %c3_930 = arith.constant 3 : index
    %c0_931 = arith.constant 0 : index
    %c0_932 = arith.constant 0 : index
    %1284 = vector.load %arg38[%c3_930, %c0_931, %c0_932] : memref<9x8x8xbf16, #tpu.memory_space<vmem>>, vector<1x8x8xbf16>
    %1285 = vector.shape_cast %1284 : vector<1x8x8xbf16> to vector<8x8xbf16>
    %cst_933 = arith.constant dense<0.000000e+00> : vector<8x256xf32>
    %1286 = tpu.matmul %1285, %1283, %cst_933 {dimension_numbers = #tpu.dot_dimension_numbers<[1], [0], [0], [1], [0, 0, 1, 1], [], []>} : vector<8x8xbf16>, vector<8x256xbf16>, vector<8x256xf32> -> vector<8x256xf32>
    %1287 = arith.addf %1278, %1286 : vector<8x256xf32>
    %1288 = vector.extract_strided_slice %1231 {offsets = [0, 16], sizes = [8, 256], strides = [1, 1]} : vector<8x290xbf16> to vector<8x256xbf16>
    %1289 = vector.broadcast %1280 : vector<1x256xbf16> to vector<8x256xbf16>
    %1290 = arith.mulf %1288, %1289 : vector<8x256xbf16>
    %c3_934 = arith.constant 3 : index
    %c0_935 = arith.constant 0 : index
    %c0_936 = arith.constant 0 : index
    %1291 = vector.load %arg39[%c3_934, %c0_935, %c0_936] : memref<9x8x8xbf16, #tpu.memory_space<vmem>>, vector<1x8x8xbf16>
    %1292 = vector.shape_cast %1291 : vector<1x8x8xbf16> to vector<8x8xbf16>
    %cst_937 = arith.constant dense<0.000000e+00> : vector<8x256xf32>
    %1293 = tpu.matmul %1292, %1290, %cst_937 {dimension_numbers = #tpu.dot_dimension_numbers<[1], [0], [0], [1], [0, 0, 1, 1], [], []>} : vector<8x8xbf16>, vector<8x256xbf16>, vector<8x256xf32> -> vector<8x256xf32>
    %1294 = arith.addf %1287, %1293 : vector<8x256xf32>
    %c4_938 = arith.constant 4 : index
    %c0_939 = arith.constant 0 : index
    %c0_940 = arith.constant 0 : index
    %1295 = vector.load %arg2[%c4_938, %c0_939, %c0_940] : memref<9x1x256xbf16, #tpu.memory_space<vmem>>, vector<1x1x256xbf16>
    %1296 = vector.shape_cast %1295 : vector<1x1x256xbf16> to vector<1x256xbf16>
    %1297 = vector.extract_strided_slice %1229 {offsets = [0, 17], sizes = [8, 256], strides = [1, 1]} : vector<8x290xbf16> to vector<8x256xbf16>
    %1298 = vector.broadcast %1296 : vector<1x256xbf16> to vector<8x256xbf16>
    %1299 = arith.mulf %1297, %1298 : vector<8x256xbf16>
    %c4_941 = arith.constant 4 : index
    %c0_942 = arith.constant 0 : index
    %c0_943 = arith.constant 0 : index
    %1300 = vector.load %arg38[%c4_941, %c0_942, %c0_943] : memref<9x8x8xbf16, #tpu.memory_space<vmem>>, vector<1x8x8xbf16>
    %1301 = vector.shape_cast %1300 : vector<1x8x8xbf16> to vector<8x8xbf16>
    %cst_944 = arith.constant dense<0.000000e+00> : vector<8x256xf32>
    %1302 = tpu.matmul %1301, %1299, %cst_944 {dimension_numbers = #tpu.dot_dimension_numbers<[1], [0], [0], [1], [0, 0, 1, 1], [], []>} : vector<8x8xbf16>, vector<8x256xbf16>, vector<8x256xf32> -> vector<8x256xf32>
    %1303 = arith.addf %1294, %1302 : vector<8x256xf32>
    %1304 = vector.extract_strided_slice %1231 {offsets = [0, 17], sizes = [8, 256], strides = [1, 1]} : vector<8x290xbf16> to vector<8x256xbf16>
    %1305 = vector.broadcast %1296 : vector<1x256xbf16> to vector<8x256xbf16>
    %1306 = arith.mulf %1304, %1305 : vector<8x256xbf16>
    %c4_945 = arith.constant 4 : index
    %c0_946 = arith.constant 0 : index
    %c0_947 = arith.constant 0 : index
    %1307 = vector.load %arg39[%c4_945, %c0_946, %c0_947] : memref<9x8x8xbf16, #tpu.memory_space<vmem>>, vector<1x8x8xbf16>
    %1308 = vector.shape_cast %1307 : vector<1x8x8xbf16> to vector<8x8xbf16>
    %cst_948 = arith.constant dense<0.000000e+00> : vector<8x256xf32>
    %1309 = tpu.matmul %1308, %1306, %cst_948 {dimension_numbers = #tpu.dot_dimension_numbers<[1], [0], [0], [1], [0, 0, 1, 1], [], []>} : vector<8x8xbf16>, vector<8x256xbf16>, vector<8x256xf32> -> vector<8x256xf32>
    %1310 = arith.addf %1303, %1309 : vector<8x256xf32>
    %c5_949 = arith.constant 5 : index
    %c0_950 = arith.constant 0 : index
    %c0_951 = arith.constant 0 : index
    %1311 = vector.load %arg2[%c5_949, %c0_950, %c0_951] : memref<9x1x256xbf16, #tpu.memory_space<vmem>>, vector<1x1x256xbf16>
    %1312 = vector.shape_cast %1311 : vector<1x1x256xbf16> to vector<1x256xbf16>
    %1313 = vector.extract_strided_slice %1229 {offsets = [0, 18], sizes = [8, 256], strides = [1, 1]} : vector<8x290xbf16> to vector<8x256xbf16>
    %1314 = vector.broadcast %1312 : vector<1x256xbf16> to vector<8x256xbf16>
    %1315 = arith.mulf %1313, %1314 : vector<8x256xbf16>
    %c5_952 = arith.constant 5 : index
    %c0_953 = arith.constant 0 : index
    %c0_954 = arith.constant 0 : index
    %1316 = vector.load %arg38[%c5_952, %c0_953, %c0_954] : memref<9x8x8xbf16, #tpu.memory_space<vmem>>, vector<1x8x8xbf16>
    %1317 = vector.shape_cast %1316 : vector<1x8x8xbf16> to vector<8x8xbf16>
    %cst_955 = arith.constant dense<0.000000e+00> : vector<8x256xf32>
    %1318 = tpu.matmul %1317, %1315, %cst_955 {dimension_numbers = #tpu.dot_dimension_numbers<[1], [0], [0], [1], [0, 0, 1, 1], [], []>} : vector<8x8xbf16>, vector<8x256xbf16>, vector<8x256xf32> -> vector<8x256xf32>
    %1319 = arith.addf %1310, %1318 : vector<8x256xf32>
    %1320 = vector.extract_strided_slice %1231 {offsets = [0, 18], sizes = [8, 256], strides = [1, 1]} : vector<8x290xbf16> to vector<8x256xbf16>
    %1321 = vector.broadcast %1312 : vector<1x256xbf16> to vector<8x256xbf16>
    %1322 = arith.mulf %1320, %1321 : vector<8x256xbf16>
    %c5_956 = arith.constant 5 : index
    %c0_957 = arith.constant 0 : index
    %c0_958 = arith.constant 0 : index
    %1323 = vector.load %arg39[%c5_956, %c0_957, %c0_958] : memref<9x8x8xbf16, #tpu.memory_space<vmem>>, vector<1x8x8xbf16>
    %1324 = vector.shape_cast %1323 : vector<1x8x8xbf16> to vector<8x8xbf16>
    %cst_959 = arith.constant dense<0.000000e+00> : vector<8x256xf32>
    %1325 = tpu.matmul %1324, %1322, %cst_959 {dimension_numbers = #tpu.dot_dimension_numbers<[1], [0], [0], [1], [0, 0, 1, 1], [], []>} : vector<8x8xbf16>, vector<8x256xbf16>, vector<8x256xf32> -> vector<8x256xf32>
    %1326 = arith.addf %1319, %1325 : vector<8x256xf32>
    %c6_960 = arith.constant 6 : index
    %c0_961 = arith.constant 0 : index
    %c0_962 = arith.constant 0 : index
    %1327 = vector.load %arg2[%c6_960, %c0_961, %c0_962] : memref<9x1x256xbf16, #tpu.memory_space<vmem>>, vector<1x1x256xbf16>
    %1328 = vector.shape_cast %1327 : vector<1x1x256xbf16> to vector<1x256xbf16>
    %1329 = vector.extract_strided_slice %1229 {offsets = [0, 32], sizes = [8, 256], strides = [1, 1]} : vector<8x290xbf16> to vector<8x256xbf16>
    %1330 = vector.broadcast %1328 : vector<1x256xbf16> to vector<8x256xbf16>
    %1331 = arith.mulf %1329, %1330 : vector<8x256xbf16>
    %c6_963 = arith.constant 6 : index
    %c0_964 = arith.constant 0 : index
    %c0_965 = arith.constant 0 : index
    %1332 = vector.load %arg38[%c6_963, %c0_964, %c0_965] : memref<9x8x8xbf16, #tpu.memory_space<vmem>>, vector<1x8x8xbf16>
    %1333 = vector.shape_cast %1332 : vector<1x8x8xbf16> to vector<8x8xbf16>
    %cst_966 = arith.constant dense<0.000000e+00> : vector<8x256xf32>
    %1334 = tpu.matmul %1333, %1331, %cst_966 {dimension_numbers = #tpu.dot_dimension_numbers<[1], [0], [0], [1], [0, 0, 1, 1], [], []>} : vector<8x8xbf16>, vector<8x256xbf16>, vector<8x256xf32> -> vector<8x256xf32>
    %1335 = arith.addf %1326, %1334 : vector<8x256xf32>
    %1336 = vector.extract_strided_slice %1231 {offsets = [0, 32], sizes = [8, 256], strides = [1, 1]} : vector<8x290xbf16> to vector<8x256xbf16>
    %1337 = vector.broadcast %1328 : vector<1x256xbf16> to vector<8x256xbf16>
    %1338 = arith.mulf %1336, %1337 : vector<8x256xbf16>
    %c6_967 = arith.constant 6 : index
    %c0_968 = arith.constant 0 : index
    %c0_969 = arith.constant 0 : index
    %1339 = vector.load %arg39[%c6_967, %c0_968, %c0_969] : memref<9x8x8xbf16, #tpu.memory_space<vmem>>, vector<1x8x8xbf16>
    %1340 = vector.shape_cast %1339 : vector<1x8x8xbf16> to vector<8x8xbf16>
    %cst_970 = arith.constant dense<0.000000e+00> : vector<8x256xf32>
    %1341 = tpu.matmul %1340, %1338, %cst_970 {dimension_numbers = #tpu.dot_dimension_numbers<[1], [0], [0], [1], [0, 0, 1, 1], [], []>} : vector<8x8xbf16>, vector<8x256xbf16>, vector<8x256xf32> -> vector<8x256xf32>
    %1342 = arith.addf %1335, %1341 : vector<8x256xf32>
    %c7_971 = arith.constant 7 : index
    %c0_972 = arith.constant 0 : index
    %c0_973 = arith.constant 0 : index
    %1343 = vector.load %arg2[%c7_971, %c0_972, %c0_973] : memref<9x1x256xbf16, #tpu.memory_space<vmem>>, vector<1x1x256xbf16>
    %1344 = vector.shape_cast %1343 : vector<1x1x256xbf16> to vector<1x256xbf16>
    %1345 = vector.extract_strided_slice %1229 {offsets = [0, 33], sizes = [8, 256], strides = [1, 1]} : vector<8x290xbf16> to vector<8x256xbf16>
    %1346 = vector.broadcast %1344 : vector<1x256xbf16> to vector<8x256xbf16>
    %1347 = arith.mulf %1345, %1346 : vector<8x256xbf16>
    %c7_974 = arith.constant 7 : index
    %c0_975 = arith.constant 0 : index
    %c0_976 = arith.constant 0 : index
    %1348 = vector.load %arg38[%c7_974, %c0_975, %c0_976] : memref<9x8x8xbf16, #tpu.memory_space<vmem>>, vector<1x8x8xbf16>
    %1349 = vector.shape_cast %1348 : vector<1x8x8xbf16> to vector<8x8xbf16>
    %cst_977 = arith.constant dense<0.000000e+00> : vector<8x256xf32>
    %1350 = tpu.matmul %1349, %1347, %cst_977 {dimension_numbers = #tpu.dot_dimension_numbers<[1], [0], [0], [1], [0, 0, 1, 1], [], []>} : vector<8x8xbf16>, vector<8x256xbf16>, vector<8x256xf32> -> vector<8x256xf32>
    %1351 = arith.addf %1342, %1350 : vector<8x256xf32>
    %1352 = vector.extract_strided_slice %1231 {offsets = [0, 33], sizes = [8, 256], strides = [1, 1]} : vector<8x290xbf16> to vector<8x256xbf16>
    %1353 = vector.broadcast %1344 : vector<1x256xbf16> to vector<8x256xbf16>
    %1354 = arith.mulf %1352, %1353 : vector<8x256xbf16>
    %c7_978 = arith.constant 7 : index
    %c0_979 = arith.constant 0 : index
    %c0_980 = arith.constant 0 : index
    %1355 = vector.load %arg39[%c7_978, %c0_979, %c0_980] : memref<9x8x8xbf16, #tpu.memory_space<vmem>>, vector<1x8x8xbf16>
    %1356 = vector.shape_cast %1355 : vector<1x8x8xbf16> to vector<8x8xbf16>
    %cst_981 = arith.constant dense<0.000000e+00> : vector<8x256xf32>
    %1357 = tpu.matmul %1356, %1354, %cst_981 {dimension_numbers = #tpu.dot_dimension_numbers<[1], [0], [0], [1], [0, 0, 1, 1], [], []>} : vector<8x8xbf16>, vector<8x256xbf16>, vector<8x256xf32> -> vector<8x256xf32>
    %1358 = arith.addf %1351, %1357 : vector<8x256xf32>
    %c8_982 = arith.constant 8 : index
    %c0_983 = arith.constant 0 : index
    %c0_984 = arith.constant 0 : index
    %1359 = vector.load %arg2[%c8_982, %c0_983, %c0_984] : memref<9x1x256xbf16, #tpu.memory_space<vmem>>, vector<1x1x256xbf16>
    %1360 = vector.shape_cast %1359 : vector<1x1x256xbf16> to vector<1x256xbf16>
    %1361 = vector.extract_strided_slice %1229 {offsets = [0, 34], sizes = [8, 256], strides = [1, 1]} : vector<8x290xbf16> to vector<8x256xbf16>
    %1362 = vector.broadcast %1360 : vector<1x256xbf16> to vector<8x256xbf16>
    %1363 = arith.mulf %1361, %1362 : vector<8x256xbf16>
    %c8_985 = arith.constant 8 : index
    %c0_986 = arith.constant 0 : index
    %c0_987 = arith.constant 0 : index
    %1364 = vector.load %arg38[%c8_985, %c0_986, %c0_987] : memref<9x8x8xbf16, #tpu.memory_space<vmem>>, vector<1x8x8xbf16>
    %1365 = vector.shape_cast %1364 : vector<1x8x8xbf16> to vector<8x8xbf16>
    %cst_988 = arith.constant dense<0.000000e+00> : vector<8x256xf32>
    %1366 = tpu.matmul %1365, %1363, %cst_988 {dimension_numbers = #tpu.dot_dimension_numbers<[1], [0], [0], [1], [0, 0, 1, 1], [], []>} : vector<8x8xbf16>, vector<8x256xbf16>, vector<8x256xf32> -> vector<8x256xf32>
    %1367 = arith.addf %1358, %1366 : vector<8x256xf32>
    %1368 = vector.extract_strided_slice %1231 {offsets = [0, 34], sizes = [8, 256], strides = [1, 1]} : vector<8x290xbf16> to vector<8x256xbf16>
    %1369 = vector.broadcast %1360 : vector<1x256xbf16> to vector<8x256xbf16>
    %1370 = arith.mulf %1368, %1369 : vector<8x256xbf16>
    %c8_989 = arith.constant 8 : index
    %c0_990 = arith.constant 0 : index
    %c0_991 = arith.constant 0 : index
    %1371 = vector.load %arg39[%c8_989, %c0_990, %c0_991] : memref<9x8x8xbf16, #tpu.memory_space<vmem>>, vector<1x8x8xbf16>
    %1372 = vector.shape_cast %1371 : vector<1x8x8xbf16> to vector<8x8xbf16>
    %cst_992 = arith.constant dense<0.000000e+00> : vector<8x256xf32>
    %1373 = tpu.matmul %1372, %1370, %cst_992 {dimension_numbers = #tpu.dot_dimension_numbers<[1], [0], [0], [1], [0, 0, 1, 1], [], []>} : vector<8x8xbf16>, vector<8x256xbf16>, vector<8x256xf32> -> vector<8x256xf32>
    %1374 = arith.addf %1367, %1373 : vector<8x256xf32>
    %c0_993 = arith.constant 0 : index
    %c0_994 = arith.constant 0 : index
    %1375 = vector.load %arg40[%c0_993, %c0_994] : memref<8x1xf32, #tpu.memory_space<vmem>>, vector<8x1xf32>
    %1376 = vector.broadcast %1375 : vector<8x1xf32> to vector<8x256xf32>
    %1377 = arith.addf %1374, %1376 : vector<8x256xf32>
    %cst_995 = arith.constant 0.000000e+00 : f32
    %1378 = vector.broadcast %cst_995 : f32 to vector<8x256xf32>
    %1379 = arith.maximumf %1377, %1378 : vector<8x256xf32>
    %1380 = arith.truncf %1379 : vector<8x256xf32> to vector<8x256xbf16>
    %cst_996 = arith.constant 0.000000e+00 : bf16
    %1381 = vector.broadcast %cst_996 : bf16 to vector<8x17xbf16>
    %1382 = tpu.concatenate %1381, %1380, %1381 in 1 : vector<8x17xbf16>, vector<8x256xbf16>, vector<8x17xbf16> -> vector<8x290xbf16>
    %c0_997 = arith.constant 0 : index
    %c0_998 = arith.constant 0 : index
    %c0_999 = arith.constant 0 : index
    %1383 = vector.load %arg2[%c0_997, %c0_998, %c0_999] : memref<9x1x256xbf16, #tpu.memory_space<vmem>>, vector<1x1x256xbf16>
    %1384 = vector.shape_cast %1383 : vector<1x1x256xbf16> to vector<1x256xbf16>
    %1385 = vector.extract_strided_slice %1382 {offsets = [0, 0], sizes = [8, 256], strides = [1, 1]} : vector<8x290xbf16> to vector<8x256xbf16>
    %1386 = vector.broadcast %1384 : vector<1x256xbf16> to vector<8x256xbf16>
    %1387 = arith.mulf %1385, %1386 : vector<8x256xbf16>
    %c0_1000 = arith.constant 0 : index
    %c0_1001 = arith.constant 0 : index
    %c0_1002 = arith.constant 0 : index
    %1388 = vector.load %arg41[%c0_1000, %c0_1001, %c0_1002] : memref<9x8x8xbf16, #tpu.memory_space<vmem>>, vector<1x8x8xbf16>
    %1389 = vector.shape_cast %1388 : vector<1x8x8xbf16> to vector<8x8xbf16>
    %cst_1003 = arith.constant dense<0.000000e+00> : vector<8x256xf32>
    %1390 = tpu.matmul %1389, %1387, %cst_1003 {dimension_numbers = #tpu.dot_dimension_numbers<[1], [0], [0], [1], [0, 0, 1, 1], [], []>} : vector<8x8xbf16>, vector<8x256xbf16>, vector<8x256xf32> -> vector<8x256xf32>
    %c1_1004 = arith.constant 1 : index
    %c0_1005 = arith.constant 0 : index
    %c0_1006 = arith.constant 0 : index
    %1391 = vector.load %arg2[%c1_1004, %c0_1005, %c0_1006] : memref<9x1x256xbf16, #tpu.memory_space<vmem>>, vector<1x1x256xbf16>
    %1392 = vector.shape_cast %1391 : vector<1x1x256xbf16> to vector<1x256xbf16>
    %1393 = vector.extract_strided_slice %1382 {offsets = [0, 1], sizes = [8, 256], strides = [1, 1]} : vector<8x290xbf16> to vector<8x256xbf16>
    %1394 = vector.broadcast %1392 : vector<1x256xbf16> to vector<8x256xbf16>
    %1395 = arith.mulf %1393, %1394 : vector<8x256xbf16>
    %c1_1007 = arith.constant 1 : index
    %c0_1008 = arith.constant 0 : index
    %c0_1009 = arith.constant 0 : index
    %1396 = vector.load %arg41[%c1_1007, %c0_1008, %c0_1009] : memref<9x8x8xbf16, #tpu.memory_space<vmem>>, vector<1x8x8xbf16>
    %1397 = vector.shape_cast %1396 : vector<1x8x8xbf16> to vector<8x8xbf16>
    %cst_1010 = arith.constant dense<0.000000e+00> : vector<8x256xf32>
    %1398 = tpu.matmul %1397, %1395, %cst_1010 {dimension_numbers = #tpu.dot_dimension_numbers<[1], [0], [0], [1], [0, 0, 1, 1], [], []>} : vector<8x8xbf16>, vector<8x256xbf16>, vector<8x256xf32> -> vector<8x256xf32>
    %1399 = arith.addf %1390, %1398 : vector<8x256xf32>
    %c2_1011 = arith.constant 2 : index
    %c0_1012 = arith.constant 0 : index
    %c0_1013 = arith.constant 0 : index
    %1400 = vector.load %arg2[%c2_1011, %c0_1012, %c0_1013] : memref<9x1x256xbf16, #tpu.memory_space<vmem>>, vector<1x1x256xbf16>
    %1401 = vector.shape_cast %1400 : vector<1x1x256xbf16> to vector<1x256xbf16>
    %1402 = vector.extract_strided_slice %1382 {offsets = [0, 2], sizes = [8, 256], strides = [1, 1]} : vector<8x290xbf16> to vector<8x256xbf16>
    %1403 = vector.broadcast %1401 : vector<1x256xbf16> to vector<8x256xbf16>
    %1404 = arith.mulf %1402, %1403 : vector<8x256xbf16>
    %c2_1014 = arith.constant 2 : index
    %c0_1015 = arith.constant 0 : index
    %c0_1016 = arith.constant 0 : index
    %1405 = vector.load %arg41[%c2_1014, %c0_1015, %c0_1016] : memref<9x8x8xbf16, #tpu.memory_space<vmem>>, vector<1x8x8xbf16>
    %1406 = vector.shape_cast %1405 : vector<1x8x8xbf16> to vector<8x8xbf16>
    %cst_1017 = arith.constant dense<0.000000e+00> : vector<8x256xf32>
    %1407 = tpu.matmul %1406, %1404, %cst_1017 {dimension_numbers = #tpu.dot_dimension_numbers<[1], [0], [0], [1], [0, 0, 1, 1], [], []>} : vector<8x8xbf16>, vector<8x256xbf16>, vector<8x256xf32> -> vector<8x256xf32>
    %1408 = arith.addf %1399, %1407 : vector<8x256xf32>
    %c3_1018 = arith.constant 3 : index
    %c0_1019 = arith.constant 0 : index
    %c0_1020 = arith.constant 0 : index
    %1409 = vector.load %arg2[%c3_1018, %c0_1019, %c0_1020] : memref<9x1x256xbf16, #tpu.memory_space<vmem>>, vector<1x1x256xbf16>
    %1410 = vector.shape_cast %1409 : vector<1x1x256xbf16> to vector<1x256xbf16>
    %1411 = vector.extract_strided_slice %1382 {offsets = [0, 16], sizes = [8, 256], strides = [1, 1]} : vector<8x290xbf16> to vector<8x256xbf16>
    %1412 = vector.broadcast %1410 : vector<1x256xbf16> to vector<8x256xbf16>
    %1413 = arith.mulf %1411, %1412 : vector<8x256xbf16>
    %c3_1021 = arith.constant 3 : index
    %c0_1022 = arith.constant 0 : index
    %c0_1023 = arith.constant 0 : index
    %1414 = vector.load %arg41[%c3_1021, %c0_1022, %c0_1023] : memref<9x8x8xbf16, #tpu.memory_space<vmem>>, vector<1x8x8xbf16>
    %1415 = vector.shape_cast %1414 : vector<1x8x8xbf16> to vector<8x8xbf16>
    %cst_1024 = arith.constant dense<0.000000e+00> : vector<8x256xf32>
    %1416 = tpu.matmul %1415, %1413, %cst_1024 {dimension_numbers = #tpu.dot_dimension_numbers<[1], [0], [0], [1], [0, 0, 1, 1], [], []>} : vector<8x8xbf16>, vector<8x256xbf16>, vector<8x256xf32> -> vector<8x256xf32>
    %1417 = arith.addf %1408, %1416 : vector<8x256xf32>
    %c4_1025 = arith.constant 4 : index
    %c0_1026 = arith.constant 0 : index
    %c0_1027 = arith.constant 0 : index
    %1418 = vector.load %arg2[%c4_1025, %c0_1026, %c0_1027] : memref<9x1x256xbf16, #tpu.memory_space<vmem>>, vector<1x1x256xbf16>
    %1419 = vector.shape_cast %1418 : vector<1x1x256xbf16> to vector<1x256xbf16>
    %1420 = vector.extract_strided_slice %1382 {offsets = [0, 17], sizes = [8, 256], strides = [1, 1]} : vector<8x290xbf16> to vector<8x256xbf16>
    %1421 = vector.broadcast %1419 : vector<1x256xbf16> to vector<8x256xbf16>
    %1422 = arith.mulf %1420, %1421 : vector<8x256xbf16>
    %c4_1028 = arith.constant 4 : index
    %c0_1029 = arith.constant 0 : index
    %c0_1030 = arith.constant 0 : index
    %1423 = vector.load %arg41[%c4_1028, %c0_1029, %c0_1030] : memref<9x8x8xbf16, #tpu.memory_space<vmem>>, vector<1x8x8xbf16>
    %1424 = vector.shape_cast %1423 : vector<1x8x8xbf16> to vector<8x8xbf16>
    %cst_1031 = arith.constant dense<0.000000e+00> : vector<8x256xf32>
    %1425 = tpu.matmul %1424, %1422, %cst_1031 {dimension_numbers = #tpu.dot_dimension_numbers<[1], [0], [0], [1], [0, 0, 1, 1], [], []>} : vector<8x8xbf16>, vector<8x256xbf16>, vector<8x256xf32> -> vector<8x256xf32>
    %1426 = arith.addf %1417, %1425 : vector<8x256xf32>
    %c5_1032 = arith.constant 5 : index
    %c0_1033 = arith.constant 0 : index
    %c0_1034 = arith.constant 0 : index
    %1427 = vector.load %arg2[%c5_1032, %c0_1033, %c0_1034] : memref<9x1x256xbf16, #tpu.memory_space<vmem>>, vector<1x1x256xbf16>
    %1428 = vector.shape_cast %1427 : vector<1x1x256xbf16> to vector<1x256xbf16>
    %1429 = vector.extract_strided_slice %1382 {offsets = [0, 18], sizes = [8, 256], strides = [1, 1]} : vector<8x290xbf16> to vector<8x256xbf16>
    %1430 = vector.broadcast %1428 : vector<1x256xbf16> to vector<8x256xbf16>
    %1431 = arith.mulf %1429, %1430 : vector<8x256xbf16>
    %c5_1035 = arith.constant 5 : index
    %c0_1036 = arith.constant 0 : index
    %c0_1037 = arith.constant 0 : index
    %1432 = vector.load %arg41[%c5_1035, %c0_1036, %c0_1037] : memref<9x8x8xbf16, #tpu.memory_space<vmem>>, vector<1x8x8xbf16>
    %1433 = vector.shape_cast %1432 : vector<1x8x8xbf16> to vector<8x8xbf16>
    %cst_1038 = arith.constant dense<0.000000e+00> : vector<8x256xf32>
    %1434 = tpu.matmul %1433, %1431, %cst_1038 {dimension_numbers = #tpu.dot_dimension_numbers<[1], [0], [0], [1], [0, 0, 1, 1], [], []>} : vector<8x8xbf16>, vector<8x256xbf16>, vector<8x256xf32> -> vector<8x256xf32>
    %1435 = arith.addf %1426, %1434 : vector<8x256xf32>
    %c6_1039 = arith.constant 6 : index
    %c0_1040 = arith.constant 0 : index
    %c0_1041 = arith.constant 0 : index
    %1436 = vector.load %arg2[%c6_1039, %c0_1040, %c0_1041] : memref<9x1x256xbf16, #tpu.memory_space<vmem>>, vector<1x1x256xbf16>
    %1437 = vector.shape_cast %1436 : vector<1x1x256xbf16> to vector<1x256xbf16>
    %1438 = vector.extract_strided_slice %1382 {offsets = [0, 32], sizes = [8, 256], strides = [1, 1]} : vector<8x290xbf16> to vector<8x256xbf16>
    %1439 = vector.broadcast %1437 : vector<1x256xbf16> to vector<8x256xbf16>
    %1440 = arith.mulf %1438, %1439 : vector<8x256xbf16>
    %c6_1042 = arith.constant 6 : index
    %c0_1043 = arith.constant 0 : index
    %c0_1044 = arith.constant 0 : index
    %1441 = vector.load %arg41[%c6_1042, %c0_1043, %c0_1044] : memref<9x8x8xbf16, #tpu.memory_space<vmem>>, vector<1x8x8xbf16>
    %1442 = vector.shape_cast %1441 : vector<1x8x8xbf16> to vector<8x8xbf16>
    %cst_1045 = arith.constant dense<0.000000e+00> : vector<8x256xf32>
    %1443 = tpu.matmul %1442, %1440, %cst_1045 {dimension_numbers = #tpu.dot_dimension_numbers<[1], [0], [0], [1], [0, 0, 1, 1], [], []>} : vector<8x8xbf16>, vector<8x256xbf16>, vector<8x256xf32> -> vector<8x256xf32>
    %1444 = arith.addf %1435, %1443 : vector<8x256xf32>
    %c7_1046 = arith.constant 7 : index
    %c0_1047 = arith.constant 0 : index
    %c0_1048 = arith.constant 0 : index
    %1445 = vector.load %arg2[%c7_1046, %c0_1047, %c0_1048] : memref<9x1x256xbf16, #tpu.memory_space<vmem>>, vector<1x1x256xbf16>
    %1446 = vector.shape_cast %1445 : vector<1x1x256xbf16> to vector<1x256xbf16>
    %1447 = vector.extract_strided_slice %1382 {offsets = [0, 33], sizes = [8, 256], strides = [1, 1]} : vector<8x290xbf16> to vector<8x256xbf16>
    %1448 = vector.broadcast %1446 : vector<1x256xbf16> to vector<8x256xbf16>
    %1449 = arith.mulf %1447, %1448 : vector<8x256xbf16>
    %c7_1049 = arith.constant 7 : index
    %c0_1050 = arith.constant 0 : index
    %c0_1051 = arith.constant 0 : index
    %1450 = vector.load %arg41[%c7_1049, %c0_1050, %c0_1051] : memref<9x8x8xbf16, #tpu.memory_space<vmem>>, vector<1x8x8xbf16>
    %1451 = vector.shape_cast %1450 : vector<1x8x8xbf16> to vector<8x8xbf16>
    %cst_1052 = arith.constant dense<0.000000e+00> : vector<8x256xf32>
    %1452 = tpu.matmul %1451, %1449, %cst_1052 {dimension_numbers = #tpu.dot_dimension_numbers<[1], [0], [0], [1], [0, 0, 1, 1], [], []>} : vector<8x8xbf16>, vector<8x256xbf16>, vector<8x256xf32> -> vector<8x256xf32>
    %1453 = arith.addf %1444, %1452 : vector<8x256xf32>
    %c8_1053 = arith.constant 8 : index
    %c0_1054 = arith.constant 0 : index
    %c0_1055 = arith.constant 0 : index
    %1454 = vector.load %arg2[%c8_1053, %c0_1054, %c0_1055] : memref<9x1x256xbf16, #tpu.memory_space<vmem>>, vector<1x1x256xbf16>
    %1455 = vector.shape_cast %1454 : vector<1x1x256xbf16> to vector<1x256xbf16>
    %1456 = vector.extract_strided_slice %1382 {offsets = [0, 34], sizes = [8, 256], strides = [1, 1]} : vector<8x290xbf16> to vector<8x256xbf16>
    %1457 = vector.broadcast %1455 : vector<1x256xbf16> to vector<8x256xbf16>
    %1458 = arith.mulf %1456, %1457 : vector<8x256xbf16>
    %c8_1056 = arith.constant 8 : index
    %c0_1057 = arith.constant 0 : index
    %c0_1058 = arith.constant 0 : index
    %1459 = vector.load %arg41[%c8_1056, %c0_1057, %c0_1058] : memref<9x8x8xbf16, #tpu.memory_space<vmem>>, vector<1x8x8xbf16>
    %1460 = vector.shape_cast %1459 : vector<1x8x8xbf16> to vector<8x8xbf16>
    %cst_1059 = arith.constant dense<0.000000e+00> : vector<8x256xf32>
    %1461 = tpu.matmul %1460, %1458, %cst_1059 {dimension_numbers = #tpu.dot_dimension_numbers<[1], [0], [0], [1], [0, 0, 1, 1], [], []>} : vector<8x8xbf16>, vector<8x256xbf16>, vector<8x256xf32> -> vector<8x256xf32>
    %1462 = arith.addf %1453, %1461 : vector<8x256xf32>
    %c0_1060 = arith.constant 0 : index
    %c0_1061 = arith.constant 0 : index
    %1463 = vector.load %arg42[%c0_1060, %c0_1061] : memref<8x1xf32, #tpu.memory_space<vmem>>, vector<8x1xf32>
    %1464 = vector.broadcast %1463 : vector<8x1xf32> to vector<8x256xf32>
    %1465 = arith.addf %1462, %1464 : vector<8x256xf32>
    %cst_1062 = arith.constant 0.000000e+00 : f32
    %1466 = vector.broadcast %cst_1062 : f32 to vector<8x256xf32>
    %1467 = arith.maximumf %1465, %1466 : vector<8x256xf32>
    %1468 = arith.truncf %1467 : vector<8x256xf32> to vector<8x256xbf16>
    %1469 = arith.extf %1468 : vector<8x256xbf16> to vector<8x256xf32>
    %c0_1063 = arith.constant 0 : index
    %c0_1064 = arith.constant 0 : index
    %1470 = vector.load %arg43[%c0_1063, %c0_1064] : memref<8x1xf32, #tpu.memory_space<vmem>>, vector<8x1xf32>
    %1471 = vector.broadcast %1470 : vector<8x1xf32> to vector<8x256xf32>
    %1472 = arith.mulf %1469, %1471 : vector<8x256xf32>
    %cst_1065 = arith.constant dense<0.000000e+00> : vector<256xf32>
    %1473 = vector.multi_reduction <add>, %1472, %cst_1065 [0] : vector<8x256xf32> to vector<256xf32>
    %1474 = vector.shape_cast %1473 : vector<256xf32> to vector<1x256xf32>
    %c0_1066 = arith.constant 0 : index
    %c0_1067 = arith.constant 0 : index
    %1475 = vector.load %arg44[%c0_1066, %c0_1067] : memref<1x1xf32, #tpu.memory_space<vmem>>, vector<1x1xf32>
    %1476 = vector.broadcast %1475 : vector<1x1xf32> to vector<1x256xf32>
    %1477 = arith.addf %1474, %1476 : vector<1x256xf32>
    %1478 = arith.negf %1477 : vector<1x256xf32>
    %1479 = math.exp %1478 : vector<1x256xf32>
    %cst_1068 = arith.constant 1.000000e+00 : f32
    %1480 = vector.broadcast %cst_1068 : f32 to vector<1x256xf32>
    %1481 = arith.addf %1480, %1479 : vector<1x256xf32>
    %1482 = arith.divf %1480, %1481 : vector<1x256xf32>
    %1483 = vector.shape_cast %1482 : vector<1x256xf32> to vector<1x1x256xf32>
    %c0_1069 = arith.constant 0 : index
    %c0_1070 = arith.constant 0 : index
    %c0_1071 = arith.constant 0 : index
    %1484 = vector.load %arg45[%c0_1069, %c0_1070, %c0_1071] : memref<1x1x256xf32, #tpu.memory_space<vmem>>, vector<1x1x256xf32>
    tpu.vector_store %arg45[%c0_1069, %c0_1070, %c0_1071], %1483 {strides = array<i32>} : memref<1x1x256xf32, #tpu.memory_space<vmem>>, vector<1x1x256xf32>,
    return
  }
  func.func @transform_0(%arg0: i32) -> (i32, i32, i32) {
    %c0_i32 = arith.constant 0 : i32
    %c0_i32_0 = arith.constant 0 : i32
    %c0_i32_1 = arith.constant 0 : i32
    return %arg0, %c0_i32, %c0_i32_0 : i32, i32, i32
  }
  func.func @transform_1(%arg0: i32) -> (i32, i32, i32) {
    %c0_i32 = arith.constant 0 : i32
    %c0_i32_0 = arith.constant 0 : i32
    %c0_i32_1 = arith.constant 0 : i32
    %c0_i32_2 = arith.constant 0 : i32
    return %c0_i32, %c0_i32_0, %c0_i32_1 : i32, i32, i32
  }
  func.func @transform_2(%arg0: i32) -> (i32, i32, i32) {
    %c0_i32 = arith.constant 0 : i32
    %c0_i32_0 = arith.constant 0 : i32
    %c0_i32_1 = arith.constant 0 : i32
    %c0_i32_2 = arith.constant 0 : i32
    return %c0_i32, %c0_i32_0, %c0_i32_1 : i32, i32, i32
  }
  func.func @transform_3(%arg0: i32) -> (i32, i32, i32) {
    %c0_i32 = arith.constant 0 : i32
    %c0_i32_0 = arith.constant 0 : i32
    %c0_i32_1 = arith.constant 0 : i32
    %c0_i32_2 = arith.constant 0 : i32
    return %c0_i32, %c0_i32_0, %c0_i32_1 : i32, i32, i32
  }
  func.func @transform_4(%arg0: i32) -> (i32, i32, i32) {
    %c0_i32 = arith.constant 0 : i32
    %c0_i32_0 = arith.constant 0 : i32
    %c0_i32_1 = arith.constant 0 : i32
    %c0_i32_2 = arith.constant 0 : i32
    return %c0_i32, %c0_i32_0, %c0_i32_1 : i32, i32, i32
  }
  func.func @transform_5(%arg0: i32) -> (i32, i32) {
    %c0_i32 = arith.constant 0 : i32
    %c0_i32_0 = arith.constant 0 : i32
    %c0_i32_1 = arith.constant 0 : i32
    return %c0_i32, %c0_i32_0 : i32, i32
  }
  func.func @transform_6(%arg0: i32) -> (i32, i32) {
    %c0_i32 = arith.constant 0 : i32
    %c0_i32_0 = arith.constant 0 : i32
    %c0_i32_1 = arith.constant 0 : i32
    return %c0_i32, %c0_i32_0 : i32, i32
  }
  func.func @transform_7(%arg0: i32) -> (i32, i32) {
    %c0_i32 = arith.constant 0 : i32
    %c0_i32_0 = arith.constant 0 : i32
    %c0_i32_1 = arith.constant 0 : i32
    return %c0_i32, %c0_i32_0 : i32, i32
  }
  func.func @transform_8(%arg0: i32) -> (i32, i32) {
    %c0_i32 = arith.constant 0 : i32
    %c0_i32_0 = arith.constant 0 : i32
    %c0_i32_1 = arith.constant 0 : i32
    return %c0_i32, %c0_i32_0 : i32, i32
  }
  func.func @transform_9(%arg0: i32) -> (i32, i32) {
    %c0_i32 = arith.constant 0 : i32
    %c0_i32_0 = arith.constant 0 : i32
    %c0_i32_1 = arith.constant 0 : i32
    return %c0_i32, %c0_i32_0 : i32, i32
  }
  func.func @transform_10(%arg0: i32) -> (i32, i32) {
    %c0_i32 = arith.constant 0 : i32
    %c0_i32_0 = arith.constant 0 : i32
    %c0_i32_1 = arith.constant 0 : i32
    return %c0_i32, %c0_i32_0 : i32, i32
  }
  func.func @transform_11(%arg0: i32) -> (i32, i32, i32) {
    %c0_i32 = arith.constant 0 : i32
    %c0_i32_0 = arith.constant 0 : i32
    %c0_i32_1 = arith.constant 0 : i32
    %c0_i32_2 = arith.constant 0 : i32
    return %c0_i32, %c0_i32_0, %c0_i32_1 : i32, i32, i32
  }
  func.func @transform_12(%arg0: i32) -> (i32, i32) {
    %c0_i32 = arith.constant 0 : i32
    %c0_i32_0 = arith.constant 0 : i32
    %c0_i32_1 = arith.constant 0 : i32
    return %c0_i32, %c0_i32_0 : i32, i32
  }
  func.func @transform_13(%arg0: i32) -> (i32, i32, i32) {
    %c0_i32 = arith.constant 0 : i32
    %c0_i32_0 = arith.constant 0 : i32
    %c0_i32_1 = arith.constant 0 : i32
    %c0_i32_2 = arith.constant 0 : i32
    return %c0_i32, %c0_i32_0, %c0_i32_1 : i32, i32, i32
  }
  func.func @transform_14(%arg0: i32) -> (i32, i32) {
    %c0_i32 = arith.constant 0 : i32
    %c0_i32_0 = arith.constant 0 : i32
    %c0_i32_1 = arith.constant 0 : i32
    return %c0_i32, %c0_i32_0 : i32, i32
  }
  func.func @transform_15(%arg0: i32) -> (i32, i32, i32) {
    %c0_i32 = arith.constant 0 : i32
    %c0_i32_0 = arith.constant 0 : i32
    %c0_i32_1 = arith.constant 0 : i32
    %c0_i32_2 = arith.constant 0 : i32
    return %c0_i32, %c0_i32_0, %c0_i32_1 : i32, i32, i32
  }
  func.func @transform_16(%arg0: i32) -> (i32, i32) {
    %c0_i32 = arith.constant 0 : i32
    %c0_i32_0 = arith.constant 0 : i32
    %c0_i32_1 = arith.constant 0 : i32
    return %c0_i32, %c0_i32_0 : i32, i32
  }
  func.func @transform_17(%arg0: i32) -> (i32, i32, i32) {
    %c0_i32 = arith.constant 0 : i32
    %c0_i32_0 = arith.constant 0 : i32
    %c0_i32_1 = arith.constant 0 : i32
    %c0_i32_2 = arith.constant 0 : i32
    return %c0_i32, %c0_i32_0, %c0_i32_1 : i32, i32, i32
  }
  func.func @transform_18(%arg0: i32) -> (i32, i32) {
    %c0_i32 = arith.constant 0 : i32
    %c0_i32_0 = arith.constant 0 : i32
    %c0_i32_1 = arith.constant 0 : i32
    return %c0_i32, %c0_i32_0 : i32, i32
  }
  func.func @transform_19(%arg0: i32) -> (i32, i32, i32) {
    %c0_i32 = arith.constant 0 : i32
    %c0_i32_0 = arith.constant 0 : i32
    %c0_i32_1 = arith.constant 0 : i32
    %c0_i32_2 = arith.constant 0 : i32
    return %c0_i32, %c0_i32_0, %c0_i32_1 : i32, i32, i32
  }
  func.func @transform_20(%arg0: i32) -> (i32, i32) {
    %c0_i32 = arith.constant 0 : i32
    %c0_i32_0 = arith.constant 0 : i32
    %c0_i32_1 = arith.constant 0 : i32
    return %c0_i32, %c0_i32_0 : i32, i32
  }
  func.func @transform_21(%arg0: i32) -> (i32, i32, i32) {
    %c0_i32 = arith.constant 0 : i32
    %c0_i32_0 = arith.constant 0 : i32
    %c0_i32_1 = arith.constant 0 : i32
    %c0_i32_2 = arith.constant 0 : i32
    return %c0_i32, %c0_i32_0, %c0_i32_1 : i32, i32, i32
  }
  func.func @transform_22(%arg0: i32) -> (i32, i32) {
    %c0_i32 = arith.constant 0 : i32
    %c0_i32_0 = arith.constant 0 : i32
    %c0_i32_1 = arith.constant 0 : i32
    return %c0_i32, %c0_i32_0 : i32, i32
  }
  func.func @transform_23(%arg0: i32) -> (i32, i32, i32) {
    %c0_i32 = arith.constant 0 : i32
    %c0_i32_0 = arith.constant 0 : i32
    %c0_i32_1 = arith.constant 0 : i32
    %c0_i32_2 = arith.constant 0 : i32
    return %c0_i32, %c0_i32_0, %c0_i32_1 : i32, i32, i32
  }
  func.func @transform_24(%arg0: i32) -> (i32, i32) {
    %c0_i32 = arith.constant 0 : i32
    %c0_i32_0 = arith.constant 0 : i32
    %c0_i32_1 = arith.constant 0 : i32
    return %c0_i32, %c0_i32_0 : i32, i32
  }
  func.func @transform_25(%arg0: i32) -> (i32, i32, i32) {
    %c0_i32 = arith.constant 0 : i32
    %c0_i32_0 = arith.constant 0 : i32
    %c0_i32_1 = arith.constant 0 : i32
    %c0_i32_2 = arith.constant 0 : i32
    return %c0_i32, %c0_i32_0, %c0_i32_1 : i32, i32, i32
  }
  func.func @transform_26(%arg0: i32) -> (i32, i32) {
    %c0_i32 = arith.constant 0 : i32
    %c0_i32_0 = arith.constant 0 : i32
    %c0_i32_1 = arith.constant 0 : i32
    return %c0_i32, %c0_i32_0 : i32, i32
  }
  func.func @transform_27(%arg0: i32) -> (i32, i32, i32) {
    %c0_i32 = arith.constant 0 : i32
    %c0_i32_0 = arith.constant 0 : i32
    %c0_i32_1 = arith.constant 0 : i32
    %c0_i32_2 = arith.constant 0 : i32
    return %c0_i32, %c0_i32_0, %c0_i32_1 : i32, i32, i32
  }
  func.func @transform_28(%arg0: i32) -> (i32, i32, i32) {
    %c0_i32 = arith.constant 0 : i32
    %c0_i32_0 = arith.constant 0 : i32
    %c0_i32_1 = arith.constant 0 : i32
    %c0_i32_2 = arith.constant 0 : i32
    return %c0_i32, %c0_i32_0, %c0_i32_1 : i32, i32, i32
  }
  func.func @transform_29(%arg0: i32) -> (i32, i32) {
    %c0_i32 = arith.constant 0 : i32
    %c0_i32_0 = arith.constant 0 : i32
    %c0_i32_1 = arith.constant 0 : i32
    return %c0_i32, %c0_i32_0 : i32, i32
  }
  func.func @transform_30(%arg0: i32) -> (i32, i32, i32) {
    %c0_i32 = arith.constant 0 : i32
    %c0_i32_0 = arith.constant 0 : i32
    %c0_i32_1 = arith.constant 0 : i32
    %c0_i32_2 = arith.constant 0 : i32
    return %c0_i32, %c0_i32_0, %c0_i32_1 : i32, i32, i32
  }
  func.func @transform_31(%arg0: i32) -> (i32, i32) {
    %c0_i32 = arith.constant 0 : i32
    %c0_i32_0 = arith.constant 0 : i32
    %c0_i32_1 = arith.constant 0 : i32
    return %c0_i32, %c0_i32_0 : i32, i32
  }
  func.func @transform_32(%arg0: i32) -> (i32, i32, i32) {
    %c0_i32 = arith.constant 0 : i32
    %c0_i32_0 = arith.constant 0 : i32
    %c0_i32_1 = arith.constant 0 : i32
    %c0_i32_2 = arith.constant 0 : i32
    return %c0_i32, %c0_i32_0, %c0_i32_1 : i32, i32, i32
  }
  func.func @transform_33(%arg0: i32) -> (i32, i32, i32) {
    %c0_i32 = arith.constant 0 : i32
    %c0_i32_0 = arith.constant 0 : i32
    %c0_i32_1 = arith.constant 0 : i32
    %c0_i32_2 = arith.constant 0 : i32
    return %c0_i32, %c0_i32_0, %c0_i32_1 : i32, i32, i32
  }
  func.func @transform_34(%arg0: i32) -> (i32, i32) {
    %c0_i32 = arith.constant 0 : i32
    %c0_i32_0 = arith.constant 0 : i32
    %c0_i32_1 = arith.constant 0 : i32
    return %c0_i32, %c0_i32_0 : i32, i32
  }
  func.func @transform_35(%arg0: i32) -> (i32, i32, i32) {
    %c0_i32 = arith.constant 0 : i32
    %c0_i32_0 = arith.constant 0 : i32
    %c0_i32_1 = arith.constant 0 : i32
    %c0_i32_2 = arith.constant 0 : i32
    return %c0_i32, %c0_i32_0, %c0_i32_1 : i32, i32, i32
  }
  func.func @transform_36(%arg0: i32) -> (i32, i32) {
    %c0_i32 = arith.constant 0 : i32
    %c0_i32_0 = arith.constant 0 : i32
    %c0_i32_1 = arith.constant 0 : i32
    return %c0_i32, %c0_i32_0 : i32, i32
  }
  func.func @transform_37(%arg0: i32) -> (i32, i32, i32) {
    %c0_i32 = arith.constant 0 : i32
    %c0_i32_0 = arith.constant 0 : i32
    %c0_i32_1 = arith.constant 0 : i32
    %c0_i32_2 = arith.constant 0 : i32
    return %c0_i32, %c0_i32_0, %c0_i32_1 : i32, i32, i32
  }
  func.func @transform_38(%arg0: i32) -> (i32, i32, i32) {
    %c0_i32 = arith.constant 0 : i32
    %c0_i32_0 = arith.constant 0 : i32
    %c0_i32_1 = arith.constant 0 : i32
    %c0_i32_2 = arith.constant 0 : i32
    return %c0_i32, %c0_i32_0, %c0_i32_1 : i32, i32, i32
  }
  func.func @transform_39(%arg0: i32) -> (i32, i32) {
    %c0_i32 = arith.constant 0 : i32
    %c0_i32_0 = arith.constant 0 : i32
    %c0_i32_1 = arith.constant 0 : i32
    return %c0_i32, %c0_i32_0 : i32, i32
  }
  func.func @transform_40(%arg0: i32) -> (i32, i32, i32) {
    %c0_i32 = arith.constant 0 : i32
    %c0_i32_0 = arith.constant 0 : i32
    %c0_i32_1 = arith.constant 0 : i32
    %c0_i32_2 = arith.constant 0 : i32
    return %c0_i32, %c0_i32_0, %c0_i32_1 : i32, i32, i32
  }
  func.func @transform_41(%arg0: i32) -> (i32, i32) {
    %c0_i32 = arith.constant 0 : i32
    %c0_i32_0 = arith.constant 0 : i32
    %c0_i32_1 = arith.constant 0 : i32
    return %c0_i32, %c0_i32_0 : i32, i32
  }
  func.func @transform_42(%arg0: i32) -> (i32, i32) {
    %c0_i32 = arith.constant 0 : i32
    %c0_i32_0 = arith.constant 0 : i32
    %c0_i32_1 = arith.constant 0 : i32
    return %c0_i32, %c0_i32_0 : i32, i32
  }
  func.func @transform_43(%arg0: i32) -> (i32, i32) {
    %c0_i32 = arith.constant 0 : i32
    %c0_i32_0 = arith.constant 0 : i32
    %c0_i32_1 = arith.constant 0 : i32
    return %c0_i32, %c0_i32_0 : i32, i32
  }
  func.func @transform_44(%arg0: i32) -> (i32, i32, i32) {
    %c0_i32 = arith.constant 0 : i32
    %c0_i32_0 = arith.constant 0 : i32
    %c0_i32_1 = arith.constant 0 : i32
    return %arg0, %c0_i32, %c0_i32_0 : i32, i32, i32
  }
}

</mosaic_0001>

<bundles_post_ra>
// kernel: unet_forward.1
= control target key start
LH: loop header
LB: loop body
LE: loop exit
PB: predicated region body
PF: predicated region fallthrough
CT: control target
= control target key end

     0   :  { %s15522_s6 = smov 1   ;;  %s15523_s10 = smov 2   ;;  %s17892_s0 = inlined_call_operand.smem [shape: u32[45], index: -1, kind: input, shape index: {}] }
   0x1   :  { %s15608_s5 = sld [smem:[%s17892_s0]]   ;;  %s15524_s14 = smov 3  }
   0x2   :  { %s15613_s9 = sld [smem:[%s17892_s0 + %s15522_s6]]   ;;  %s15525_s18 = smov 4  }
   0x3   :  { %s15618_s13 = sld [smem:[%s17892_s0 + %s15523_s10]]   ;;  %s15526_s22 = smov 5  }
   0x4   :  { %s15623_s17 = sld [smem:[%s17892_s0 + %s15524_s14]]   ;;  %s15527_s26 = smov 6  }
   0x5   :  { %s15628_s21 = sld [smem:[%s17892_s0 + %s15525_s18]]   ;;  %s15528_s30 = smov 7  }
   0x6   :  { %s15633_s25 = sld [smem:[%s17892_s0 + %s15526_s22]]   ;;  %s15529_s4 = smov 8  }
   0x7   :  { %18029 = sst [smem:[#allocation3_spill]] %s15608_s5  ;;  %s15530_s10 = smov 9  }
   0x8   :  { %18030 = sst [smem:[#allocation4_spill]] %s15613_s9  ;;  %s15531_s15 = smov 10  }
   0x9   :  { %18031 = sst [smem:[#allocation5_spill]] %s15618_s13  ;;  %s15532_s20 = smov 11  }
   0xa   :  { %s15638_s29 = sld [smem:[%s17892_s0 + %s15527_s26]]   ;;  %s15533_s26 = smov 12  }
   0xb   :  { %18032 = sst [smem:[#allocation6_spill]] %s15628_s21  ;;  %s15534_s1 = smov 13  }
   0xc   :  { %s15643_s3 = sld [smem:[%s17892_s0 + %s15528_s30]]   ;;  %s15535_s7 = smov 14  }
   0xd   :  { %s15648_s8 = sld [smem:[%s17892_s0 + %s15529_s4]]   ;;  %s15537_s22 = smov 16  }
   0xe   :  { %s15653_s14 = sld [smem:[%s17892_s0 + %s15530_s10]]   ;;  %s15538_s28 = smov 17  }
   0xf   :  { %s15658_s19 = sld [smem:[%s17892_s0 + %s15531_s15]]   ;;  %s15536_s15 = smov 15  }
  0x10   :  { %s15663_s24 = sld [smem:[%s17892_s0 + %s15532_s20]]   ;;  %s15565_s23 = smov 44  }
  0x11   :  { %s15668_s30 = sld [smem:[%s17892_s0 + %s15533_s26]]  }
  0x12   :  { %18033 = sst [smem:[#allocation7_spill]] %s15643_s3 }
  0x13   :  { %18034 = sst [smem:[#allocation8_spill]] %s15648_s8 }
  0x14   :  { %18035 = sst [smem:[#allocation9_spill]] %s15653_s14 }
  0x15   :  { %18036 = sst [smem:[#allocation10_spill]] %s15658_s19 }
  0x16   :  { %s15673_s6 = sld [smem:[%s17892_s0 + %s15534_s1]]  }
  0x17   :  { %s15678_s12 = sld [smem:[%s17892_s0 + %s15535_s7]]   ;;  %s15539_s7 = smov 18  }
  0x18   :  { %s15683_s20 = sld [smem:[%s17892_s0 + %s15536_s15]]   ;;  %s15540_s15 = smov 19  }
  0x19   :  { %s15688_s27 = sld [smem:[%s17892_s0 + %s15537_s22]]   ;;  %s15541_s22 = smov 20  }
  0x1a   :  { %s15693_s4 = sld [smem:[%s17892_s0 + %s15538_s28]]   ;;  %s15542_s28 = smov 21  }
  0x1b   :  { %s15698_s19 = sld [smem:[%s17892_s0 + %s15539_s7]]   ;;  %s15543_s7 = smov 22  }
  0x1c   :  { %18037 = sst [smem:[#allocation11_spill]] %s15673_s6 }
  0x1d   :  { %18038 = sst [smem:[#allocation12_spill]] %s15678_s12 }
  0x1e   :  { %s15703_s14 = sld [smem:[%s17892_s0 + %s15540_s15]]   ;;  %s15544_s15 = smov 23  }
  0x1f   :  { %s15708_s8 = sld [smem:[%s17892_s0 + %s15541_s22]]   ;;  %s15545_s22 = smov 24  }
  0x20   :  { %18039 = sst [smem:[#allocation13_spill]] %s15693_s4 }
  0x21   :  { %s15713_s21 = sld [smem:[%s17892_s0 + %s15542_s28]]   ;;  %s15546_s28 = smov 25  }
  0x22   :  { %s15718_s3 = sld [smem:[%s17892_s0 + %s15543_s7]]   ;;  %s15547_s7 = smov 26  }
  0x24   :  { %18040 = sst [smem:[#allocation14_spill]] %s15703_s14 }
  0x25   :  { %18041 = sst [smem:[#allocation15_spill]] %s15708_s8 }
  0x26   :  { %s15723_s14 = sld [smem:[%s17892_s0 + %s15544_s15]]   ;;  %s15548_s15 = smov 27  }
  0x27   :  { %18042 = sst [smem:[#allocation16_spill]] %s15713_s21 }
  0x28   :  { %18043 = sst [smem:[#allocation17_spill]] %s15718_s3 }
  0x29   :  { %s15728_s8 = sld [smem:[%s17892_s0 + %s15545_s22]]   ;;  %s15549_s22 = smov 28  }
  0x2a   :  { %s15733_s21 = sld [smem:[%s17892_s0 + %s15546_s28]]   ;;  %s15550_s28 = smov 29  }
  0x2b   :  { %s15738_s3 = sld [smem:[%s17892_s0 + %s15547_s7]]   ;;  %s15551_s7 = smov 30  }
  0x2c   :  { %18044 = sst [smem:[#allocation18_spill]] %s15723_s14 }
  0x2d   :  { %s15743_s14 = sld [smem:[%s17892_s0 + %s15548_s15]]   ;;  %s15552_s15 = smov 31  }
  0x2f   :  { %18045 = sst [smem:[#allocation19_spill]] %s15728_s8 }
  0x30   :  { %18046 = sst [smem:[#allocation20_spill]] %s15733_s21 }
  0x31   :  { %18047 = sst [smem:[#allocation21_spill]] %s15738_s3 }
  0x32   :  { %s15748_s8 = sld [smem:[%s17892_s0 + %s15549_s22]]   ;;  %s15553_s22 = smov 32  }
  0x33   :  { %18048 = sst [smem:[#allocation22_spill]] %s15743_s14 }
  0x34   :  { %s15753_s21 = sld [smem:[%s17892_s0 + %s15550_s28]]   ;;  %s15554_s28 = smov 33  }
  0x35   :  { %s15758_s3 = sld [smem:[%s17892_s0 + %s15551_s7]]   ;;  %s15555_s7 = smov 34  }
  0x36   :  { %s15763_s14 = sld [smem:[%s17892_s0 + %s15552_s15]]   ;;  %s15556_s15 = smov 35  }
  0x38   :  { %18049 = sst [smem:[#allocation23_spill]] %s15748_s8 }
  0x39   :  { %s15768_s8 = sld [smem:[%s17892_s0 + %s15553_s22]]   ;;  %s15557_s22 = smov 36  }
  0x3a   :  { %18050 = sst [smem:[#allocation24_spill]] %s15753_s21 }
  0x3b   :  { %18051 = sst [smem:[#allocation25_spill]] %s15758_s3 }
  0x3c   :  { %18052 = sst [smem:[#allocation26_spill]] %s15763_s14 }
  0x3d   :  { %s15773_s21 = sld [smem:[%s17892_s0 + %s15554_s28]]   ;;  %s15558_s28 = smov 37  }
  0x3e   :  { %s15778_s3 = sld [smem:[%s17892_s0 + %s15555_s7]]   ;;  %s15559_s7 = smov 38  }
  0x3f   :  { %18053 = sst [smem:[#allocation27_spill]] %s15768_s8 }
  0x40   :  { %s15783_s14 = sld [smem:[%s17892_s0 + %s15556_s15]]   ;;  %s15560_s15 = smov 39  }
  0x41   :  { %s15788_s8 = sld [smem:[%s17892_s0 + %s15557_s22]]   ;;  %s15561_s22 = smov 40  }
  0x43   :  { %18054 = sst [smem:[#allocation28_spill]] %s15773_s21 }
  0x44   :  { %18055 = sst [smem:[#allocation29_spill]] %s15778_s3 }
  0x45   :  { %s15793_s21 = sld [smem:[%s17892_s0 + %s15558_s28]]   ;;  %s15562_s28 = smov 41  }
  0x46   :  { %18056 = sst [smem:[#allocation30_spill]] %s15783_s14 }
  0x47   :  { %18057 = sst [smem:[#allocation31_spill]] %s15788_s8 }
  0x48   :  { %s15798_s3 = sld [smem:[%s17892_s0 + %s15559_s7]]   ;;  %s15563_s7 = smov 42  }
  0x49   :  { %s15803_s14 = sld [smem:[%s17892_s0 + %s15560_s15]]   ;;  %s15564_s15 = smov 43  }
  0x4a   :  { %s15808_s8 = sld [smem:[%s17892_s0 + %s15561_s22]]  }
  0x4b   :  { %18058 = sst [smem:[#allocation32_spill]] %s15793_s21 }
  0x4c   :  { %s15813_s21 = sld [smem:[%s17892_s0 + %s15562_s28]]   ;;  %s15828_s28 = smov 0  }
  0x4e   :  { %18059 = sst [smem:[#allocation33_spill]] %s15798_s3 }
  0x4f   :  { %18060 = sst [smem:[#allocation34_spill]] %s15803_s14 }
  0x50   :  { %18061 = sst [smem:[#allocation35_spill]] %s15808_s8 }
  0x51   :  { %s15818_s3 = sld [smem:[%s17892_s0 + %s15563_s7]]  }
  0x52   :  { %s13322_s14 = sld [smem:[%s17892_s0 + %s15564_s15]]  }
  0x53   :  { %s15826_s8 = sld [smem:[%s17892_s0 + %s15565_s23]]  }
  0x58   :  { %v94_v0 = vstv %s13322_s14 }
  0x59   :  { %95 = vst [vmem:[#allocation2] sm:$0x1] %v94_v0 }
  0x5a LB: > { %s18062_s13 = sld [smem:[#allocation5_spill]]  ;;  %s18063_s9 = sld [smem:[#allocation4_spill]]  ;;  %s15520_s28 = sphi %s15828_s28, %s101_s28  }
  0x5b   : > { %s18064_s6 = sld [smem:[#allocation11_spill]]  ;;  %s18065_s4 = sld [smem:[#allocation13_spill]] }
  0x5c   : > { %s13324_s1 = sadd.s32 4294967295, %s15520_s28   ;;  %p13328_p0 = scmp.ge.s32.totalorder %s15520_s28, 1 }
  0x5d   : > { %p1209_p1 = scmp.lt.s32.totalorder %s15520_s28, 3 }
  0x5f   : > { %p1210_p2 = pnand %p13328_p0, %p1209_p1 }
  0x61   : > { %1213 = sbr.rel (%p1210_p2) target bundleno = 9545 (0x2549), region = 196 }
  0x68   : > { %p1314_p3 = scmp.lt.s32.totalorder %s13324_s1, 1  ;;  %s18066_s5 = sld [smem:[#allocation3_spill]]  ;;  %v17924_v1 = vlaneseq  ;;  %v15566_v2 = vmov 1966171168   ;;  %vm1334_vm0 = vcmask 138240   ;;  %vm1457_vm1 = vcmask 1043456  }
  0x69   : > { %v1356_v3 = vunpack.c.l.s4 %v15566_v2  ;;  %v13334_v5 = vld.sshfl [vmem:[%s18063_s9 + $0x2] sm:$0x11 pattern:$0x75316420]  ;;  %s17921_s2 = smov 17   ;;  %s17951_s7 = smov 1  }
  0x6a   : > { %s18198_s1 = smov (!%p1314_p3, %s13324_s1), 1  ;;  %v1359_v4 = vshrl.u32 %v17924_v1, 7  ;;  %v1396_v7 = vcombine.high %v13334_v5, %v13334_v5  ;;  %v13341_v8 = vld.sshfl [vmem:[%s18063_s9 + $0x4] sm:$0x11 pattern:$0x75316420] }
  0x6b   : > { %v1357_v6 = vunpack.c.0.s8 %v1356_v3  ;;  %s14037_s0 = sshll.u32 %s18198_s1, 4  ;;  %v1565_v9 = vcombine.high %v13341_v8, %v13341_v8  ;;  %v13346_v13 = vld.sshfl [vmem:[%s18063_s9 + $0x6] sm:$0x11 pattern:$0x75316420]  ;;  %s17949_s10 = smov 2  }
  0x6c   : > { %v15846_v15 = vsub.s32 0, %v1359_v4  ;;  %v1684_v20 = vcombine.high %v13346_v13, %v13346_v13  ;;  %v13351_v25 = vld.sshfl [vmem:[%s18063_s9 + $0x8] sm:$0x11 pattern:$0x75316420]  ;;  %s15570_s11 = smov 16  }
  0x6d   : > { %v15843_v10 = vsub.s32 %v1357_v6, %v1359_v4  ;;  %v1803_v31 = vcombine.high %v13351_v25, %v13351_v25  ;;  %v13356_v32 = vld.sshfl [vmem:[%s18063_s9 + $0xa] sm:$0x11 pattern:$0x75316420]  ;;  %s17914_s15 = smov 18   ;;  %s15572_s16 = smov 32  }
  0x6e   : > { %s1318_s14 = scalar_lea.vmem %s18066_s5, %s14037_s0  ;;  %18068 = vst [vmem:[#allocation37_spill] sm:$0xff] %v15846_v15  ;;  %v13361_v36 = vld.sshfl [vmem:[%s18063_s9 + $0xc] sm:$0x11 pattern:$0x75316420]  ;;  %v1921_v43 = vcombine.high %v13356_v32, %v13356_v32  ;;  %s15573_s18 = smov 33  }
  0x6f   : > { %18067 = vst [vmem:[#allocation36_spill] sm:$0xff] %v15843_v10  ;;  %v1324_v11 = vld [vmem:[%s1318_s14] sm:$0xff]  ;;  %v1325_v12 = vld [vmem:[%s1318_s14 + $0x8] sm:$0xff]  ;;  %v1403_v16 = vrot.slane %v13334_v5, %v15843_v10  ;;  %v1410_v17 = vrot.slane %v1396_v7, %v15843_v10  ;;  %v1572_v18 = vrot.slane %v13341_v8, %v15843_v10  ;;  %v1579_v19 = vrot.slane %v1565_v9, %v15843_v10  ;;  %s15574_s23 = smov 34   ;;  %s17981_s22 = smov 127  }
  0x70   : > { %v1326_v14 = vpack.c.bf16 %v1324_v11, %v1324_v11  ;;  %v1327_v22 = vpack.c.bf16 %v1325_v12, %v1325_v12  ;;  %v1691_v24 = vrot.slane %v13346_v13, %v15843_v10  ;;  %v1698_v29 = vrot.slane %v1684_v20, %v15843_v10  ;;  %v13366_v44 = vld.sshfl [vmem:[%s18063_s9 + $0xe] sm:$0x11 pattern:$0x75316420]  ;;  %s17958_s26 = smov 126   ;;  %s17942_s0 = smov 112  }
  0x71   : > { %v1412_v21 = vpack.i.b16 %v1403_v16, %v1403_v16  ;;  %v1419_v23 = vpack.i.b16 %v1410_v17, %v1410_v17  ;;  %v1581_v26 = vpack.i.b16 %v1572_v18, %v1572_v18  ;;  %v1588_v28 = vpack.i.b16 %v1579_v19, %v1579_v19  ;;  %v13371_v52 = vld.sshfl [vmem:[%s18063_s9 + $0x10] sm:$0x11 pattern:$0x75316420]  ;;  %s17940_s14 = smov 111   ;;  %s18090_s12 = sld [smem:[#allocation12_spill]] }
  0x72   : > { %1330 = vrot.lane.b32.xlu0 %v1326_v14, %s17921_s2  ;;  %v1810_v30 = vrot.slane %v13351_v25, %v15843_v10  ;;  %v1700_v35 = vpack.i.b16 %v1691_v24, %v1691_v24  ;;  %v1707_v38 = vpack.i.b16 %v1698_v29, %v1698_v29  ;;  %v1817_v40 = vrot.slane %v1803_v31, %v15843_v10  ;;  %v13332_v14 = vld.sshfl [vmem:[%s18063_s9] sm:$0x11 pattern:$0x75316420]  ;;  %s18112_s5 = sld [smem:[#allocation21_spill]]  ;;  %s18116_s9 = sld [smem:[#allocation24_spill]] }
  0x73   : > { %v1417_v27 = vrot.slane %v1412_v21, %v15846_v15  ;;  %v1424_v33 = vrot.slane %v1419_v23, %v15846_v15  ;;  %v1586_v34 = vrot.slane %v1581_v26, %v15846_v15  ;;  %v1593_v37 = vrot.slane %v1588_v28, %v15846_v15 }
  0x74   : > { %v1819_v39 = vpack.i.b16 %v1810_v30, %v1810_v30  ;;  %v1705_v41 = vrot.slane %v1700_v35, %v15846_v15  ;;  %v1928_v42 = vrot.slane %v13356_v32, %v15843_v10  ;;  %v1712_v45 = vrot.slane %v1707_v38, %v15846_v15 }
  0x75   : > { %1427 = vrot.lane.b32.xlu1 %v1417_v27, %s17951_s7  ;;  %v1826_v47 = vpack.i.b16 %v1817_v40, %v1817_v40  ;;  %v2047_v48 = vrot.slane %v13361_v36, %v15843_v10  ;;  %v1935_v50 = vrot.slane %v1921_v43, %v15843_v10  ;;  %v2040_v51 = vcombine.high %v13361_v36, %v13361_v36 }
  0x76   : > { %1332 = vrot.lane.b32.xlu0 %v1327_v22, %s17921_s2  ;;  %v1824_v46 = vrot.slane %v1819_v39, %v15846_v15  ;;  %v1937_v49 = vpack.i.b16 %v1928_v42, %v1928_v42  ;;  %v2166_v55 = vrot.slane %v13366_v44, %v15843_v10  ;;  %v2159_v56 = vcombine.high %v13366_v44, %v13366_v44 }
  0x77   : > { %v1831_v53 = vrot.slane %v1826_v47, %v15846_v15  ;;  %v2056_v54 = vpack.i.b16 %v2047_v48, %v2047_v48  ;;  %v1944_v58 = vpack.i.b16 %v1935_v50, %v1935_v50  ;;  %v2054_v59 = vrot.slane %v2040_v51, %v15843_v10 }
  0x78   : > { %v1942_v57 = vrot.slane %v1937_v49, %v15846_v15  ;;  %v2175_v60 = vpack.i.b16 %v2166_v55, %v2166_v55  ;;  %v2173_v61 = vrot.slane %v2159_v56, %v15843_v10  ;;  %v2285_v62 = vrot.slane %v13371_v52, %v15843_v10 }
  0x79   : > { %1429 = vrot.lane.b32.xlu1 %v1424_v33, %s17951_s7  ;;  %v2278_v63 = vcombine.high %v13371_v52, %v13371_v52  ;;  %v1949_v0 = vrot.slane %v1944_v58, %v15846_v15  ;;  %v2061_v2 = vrot.slane %v2056_v54, %v15846_v15  ;;  %v2063_v3 = vpack.i.b16 %v2054_v59, %v2054_v59 }
  0x7a   : > { %1596 = vrot.lane.b32.xlu0 %v1586_v34, %s17949_s10  ;;  %v2180_v4 = vrot.slane %v2175_v60, %v15846_v15  ;;  %v2294_v5 = vpack.i.b16 %v2285_v62, %v2285_v62  ;;  %v2182_v7 = vpack.i.b16 %v2173_v61, %v2173_v61  ;;  %v1354_v16 = vcombine.high %v13332_v14, %v13332_v14 }
  0x7b   : > { %v2068_v6 = vrot.slane %v2063_v3, %v15846_v15  ;;  %v2292_v8 = vrot.slane %v2278_v63, %v15843_v10  ;;  %v1361_v17 = vrot.slane %v13332_v14, %v15843_v10  ;;  %vm1453_vm2 = vcmask 64512  }
  0x7c   : > { %v2187_v9 = vrot.slane %v2182_v7, %v15846_v15  ;;  %v2299_v11 = vrot.slane %v2294_v5, %v15846_v15  ;;  %v1368_v18 = vrot.slane %v1354_v16, %v15843_v10  ;;  %vm1431_vm3 = vcmask 7168  }
  0x7d   : > { %1598 = vrot.lane.b32.xlu1 %v1593_v37, %s17949_s10  ;;  %v2301_v12 = vpack.i.b16 %v2292_v8, %v2292_v8  ;;  %v1370_v19 = vpack.i.b16 %v1361_v17, %v1361_v17  ;;  %v17925_v44 = vmov 0   ;;  %vm1600_vm4 = vcmask 15360  }
  0x7e   : > { %1715 = vrot.lane.b32.xlu0 %v1705_v41, %s15570_s11  ;;  %v1377_v20 = vpack.i.b16 %v1368_v18, %v1368_v18  ;;  %v1385_v41 = vld [vmem:[%s15663_s24] sm:$0xf]  ;;  %1496 = vmatprep.mubr.bf16.mxu0 %v17925_v44  ;;  %vm1719_vm5 = vcmask 130048   ;;  %vm1956_vm6 = vcmask 146432   ;;  %vm2075_vm7 = vcmask 261120  }
  0x7f   : > { %v2306_v13 = vrot.slane %v2301_v12, %v15846_v15  ;;  %v15901_v22 = vrot.slane %v1370_v19, %v15846_v15  ;;  %1546 = vmatprep.mubr.bf16.mxu1 %v17925_v44  ;;  %15353 = vset.pattern.permute.xlu0 %v17925_v44  ;;  %vm2194_vm8 = vcmask 269312   ;;  %vm2313_vm9 = vcmask 277504   ;;  %v2387_v19 = vld [vmem:[%s15668_s30] sm:$0xff] }
  0x80   : > { %v15907_v24 = vrot.slane %v1377_v20, %v15846_v15  ;;  %15354 = vset.pattern.permute.xlu1 %v17925_v44  ;;  %vm1450_vm10 = vcmask 1039360   ;;  %vm1619_vm11 = vcmask 1031168   ;;  %vm1738_vm12 = vcmask 916480  }
  0x81   : > { %1717 = vrot.lane.b32.xlu1 %v1712_v45, %s15570_s11  ;;  %18069 = vst [vmem:[#allocation38_spill] sm:$0xff] %v15901_v22  ;;  %vm17971_vm13 = vcmask 908288   ;;  %vm17970_vm14 = vcmask 900096   ;;  %vm17947_vm15 = vcmask 785408  }
  0x82   : > { %1834 = vrot.lane.b32.xlu0 %v1824_v46, %s17921_s2  ;;  %18070 = vst [vmem:[#allocation39_spill] sm:$0xff] %v15907_v24 }
  0x85   : > { %1836 = vrot.lane.b32.xlu1 %v1831_v53, %s17921_s2 }
  0x86   : > { %1952 = vrot.lane.b32.xlu0 %v1942_v57, %s17914_s15 }
  0x89   : > { %1954 = vrot.lane.b32.xlu1 %v1949_v0, %s17914_s15  ;;  %s17915_s15 = smov 94  }
  0x8a   : > { %2071 = vrot.lane.b32.xlu0 %v2061_v2, %s15572_s16 }
  0x8d   : > { %2073 = vrot.lane.b32.xlu1 %v2068_v6, %s15572_s16  ;;  %s17938_s16 = smov 110  }
  0x8e   : > { %2190 = vrot.lane.b32.xlu0 %v2180_v4, %s15573_s18 }
  0x91   : > { %2192 = vrot.lane.b32.xlu1 %v2187_v9, %s15573_s18  ;;  %s17919_s18 = smov 96  }
  0x92   : > { %2309 = vrot.lane.b32.xlu0 %v2299_v11, %s15574_s23 }
  0x95   : > { %2311 = vrot.lane.b32.xlu1 %v2306_v13, %s15574_s23  ;;  %s17917_s23 = smov 95  }
  0xe4   : > { %v1331_v21 = vpop.permute.xlu0 %1330 }
  0xe5   : > { %v15904_v23 = vsel %vm1334_vm0, 0, %v1331_v21 }
  0xe6   : > { %v1383_v27 = vmul.bf16 %v15901_v22, %v15904_v23 }
  0xe7   : > { %v15909_v25 = vpop.permute.xlu1 %1427 }
  0xe8   : > { %v1333_v26 = vpop.permute.xlu0 %1332  ;;  %v1436_v29 = vmul.bf16 %v15909_v25, %v15904_v23  ;;  %v1509_v34 = vsel %vm1457_vm1, %v1383_v27, 0 }
  0xe9   : > { %v15914_v28 = vsel %vm1334_vm0, %v1331_v21, %v1333_v26  ;;  %v15922_v31 = vsel %vm1334_vm0, %v1333_v26, 0 }
  0xea   : > { %v1384_v30 = vmul.bf16 %v15907_v24, %v15914_v28  ;;  %1444 = vrot.lane.b32.xlu0 %v1436_v29, %s17981_s22 }
  0xeb   : > { %v15924_v32 = vpop.permute.xlu1 %1429 }
  0xec   : > { %13338 = vmatprep.subr.msk.bf16.mxu1 %vm1457_vm1, %v1384_v30  ;;  %v15927_v33 = vpop.permute.xlu0 %1596  ;;  %v1438_v35 = vmul.bf16 %v15924_v32, %v15922_v31  ;;  %v15961_v47 = vsel %vm1431_vm3, %v15909_v25, %v15924_v32  ;;  %vm17946_vm3 = vcmask 777216  }
  0xed   : > { %1515 = vmatpush1.bf16.msra.mxu1 %v1509_v34  ;;  %v1605_v36 = vmul.bf16 %v15927_v33, %v15904_v23  ;;  %v1437_v50 = vmul.bf16 %v15961_v47, %v15914_v28 }
  0xee   : > { %1448 = vrot.lane.b32.xlu0 %v1438_v35, %s17981_s22 }
  0xef   : > { %1613 = vrot.lane.b32.xlu1 %v1605_v36, %s17958_s26  ;;  %v15936_v37 = vpop.permute.xlu1 %1598 }
  0xf0   : > { %18071 = vst [vmem:[#allocation40_spill] sm:$0xff] %v15936_v37  ;;  %v15938_v38 = vpop.permute.xlu0 %1715  ;;  %v1607_v39 = vmul.bf16 %v15936_v37, %v15922_v31  ;;  %13339 = vmatmul.mubr.msk.bf16.vlgmr.msra.gmra.mrb[0].mxu1 %vm1453_vm2, %v1385_v41  ;;  %v15977_v52 = vsel %vm1600_vm4, %v15927_v33, %v15936_v37  ;;  %vm17937_vm4 = vcmask 769024  }
  0xf1   : > { %18072 = vst [vmem:[#allocation41_spill] sm:$0xff] %v15938_v38  ;;  %v1724_v40 = vmul.bf16 %v15938_v38, %v15904_v23  ;;  %1782 = vmatprep.mubr.bf16.mxu1 %v17925_v44  ;;  %v1606_v55 = vmul.bf16 %v15977_v52, %v15914_v28 }
  0xf3   : > { %1617 = vrot.lane.b32.xlu1 %v1607_v39, %s17958_s26  ;;  %1732 = vrot.lane.b32.xlu0 %v1724_v40, %s17942_s0  ;;  %v15947_v42 = vpop.permute.xlu1 %1717  ;;  %v13335_v40 = vld [vmem:[%s15663_s24 + $0x4] sm:$0xf] }
  0xf4   : > { %18073 = vst [vmem:[#allocation42_spill] sm:$0xff] %v15947_v42  ;;  %v15949_v43 = vpop.permute.xlu0 %1834  ;;  %v1726_v45 = vmul.bf16 %v15947_v42, %v15922_v31  ;;  %v16003_v60 = vsel %vm1719_vm5, %v15938_v38, %v15947_v42 }
  0xf5   : > { %18074 = vst [vmem:[#allocation43_spill] sm:$0xff] %v15949_v43  ;;  %v1842_v46 = vmul.bf16 %v15949_v43, %v15904_v23  ;;  %18080 = vst [vmem:[#allocation49_spill] sm:$0xff] %v16003_v60  ;;  %v1725_v63 = vmul.bf16 %v16003_v60, %v15914_v28 }
  0xf7   : > { %1736 = vrot.lane.b32.xlu0 %v1726_v45, %s17942_s0  ;;  %1850 = vrot.lane.b32.xlu1 %v1842_v46, %s17940_s14  ;;  %v15967_v48 = vpop.permute.xlu1 %1836 }
  0xf8   : > { %18075 = vst [vmem:[#allocation44_spill] sm:$0xff] %v15967_v48  ;;  %v15969_v49 = vpop.permute.xlu0 %1952  ;;  %v1844_v54 = vmul.bf16 %v15967_v48, %v15922_v31  ;;  %v15998_v59 = vsel %vm1334_vm0, %v15949_v43, %v15967_v48 }
  0xf9   : > { %18076 = vst [vmem:[#allocation45_spill] sm:$0xff] %v15969_v49  ;;  %v1961_v51 = vmul.bf16 %v15969_v49, %v15904_v23  ;;  %18079 = vst [vmem:[#allocation48_spill] sm:$0xff] %v15998_v59  ;;  %v1843_v62 = vmul.bf16 %v15998_v59, %v15914_v28 }
  0xfb   : > { %1446 = vrot.lane.b32.xlu1 %v1437_v50, %s17981_s22  ;;  %1969 = vrot.lane.b32.xlu0 %v1961_v51, %s17938_s16  ;;  %v15981_v53 = vpop.permute.xlu1 %1954 }
  0xfc   : > { %18077 = vst [vmem:[#allocation46_spill] sm:$0xff] %v15981_v53  ;;  %v15987_v56 = vpop.permute.xlu0 %2071  ;;  %v1963_v57 = vmul.bf16 %v15981_v53, %v15922_v31  ;;  %v16025_v5 = vsel %vm1956_vm6, %v15969_v49, %v15981_v53  ;;  %vm15588_vm6 = vmmov 0  }
  0xfd   : > { %18078 = vst [vmem:[#allocation47_spill] sm:$0xff] %v15987_v56  ;;  %v2080_v58 = vmul.bf16 %v15987_v56, %v15904_v23  ;;  %18084 = vst [vmem:[#allocation53_spill] sm:$0xff] %v16025_v5  ;;  %v1962_v7 = vmul.bf16 %v16025_v5, %v15914_v28 }
  0xff   : > { %1854 = vrot.lane.b32.xlu1 %v1844_v54, %s17940_s14  ;;  %1615 = vrot.lane.b32.xlu0 %v1606_v55, %s17958_s26  ;;  %v16005_v61 = vpop.permute.xlu1 %2073 }
 0x100   : > { %18081 = vst [vmem:[#allocation50_spill] sm:$0xff] %v16005_v61  ;;  %v16013_v0 = vpop.permute.xlu0 %2190  ;;  %v2082_v3 = vmul.bf16 %v16005_v61, %v15922_v31  ;;  %v16030_v6 = vsel %vm2075_vm7, %v15987_v56, %v16005_v61 }
 0x101   : > { %18082 = vst [vmem:[#allocation51_spill] sm:$0xff] %v16013_v0  ;;  %v2199_v4 = vmul.bf16 %v16013_v0, %v15904_v23  ;;  %18085 = vst [vmem:[#allocation54_spill] sm:$0xff] %v16030_v6  ;;  %v2081_v8 = vmul.bf16 %v16030_v6, %v15914_v28 }
 0x103   : > { %1973 = vrot.lane.b32.xlu0 %v1963_v57, %s17938_s16  ;;  %2088 = vrot.lane.b32.xlu1 %v2080_v58, %s17919_s18  ;;  %v16017_v2 = vpop.permute.xlu1 %2192  ;;  %v13342_v57 = vld [vmem:[%s15663_s24 + $0x8] sm:$0xf] }
 0x104   : > { %18083 = vst [vmem:[#allocation52_spill] sm:$0xff] %v16017_v2  ;;  %v16038_v9 = vpop.permute.xlu0 %2309  ;;  %v2201_v12 = vmul.bf16 %v16017_v2, %v15922_v31  ;;  %v16050_v14 = vsel %vm2194_vm8, %v16013_v0, %v16017_v2  ;;  %vm3221_vm8 = vcmask 72704  }
 0x105   : > { %18086 = vst [vmem:[#allocation55_spill] sm:$0xff] %v16038_v9  ;;  %v2318_v13 = vmul.bf16 %v16038_v9, %v15904_v23  ;;  %18088 = vst [vmem:[#allocation57_spill] sm:$0xff] %v16050_v14  ;;  %v2200_v17 = vmul.bf16 %v16050_v14, %v15914_v28 }
 0x107   : > { %1852 = vrot.lane.b32.xlu0 %v1843_v62, %s17940_s14  ;;  %1734 = vrot.lane.b32.xlu1 %v1725_v63, %s17942_s0  ;;  %v16040_v11 = vpop.permute.xlu1 %2311 }
 0x108   : > { %18087 = vst [vmem:[#allocation56_spill] sm:$0xff] %v16040_v11  ;;  %v16054_v16 = vsel %vm2313_vm9, %v16038_v9, %v16040_v11  ;;  %v2320_v20 = vmul.bf16 %v16040_v11, %v15922_v31  ;;  %vm3224_vm9 = vcmask 596992  }
 0x109   : > { %18089 = vst [vmem:[#allocation58_spill] sm:$0xff] %v16054_v16  ;;  %v2319_v18 = vmul.bf16 %v16054_v16, %v15914_v28 }
 0x10b   : > { %2092 = vrot.lane.b32.xlu1 %v2082_v3, %s17919_s18  ;;  %2207 = vrot.lane.b32.xlu0 %v2199_v4, %s17917_s23 }
 0x10f   : > { %1971 = vrot.lane.b32.xlu1 %v1962_v7, %s17938_s16  ;;  %2090 = vrot.lane.b32.xlu0 %v2081_v8, %s17919_s18 }
 0x113   : > { %2211 = vrot.lane.b32.xlu0 %v2201_v12, %s17917_s23  ;;  %2326 = vrot.lane.b32.xlu1 %v2318_v13, %s17915_s15  ;;  %v13347_v13 = vld [vmem:[%s15663_s24 + $0xc] sm:$0xf] }
 0x117   : > { %2209 = vrot.lane.b32.xlu1 %v2200_v17, %s17917_s23  ;;  %2328 = vrot.lane.b32.xlu0 %v2319_v18, %s17915_s15 }
 0x11b   : > { %2330 = vrot.lane.b32.xlu1 %v2320_v20, %s17915_s15  ;;  %2390 = vperm.xlu0 %15353, %v2387_v19   ;;  %v13352_v19 = vld [vmem:[%s15663_s24 + $0x10] sm:$0xf] }
 0x15c   : > { %v1445_v21 = vpop.permute.xlu0 %1444 }
 0x160   : > { %v1449_v26 = vpop.permute.xlu0 %1448 }
 0x161   : > { %v1614_v23 = vpop.permute.xlu1 %1613 }
 0x165   : > { %v1618_v27 = vpop.permute.xlu1 %1617  ;;  %v1733_v29 = vpop.permute.xlu0 %1732 }
 0x169   : > { %v1851_v30 = vpop.permute.xlu1 %1850  ;;  %v1737_v34 = vpop.permute.xlu0 %1736 }
 0x16d   : > { %v1447_v28 = vpop.permute.xlu1 %1446  ;;  %v1970_v35 = vpop.permute.xlu0 %1969 }
 0x16e   : > { %v1452_v36 = vsel %vm1450_vm10, %v1447_v28, %v1449_v26  ;;  %v1451_v39 = vsel %vm1450_vm10, %v1445_v21, %v1447_v28  ;;  %v13357_v28 = vld [vmem:[%s15663_s24 + $0x14] sm:$0xf] }
 0x16f   : > { %13336 = vmatprep.subr.msk.bf16.mxu0 %vm1457_vm1, %v1452_v36  ;;  %v1459_v31 = vsel %vm1457_vm1, %v1451_v39, 0  ;;  %v13362_v39 = vld [vmem:[%s15663_s24 + $0x18] sm:$0xf] }
 0x170   : > { %1465 = vmatpush1.bf16.msra.mxu0 %v1459_v31 }
 0x171   : > { %v1855_v41 = vpop.permute.xlu1 %1854  ;;  %v1616_v45 = vpop.permute.xlu0 %1615 }
 0x172   : > { %v1620_v46 = vsel %vm1619_vm11, %v1614_v23, %v1616_v45  ;;  %v1621_v50 = vsel %vm1619_vm11, %v1616_v45, %v1618_v27 }
 0x173   : > { %13337 = vmatmul.mubr.msk.bf16.vlgmr.msra.gmra.mrb[0].mxu0 %vm1453_vm2, %v13335_v40  ;;  %13343 = vmatprep.subr.msk.bf16.mxu0 %vm1457_vm1, %v1621_v50  ;;  %v1626_v51 = vsel %vm1457_vm1, %v1620_v46, 0 }
 0x174   : > { %1632 = vmatpush1.bf16.msra.mxu0 %v1626_v51  ;;  %1663 = vmatprep.mubr.bf16.mxu0 %v17925_v44  ;;  %v13367_v51 = vld [vmem:[%s15663_s24 + $0x1c] sm:$0xf] }
 0x175   : > { %v2089_v54 = vpop.permute.xlu1 %2088  ;;  %v1974_v55 = vpop.permute.xlu0 %1973 }
 0x179   : > { %v1735_v58 = vpop.permute.xlu1 %1734  ;;  %v1853_v62 = vpop.permute.xlu0 %1852 }
 0x17a   : > { %v1739_v63 = vsel %vm1738_vm12, %v1733_v29, %v1735_v58  ;;  %v1857_v3 = vsel %vm17971_vm13, %v1851_v30, %v1853_v62  ;;  %v1740_v4 = vsel %vm1738_vm12, %v1735_v58, %v1737_v34  ;;  %v1858_v7 = vsel %vm17971_vm13, %v1853_v62, %v1855_v41  ;;  %v13372_v58 = vld [vmem:[%s15663_s24 + $0x20] sm:$0xf] }
 0x17b   : > { %13344 = vmatmul.mubr.msk.bf16.vlgmr.msra.gmra.mrb[4].mxu0 %vm1453_vm2, %v13342_v57  ;;  %13348 = vmatprep.subr.msk.bf16.mxu1 %vm1457_vm1, %v1740_v4  ;;  %v1745_v8 = vsel %vm1457_vm1, %v1739_v63, 0  ;;  %v1863_v12 = vsel %vm1457_vm1, %v1857_v3, 0 }
 0x17c   : > { %13353 = vmatprep.subr.msk.bf16.mxu0 %vm1457_vm1, %v1858_v7  ;;  %1751 = vmatpush1.bf16.msra.mxu1 %v1745_v8 }
 0x17d   : > { %1869 = vmatpush1.bf16.msra.mxu0 %v1863_v12  ;;  %v2093_v17 = vpop.permute.xlu1 %2092  ;;  %v2208_v18 = vpop.permute.xlu0 %2207  ;;  %1900 = vmatprep.mubr.bf16.mxu0 %v17925_v44 }
 0x17f   : > { %13349 = vmatmul.mubr.msk.bf16.vlgmr.msra.gmra.mrb[4].mxu1 %vm1453_vm2, %v13347_v13 }
 0x180   : > { %2019 = vmatprep.mubr.bf16.mxu1 %v17925_v44 }
 0x181   : > { %v1972_v20 = vpop.permute.xlu1 %1971  ;;  %v2091_v21 = vpop.permute.xlu0 %2090 }
 0x182   : > { %v1976_v23 = vsel %vm17970_vm14, %v1970_v35, %v1972_v20  ;;  %v2095_v26 = vsel %vm17947_vm15, %v2089_v54, %v2091_v21  ;;  %v1977_v27 = vsel %vm17970_vm14, %v1972_v20, %v1974_v55  ;;  %v2096_v29 = vsel %vm17947_vm15, %v2091_v21, %v2093_v17 }
 0x183   : > { %13354 = vmatmul.mubr.msk.bf16.vlgmr.msra.gmra.mrb[8].mxu0 %vm1453_vm2, %v13352_v19  ;;  %13358 = vmatprep.subr.msk.bf16.mxu1 %vm1457_vm1, %v1977_v27  ;;  %v1982_v30 = vsel %vm1457_vm1, %v1976_v23, 0  ;;  %v2101_v34 = vsel %vm1457_vm1, %v2095_v26, 0 }
 0x184   : > { %13363 = vmatprep.subr.msk.bf16.mxu0 %vm1457_vm1, %v2096_v29  ;;  %1988 = vmatpush1.bf16.msra.mxu1 %v1982_v30 }
 0x185   : > { %2107 = vmatpush1.bf16.msra.mxu0 %v2101_v34  ;;  %v2327_v35 = vpop.permute.xlu1 %2326  ;;  %v2212_v36 = vpop.permute.xlu0 %2211  ;;  %2138 = vmatprep.mubr.bf16.mxu0 %v17925_v44 }
 0x187   : > { %13359 = vmatmul.mubr.msk.bf16.vlgmr.msra.gmra.mrb[8].mxu1 %vm1453_vm2, %v13357_v28 }
 0x188   : > { %2257 = vmatprep.mubr.bf16.mxu1 %v17925_v44 }
 0x189   : > { %v2210_v31 = vpop.permute.xlu1 %2209  ;;  %v2329_v40 = vpop.permute.xlu0 %2328 }
 0x18a   : > { %v2214_v41 = vsel %vm17946_vm3, %v2208_v18, %v2210_v31  ;;  %v2215_v45 = vsel %vm17946_vm3, %v2210_v31, %v2212_v36  ;;  %v2333_v50 = vsel %vm17937_vm4, %v2327_v35, %v2329_v40 }
 0x18b   : > { %13364 = vmatmul.mubr.msk.bf16.vlgmr.msra.gmra.mrb[12].mxu0 %vm1453_vm2, %v13362_v39  ;;  %13368 = vmatprep.subr.msk.bf16.mxu1 %vm1457_vm1, %v2215_v45  ;;  %v2220_v46 = vsel %vm1457_vm1, %v2214_v41, 0  ;;  %v2339_v57 = vsel %vm1457_vm1, %v2333_v50, 0 }
 0x18c   : > { %2226 = vmatpush1.bf16.msra.mxu1 %v2220_v46  ;;  %2376 = vmatprep.mubr.bf16.mxu0 %v17925_v44 }
 0x18d   : > { %v2331_v54 = vpop.permute.xlu1 %2330 }
 0x18e   : > { %v2334_v55 = vsel %vm17937_vm4, %v2329_v40, %v2331_v54 }
 0x18f   : > { %13369 = vmatmul.mubr.msk.bf16.vlgmr.msra.gmra.mrb[12].mxu1 %vm1453_vm2, %v13367_v51  ;;  %13373 = vmatprep.subr.msk.bf16.mxu0 %vm1457_vm1, %v2334_v55 }
 0x190   : > { %2345 = vmatpush1.bf16.msra.mxu0 %v2339_v57  ;;  %2473 = vmatprep.mubr.bf16.mxu1 %v17925_v44 }
 0x193   : > { %13374 = vmatmul.mubr.msk.bf16.vlgmr.msra.gmra.mrb[16].mxu0 %vm1453_vm2, %v13372_v58 }
 0x194   : > { %2523 = vmatprep.mubr.bf16.mxu0 %v17925_v44 }
 0x1c3   : > { %v1548_v62 = vpop.f32.mrb[0].mxu1 }
 0x1c4   : > { %v1550_v63 = vpop.f32.mrb[1].mxu1 }
 0x1c5   : > { %v1552_v3 = vpop.f32.mrb[2].mxu1 }
 0x1c6   : > { %v1553_v4 = vpop.f32.mrb[3].mxu1 }
 0x246   : > { %v1498_v7 = vpop.f32.mrb[0].mxu0 }
 0x247   : > { %v1500_v8 = vpop.f32.mrb[1].mxu0  ;;  %v1549_v12 = vadd.f32 %v1548_v62, %v1498_v7 }
 0x248   : > { %v1502_v13 = vpop.f32.mrb[2].mxu0  ;;  %v1551_v17 = vadd.f32 %v1550_v63, %v1500_v8 }
 0x249   : > { %v1503_v18 = vpop.f32.mrb[3].mxu0 }
 0x24e   : > { %v1665_v19 = vpop.f32.mrb[4].mxu0 }
 0x24f   : > { %v1672_v20 = vadd.f32 %v1665_v19, %v1549_v12  ;;  %v1667_v21 = vpop.f32.mrb[5].mxu0 }
 0x250   : > { %v1673_v23 = vadd.f32 %v1667_v21, %v1551_v17  ;;  %v1669_v26 = vpop.f32.mrb[6].mxu0 }
 0x251   : > { %v1670_v27 = vpop.f32.mrb[7].mxu0 }
 0x252   : > { %v1784_v29 = vpop.f32.mrb[4].mxu1 }
 0x253   : > { %v1791_v30 = vadd.f32 %v1784_v29, %v1672_v20  ;;  %v1786_v34 = vpop.f32.mrb[5].mxu1 }
 0x254   : > { %v1792_v28 = vadd.f32 %v1786_v34, %v1673_v23  ;;  %v1788_v35 = vpop.f32.mrb[6].mxu1  ;;  %v2391_v23 = vpop.permute.xlu0 %2390 }
 0x255   : > { %v1789_v36 = vpop.f32.mrb[7].mxu1 }
 0x256   : > { %v1902_v39 = vpop.f32.mrb[8].mxu0 }
 0x257   : > { %v1909_v31 = vadd.f32 %v1902_v39, %v1791_v30  ;;  %v1904_v40 = vpop.f32.mrb[9].mxu0 }
 0x258   : > { %v1910_v41 = vadd.f32 %v1904_v40, %v1792_v28  ;;  %v1906_v45 = vpop.f32.mrb[10].mxu0 }
 0x259   : > { %v1907_v46 = vpop.f32.mrb[11].mxu0 }
 0x25a   : > { %v2021_v50 = vpop.f32.mrb[8].mxu1 }
 0x25b   : > { %v2028_v51 = vadd.f32 %v2021_v50, %v1909_v31  ;;  %v2023_v54 = vpop.f32.mrb[9].mxu1 }
 0x25c   : > { %v2029_v55 = vadd.f32 %v2023_v54, %v1910_v41  ;;  %v2025_v57 = vpop.f32.mrb[10].mxu1 }
 0x25d   : > { %v2026_v58 = vpop.f32.mrb[11].mxu1 }
 0x25e   : > { %v2140_v62 = vpop.f32.mrb[12].mxu0 }
 0x25f   : > { %v2147_v63 = vadd.f32 %v2140_v62, %v2028_v51  ;;  %v2142_v3 = vpop.f32.mrb[13].mxu0 }
 0x260   : > { %v2148_v4 = vadd.f32 %v2142_v3, %v2029_v55  ;;  %v2144_v7 = vpop.f32.mrb[14].mxu0 }
 0x261   : > { %v2145_v8 = vpop.f32.mrb[15].mxu0  ;;  %v2415_v7 = vld [vmem:[%s18064_s6] sm:$0xf] }
 0x262   : > { %v2259_v12 = vpop.f32.mrb[12].mxu1 }
 0x263   : > { %v2266_v13 = vadd.f32 %v2259_v12, %v2147_v63  ;;  %v2261_v17 = vpop.f32.mrb[13].mxu1 }
 0x264   : > { %v2267_v18 = vadd.f32 %v2261_v17, %v2148_v4  ;;  %v2263_v19 = vpop.f32.mrb[14].mxu1 }
 0x265   : > { %v2264_v20 = vpop.f32.mrb[15].mxu1 }
 0x266   : > { %v2378_v21 = vpop.f32.mrb[16].mxu0 }
 0x267   : > { %v2385_v26 = vadd.f32 %v2378_v21, %v2266_v13  ;;  %v2380_v27 = vpop.f32.mrb[17].mxu0 }
 0x268   : > { %v2386_v29 = vadd.f32 %v2380_v27, %v2267_v18  ;;  %v2382_v30 = vpop.f32.mrb[18].mxu0 }
 0x269   : > { %v2393_v34 = vadd.f32 %v2391_v23, %v2385_v26  ;;  %v2383_v28 = vpop.f32.mrb[19].mxu0 }
 0x26a   : > { %v2394_v35 = vadd.f32 %v2391_v23, %v2386_v29 }
 0x26b   : > { %v2395_v36 = vmax.f32 %v2393_v34, 0.0 }
 0x26c   : > { %v2396_v39 = vmax.f32 %v2394_v35, 0.0 }
 0x26d   : > { %v2397_v31 = vpack.c.bf16 %v2395_v36, %v2395_v36 }
 0x26e   : > { %v2398_v40 = vpack.c.bf16 %v2396_v39, %v2396_v39 }
 0x26f   : > { %2401 = vrot.lane.b32.xlu1 %v2397_v31, %s17921_s2 }
 0x273   : > { %2403 = vrot.lane.b32.xlu1 %v2398_v40, %s17921_s2  ;;  %v3008_v40 = vld [vmem:[%s18090_s12] sm:$0xff]  ;;  %s18119_s12 = smov 118  }
 0x2e1   : > { %v2402_v41 = vpop.permute.xlu1 %2401 }
 0x2e2   : > { %v2408_v45 = vsel %vm1334_vm0, 0, %v2402_v41 }
 0x2e3   : > { %v2532_v46 = vmul.bf16 %v2408_v45, %v15927_v33  ;;  %v2416_v50 = vmul.bf16 %v2408_v45, %v15909_v25  ;;  %v2413_v55 = vmul.bf16 %v2408_v45, %v15901_v22  ;;  %v2668_v57 = vmul.bf16 %v2408_v45, %v15949_v43 }
 0x2e4   : > { %v2600_v58 = vmul.bf16 %v2408_v45, %v15938_v38  ;;  %v2804_v3 = vmul.bf16 %v2408_v45, %v15987_v56  ;;  %v2736_v4 = vmul.bf16 %v2408_v45, %v15969_v49  ;;  %v2872_v17 = vmul.bf16 %v2408_v45, %v16013_v0 }
 0x2e5   : > { %2540 = vrot.lane.b32.xlu1 %v2532_v46, %s17958_s26  ;;  %2424 = vrot.lane.b32.xlu0 %v2416_v50, %s17981_s22  ;;  %v2404_v51 = vpop.permute.xlu1 %2403  ;;  %v2486_v63 = vsel %vm1457_vm1, %v2413_v55, 0  ;;  %v2940_v18 = vmul.bf16 %v2408_v45, %v16038_v9 }
 0x2e6   : > { %v2405_v54 = vsel %vm1334_vm0, %v2402_v41, %v2404_v51  ;;  %v2411_v8 = vsel %vm1334_vm0, %v2404_v51, 0 }
 0x2e7   : > { %v2414_v62 = vmul.bf16 %v2405_v54, %v15907_v24  ;;  %v2418_v12 = vmul.bf16 %v2411_v8, %v15924_v32  ;;  %v2417_v13 = vmul.bf16 %v2405_v54, %v15961_v47  ;;  %v2533_v19 = vmul.bf16 %v2405_v54, %v15977_v52 }
 0x2e8   : > { %v2534_v20 = vmul.bf16 %v2411_v8, %v15936_v37  ;;  %v2602_v21 = vmul.bf16 %v2411_v8, %v15947_v42  ;;  %v2601_v23 = vmul.bf16 %v2405_v54, %v16003_v60  ;;  %v2669_v26 = vmul.bf16 %v2405_v54, %v15998_v59 }
 0x2e9   : > { %2676 = vrot.lane.b32.xlu1 %v2668_v57, %s17940_s14  ;;  %2608 = vrot.lane.b32.xlu0 %v2600_v58, %s17942_s0  ;;  %v2670_v27 = vmul.bf16 %v2411_v8, %v15967_v48  ;;  %v2738_v29 = vmul.bf16 %v2411_v8, %v15981_v53  ;;  %v2737_v30 = vmul.bf16 %v2405_v54, %v16025_v5 }
 0x2ea   : > { %13378 = vmatprep.subr.msk.bf16.mxu0 %vm1457_vm1, %v2414_v62  ;;  %v2805_v34 = vmul.bf16 %v2405_v54, %v16030_v6  ;;  %v2806_v28 = vmul.bf16 %v2411_v8, %v16005_v61  ;;  %v2874_v35 = vmul.bf16 %v2411_v8, %v16017_v2  ;;  %v2873_v36 = vmul.bf16 %v2405_v54, %v16050_v14 }
 0x2eb   : > { %2492 = vmatpush1.bf16.msra.mxu0 %v2486_v63  ;;  %v2941_v39 = vmul.bf16 %v2405_v54, %v16054_v16  ;;  %v2942_v31 = vmul.bf16 %v2411_v8, %v16040_v11 }
 0x2ed   : > { %2812 = vrot.lane.b32.xlu1 %v2804_v3, %s17919_s18  ;;  %2744 = vrot.lane.b32.xlu0 %v2736_v4, %s17938_s16  ;;  %v13375_v3 = vld [vmem:[%s18064_s6 + $0x4] sm:$0xf] }
 0x2ee   : > { %13379 = vmatmul.mubr.msk.bf16.vlgmr.msra.gmra.mrb[20].mxu0 %vm1453_vm2, %v2415_v7 }
 0x2ef   : > { %2657 = vmatprep.mubr.bf16.mxu0 %v17925_v44 }
 0x2f1   : > { %2428 = vrot.lane.b32.xlu0 %v2418_v12, %s17981_s22  ;;  %2426 = vrot.lane.b32.xlu1 %v2417_v13, %s17981_s22 }
 0x2f5   : > { %2880 = vrot.lane.b32.xlu0 %v2872_v17, %s17917_s23  ;;  %2948 = vrot.lane.b32.xlu1 %v2940_v18, %s17915_s15 }
 0x2f9   : > { %2542 = vrot.lane.b32.xlu0 %v2533_v19, %s17958_s26  ;;  %2544 = vrot.lane.b32.xlu1 %v2534_v20, %s17958_s26  ;;  %v13380_v19 = vld [vmem:[%s18064_s6 + $0x8] sm:$0xf] }
 0x2fd   : > { %2612 = vrot.lane.b32.xlu0 %v2602_v21, %s17942_s0  ;;  %2610 = vrot.lane.b32.xlu1 %v2601_v23, %s17942_s0 }
 0x301   : > { %2678 = vrot.lane.b32.xlu0 %v2669_v26, %s17940_s14  ;;  %2680 = vrot.lane.b32.xlu1 %v2670_v27, %s17940_s14 }
 0x305   : > { %2748 = vrot.lane.b32.xlu0 %v2738_v29, %s17938_s16  ;;  %2746 = vrot.lane.b32.xlu1 %v2737_v30, %s17938_s16  ;;  %v13383_v29 = vld [vmem:[%s18064_s6 + $0xc] sm:$0xf] }
 0x309   : > { %2814 = vrot.lane.b32.xlu0 %v2805_v34, %s17919_s18  ;;  %2816 = vrot.lane.b32.xlu1 %v2806_v28, %s17919_s18  ;;  %s17952_s18 = smov 9  }
 0x30d   : > { %2884 = vrot.lane.b32.xlu0 %v2874_v35, %s17917_s23  ;;  %2882 = vrot.lane.b32.xlu1 %v2873_v36, %s17917_s23  ;;  %s17923_s23 = smov 10  }
 0x311   : > { %2950 = vrot.lane.b32.xlu0 %v2941_v39, %s17915_s15  ;;  %2952 = vrot.lane.b32.xlu1 %v2942_v31, %s17915_s15  ;;  %v13386_v39 = vld [vmem:[%s18064_s6 + $0x10] sm:$0xf]  ;;  %s15584_s15 = smov 8  }
 0x315   : > { %3011 = vperm.xlu0 %15353, %v3008_v40  }
 0x319   : > { %3027 = vrot.lane.b32.xlu0 %v17925_v44, %s17981_s22 }
 0x357   : > { %v2425_v41 = vpop.permute.xlu0 %2424  ;;  %v2541_v45 = vpop.permute.xlu1 %2540 }
 0x35b   : > { %v2609_v46 = vpop.permute.xlu0 %2608  ;;  %v2677_v50 = vpop.permute.xlu1 %2676 }
 0x35f   : > { %v2745_v51 = vpop.permute.xlu0 %2744  ;;  %v2813_v55 = vpop.permute.xlu1 %2812 }
 0x363   : > { %v2429_v57 = vpop.permute.xlu0 %2428  ;;  %v2427_v54 = vpop.permute.xlu1 %2426 }
 0x364   : > { %v2430_v58 = vsel %vm1450_vm10, %v2425_v41, %v2427_v54  ;;  %v2431_v62 = vsel %vm1450_vm10, %v2427_v54, %v2429_v57 }
 0x365   : > { %13376 = vmatprep.subr.msk.bf16.mxu1 %vm1457_vm1, %v2431_v62  ;;  %v2436_v63 = vsel %vm1457_vm1, %v2430_v58, 0 }
 0x366   : > { %2442 = vmatpush1.bf16.msra.mxu1 %v2436_v63  ;;  %v13392_v63 = vld [vmem:[%s18064_s6 + $0x18] sm:$0xf] }
 0x367   : > { %v2881_v4 = vpop.permute.xlu0 %2880  ;;  %v16192_v7 = vpop.permute.xlu1 %2948 }
 0x369   : > { %13377 = vmatmul.mubr.msk.bf16.vlgmr.msra.gmra.mrb[16].mxu1 %vm1453_vm2, %v13375_v3 }
 0x36a   : > { %2589 = vmatprep.mubr.bf16.mxu1 %v17925_v44 }
 0x36b   : > { %v2543_v8 = vpop.permute.xlu0 %2542  ;;  %v2545_v12 = vpop.permute.xlu1 %2544 }
 0x36c   : > { %v2546_v13 = vsel %vm1619_vm11, %v2541_v45, %v2543_v8  ;;  %v2547_v17 = vsel %vm1619_vm11, %v2543_v8, %v2545_v12 }
 0x36d   : > { %13381 = vmatprep.subr.msk.bf16.mxu1 %vm1457_vm1, %v2547_v17  ;;  %v2552_v18 = vsel %vm1457_vm1, %v2546_v13, 0  ;;  %v13395_v17 = vld [vmem:[%s18064_s6 + $0x1c] sm:$0xf] }
 0x36e   : > { %2558 = vmatpush1.bf16.msra.mxu1 %v2552_v18 }
 0x36f   : > { %v2613_v20 = vpop.permute.xlu0 %2612  ;;  %v2611_v21 = vpop.permute.xlu1 %2610 }
 0x370   : > { %v2614_v23 = vsel %vm1738_vm12, %v2609_v46, %v2611_v21  ;;  %v2615_v26 = vsel %vm1738_vm12, %v2611_v21, %v2613_v20 }
 0x371   : > { %13382 = vmatmul.mubr.msk.bf16.vlgmr.msra.gmra.mrb[20].mxu1 %vm1453_vm2, %v13380_v19  ;;  %13384 = vmatprep.subr.msk.bf16.mxu0 %vm1457_vm1, %v2615_v26  ;;  %v2620_v27 = vsel %vm1457_vm1, %v2614_v23, 0  ;;  %v13398_v23 = vld [vmem:[%s18064_s6 + $0x20] sm:$0xf] }
 0x372   : > { %2626 = vmatpush1.bf16.msra.mxu0 %v2620_v27  ;;  %2725 = vmatprep.mubr.bf16.mxu1 %v17925_v44 }
 0x373   : > { %v2679_v30 = vpop.permute.xlu0 %2678  ;;  %v2681_v34 = vpop.permute.xlu1 %2680 }
 0x374   : > { %v2682_v28 = vsel %vm17971_vm13, %v2677_v50, %v2679_v30  ;;  %v2683_v35 = vsel %vm17971_vm13, %v2679_v30, %v2681_v34  ;;  %v13389_v50 = vld [vmem:[%s18064_s6 + $0x14] sm:$0xf]  ;;  %vm6281_vm13 = vcmask 56320   ;;  %s18113_s6 = smov 124  }
 0x375   : > { %13385 = vmatmul.mubr.msk.bf16.vlgmr.msra.gmra.mrb[24].mxu0 %vm1453_vm2, %v13383_v29  ;;  %13387 = vmatprep.subr.msk.bf16.mxu1 %vm1457_vm1, %v2683_v35  ;;  %v2688_v36 = vsel %vm1457_vm1, %v2682_v28, 0 }
 0x376   : > { %2694 = vmatpush1.bf16.msra.mxu1 %v2688_v36  ;;  %2793 = vmatprep.mubr.bf16.mxu0 %v17925_v44 }
 0x377   : > { %v2749_v31 = vpop.permute.xlu0 %2748  ;;  %v2747_v40 = vpop.permute.xlu1 %2746 }
 0x378   : > { %v2750_v41 = vsel %vm17970_vm14, %v2745_v51, %v2747_v40  ;;  %v2751_v45 = vsel %vm17970_vm14, %v2747_v40, %v2749_v31  ;;  %vm6276_vm14 = vcmask 23552  }
 0x379   : > { %13388 = vmatmul.mubr.msk.bf16.vlgmr.msra.gmra.mrb[24].mxu1 %vm1453_vm2, %v13386_v39  ;;  %13390 = vmatprep.subr.msk.bf16.mxu0 %vm1457_vm1, %v2751_v45  ;;  %v2756_v46 = vsel %vm1457_vm1, %v2750_v41, 0 }
 0x37a   : > { %2762 = vmatpush1.bf16.msra.mxu0 %v2756_v46  ;;  %2861 = vmatprep.mubr.bf16.mxu1 %v17925_v44 }
 0x37b   : > { %v2815_v57 = vpop.permute.xlu0 %2814  ;;  %v2817_v54 = vpop.permute.xlu1 %2816 }
 0x37c   : > { %v2818_v58 = vsel %vm17947_vm15, %v2813_v55, %v2815_v57  ;;  %v2819_v51 = vsel %vm17947_vm15, %v2815_v57, %v2817_v54  ;;  %vm4542_vm15 = vcmask 171008  }
 0x37d   : > { %13391 = vmatmul.mubr.msk.bf16.vlgmr.msra.gmra.mrb[28].mxu0 %vm1453_vm2, %v13389_v50  ;;  %13393 = vmatprep.subr.msk.bf16.mxu1 %vm1457_vm1, %v2819_v51  ;;  %v2824_v62 = vsel %vm1457_vm1, %v2818_v58, 0 }
 0x37e   : > { %2830 = vmatpush1.bf16.msra.mxu1 %v2824_v62  ;;  %2929 = vmatprep.mubr.bf16.mxu0 %v17925_v44 }
 0x37f   : > { %v2885_v3 = vpop.permute.xlu0 %2884  ;;  %v2883_v8 = vpop.permute.xlu1 %2882 }
 0x380   : > { %v2886_v12 = vsel %vm17946_vm3, %v2881_v4, %v2883_v8  ;;  %v2887_v55 = vsel %vm17946_vm3, %v2883_v8, %v2885_v3  ;;  %vm4539_vm3 = vcmask 39936  }
 0x381   : > { %13394 = vmatmul.mubr.msk.bf16.vlgmr.msra.gmra.mrb[28].mxu1 %vm1453_vm2, %v13392_v63  ;;  %13396 = vmatprep.subr.msk.bf16.mxu0 %vm1457_vm1, %v2887_v55  ;;  %v2892_v13 = vsel %vm1457_vm1, %v2886_v12, 0 }
 0x382   : > { %2898 = vmatpush1.bf16.msra.mxu0 %v2892_v13  ;;  %2997 = vmatprep.mubr.bf16.mxu1 %v17925_v44 }
 0x383   : > { %v2951_v18 = vpop.permute.xlu0 %2950  ;;  %v2953_v19 = vpop.permute.xlu1 %2952 }
 0x384   : > { %v2954_v20 = vsel %vm17937_vm4, %v16192_v7, %v2951_v18  ;;  %v2955_v4 = vsel %vm17937_vm4, %v2951_v18, %v2953_v19  ;;  %vm4444_vm4 = vcmask 523264  }
 0x385   : > { %13397 = vmatmul.mubr.msk.bf16.vlgmr.msra.gmra.mrb[32].mxu0 %vm1453_vm2, %v13395_v17  ;;  %13399 = vmatprep.subr.msk.bf16.mxu1 %vm1457_vm1, %v2955_v4  ;;  %v2960_v21 = vsel %vm1457_vm1, %v2954_v20, 0 }
 0x386   : > { %2966 = vmatpush1.bf16.msra.mxu1 %v2960_v21 }
 0x389   : > { %13400 = vmatmul.mubr.msk.bf16.vlgmr.msra.gmra.mrb[32].mxu1 %vm1453_vm2, %v13398_v23 }
 0x3c1   : > { %v2525_v26 = vpop.f32.mrb[20].mxu0 }
 0x3c2   : > { %v2527_v27 = vpop.f32.mrb[21].mxu0 }
 0x3c3   : > { %v2529_v29 = vpop.f32.mrb[22].mxu0 }
 0x3c4   : > { %v2530_v30 = vpop.f32.mrb[23].mxu0 }
 0x43c   : > { %v2475_v34 = vpop.f32.mrb[16].mxu1 }
 0x43d   : > { %v2526_v28 = vadd.f32 %v2525_v26, %v2475_v34  ;;  %v2477_v35 = vpop.f32.mrb[17].mxu1 }
 0x43e   : > { %v2528_v7 = vadd.f32 %v2527_v27, %v2477_v35  ;;  %v2479_v36 = vpop.f32.mrb[18].mxu1 }
 0x43f   : > { %v2480_v39 = vpop.f32.mrb[19].mxu1 }
 0x444   : > { %v2591_v31 = vpop.f32.mrb[20].mxu1 }
 0x445   : > { %v2598_v40 = vadd.f32 %v2591_v31, %v2526_v28  ;;  %v2593_v41 = vpop.f32.mrb[21].mxu1 }
 0x446   : > { %v2599_v45 = vadd.f32 %v2593_v41, %v2528_v7  ;;  %v2595_v46 = vpop.f32.mrb[22].mxu1 }
 0x447   : > { %v2596_v50 = vpop.f32.mrb[23].mxu1 }
 0x448   : > { %v2659_v57 = vpop.f32.mrb[24].mxu0 }
 0x449   : > { %v2666_v54 = vadd.f32 %v2659_v57, %v2598_v40  ;;  %v2661_v58 = vpop.f32.mrb[25].mxu0 }
 0x44a   : > { %v2667_v51 = vadd.f32 %v2661_v58, %v2599_v45  ;;  %v2663_v62 = vpop.f32.mrb[26].mxu0 }
 0x44b   : > { %v2664_v63 = vpop.f32.mrb[27].mxu0 }
 0x44c   : > { %v2727_v3 = vpop.f32.mrb[24].mxu1  ;;  %v15355_v63 = vld [vmem:[%s15633_s25 + $0x40] sm:$0xff]  }
 0x44d   : > { %v2734_v8 = vadd.f32 %v2727_v3, %v2666_v54  ;;  %v2729_v12 = vpop.f32.mrb[25].mxu1  ;;  %v3012_v54 = vpop.permute.xlu0 %3011  ;;  %v15356_v3 = vld [vmem:[%s15633_s25] sm:$0xff]   ;;  %14038 = vmatprep.subr.bf16.mxu0 %v15355_v63 }
 0x44e   : > { %v2735_v55 = vadd.f32 %v2729_v12, %v2667_v51  ;;  %v2731_v13 = vpop.f32.mrb[26].mxu1  ;;  %14039 = vmatpush3.bf16.msra.mxu0 %v15356_v3 }
 0x44f   : > { %v2732_v17 = vpop.f32.mrb[27].mxu1 }
 0x450   : > { %v2795_v18 = vpop.f32.mrb[28].mxu0 }
 0x451   : > { %v2802_v19 = vadd.f32 %v2795_v18, %v2734_v8  ;;  %v2797_v20 = vpop.f32.mrb[29].mxu0  ;;  %v15357_v8 = vld [vmem:[%s15633_s25 + $0x48] sm:$0xff]   ;;  %v15359_v18 = vld [vmem:[%s15633_s25 + $0x50] sm:$0xff]  }
 0x452   : > { %v2803_v4 = vadd.f32 %v2797_v20, %v2735_v55  ;;  %v2799_v21 = vpop.f32.mrb[30].mxu0  ;;  %v15358_v55 = vld [vmem:[%s15633_s25 + $0x8] sm:$0xff]   ;;  %14040 = vmatprep.subr.bf16.mxu0 %v15357_v8 }
 0x453   : > { %v2800_v23 = vpop.f32.mrb[31].mxu0  ;;  %14041 = vmatpush3.bf16.msra.mxu0 %v15358_v55  ;;  %v15362_v21 = vld [vmem:[%s15633_s25 + $0x18] sm:$0xff]  }
 0x454   : > { %v2863_v26 = vpop.f32.mrb[28].mxu1  ;;  %14042 = vmatprep.subr.bf16.mxu0 %v15359_v18  ;;  %v15363_v23 = vld [vmem:[%s15633_s25 + $0x60] sm:$0xff]  }
 0x455   : > { %v2870_v27 = vadd.f32 %v2863_v26, %v2802_v19  ;;  %v2865_v29 = vpop.f32.mrb[29].mxu1  ;;  %v15360_v19 = vld [vmem:[%s15633_s25 + $0x10] sm:$0xff]   ;;  %v15364_v26 = vld [vmem:[%s15633_s25 + $0x20] sm:$0xff]  }
 0x456   : > { %v2871_v30 = vadd.f32 %v2865_v29, %v2803_v4  ;;  %v2867_v34 = vpop.f32.mrb[30].mxu1  ;;  %v15361_v4 = vld [vmem:[%s15633_s25 + $0x58] sm:$0xff]   ;;  %v15366_v29 = vld [vmem:[%s15633_s25 + $0x28] sm:$0xff]   ;;  %v13439_v18 = vld [vmem:[%s18062_s13 + $0x5] sm:$0x1] }
 0x457   : > { %v2868_v28 = vpop.f32.mrb[31].mxu1  ;;  %14043 = vmatpush3.bf16.msra.mxu0 %v15360_v19  ;;  %v15368_v34 = vld [vmem:[%s15633_s25 + $0x30] sm:$0xff]   ;;  %v3587_v19 = vpack.i.b16 %v13439_v18, %v13439_v18 }
 0x458   : > { %v2931_v35 = vpop.f32.mrb[32].mxu0  ;;  %14044 = vmatprep.subr.bf16.mxu0 %v15361_v4  ;;  %v15369_v28 = vld [vmem:[%s15633_s25 + $0x78] sm:$0xff]  }
 0x459   : > { %v2938_v7 = vadd.f32 %v2931_v35, %v2870_v27  ;;  %v2933_v36 = vpop.f32.mrb[33].mxu0  ;;  %v15365_v27 = vld [vmem:[%s15633_s25 + $0x68] sm:$0xff]   ;;  %v15370_v35 = vld [vmem:[%s15633_s25 + $0x38] sm:$0xff]   ;;  %v3592_v4 = vrot.slane %v3587_v19, %v15846_v15 }
 0x45a   : > { %v2939_v39 = vadd.f32 %v2933_v36, %v2871_v30  ;;  %v2935_v31 = vpop.f32.mrb[34].mxu0  ;;  %v15367_v30 = vld [vmem:[%s15633_s25 + $0x70] sm:$0xff]  }
 0x45b   : > { %v2936_v40 = vpop.f32.mrb[35].mxu0  ;;  %14045 = vmatpush3.bf16.msra.mxu0 %v15362_v21  ;;  %v13417_v31 = vld [vmem:[%s18062_s13 + $0x1] sm:$0x1]  ;;  %v13449_v21 = vld [vmem:[%s18062_s13 + $0x7] sm:$0x1] }
 0x45c   : > { %v2999_v41 = vpop.f32.mrb[32].mxu1  ;;  %14046 = vmatprep.subr.bf16.mxu0 %v15363_v23  ;;  %v3735_v23 = vpack.i.b16 %v13449_v21, %v13449_v21 }
 0x45d   : > { %v3006_v45 = vadd.f32 %v2999_v41, %v2938_v7  ;;  %v3001_v46 = vpop.f32.mrb[33].mxu1  ;;  %v3028_v7 = vpop.permute.xlu0 %3027 }
 0x45e   : > { %v3007_v50 = vadd.f32 %v3001_v46, %v2939_v39  ;;  %v3003_v57 = vpop.f32.mrb[34].mxu1 }
 0x45f   : > { %v3004_v58 = vpop.f32.mrb[35].mxu1  ;;  %v3014_v51 = vadd.f32 %v3012_v54, %v3006_v45  ;;  %14047 = vmatpush3.bf16.msra.mxu0 %v15364_v26  ;;  %v3241_v45 = vpack.i.b16 %v13417_v31, %v13417_v31  ;;  %v3740_v26 = vrot.slane %v3735_v23, %v15846_v15 }
 0x460   : > { %v3015_v62 = vadd.f32 %v3012_v54, %v3007_v50  ;;  %14048 = vmatprep.subr.bf16.mxu0 %v15365_v27  ;;  %v13429_v50 = vld [vmem:[%s18062_s13 + $0x3] sm:$0x1]  ;;  %v13424_v27 = vld [vmem:[%s18062_s13 + $0x2] sm:$0x1] }
 0x461   : > { %v3016_v13 = vmax.f32 %v3014_v51, 0.0  ;;  %v3246_v54 = vrot.slane %v3241_v45, %v15846_v15  ;;  %v3439_v58 = vpack.i.b16 %v13429_v50, %v13429_v50  ;;  %v13454_v50 = vld [vmem:[%s18062_s13 + $0x8] sm:$0x1] }
 0x462   : > { %v3017_v12 = vmax.f32 %v3015_v62, 0.0 }
 0x463   : > { %v16254_v20 = vpack.c.bf16 %v3016_v13, %v3016_v13  ;;  %14049 = vmatpush3.bf16.msra.mxu0 %v15366_v29  ;;  %v3444_v51 = vrot.slane %v3439_v58, %v15846_v15 }
 0x464   : > { %v16248_v17 = vpack.c.bf16 %v3017_v12, %v3017_v12  ;;  %14050 = vmatprep.subr.bf16.mxu0 %v15367_v30 }
 0x466   : > { %3025 = vrot.lane.b32.xlu1 %v16248_v17, %s17981_s22 }
 0x467   : > { %14051 = vmatpush3.bf16.msra.mxu0 %v15368_v34 }
 0x468   : > { %14052 = vmatprep.subr.bf16.mxu0 %v15369_v28 }
 0x46a   : > { %3023 = vrot.lane.b32.xlu1 %v16254_v20, %s17981_s22 }
 0x46b   : > { %14053 = vmatpush3.bf16.msra.mxu0 %v15370_v35  ;;  %v3365_v35 = vpack.i.b16 %v13424_v27, %v13424_v27 }
 0x46d   : > { %v3370_v31 = vrot.slane %v3365_v35, %v15846_v15 }
 0x46e   : > { %3041 = vrot.lane.b32.xlu1 %v17925_v44, %s17942_s0 }
 0x4d8   : > { %v3026_v36 = vpop.permute.xlu1 %3025 }
 0x4d9   : > { %v3030_v39 = vsel %vm1450_vm10, %v3026_v36, %v3028_v7 }
 0x4da   : > { %v3034_v40 = vmax.bf16 %v3030_v39, %v16248_v17 }
 0x4dc   : > { %3039 = vrot.lane.b32.xlu0 %v3034_v40, %s17942_s0  ;;  %v3024_v41 = vpop.permute.xlu1 %3023 }
 0x4dd   : > { %v3029_v46 = vsel %vm1450_vm10, %v3024_v41, %v3026_v36  ;;  %v13434_v36 = vld [vmem:[%s18062_s13 + $0x4] sm:$0x1]  ;;  %v13444_v41 = vld [vmem:[%s18062_s13 + $0x6] sm:$0x1] }
 0x4de   : > { %v3033_v57 = vmax.bf16 %v3029_v46, %v16254_v20  ;;  %v3661_v46 = vpack.i.b16 %v13444_v41, %v13444_v41 }
 0x4e0   : > { %3037 = vrot.lane.b32.xlu0 %v3033_v57, %s17942_s0  ;;  %v3042_v62 = vpop.permute.xlu1 %3041 }
 0x4e4   : > { %3248 = vrot.lane.b32.xlu0 %v3246_v54, %s17951_s7  ;;  %v3809_v54 = vpack.i.b16 %v13454_v50, %v13454_v50 }
 0x4e6   : > { %v3814_v58 = vrot.slane %v3809_v54, %v15846_v15 }
 0x4e8   : > { %3446 = vrot.lane.b32.xlu0 %v3444_v51, %s15584_s15  ;;  %v17927_v51 = vmov 0.0  }
 0x4e9   : > { %14370 = vmatprep.subr.bf16.mxu1 %v17927_v51  ;;  %14394 = vmatprep.subr.bf16.mxu0 %v17927_v51 }
 0x4ea   : > { %14372 = vmatprep.mubr.msk.bf16.mxu1 %vm15588_vm6, %v17927_v51 }
 0x4ec   : > { %3594 = vrot.lane.b32.xlu0 %v3592_v4, %s17923_s23  ;;  %s17960_s23 = smov 118  }
 0x4f0   : > { %3742 = vrot.lane.b32.xlu0 %v3740_v26, %s17921_s2  ;;  %s18091_s2 = smov 18  }
 0x54e   : > { %v3040_v63 = vpop.permute.xlu0 %3039 }
 0x54f   : > { %v3044_v3 = vsel %vm1738_vm12, %v3040_v63, %v3042_v62 }
 0x550   : > { %v3048_v8 = vmax.bf16 %v3044_v3, %v3034_v40  ;;  %v3513_v40 = vpack.i.b16 %v13434_v36, %v13434_v36  ;;  %v3881_v36 = vld [vmem:[%s15688_s27 + $0x8] sm:$0xff] }
 0x552   : > { %v3038_v12 = vpop.permute.xlu0 %3037  ;;  %3209 = vmatprep.mubr.bf16.mxu0 %v3048_v8  ;;  %v3518_v45 = vrot.slane %v3513_v40, %v15846_v15 }
 0x553   : > { %v3043_v55 = vsel %vm1738_vm12, %v3038_v12, %v3040_v63 }
 0x554   : > { %v3047_v13 = vmax.bf16 %v3043_v55, %v3033_v57  ;;  %v3666_v57 = vrot.slane %v3661_v46, %v15846_v15  ;;  %v15371_v46 = vld [vmem:[%s15683_s20 + $0x8] sm:$0xff]  }
 0x556   : > { %3210 = vmatmul.mubr.bf16.vlgmr.msra.gmra.mrb[36].mxu0 %v3047_v13  ;;  %v16305_v62 = vpop.permute.xlu0 %3248 }
 0x557   : > { %14396 = vmatprep.mubr.msk.bf16.mxu0 %vm15588_vm6, %v17927_v51 }
 0x55a   : > { %v16311_v63 = vpop.permute.xlu0 %3446 }
 0x55e   : > { %v16320_v19 = vpop.permute.xlu0 %3594 }
 0x562   : > { %v16330_v27 = vpop.permute.xlu0 %3742 }
 0x629   : > { %v14054_v29 = vpop.f32.mrb[36].mxu0 }
 0x62a   : > { %v14055_v30 = vpop.f32.mrb[37].mxu0 }
 0x62b   : > { %v14056_v34 = vadd.f32 %v14055_v30, %v14054_v29  ;;  %v14057_v28 = vpop.f32.mrb[38].mxu0 }
 0x62c   : > { %v14058_v7 = vpop.f32.mrb[39].mxu0 }
 0x62d   : > { %v3217_v39 = vpack.c.bf16 %v14056_v34, %v14056_v34  ;;  %v3880_v7 = vld [vmem:[%s15688_s27] sm:$0xff] }
 0x62f   : > { %3219 = vrot.lane.b32.xlu1 %v3217_v39, %s17952_s18  ;;  %v3227_v39 = vld [vmem:[%s18062_s13] sm:$0x1]  ;;  %s18121_s13 = sld [smem:[#allocation23_spill]] }
 0x633   : > { %3372 = vrot.lane.b32.xlu1 %v3370_v31, %s17949_s10  ;;  %v3229_v31 = vpack.i.b16 %v3227_v39, %v3227_v39  ;;  %v15376_v39 = vld [vmem:[%s15683_s20 + $0x18] sm:$0xff]  }
 0x635   : > { %v16347_v40 = vrot.slane %v3229_v31, %v15846_v15 }
 0x637   : > { %3520 = vrot.lane.b32.xlu1 %v3518_v45, %s17952_s18 }
 0x63b   : > { %3668 = vrot.lane.b32.xlu1 %v3666_v57, %s15570_s11  ;;  %s17962_s11 = smov 119  }
 0x63f   : > { %3816 = vrot.lane.b32.xlu1 %v3814_v58, %s18091_s2  ;;  %s17964_s2 = smov 120  }
 0x6a1   : > { %v3220_v3 = vpop.permute.xlu1 %3219 }
 0x6a2   : > { %v3223_v8 = vsel %vm3221_vm8, 0, %v3220_v3 }
 0x6a3   : > { %v3225_v12 = vsel %vm3224_vm9, %v3223_v8, 0  ;;  %v15372_v8 = vld [vmem:[%s15683_s20 + $0x20] sm:$0xff]  }
 0x6a4   : > { %v3251_v55 = vmul.bf16 %v16305_v62, %v3225_v12  ;;  %v3449_v4 = vmul.bf16 %v16311_v63, %v3225_v12  ;;  %v3597_v26 = vmul.bf16 %v16320_v19, %v3225_v12  ;;  %v3745_v34 = vmul.bf16 %v16330_v27, %v3225_v12 }
 0x6a5   : > { %v16316_v13 = vpop.permute.xlu1 %3372  ;;  %v3235_v50 = vmul.bf16 %v16347_v40, %v3225_v12 }
 0x6a6   : > { %3261 = vrot.lane.b32.xlu0 %v3251_v55, %s17981_s22  ;;  %v3375_v18 = vmul.bf16 %v16316_v13, %v3225_v12 }
 0x6a7   : > { %v3319_v54 = vsel %vm1457_vm1, %v3235_v50, 0 }
 0x6a8   : > { %3385 = vrot.lane.b32.xlu1 %v3375_v18, %s17958_s26 }
 0x6a9   : > { %v16324_v21 = vpop.permute.xlu1 %3520 }
 0x6aa   : > { %3459 = vrot.lane.b32.xlu0 %v3449_v4, %s17964_s2  ;;  %v3523_v23 = vmul.bf16 %v16324_v21, %v3225_v12 }
 0x6ac   : > { %3533 = vrot.lane.b32.xlu1 %v3523_v23, %s17962_s11  ;;  %v15374_v23 = vld [vmem:[%s15683_s20 + $0x30] sm:$0xff]  }
 0x6ad   : > { %v16332_v29 = vpop.permute.xlu1 %3668 }
 0x6ae   : > { %3607 = vrot.lane.b32.xlu0 %v3597_v26, %s17960_s23  ;;  %v3671_v30 = vmul.bf16 %v16332_v29, %v3225_v12 }
 0x6b0   : > { %3681 = vrot.lane.b32.xlu1 %v3671_v30, %s17942_s0  ;;  %v15375_v30 = vld [vmem:[%s15683_s20 + $0x10] sm:$0xff]  }
 0x6b1   : > { %v16338_v28 = vpop.permute.xlu1 %3816 }
 0x6b2   : > { %3755 = vrot.lane.b32.xlu0 %v3745_v34, %s17940_s14  ;;  %v3819_v35 = vmul.bf16 %v16338_v28, %v3225_v12  ;;  %v15373_v12 = vld [vmem:[%s15683_s20] sm:$0xff]  }
 0x6b4   : > { %3829 = vrot.lane.b32.xlu1 %v3819_v35, %s17938_s16 }
 0x6b6   : > { %3884 = vperm.xlu0 %15353, %v3880_v7  }
 0x6b8   : > { %3889 = vperm.xlu1 %15354, %v3881_v36   ;;  %v15378_v36 = vld [vmem:[%s15683_s20 + $0x40] sm:$0xff]  }
 0x718   : > { %v3262_v41 = vpop.permute.xlu0 %3261 }
 0x719   : > { %v3267_v45 = vsel %vm1457_vm1, %v3262_v41, 0 }
 0x71a   : > { %14371 = vmatpush3.bf16.msra.mxu1 %v3267_v45  ;;  %v3386_v57 = vpop.permute.xlu1 %3385  ;;  %v15377_v45 = vld [vmem:[%s15683_s20 + $0x28] sm:$0xff]  }
 0x71b   : > { %14376 = vmatprep.subr.bf16.mxu1 %v17927_v51  ;;  %v3391_v4 = vsel %vm1457_vm1, %v3386_v57, 0  ;;  %v15379_v57 = vld [vmem:[%s15683_s20 + $0x38] sm:$0xff]  }
 0x71c   : > { %v3460_v34 = vpop.permute.xlu0 %3459 }
 0x71d   : > { %14373 = vmatmul.mubr.msk.bf16.vlgmr.msra.gmra.mrb[36].mxu1 %vm1453_vm2, %v15371_v46  ;;  %v3465_v7 = vsel %vm1457_vm1, %v3460_v34, 0 }
 0x71e   : > { %14377 = vmatpush3.bf16.msra.mxu1 %v3319_v54  ;;  %v3534_v58 = vpop.permute.xlu1 %3533  ;;  %14378 = vmatprep.mubr.msk.bf16.mxu1 %vm15588_vm6, %v17927_v51 }
 0x71f   : > { %v3539_v3 = vsel %vm1457_vm1, %v3534_v58, 0  ;;  %14382 = vmatprep.subr.bf16.mxu1 %v17927_v51 }
 0x720   : > { %14395 = vmatpush3.bf16.msra.mxu0 %v3539_v3  ;;  %v3608_v31 = vpop.permute.xlu0 %3607 }
 0x721   : > { %14406 = vmatprep.subr.bf16.mxu0 %v17927_v51  ;;  %v3613_v41 = vsel %vm1457_vm1, %v3608_v31, 0 }
 0x722   : > { %v3682_v55 = vpop.permute.xlu1 %3681 }
 0x723   : > { %v3687_v18 = vsel %vm1457_vm1, %v3682_v55, 0  ;;  %14397 = vmatmul.mubr.msk.bf16.vlgmr.msra.gmra.mrb[40].mxu0 %vm1453_vm2, %v15372_v8 }
 0x724   : > { %14407 = vmatpush3.bf16.msra.mxu0 %v3687_v18  ;;  %14408 = vmatprep.mubr.msk.bf16.mxu0 %vm15588_vm6, %v17927_v51  ;;  %v3756_v46 = vpop.permute.xlu0 %3755 }
 0x725   : > { %14379 = vmatmul.mubr.msk.bf16.vlgmr.msra.gmra.mrb[40].mxu1 %vm1453_vm2, %v15373_v12  ;;  %14418 = vmatprep.subr.bf16.mxu0 %v17927_v51  ;;  %v3761_v50 = vsel %vm1457_vm1, %v3756_v46, 0 }
 0x726   : > { %14383 = vmatpush3.bf16.msra.mxu1 %v3391_v4  ;;  %14384 = vmatprep.mubr.msk.bf16.mxu1 %vm15588_vm6, %v17927_v51  ;;  %v3830_v26 = vpop.permute.xlu1 %3829 }
 0x727   : > { %14388 = vmatprep.subr.bf16.mxu1 %v17927_v51  ;;  %v3835_v35 = vsel %vm1457_vm1, %v3830_v26, 0 }
 0x72b   : > { %14409 = vmatmul.mubr.msk.bf16.vlgmr.msra.gmra.mrb[44].mxu0 %vm1453_vm2, %v15374_v23 }
 0x72c   : > { %14419 = vmatpush3.bf16.msra.mxu0 %v3835_v35  ;;  %14420 = vmatprep.mubr.msk.bf16.mxu0 %vm15588_vm6, %v17927_v51 }
 0x72d   : > { %14385 = vmatmul.mubr.msk.bf16.vlgmr.msra.gmra.mrb[44].mxu1 %vm1453_vm2, %v15375_v30  ;;  %14430 = vmatprep.subr.bf16.mxu0 %v17927_v51 }
 0x72e   : > { %14389 = vmatpush3.bf16.msra.mxu1 %v3465_v7  ;;  %14390 = vmatprep.mubr.msk.bf16.mxu1 %vm15588_vm6, %v17927_v51 }
 0x72f   : > { %14400 = vmatprep.subr.bf16.mxu1 %v17927_v51 }
 0x733   : > { %14421 = vmatmul.mubr.msk.bf16.vlgmr.msra.gmra.mrb[48].mxu0 %vm1453_vm2, %v15378_v36 }
 0x734   : > { %14432 = vmatprep.mubr.msk.bf16.mxu0 %vm15588_vm6, %v17927_v51 }
 0x735   : > { %14391 = vmatmul.mubr.msk.bf16.vlgmr.msra.gmra.mrb[48].mxu1 %vm1453_vm2, %v15376_v39 }
 0x736   : > { %14401 = vmatpush3.bf16.msra.mxu1 %v3613_v41  ;;  %14402 = vmatprep.mubr.msk.bf16.mxu1 %vm15588_vm6, %v17927_v51 }
 0x737   : > { %14412 = vmatprep.subr.bf16.mxu1 %v17927_v51 }
 0x73d   : > { %14403 = vmatmul.mubr.msk.bf16.vlgmr.msra.gmra.mrb[52].mxu1 %vm1453_vm2, %v15377_v45 }
 0x73e   : > { %14413 = vmatpush3.bf16.msra.mxu1 %v3761_v50  ;;  %14414 = vmatprep.mubr.msk.bf16.mxu1 %vm15588_vm6, %v17927_v51 }
 0x73f   : > { %14424 = vmatprep.subr.bf16.mxu1 %v17927_v51 }
 0x745   : > { %14415 = vmatmul.mubr.msk.bf16.vlgmr.msra.gmra.mrb[56].mxu1 %vm1453_vm2, %v15379_v57 }
 0x746   : > { %14426 = vmatprep.mubr.msk.bf16.mxu1 %vm15588_vm6, %v17927_v51 }
 0x7f0   : > { %v3303_v54 = vpop.f32.mrb[36].mxu1 }
 0x7f1   : > { %v14374_v58 = vpop.f32.mrb[37].mxu1 }
 0x7f2   : > { %v3306_v3 = vpop.f32.mrb[38].mxu1 }
 0x7f3   : > { %v14375_v8 = vpop.f32.mrb[39].mxu1 }
 0x7f6   : > { %v3575_v12 = vpop.f32.mrb[40].mxu0 }
 0x7f7   : > { %v14398_v55 = vpop.f32.mrb[41].mxu0 }
 0x7f8   : > { %v3355_v18 = vpop.f32.mrb[40].mxu1  ;;  %v3578_v4 = vpop.f32.mrb[42].mxu0 }
 0x7f9   : > { %v3356_v23 = vadd.f32 %v3355_v18, %v3303_v54  ;;  %v14380_v26 = vpop.f32.mrb[41].mxu1  ;;  %v14399_v30 = vpop.f32.mrb[43].mxu0 }
 0x7fa   : > { %v3358_v34 = vpop.f32.mrb[42].mxu1 }
 0x7fb   : > { %v3359_v35 = vadd.f32 %v3358_v34, %v3306_v3  ;;  %v14381_v7 = vpop.f32.mrb[43].mxu1 }
 0x7fe   : > { %v3723_v36 = vpop.f32.mrb[44].mxu0 }
 0x7ff   : > { %v14410_v39 = vpop.f32.mrb[45].mxu0 }
 0x800   : > { %v3427_v31 = vpop.f32.mrb[44].mxu1  ;;  %v3726_v41 = vpop.f32.mrb[46].mxu0 }
 0x801   : > { %v3434_v45 = vadd.f32 %v3427_v31, %v3356_v23  ;;  %v14386_v46 = vpop.f32.mrb[45].mxu1  ;;  %v14411_v50 = vpop.f32.mrb[47].mxu0 }
 0x802   : > { %v3430_v57 = vpop.f32.mrb[46].mxu1 }
 0x803   : > { %v3435_v58 = vadd.f32 %v3430_v57, %v3359_v35  ;;  %v14387_v8 = vpop.f32.mrb[47].mxu1 }
 0x806   : > { %v3871_v1 = vpop.f32.mrb[48].mxu0 }
 0x807   : > { %v14422_v55 = vpop.f32.mrb[49].mxu0 }
 0x808   : > { %v3501_v44 = vpop.f32.mrb[48].mxu1  ;;  %v3874_v51 = vpop.f32.mrb[50].mxu0 }
 0x809   : > { %v3508_v54 = vadd.f32 %v3501_v44, %v3434_v45  ;;  %v14392_v18 = vpop.f32.mrb[49].mxu1  ;;  %v14423_v26 = vpop.f32.mrb[51].mxu0 }
 0x80a   : > { %v3504_v30 = vpop.f32.mrb[50].mxu1  ;;  %v3885_v26 = vpop.permute.xlu0 %3884 }
 0x80b   : > { %v3509_v3 = vadd.f32 %v3504_v30, %v3435_v58  ;;  %v14393_v34 = vpop.f32.mrb[51].mxu1  ;;  %v3582_v7 = vadd.f32 %v3575_v12, %v3508_v54  ;;  %v3890_v58 = vpop.permute.xlu1 %3889 }
 0x80d   : > { %v3583_v39 = vadd.f32 %v3578_v4, %v3509_v3 }
 0x810   : > { %v3649_v10 = vpop.f32.mrb[52].mxu1 }
 0x811   : > { %v3656_v16 = vadd.f32 %v3649_v10, %v3582_v7  ;;  %v14404_v23 = vpop.f32.mrb[53].mxu1 }
 0x812   : > { %v3652_v31 = vpop.f32.mrb[54].mxu1 }
 0x813   : > { %v3657_v46 = vadd.f32 %v3652_v31, %v3583_v39  ;;  %v14405_v50 = vpop.f32.mrb[55].mxu1  ;;  %v3730_v35 = vadd.f32 %v3723_v36, %v3656_v16  ;;  %v18092_v39 = vmov 0.0  }
 0x815   : > { %v3731_v57 = vadd.f32 %v3726_v41, %v3657_v46 }
 0x818   : > { %v3797_v8 = vpop.f32.mrb[56].mxu1 }
 0x819   : > { %v3804_v55 = vadd.f32 %v3797_v8, %v3730_v35  ;;  %v14416_v11 = vpop.f32.mrb[57].mxu1  ;;  %v4428_v35 = vld [vmem:[%s15698_s19 + $0x8] sm:$0xff] }
 0x81a   : > { %v3800_v9 = vpop.f32.mrb[58].mxu1 }
 0x81b   : > { %v3878_v44 = vadd.f32 %v3871_v1, %v3804_v55  ;;  %v3805_v45 = vadd.f32 %v3800_v9, %v3731_v57  ;;  %v14417_v18 = vpop.f32.mrb[59].mxu1  ;;  %v4427_v57 = vld [vmem:[%s15698_s19] sm:$0xff]  ;;  %v15381_v55 = vld [vmem:[%s18065_s4 + $0x8] sm:$0xff]  }
 0x81c   : > { %v15382_v18 = vld [vmem:[%s18065_s4 + $0x18] sm:$0xff]  }
 0x81d   : > { %v3892_v30 = vadd.f32 %v3885_v26, %v3878_v44  ;;  %v3879_v12 = vadd.f32 %v3874_v51, %v3805_v45  ;;  %v15380_v51 = vld [vmem:[%s18065_s4] sm:$0xff]  }
 0x81f   : > { %v3893_v4 = vadd.f32 %v3890_v58, %v3879_v12  ;;  %v3894_v10 = vmax.f32 %v3892_v30, 0.0  ;;  %v15383_v58 = vld [vmem:[%s18065_s4 + $0x10] sm:$0xff]   ;;  %v15384_v12 = vld [vmem:[%s18065_s4 + $0x28] sm:$0xff]  }
 0x821   : > { %v3895_v54 = vmax.f32 %v3893_v4, 0.0 }
 0x823   : > { %v3896_v3 = vpack.c.bf16 %v3895_v54, %v3894_v10  ;;  %v15385_v10 = vld [vmem:[%s18065_s4 + $0x20] sm:$0xff]  }
 0x825   : > { %3898 = vrot.lane.b32.xlu0 %v3896_v3, %s17952_s18  ;;  %v15387_v3 = vld [vmem:[%s18065_s4 + $0x38] sm:$0xff]  }
 0x897   : > { %v3899_v16 = vpop.permute.xlu0 %3898 }
 0x898   : > { %v3901_v36 = vsel %vm3221_vm8, 0, %v3899_v16  ;;  %v15386_v16 = vld [vmem:[%s18065_s4 + $0x30] sm:$0xff]  }
 0x899   : > { %v3902_v11 = vsel %vm3224_vm9, %v3901_v36, 0 }
 0x89a   : > { %v4014_v1 = vmul.bf16 %v3902_v11, %v16316_v13  ;;  %v3907_v9 = vmul.bf16 %v3902_v11, %v16305_v62  ;;  %v3904_v41 = vmul.bf16 %v3902_v11, %v16347_v40  ;;  %v4132_v34 = vmul.bf16 %v3902_v11, %v16324_v21 }
 0x89b   : > { %v4073_v7 = vmul.bf16 %v3902_v11, %v16311_v63  ;;  %v4250_v23 = vmul.bf16 %v3902_v11, %v16332_v29  ;;  %v4191_v31 = vmul.bf16 %v3902_v11, %v16320_v19  ;;  %v4368_v46 = vmul.bf16 %v3902_v11, %v16338_v28 }
 0x89c   : > { %4024 = vrot.lane.b32.xlu0 %v4014_v1, %s17958_s26  ;;  %3917 = vrot.lane.b32.xlu1 %v3907_v9, %s17981_s22  ;;  %v4309_v50 = vmul.bf16 %v3902_v11, %v16330_v27  ;;  %v15388_v11 = vld [vmem:[%s18065_s4 + $0x40] sm:$0xff]   ;;  %s18110_s4 = smov 127  }
 0x89d   : > { %14431 = vmatpush3.bf16.msra.mxu0 %v3904_v41 }
 0x89e   : > { %14442 = vmatprep.subr.bf16.mxu0 %v18092_v39 }
 0x8a0   : > { %4142 = vrot.lane.b32.xlu0 %v4132_v34, %s17962_s11  ;;  %4083 = vrot.lane.b32.xlu1 %v4073_v7, %s17964_s2 }
 0x8a1   : > { %14433 = vmatmul.mubr.msk.bf16.vlgmr.msra.gmra.mrb[52].mxu0 %vm1719_vm5, %v15380_v51 }
 0x8a2   : > { %14444 = vmatprep.mubr.msk.bf16.mxu0 %vm15588_vm6, %v18092_v39 }
 0x8a4   : > { %4260 = vrot.lane.b32.xlu0 %v4250_v23, %s17942_s0  ;;  %4201 = vrot.lane.b32.xlu1 %v4191_v31, %s17960_s23  ;;  %s17972_s0 = smov 5  }
 0x8a8   : > { %4378 = vrot.lane.b32.xlu0 %v4368_v46, %s17938_s16  ;;  %4319 = vrot.lane.b32.xlu1 %v4309_v50, %s17940_s14  ;;  %s17944_s16 = smov 4   ;;  %s18093_s14 = sld [smem:[#allocation14_spill]] }
 0x8ac   : > { %4436 = vperm.xlu0 %15353, %v4428_v35   ;;  %4431 = vperm.xlu1 %15354, %v4427_v57  }
 0x90e   : > { %v3918_v8 = vpop.permute.xlu1 %3917  ;;  %v4025_v44 = vpop.permute.xlu0 %4024 }
 0x90f   : > { %14425 = vmatpush3.bf16.msra.mxu1 %v3918_v8 }
 0x910   : > { %14436 = vmatprep.subr.bf16.mxu1 %v18092_v39 }
 0x912   : > { %14427 = vmatmul.mubr.msk.bf16.vlgmr.msra.gmra.mrb[60].mxu1 %vm1719_vm5, %v15381_v55  ;;  %v4084_v45 = vpop.permute.xlu1 %4083  ;;  %v4143_v30 = vpop.permute.xlu0 %4142 }
 0x913   : > { %14437 = vmatpush3.bf16.msra.mxu1 %v4025_v44  ;;  %14443 = vmatpush3.bf16.msra.mxu0 %v4084_v45 }
 0x914   : > { %14454 = vmatprep.subr.bf16.mxu0 %v18092_v39  ;;  %14438 = vmatprep.mubr.msk.bf16.mxu1 %vm15588_vm6, %v18092_v39 }
 0x915   : > { %14448 = vmatprep.subr.bf16.mxu1 %v18092_v39 }
 0x916   : > { %v4202_v26 = vpop.permute.xlu1 %4201  ;;  %14445 = vmatmul.mubr.msk.bf16.vlgmr.msra.gmra.mrb[56].mxu0 %vm1719_vm5, %v15382_v18  ;;  %v4261_v54 = vpop.permute.xlu0 %4260 }
 0x917   : > { %14455 = vmatpush3.bf16.msra.mxu0 %v4202_v26  ;;  %14456 = vmatprep.mubr.msk.bf16.mxu0 %vm15588_vm6, %v18092_v39 }
 0x918   : > { %14466 = vmatprep.subr.bf16.mxu0 %v18092_v39 }
 0x91a   : > { %14439 = vmatmul.mubr.msk.bf16.vlgmr.msra.gmra.mrb[64].mxu1 %vm1719_vm5, %v15383_v58  ;;  %v4320_v4 = vpop.permute.xlu1 %4319  ;;  %v4379_v36 = vpop.permute.xlu0 %4378 }
 0x91b   : > { %14449 = vmatpush3.bf16.msra.mxu1 %v4143_v30  ;;  %14450 = vmatprep.mubr.msk.bf16.mxu1 %vm15588_vm6, %v18092_v39 }
 0x91c   : > { %14460 = vmatprep.subr.bf16.mxu1 %v18092_v39 }
 0x91e   : > { %14457 = vmatmul.mubr.msk.bf16.vlgmr.msra.gmra.mrb[60].mxu0 %vm1719_vm5, %v15384_v12 }
 0x91f   : > { %14467 = vmatpush3.bf16.msra.mxu0 %v4320_v4  ;;  %14468 = vmatprep.mubr.msk.bf16.mxu0 %vm15588_vm6, %v18092_v39 }
 0x920   : > { %14478 = vmatprep.subr.bf16.mxu0 %v18092_v39 }
 0x922   : > { %14451 = vmatmul.mubr.msk.bf16.vlgmr.msra.gmra.mrb[68].mxu1 %vm1719_vm5, %v15385_v10 }
 0x923   : > { %14461 = vmatpush3.bf16.msra.mxu1 %v4261_v54  ;;  %14462 = vmatprep.mubr.msk.bf16.mxu1 %vm15588_vm6, %v18092_v39 }
 0x924   : > { %14472 = vmatprep.subr.bf16.mxu1 %v18092_v39 }
 0x926   : > { %14469 = vmatmul.mubr.msk.bf16.vlgmr.msra.gmra.mrb[64].mxu0 %vm1719_vm5, %v15387_v3 }
 0x927   : > { %14486 = vmatprep.mubr.msk.bf16.mxu0 %vm15588_vm6, %v18092_v39 }
 0x92a   : > { %14463 = vmatmul.mubr.msk.bf16.vlgmr.msra.gmra.mrb[72].mxu1 %vm1719_vm5, %v15386_v16 }
 0x92b   : > { %14473 = vmatpush3.bf16.msra.mxu1 %v4379_v36  ;;  %14474 = vmatprep.mubr.msk.bf16.mxu1 %vm15588_vm6, %v18092_v39 }
 0x932   : > { %14475 = vmatmul.mubr.msk.bf16.vlgmr.msra.gmra.mrb[76].mxu1 %vm1719_vm5, %v15388_v11 }
 0x974   : > { %v4007_v1 = vpop.f32.mrb[52].mxu0 }
 0x975   : > { %v14434_v9 = vpop.f32.mrb[53].mxu0 }
 0x976   : > { %v4010_v41 = vpop.f32.mrb[54].mxu0 }
 0x977   : > { %v14435_v51 = vpop.f32.mrb[55].mxu0 }
 0x9e5   : > { %v3958_v34 = vpop.f32.mrb[60].mxu1 }
 0x9e6   : > { %v4008_v7 = vadd.f32 %v4007_v1, %v3958_v34  ;;  %v14428_v23 = vpop.f32.mrb[61].mxu1 }
 0x9e7   : > { %v3961_v31 = vpop.f32.mrb[62].mxu1 }
 0x9e8   : > { %v4011_v46 = vadd.f32 %v4010_v41, %v3961_v31  ;;  %v14429_v50 = vpop.f32.mrb[63].mxu1 }
 0x9e9   : > { %v4123_v35 = vpop.f32.mrb[56].mxu0 }
 0x9ea   : > { %v14446_v57 = vpop.f32.mrb[57].mxu0 }
 0x9eb   : > { %v4126_v8 = vpop.f32.mrb[58].mxu0 }
 0x9ec   : > { %v14447_v55 = vpop.f32.mrb[59].mxu0 }
 0x9ed   : > { %v4064_v44 = vpop.f32.mrb[64].mxu1 }
 0x9ee   : > { %v4071_v45 = vadd.f32 %v4064_v44, %v4008_v7  ;;  %v14440_v18 = vpop.f32.mrb[65].mxu1 }
 0x9ef   : > { %v4067_v26 = vpop.f32.mrb[66].mxu1 }
 0x9f0   : > { %v4072_v58 = vadd.f32 %v4067_v26, %v4011_v46  ;;  %v4130_v30 = vadd.f32 %v4123_v35, %v4071_v45  ;;  %v14441_v12 = vpop.f32.mrb[67].mxu1 }
 0x9f1   : > { %v4241_v4 = vpop.f32.mrb[60].mxu0 }
 0x9f2   : > { %v4131_v10 = vadd.f32 %v4126_v8, %v4072_v58  ;;  %v14458_v54 = vpop.f32.mrb[61].mxu0 }
 0x9f3   : > { %v4244_v3 = vpop.f32.mrb[62].mxu0  ;;  %v15389_v54 = vld [vmem:[%s15638_s29] sm:$0xff]  }
 0x9f4   : > { %v14459_v16 = vpop.f32.mrb[63].mxu0  ;;  %14479 = vmatpush3.bf16.msra.mxu0 %v15389_v54 }
 0x9f5   : > { %v4182_v36 = vpop.f32.mrb[68].mxu1  ;;  %14480 = vmatprep.subr.bf16.mxu0 %v18092_v39 }
 0x9f6   : > { %v4189_v11 = vadd.f32 %v4182_v36, %v4130_v30  ;;  %v14452_v1 = vpop.f32.mrb[69].mxu1 }
 0x9f7   : > { %v4185_v9 = vpop.f32.mrb[70].mxu1  ;;  %v15390_v1 = vld [vmem:[%s15638_s29 + $0x8] sm:$0xff]  }
 0x9f8   : > { %v4190_v41 = vadd.f32 %v4185_v9, %v4131_v10  ;;  %v4248_v51 = vadd.f32 %v4241_v4, %v4189_v11  ;;  %v14453_v34 = vpop.f32.mrb[71].mxu1  ;;  %v4432_v4 = vpop.permute.xlu1 %4431  ;;  %14481 = vmatpush3.bf16.msra.mxu0 %v15390_v1 }
 0x9f9   : > { %v4359_v23 = vpop.f32.mrb[64].mxu0  ;;  %v4437_v11 = vpop.permute.xlu0 %4436  ;;  %v15391_v34 = vld [vmem:[%s15638_s29 + $0x10] sm:$0xff]   ;;  %14482 = vmatprep.subr.bf16.mxu0 %v18092_v39 }
 0x9fa   : > { %v4249_v31 = vadd.f32 %v4244_v3, %v4190_v41  ;;  %v14470_v7 = vpop.f32.mrb[65].mxu0 }
 0x9fb   : > { %v4362_v50 = vpop.f32.mrb[66].mxu0  ;;  %v15392_v7 = vld [vmem:[%s15638_s29 + $0x18] sm:$0xff]  }
 0x9fc   : > { %v14471_v46 = vpop.f32.mrb[67].mxu0  ;;  %14483 = vmatpush3.bf16.msra.mxu0 %v15391_v34 }
 0x9fd   : > { %v4300_v35 = vpop.f32.mrb[72].mxu1  ;;  %14484 = vmatprep.subr.bf16.mxu0 %v18092_v39 }
 0x9fe   : > { %v4307_v57 = vadd.f32 %v4300_v35, %v4248_v51  ;;  %v14464_v55 = vpop.f32.mrb[73].mxu1 }
 0x9ff   : > { %v4303_v8 = vpop.f32.mrb[74].mxu1 }
 0xa00   : > { %v4308_v44 = vadd.f32 %v4303_v8, %v4249_v31  ;;  %v4366_v45 = vadd.f32 %v4359_v23, %v4307_v57  ;;  %v14465_v18 = vpop.f32.mrb[75].mxu1  ;;  %14485 = vmatpush3.bf16.msra.mxu0 %v15392_v7  ;;  %v13498_v8 = vld [vmem:[%s15623_s17 + $0x1] sm:$0x1]  ;;  %v13547_v7 = vld [vmem:[%s15623_s17 + $0x6] sm:$0x1] }
 0xa01   : > { %v13520_v18 = vld [vmem:[%s15623_s17 + $0x3] sm:$0x1] }
 0xa02   : > { %v4367_v26 = vadd.f32 %v4362_v50, %v4308_v44  ;;  %v4561_v44 = vpack.i.b16 %v13498_v8, %v13498_v8  ;;  %v13556_v8 = vld [vmem:[%s15623_s17 + $0x7] sm:$0x1] }
 0xa05   : > { %v4418_v58 = vpop.f32.mrb[76].mxu1 }
 0xa06   : > { %v4425_v30 = vadd.f32 %v4418_v58, %v4366_v45  ;;  %v14476_v12 = vpop.f32.mrb[77].mxu1  ;;  %v4566_v45 = vrot.slane %v4561_v44, %v15846_v15 }
 0xa07   : > { %v4421_v10 = vpop.f32.mrb[78].mxu1 }
 0xa08   : > { %v4439_v3 = vadd.f32 %v4432_v4, %v4425_v30  ;;  %v4426_v16 = vadd.f32 %v4421_v10, %v4367_v26  ;;  %v14477_v36 = vpop.f32.mrb[79].mxu1  ;;  %v4806_v26 = vpack.i.b16 %v13520_v18, %v13520_v18  ;;  %v13511_v30 = vld [vmem:[%s15623_s17 + $0x2] sm:$0x1] }
 0xa09   : > { %v4714_v10 = vpack.i.b16 %v13511_v30, %v13511_v30 }
 0xa0a   : > { %v4440_v9 = vadd.f32 %v4437_v11, %v4426_v16  ;;  %v4441_v41 = vmax.f32 %v4439_v3, 0.0  ;;  %v4811_v58 = vrot.slane %v4806_v26, %v15846_v15  ;;  %v13529_v3 = vld [vmem:[%s15623_s17 + $0x4] sm:$0x1] }
 0xa0b   : > { %v4719_v11 = vrot.slane %v4714_v10, %v15846_v15  ;;  %v4898_v1 = vpack.i.b16 %v13529_v3, %v13529_v3 }
 0xa0c   : > { %v4442_v51 = vmax.f32 %v4440_v9, 0.0  ;;  %v13538_v9 = vld [vmem:[%s15623_s17 + $0x5] sm:$0x1] }
 0xa0e   : > { %v16472_v23 = vpack.c.bf16 %v4442_v51, %v4441_v41  ;;  %v4903_v41 = vrot.slane %v4898_v1, %v15846_v15  ;;  %v4990_v51 = vpack.i.b16 %v13538_v9, %v13538_v9  ;;  %v4545_v9 = vld [vmem:[%s15623_s17] sm:$0x1] }
 0xa10   : > { %v4446_v31 = vsel %vm4444_vm4, %v16472_v23, 0  ;;  %v4995_v34 = vrot.slane %v4990_v51, %v15846_v15 }
 0xa11   : > { %4448 = vrot.lane.b32.xlu1 %v4446_v31, %s17981_s22  ;;  %v15393_v31 = vld [vmem:[%s18093_s14 + $0x10] sm:$0xff]  }
 0xa12   : > { %14492 = vmatprep.mubr.msk.bf16.mxu1 %vm1719_vm5, %v15393_v31 }
 0xa83   : > { %v4449_v50 = vpop.permute.xlu1 %4448 }
 0xa84   : > { %v4451_v46 = vmax.bf16 %v4449_v50, %v16472_v23 }
 0xa86   : > { %v4453_v35 = vsel %vm4444_vm4, %v4451_v46, 0 }
 0xa87   : > { %4455 = vrot.lane.b32.xlu0 %v4453_v35, %s17964_s2 }
 0xa8b   : > { %4568 = vrot.lane.b32.xlu0 %v4566_v45, %s17951_s7  ;;  %s17966_s7 = smov 122  }
 0xa8f   : > { %4813 = vrot.lane.b32.xlu0 %v4811_v58, %s17944_s16  ;;  %s17948_s16 = smov 6   ;;  %v5174_v58 = vpack.i.b16 %v13556_v8, %v13556_v8 }
 0xa91   : > { %v5179_v10 = vrot.slane %v5174_v58, %v15846_v15 }
 0xaf9   : > { %v4456_v57 = vpop.permute.xlu0 %4455 }
 0xafa   : > { %v4458_v55 = vmax.bf16 %v4456_v57, %v4451_v46  ;;  %v5082_v57 = vpack.i.b16 %v13547_v7, %v13547_v7  ;;  %v15394_v7 = vld [vmem:[%s18093_s14 + $0x18] sm:$0xff]  }
 0xafc   : > { %14487 = vmatmul.mubr.msk.bf16.vlgmr.msra.gmra.mrb[68].mxu0 %vm4444_vm4, %v4458_v55  ;;  %v5087_v26 = vrot.slane %v5082_v57, %v15846_v15 }
 0xafd   : > { %v16503_v50 = vpop.permute.xlu0 %4568 }
 0xb01   : > { %v16514_v30 = vpop.permute.xlu0 %4813 }
 0xbcf   : > { %v4528_v12 = vpop.f32.mrb[68].mxu0 }
 0xbd0   : > { %v14488_v4 = vpop.f32.mrb[69].mxu0 }
 0xbd1   : > { %v4531_v54 = vpop.f32.mrb[70].mxu0 }
 0xbd2   : > { %v4535_v16 = vpack.c.bf16 %v4531_v54, %v4528_v12  ;;  %v14489_v36 = vpop.f32.mrb[71].mxu0  ;;  %v13565_v12 = vld [vmem:[%s15623_s17 + $0x8] sm:$0x1] }
 0xbd3   : > { %v5266_v54 = vpack.i.b16 %v13565_v12, %v13565_v12 }
 0xbd4   : > { %4537 = vrot.lane.b32.xlu1 %v4535_v16, %s17972_s0 }
 0xbd5   : > { %v5271_v36 = vrot.slane %v5266_v54, %v15846_v15 }
 0xbd8   : > { %4721 = vrot.lane.b32.xlu1 %v4719_v11, %s17949_s10  ;;  %s18094_s10 = smov 10  }
 0xbdc   : > { %4905 = vrot.lane.b32.xlu1 %v4903_v41, %s17972_s0  ;;  %v4547_v41 = vpack.i.b16 %v4545_v9, %v4545_v9  ;;  %v15399_v9 = vld [vmem:[%s18093_s14 + $0x30] sm:$0xff]  }
 0xbde   : > { %v16535_v51 = vrot.slane %v4547_v41, %v15846_v15 }
 0xbe0   : > { %4997 = vrot.lane.b32.xlu1 %v4995_v34, %s17948_s16  ;;  %s17974_s16 = smov 124  }
 0xc46   : > { %v4538_v46 = vpop.permute.xlu1 %4537 }
 0xc47   : > { %v4541_v35 = vsel %vm4539_vm3, 0, %v4538_v46  ;;  %v15395_v46 = vld [vmem:[%s18093_s14] sm:$0xff]  }
 0xc48   : > { %v4543_v55 = vsel %vm4542_vm15, %v4541_v35, 0 }
 0xc49   : > { %v4571_v44 = vmul.bf16 %v16503_v50, %v4543_v55  ;;  %v4816_v4 = vmul.bf16 %v16514_v30, %v4543_v55  ;;  %v4553_v31 = vmul.bf16 %v16535_v51, %v4543_v55 }
 0xc4a   : > { %v16509_v45 = vpop.permute.xlu1 %4721 }
 0xc4b   : > { %4588 = vrot.lane.b32.xlu0 %v4571_v44, %s17981_s22  ;;  %v4724_v18 = vmul.bf16 %v16509_v45, %v4543_v55 }
 0xc4d   : > { %4741 = vrot.lane.b32.xlu1 %v4724_v18, %s17958_s26 }
 0xc4e   : > { %v16521_v3 = vpop.permute.xlu1 %4905 }
 0xc4f   : > { %5089 = vrot.lane.b32.xlu0 %v5087_v26, %s15584_s15  ;;  %v4908_v16 = vmul.bf16 %v16521_v3, %v4543_v55  ;;  %s17968_s15 = smov 123  }
 0xc51   : > { %4833 = vrot.lane.b32.xlu1 %v4816_v4, %s17974_s16  ;;  %v15396_v4 = vld [vmem:[%s18093_s14 + $0x8] sm:$0xff]  }
 0xc52   : > { %v16528_v11 = vpop.permute.xlu1 %4997 }
 0xc53   : > { %5181 = vrot.lane.b32.xlu0 %v5179_v10, %s17952_s18  ;;  %v5000_v1 = vmul.bf16 %v16528_v11, %v4543_v55  ;;  %s18095_s18 = sld [smem:[#allocation15_spill]]  ;;  %v15397_v10 = vld [vmem:[%s18093_s14 + $0x20] sm:$0xff]  }
 0xc55   : > { %4925 = vrot.lane.b32.xlu1 %v4908_v16, %s17968_s15 }
 0xc57   : > { %5273 = vrot.lane.b32.xlu0 %v5271_v36, %s18094_s10  ;;  %s18096_s10 = sld [smem:[#allocation16_spill]] }
 0xc59   : > { %v5355_v58 = vld [vmem:[%s18095_s18] sm:$0xff]  ;;  %v5357_v54 = vld [vmem:[%s18095_s18 + $0x10] sm:$0xff]  ;;  %v5356_v16 = vld [vmem:[%s18095_s18 + $0x8] sm:$0xff] }
 0xc5b   : > { %5017 = vrot.lane.b32.xlu0 %v5000_v1, %s17966_s7  ;;  %v15398_v1 = vld [vmem:[%s18093_s14 + $0x28] sm:$0xff]  }
 0xcbd   : > { %v4589_v34 = vpop.permute.xlu0 %4588 }
 0xcbe   : > { %14490 = vmatprep.subr.bf16.mxu1 %v4589_v34 }
 0xcbf   : > { %14491 = vmatpush3.bf16.msra.mxu1 %v4589_v34  ;;  %v4742_v8 = vpop.permute.xlu1 %4741  ;;  %v15400_v34 = vld [vmem:[%s18093_s14 + $0x38] sm:$0xff]  }
 0xcc0   : > { %14496 = vmatprep.subr.bf16.mxu1 %v4553_v31 }
 0xcc1   : > { %v16540_v35 = vpop.permute.xlu0 %5089 }
 0xcc2   : > { %14493 = vmatmul.mubr.msk.bf16.vlgmr.msra.gmra.mrb[80].mxu1 %vm1719_vm5, %v15394_v7  ;;  %v5092_v57 = vmul.bf16 %v16540_v35, %v4543_v55 }
 0xcc3   : > { %14497 = vmatpush3.bf16.msra.mxu1 %v4553_v31  ;;  %14498 = vmatprep.mubr.msk.bf16.mxu1 %vm1719_vm5, %v15395_v46  ;;  %v4834_v36 = vpop.permute.xlu1 %4833  ;;  %v15401_v31 = vld [vmem:[%s18093_s14 + $0x40] sm:$0xff]   ;;  %v15402_v46 = vld [vmem:[%s18093_s14 + $0x48] sm:$0xff]  }
 0xcc4   : > { %14502 = vmatprep.subr.bf16.mxu1 %v4742_v8  ;;  %5109 = vrot.lane.b32.xlu1 %v5092_v57, %s17964_s2  ;;  %v15403_v57 = vld [vmem:[%s18093_s14 + $0x50] sm:$0xff]  }
 0xcc5   : > { %v16546_v44 = vpop.permute.xlu0 %5181 }
 0xcc6   : > { %v5184_v18 = vmul.bf16 %v16546_v44, %v4543_v55 }
 0xcc7   : > { %v4926_v41 = vpop.permute.xlu1 %4925 }
 0xcc8   : > { %5201 = vrot.lane.b32.xlu0 %v5184_v18, %s17962_s11  ;;  %v15405_v18 = vld [vmem:[%s18093_s14 + $0x60] sm:$0xff]  }
 0xcc9   : > { %v16550_v26 = vpop.permute.xlu0 %5273 }
 0xcca   : > { %v5276_v12 = vmul.bf16 %v16550_v26, %v4543_v55  ;;  %v5358_v55 = vld [vmem:[%s18095_s18 + $0x18] sm:$0xff] }
 0xccc   : > { %5361 = vperm.xlu0 %15353, %v5355_v58   ;;  %5293 = vrot.lane.b32.xlu1 %v5276_v12, %s17960_s23  ;;  %v15406_v12 = vld [vmem:[%s18093_s14 + $0x68] sm:$0xff]  }
 0xccd   : > { %v5018_v7 = vpop.permute.xlu0 %5017 }
 0xcce   : > { %14499 = vmatmul.mubr.msk.bf16.vlgmr.msra.gmra.mrb[80].mxu1 %vm1719_vm5, %v15396_v4  ;;  %v15407_v4 = vld [vmem:[%s18093_s14 + $0x70] sm:$0xff]  }
 0xccf   : > { %14503 = vmatpush3.bf16.msra.mxu1 %v4742_v8  ;;  %14504 = vmatprep.mubr.msk.bf16.mxu1 %vm1719_vm5, %v15397_v10  ;;  %v15404_v8 = vld [vmem:[%s18093_s14 + $0x58] sm:$0xff]  }
 0xcd0   : > { %14508 = vmatprep.subr.bf16.mxu1 %v4834_v36  ;;  %5371 = vperm.xlu0 %15353, %v5357_v54  }
 0xcd1   : > { %5366 = vperm.xlu1 %15354, %v5356_v16   ;;  %v15408_v16 = vld [vmem:[%s18093_s14 + $0x78] sm:$0xff]  }
 0xcd5   : > { %5376 = vperm.xlu1 %15354, %v5358_v55   ;;  %v15410_v55 = vld [vmem:[%s18093_s14 + $0x88] sm:$0xff]  }
 0xcda   : > { %14505 = vmatmul.mubr.msk.bf16.vlgmr.msra.gmra.mrb[80].mxu1 %vm1719_vm5, %v15398_v1 }
 0xcdb   : > { %14509 = vmatpush3.bf16.msra.mxu1 %v4834_v36  ;;  %14510 = vmatprep.mubr.msk.bf16.mxu1 %vm1719_vm5, %v15399_v9  ;;  %v15409_v36 = vld [vmem:[%s18093_s14 + $0x80] sm:$0xff]   ;;  %s18163_s14 = smov 94  }
 0xcdc   : > { %14514 = vmatprep.subr.bf16.mxu1 %v4926_v41 }
 0xce6   : > { %14511 = vmatmul.mubr.msk.bf16.vlgmr.msra.gmra.mrb[80].mxu1 %vm1719_vm5, %v15400_v34 }
 0xce7   : > { %14515 = vmatpush3.bf16.msra.mxu1 %v4926_v41  ;;  %14516 = vmatprep.mubr.msk.bf16.mxu1 %vm1719_vm5, %v15401_v31 }
 0xce8   : > { %14520 = vmatprep.subr.bf16.mxu1 %v5018_v7 }
 0xcf2   : > { %14517 = vmatmul.mubr.msk.bf16.vlgmr.msra.gmra.mrb[80].mxu1 %vm1719_vm5, %v15402_v46 }
 0xcf3   : > { %14521 = vmatpush3.bf16.msra.mxu1 %v5018_v7  ;;  %14522 = vmatprep.mubr.msk.bf16.mxu1 %vm1719_vm5, %v15403_v57 }
 0xcfe   : > { %14523 = vmatmul.mubr.msk.bf16.vlgmr.msra.gmra.mrb[80].mxu1 %vm1719_vm5, %v15404_v8 }
 0xcff   : > { %14528 = vmatprep.mubr.msk.bf16.mxu1 %vm1719_vm5, %v15405_v18 }
 0xd36   : > { %v5110_v58 = vpop.permute.xlu1 %5109 }
 0xd37   : > { %14526 = vmatprep.subr.bf16.mxu1 %v5110_v58 }
 0xd38   : > { %14527 = vmatpush3.bf16.msra.mxu1 %v5110_v58 }
 0xd3a   : > { %v5202_v10 = vpop.permute.xlu0 %5201 }
 0xd3b   : > { %14529 = vmatmul.mubr.msk.bf16.vlgmr.msra.gmra.mrb[80].mxu1 %vm1719_vm5, %v15406_v12  ;;  %14532 = vmatprep.subr.bf16.mxu1 %v5202_v10 }
 0xd3c   : > { %14533 = vmatpush3.bf16.msra.mxu1 %v5202_v10  ;;  %14534 = vmatprep.mubr.msk.bf16.mxu1 %vm1719_vm5, %v15407_v4 }
 0xd3e   : > { %v5294_v54 = vpop.permute.xlu1 %5293 }
 0xd3f   : > { %14538 = vmatprep.subr.bf16.mxu1 %v5294_v54 }
 0xd47   : > { %14535 = vmatmul.mubr.msk.bf16.vlgmr.msra.gmra.mrb[80].mxu1 %vm1719_vm5, %v15408_v16 }
 0xd48   : > { %14539 = vmatpush3.bf16.msra.mxu1 %v5294_v54  ;;  %14540 = vmatprep.mubr.msk.bf16.mxu1 %vm1719_vm5, %v15409_v36 }
 0xd4b   : > { %v5362_v1 = vpop.permute.xlu0 %5361 }
 0xd4f   : > { %v5372_v41 = vpop.permute.xlu0 %5371 }
 0xd50   : > { %v5367_v9 = vpop.permute.xlu1 %5366 }
 0xd53   : > { %14541 = vmatmul.mubr.msk.bf16.vlgmr.msra.gmra.mrb[80].mxu1 %vm1719_vm5, %v15410_v55  ;;  %v15411_v55 = vld [vmem:[%s18096_s10 + $0x10] sm:$0xff]  }
 0xd54   : > { %v5377_v46 = vpop.permute.xlu1 %5376  ;;  %14548 = vmatprep.mubr.msk.bf16.mxu0 %vm2075_vm7, %v15411_v55 }
 0xe26   : > { %v14542_v34 = vpop.f32.mrb[80].mxu1 }
 0xe27   : > { %v5381_v31 = vadd.f32 %v14542_v34, %v5372_v41  ;;  %v5336_v7 = vpop.f32.mrb[81].mxu1 }
 0xe28   : > { %v5379_v57 = vadd.f32 %v5362_v1, %v5336_v7  ;;  %v14543_v8 = vpop.f32.mrb[82].mxu1 }
 0xe29   : > { %v5382_v18 = vadd.f32 %v14543_v8, %v5377_v46  ;;  %v5339_v58 = vpop.f32.mrb[83].mxu1  ;;  %v5385_v4 = vmax.f32 %v5381_v31, 0.0 }
 0xe2a   : > { %v5380_v12 = vadd.f32 %v5367_v9, %v5339_v58  ;;  %v5383_v54 = vmax.f32 %v5379_v57, 0.0 }
 0xe2b   : > { %v5386_v10 = vmax.f32 %v5382_v18, 0.0 }
 0xe2c   : > { %v5384_v16 = vmax.f32 %v5380_v12, 0.0 }
 0xe2d   : > { %v5388_v36 = vpack.c.bf16 %v5386_v10, %v5385_v4 }
 0xe2e   : > { %v5387_v14 = vpack.c.bf16 %v5384_v16, %v5383_v54 }
 0xe2f   : > { %5393 = vrot.lane.b32.xlu1 %v5388_v36, %s17972_s0 }
 0xe30   : > { %5391 = vrot.lane.b32.xlu0 %v5387_v14, %s17972_s0 }
 0xea1   : > { %v5394_v41 = vpop.permute.xlu1 %5393 }
 0xea2   : > { %v5398_v34 = vsel %vm4539_vm3, 0, %v5394_v41  ;;  %v5392_v2 = vpop.permute.xlu0 %5391 }
 0xea3   : > { %v5401_v1 = vsel %vm4542_vm15, %v5398_v34, 0  ;;  %v5396_v9 = vsel %vm4539_vm3, 0, %v5392_v2 }
 0xea4   : > { %v5399_v31 = vsel %vm4542_vm15, %v5396_v9, 0  ;;  %v5410_v7 = vmul.bf16 %v5401_v1, %v16503_v50  ;;  %v5556_v14 = vmul.bf16 %v5401_v1, %v16509_v45  ;;  %v5640_v2 = vmul.bf16 %v5401_v1, %v16514_v30 }
 0xea5   : > { %v5409_v46 = vmul.bf16 %v5399_v31, %v16503_v50  ;;  %v5555_v57 = vmul.bf16 %v5399_v31, %v16509_v45  ;;  %v5639_v8 = vmul.bf16 %v5399_v31, %v16514_v30  ;;  %v5724_v18 = vmul.bf16 %v5401_v1, %v16521_v3 }
 0xea6   : > { %5430 = vrot.lane.b32.xlu1 %v5410_v7, %s17981_s22  ;;  %v5723_v58 = vmul.bf16 %v5399_v31, %v16521_v3  ;;  %v5808_v12 = vmul.bf16 %v5401_v1, %v16528_v11  ;;  %v5807_v4 = vmul.bf16 %v5399_v31, %v16528_v11  ;;  %v5892_v10 = vmul.bf16 %v5401_v1, %v16540_v35 }
 0xea7   : > { %5428 = vrot.lane.b32.xlu0 %v5409_v46, %s17981_s22  ;;  %v5891_v54 = vmul.bf16 %v5399_v31, %v16540_v35  ;;  %v5976_v16 = vmul.bf16 %v5401_v1, %v16546_v44  ;;  %v5975_v36 = vmul.bf16 %v5399_v31, %v16546_v44  ;;  %v6060_v55 = vmul.bf16 %v5401_v1, %v16550_v26 }
 0xea8   : > { %v6059_v41 = vmul.bf16 %v5399_v31, %v16550_v26 }
 0xeaa   : > { %5576 = vrot.lane.b32.xlu1 %v5556_v14, %s17958_s26 }
 0xeab   : > { %5574 = vrot.lane.b32.xlu0 %v5555_v57, %s17958_s26  ;;  %s18097_s26 = sld [smem:[#allocation17_spill]] }
 0xeae   : > { %5660 = vrot.lane.b32.xlu1 %v5640_v2, %s17974_s16  ;;  %v5403_v2 = vmul.bf16 %v5399_v31, %v16535_v51 }
 0xeaf   : > { %5658 = vrot.lane.b32.xlu0 %v5639_v8, %s17974_s16  ;;  %v15412_v8 = vld [vmem:[%s18096_s10 + $0x18] sm:$0xff]  }
 0xeb1   : > { %v6144_v34 = vld [vmem:[%s18097_s26 + $0x8] sm:$0xff]  ;;  %v6143_v9 = vld [vmem:[%s18097_s26] sm:$0xff]  ;;  %v6146_v7 = vld [vmem:[%s18097_s26 + $0x18] sm:$0xff] }
 0xeb2   : > { %5744 = vrot.lane.b32.xlu1 %v5724_v18, %s17968_s15  ;;  %v6145_v46 = vld [vmem:[%s18097_s26 + $0x10] sm:$0xff]  ;;  %v15413_v18 = vld [vmem:[%s18096_s10] sm:$0xff]  }
 0xeb3   : > { %5742 = vrot.lane.b32.xlu0 %v5723_v58, %s17968_s15  ;;  %v5404_v58 = vmul.bf16 %v5401_v1, %v16535_v51  ;;  %s18102_s15 = smov 4  }
 0xeb6   : > { %5828 = vrot.lane.b32.xlu1 %v5808_v12, %s17966_s7 }
 0xeb7   : > { %5826 = vrot.lane.b32.xlu0 %v5807_v4, %s17966_s7  ;;  %v15414_v4 = vld [vmem:[%s18096_s10 + $0x8] sm:$0xff]   ;;  %s15598_s7 = smov 3  }
 0xeba   : > { %5912 = vrot.lane.b32.xlu1 %v5892_v10, %s17964_s2  ;;  %v15415_v10 = vld [vmem:[%s18096_s10 + $0x20] sm:$0xff]  }
 0xebb   : > { %5910 = vrot.lane.b32.xlu0 %v5891_v54, %s17964_s2  ;;  %v15416_v54 = vld [vmem:[%s18096_s10 + $0x28] sm:$0xff]   ;;  %s18101_s2 = smov 2  }
 0xebe   : > { %5996 = vrot.lane.b32.xlu1 %v5976_v16, %s17962_s11  ;;  %v15417_v16 = vld [vmem:[%s18096_s10 + $0x30] sm:$0xff]  }
 0xebf   : > { %5994 = vrot.lane.b32.xlu0 %v5975_v36, %s17962_s11  ;;  %s18099_s11 = sld [smem:[#allocation6_spill]] }
 0xec2   : > { %6080 = vrot.lane.b32.xlu1 %v6060_v55, %s17960_s23 }
 0xec3   : > { %6078 = vrot.lane.b32.xlu0 %v6059_v41, %s17960_s23  ;;  %v15418_v41 = vld [vmem:[%s18096_s10 + $0x38] sm:$0xff]   ;;  %s18098_s23 = sld [smem:[#allocation7_spill]] }
 0xec6   : > { %6154 = vperm.xlu1 %15354, %v6144_v34   ;;  %v15419_v34 = vld [vmem:[%s18096_s10 + $0x40] sm:$0xff]  }
 0xec7   : > { %6149 = vperm.xlu0 %15353, %v6143_v9  }
 0xeca   : > { %6164 = vperm.xlu1 %15354, %v6146_v7  }
 0xecb   : > { %6159 = vperm.xlu0 %15353, %v6145_v46   ;;  %v15420_v46 = vld [vmem:[%s18096_s10 + $0x48] sm:$0xff]  }
 0xf18   : > { %v5431_v57 = vpop.permute.xlu1 %5430 }
 0xf19   : > { %v5429_v14 = vpop.permute.xlu0 %5428 }
 0xf1a   : > { %14544 = vmatprep.subr.bf16.mxu0 %v5429_v14 }
 0xf1b   : > { %14545 = vmatpush3.bf16.msra.mxu0 %v5429_v14  ;;  %v15421_v14 = vld [vmem:[%s18096_s10 + $0x50] sm:$0xff]  }
 0xf1c   : > { %14546 = vmatprep.subr.bf16.mxu0 %v5431_v57  ;;  %v5577_v31 = vpop.permute.xlu1 %5576 }
 0xf1d   : > { %v5575_v12 = vpop.permute.xlu0 %5574 }
 0xf1f   : > { %14547 = vmatpush3.bf16.msra.mxu0 %v5431_v57 }
 0xf20   : > { %14552 = vmatprep.subr.bf16.mxu0 %v5403_v2  ;;  %v5661_v36 = vpop.permute.xlu1 %5660 }
 0xf21   : > { %v5659_v1 = vpop.permute.xlu0 %5658 }
 0xf22   : > { %14549 = vmatmul.mubr.msk.bf16.vlgmr.msra.gmra.mrb[72].mxu0 %vm2075_vm7, %v15412_v8  ;;  %v15422_v8 = vld [vmem:[%s18096_s10 + $0x58] sm:$0xff]  }
 0xf23   : > { %14553 = vmatpush3.bf16.msra.mxu0 %v5403_v2  ;;  %14556 = vmatprep.mubr.msk.bf16.mxu0 %vm2075_vm7, %v15413_v18  ;;  %v15423_v18 = vld [vmem:[%s18096_s10 + $0x60] sm:$0xff]  }
 0xf24   : > { %14554 = vmatprep.subr.bf16.mxu0 %v5404_v58  ;;  %v5745_v9 = vpop.permute.xlu1 %5744 }
 0xf25   : > { %v5743_v55 = vpop.permute.xlu0 %5742 }
 0xf27   : > { %14555 = vmatpush3.bf16.msra.mxu0 %v5404_v58 }
 0xf28   : > { %14560 = vmatprep.subr.bf16.mxu0 %v5575_v12  ;;  %v5829_v57 = vpop.permute.xlu1 %5828 }
 0xf29   : > { %v5827_v7 = vpop.permute.xlu0 %5826 }
 0xf2c   : > { %v5913_v58 = vpop.permute.xlu1 %5912 }
 0xf2d   : > { %v5911_v2 = vpop.permute.xlu0 %5910 }
 0xf2e   : > { %14557 = vmatmul.mubr.msk.bf16.vlgmr.msra.gmra.mrb[72].mxu0 %vm2075_vm7, %v15414_v4  ;;  %v15424_v4 = vld [vmem:[%s18096_s10 + $0x68] sm:$0xff]  }
 0xf2f   : > { %14561 = vmatpush3.bf16.msra.mxu0 %v5575_v12  ;;  %14564 = vmatprep.mubr.msk.bf16.mxu0 %vm2075_vm7, %v15415_v10  ;;  %v15425_v10 = vld [vmem:[%s18096_s10 + $0x70] sm:$0xff]  }
 0xf30   : > { %14562 = vmatprep.subr.bf16.mxu0 %v5577_v31 }
 0xf31   : > { %v5995_v12 = vpop.permute.xlu0 %5994 }
 0xf33   : > { %14563 = vmatpush3.bf16.msra.mxu0 %v5577_v31  ;;  %v5997_v31 = vpop.permute.xlu1 %5996 }
 0xf34   : > { %14568 = vmatprep.subr.bf16.mxu0 %v5659_v1 }
 0xf3a   : > { %14565 = vmatmul.mubr.msk.bf16.vlgmr.msra.gmra.mrb[72].mxu0 %vm2075_vm7, %v15416_v54  ;;  %v15426_v54 = vld [vmem:[%s18096_s10 + $0x78] sm:$0xff]  }
 0xf3b   : > { %14569 = vmatpush3.bf16.msra.mxu0 %v5659_v1  ;;  %14572 = vmatprep.mubr.msk.bf16.mxu0 %vm2075_vm7, %v15417_v16  ;;  %v6079_v1 = vpop.permute.xlu0 %6078  ;;  %v15427_v16 = vld [vmem:[%s18096_s10 + $0x80] sm:$0xff]  }
 0xf3c   : > { %14570 = vmatprep.subr.bf16.mxu0 %v5661_v36 }
 0xf3f   : > { %14571 = vmatpush3.bf16.msra.mxu0 %v5661_v36  ;;  %v6081_v36 = vpop.permute.xlu1 %6080 }
 0xf40   : > { %14576 = vmatprep.subr.bf16.mxu0 %v5743_v55 }
 0xf46   : > { %14573 = vmatmul.mubr.msk.bf16.vlgmr.msra.gmra.mrb[72].mxu0 %vm2075_vm7, %v15418_v41  ;;  %v6150_v41 = vpop.permute.xlu0 %6149 }
 0xf47   : > { %14577 = vmatpush3.bf16.msra.mxu0 %v5743_v55  ;;  %14580 = vmatprep.mubr.msk.bf16.mxu0 %vm2075_vm7, %v15419_v34  ;;  %v15428_v55 = vld [vmem:[%s18096_s10 + $0x88] sm:$0xff]   ;;  %v6155_v34 = vpop.permute.xlu1 %6154  ;;  %s18117_s10 = sld [smem:[#allocation8_spill]] }
 0xf48   : > { %14578 = vmatprep.subr.bf16.mxu0 %v5745_v9 }
 0xf4b   : > { %14579 = vmatpush3.bf16.msra.mxu0 %v5745_v9  ;;  %v6160_v9 = vpop.permute.xlu0 %6159 }
 0xf4c   : > { %14584 = vmatprep.subr.bf16.mxu0 %v5827_v7 }
 0xf52   : > { %14581 = vmatmul.mubr.msk.bf16.vlgmr.msra.gmra.mrb[72].mxu0 %vm2075_vm7, %v15420_v46 }
 0xf53   : > { %14585 = vmatpush3.bf16.msra.mxu0 %v5827_v7  ;;  %14588 = vmatprep.mubr.msk.bf16.mxu0 %vm2075_vm7, %v15421_v14 }
 0xf54   : > { %14586 = vmatprep.subr.bf16.mxu0 %v5829_v57 }
 0xf57   : > { %14587 = vmatpush3.bf16.msra.mxu0 %v5829_v57  ;;  %v6165_v57 = vpop.permute.xlu1 %6164 }
 0xf58   : > { %14592 = vmatprep.subr.bf16.mxu0 %v5911_v2 }
 0xf5e   : > { %14589 = vmatmul.mubr.msk.bf16.vlgmr.msra.gmra.mrb[72].mxu0 %vm2075_vm7, %v15422_v8 }
 0xf5f   : > { %14593 = vmatpush3.bf16.msra.mxu0 %v5911_v2  ;;  %14596 = vmatprep.mubr.msk.bf16.mxu0 %vm2075_vm7, %v15423_v18 }
 0xf60   : > { %14594 = vmatprep.subr.bf16.mxu0 %v5913_v58 }
 0xf63   : > { %14595 = vmatpush3.bf16.msra.mxu0 %v5913_v58 }
 0xf64   : > { %14600 = vmatprep.subr.bf16.mxu0 %v5995_v12 }
 0xf6a   : > { %14597 = vmatmul.mubr.msk.bf16.vlgmr.msra.gmra.mrb[72].mxu0 %vm2075_vm7, %v15424_v4 }
 0xf6b   : > { %14601 = vmatpush3.bf16.msra.mxu0 %v5995_v12  ;;  %14604 = vmatprep.mubr.msk.bf16.mxu0 %vm2075_vm7, %v15425_v10 }
 0xf6c   : > { %14602 = vmatprep.subr.bf16.mxu0 %v5997_v31 }
 0xf6f   : > { %14603 = vmatpush3.bf16.msra.mxu0 %v5997_v31 }
 0xf70   : > { %14608 = vmatprep.subr.bf16.mxu0 %v6079_v1 }
 0xf76   : > { %14605 = vmatmul.mubr.msk.bf16.vlgmr.msra.gmra.mrb[72].mxu0 %vm2075_vm7, %v15426_v54 }
 0xf77   : > { %14609 = vmatpush3.bf16.msra.mxu0 %v6079_v1  ;;  %14612 = vmatprep.mubr.msk.bf16.mxu0 %vm2075_vm7, %v15427_v16 }
 0xf78   : > { %14610 = vmatprep.subr.bf16.mxu0 %v6081_v36 }
 0xf7b   : > { %14611 = vmatpush3.bf16.msra.mxu0 %v6081_v36 }
 0xf82   : > { %14613 = vmatmul.mubr.msk.bf16.vlgmr.msra.gmra.mrb[72].mxu0 %vm2075_vm7, %v15428_v55 }
0x1055   : > { %v14614_v7 = vpop.f32.mrb[72].mxu0 }
0x1056   : > { %v6169_v46 = vadd.f32 %v14614_v7, %v6160_v9  ;;  %v6124_v14 = vpop.f32.mrb[73].mxu0 }
0x1057   : > { %v6167_v2 = vadd.f32 %v6150_v41, %v6124_v14  ;;  %v14615_v8 = vpop.f32.mrb[74].mxu0  ;;  %v15429_v41 = vld [vmem:[%s18098_s23] sm:$0xff]   ;;  %s18100_s23 = smov 1  }
0x1058   : > { %v6170_v18 = vadd.f32 %v14615_v8, %v6165_v57  ;;  %v6127_v58 = vpop.f32.mrb[75].mxu0  ;;  %v6173_v4 = vmax.f32 %v6169_v46, 0.0  ;;  %14616 = vmatprep.subr.bf16.mxu1 %v15429_v41  ;;  %v13658_v57 = vld [vmem:[%s18099_s11 + $0x2] sm:$0x1] }
0x1059   : > { %v6168_v12 = vadd.f32 %v6155_v34, %v6127_v58  ;;  %v6171_v31 = vmax.f32 %v6167_v2, 0.0  ;;  %14617 = vmatpush3.bf16.msra.mxu1 %v15429_v41  ;;  %v13645_v34 = vld [vmem:[%s18099_s11 + $0x1] sm:$0x1] }
0x105a   : > { %v6174_v10 = vmax.f32 %v6170_v18, 0.0  ;;  %v6303_v7 = vpack.i.b16 %v13645_v34, %v13645_v34 }
0x105b   : > { %v6172_v1 = vmax.f32 %v6168_v12, 0.0  ;;  %v6461_v12 = vpack.i.b16 %v13658_v57, %v13658_v57  ;;  %v13694_v57 = vld [vmem:[%s18099_s11 + $0x6] sm:$0x1] }
0x105c   : > { %v16668_v54 = vpack.c.bf16 %v6174_v10, %v6173_v4  ;;  %v6308_v58 = vrot.slane %v6303_v7, %v15846_v15  ;;  %v13676_v4 = vld [vmem:[%s18099_s11 + $0x4] sm:$0x1] }
0x105d   : > { %v16670_v16 = vpack.c.bf16 %v6172_v1, %v6171_v31  ;;  %v6466_v10 = vrot.slane %v6461_v12, %v15846_v15  ;;  %v6655_v31 = vpack.i.b16 %v13676_v4, %v13676_v4  ;;  %v13685_v1 = vld [vmem:[%s18099_s11 + $0x5] sm:$0x1] }
0x105e   : > { %v6180_v36 = vsel %vm1719_vm5, %v16668_v54, 0 }
0x105f   : > { %6185 = vrot.lane.b32.xlu1 %v6180_v36, %s17981_s22  ;;  %v6178_v55 = vsel %vm1719_vm5, %v16670_v16, 0  ;;  %v6660_v36 = vrot.slane %v6655_v31, %v15846_v15 }
0x1060   : > { %6183 = vrot.lane.b32.xlu0 %v6178_v55, %s17981_s22  ;;  %v6752_v55 = vpack.i.b16 %v13685_v1, %v13685_v1 }
0x1062   : > { %v6757_v41 = vrot.slane %v6752_v55, %v15846_v15 }
0x10d1   : > { %v6186_v9 = vpop.permute.xlu1 %6185 }
0x10d2   : > { %v6190_v46 = vmax.bf16 %v6186_v9, %v16668_v54  ;;  %v6184_v14 = vpop.permute.xlu0 %6183 }
0x10d3   : > { %v6189_v2 = vmax.bf16 %v6184_v14, %v16670_v16 }
0x10d4   : > { %v6194_v8 = vsel %vm1719_vm5, %v6190_v46, 0 }
0x10d5   : > { %6199 = vrot.lane.b32.xlu1 %v6194_v8, %s17974_s16  ;;  %v6192_v18 = vsel %vm1719_vm5, %v6189_v2, 0  ;;  %v6849_v8 = vpack.i.b16 %v13694_v57, %v13694_v57 }
0x10d6   : > { %6197 = vrot.lane.b32.xlu0 %v6192_v18, %s17974_s16 }
0x10d7   : > { %v6854_v18 = vrot.slane %v6849_v8, %v15846_v15 }
0x10d9   : > { %6310 = vrot.lane.b32.xlu1 %v6308_v58, %s18100_s23  ;;  %v13703_v58 = vld [vmem:[%s18099_s11 + $0x7] sm:$0x1]  ;;  %s18103_s23 = sld [smem:[#allocation18_spill]] }
0x10da   : > { %v6946_v12 = vpack.i.b16 %v13703_v58, %v13703_v58 }
0x10dc   : > { %v6951_v4 = vrot.slane %v6946_v12, %v15846_v15 }
0x10dd   : > { %6468 = vrot.lane.b32.xlu1 %v6466_v10, %s18101_s2 }
0x10df   : > { %v15434_v0 = vld [vmem:[%s18103_s23 + $0x20] sm:$0xff]  }
0x10e1   : > { %6662 = vrot.lane.b32.xlu1 %v6660_v36, %s15598_s7  ;;  %v13667_v36 = vld [vmem:[%s18099_s11 + $0x3] sm:$0x1] }
0x10e5   : > { %6759 = vrot.lane.b32.xlu1 %v6757_v41, %s18102_s15  ;;  %v6558_v41 = vpack.i.b16 %v13667_v36, %v13667_v36  ;;  %v13712_v36 = vld [vmem:[%s18099_s11 + $0x8] sm:$0x1] }
0x10e9   : > { %6856 = vrot.lane.b32.xlu1 %v6854_v18, %s18102_s15  ;;  %s17979_s15 = smov 125  }
0x10ed   : > { %6953 = vrot.lane.b32.xlu1 %v6951_v4, %s17972_s0  ;;  %s18105_s0 = smov 6  }
0x1147   : > { %v6200_v34 = vpop.permute.xlu1 %6199 }
0x1148   : > { %v6198_v9 = vpop.permute.xlu0 %6197  ;;  %v6204_v14 = vmax.bf16 %v6200_v34, %v6190_v46  ;;  %v6563_v34 = vrot.slane %v6558_v41, %v15846_v15 }
0x1149   : > { %v6203_v7 = vmax.bf16 %v6198_v9, %v6189_v2 }
0x114b   : > { %14618 = vmatprep.mubr.msk.bf16.mxu1 %vm1719_vm5, %v6203_v7  ;;  %v16710_v9 = vpop.permute.xlu1 %6310  ;;  %v15430_v7 = vld [vmem:[%s18103_s23 + $0x10] sm:$0xff]  }
0x114c   : > { %14619 = vmatmul.mubr.msk.bf16.vlgmr.msra.gmra.mrb[84].mxu1 %vm1719_vm5, %v6204_v14 }
0x114d   : > { %14626 = vmatprep.mubr.msk.bf16.mxu1 %vm2075_vm7, %v15430_v7 }
0x114f   : > { %v16720_v58 = vpop.permute.xlu1 %6468 }
0x121f   : > { %v14620_v2 = vpop.f32.mrb[84].mxu1 }
0x1220   : > { %v6253_v46 = vpop.f32.mrb[85].mxu1 }
0x1221   : > { %v14621_v10 = vpop.f32.mrb[86].mxu1 }
0x1222   : > { %v6269_v31 = vpack.c.bf16 %v14621_v10, %v14620_v2  ;;  %v6256_v1 = vpop.f32.mrb[87].mxu1 }
0x1223   : > { %v6268_v55 = vpack.c.bf16 %v6256_v1, %v6253_v46  ;;  %v16734_v1 = vpop.permute.xlu1 %6662 }
0x1225   : > { %6272 = vrot.lane.b32.xlu0 %v6268_v55, %s15598_s7 }
0x1229   : > { %6274 = vrot.lane.b32.xlu0 %v6269_v31, %s15598_s7 }
0x122d   : > { %6565 = vrot.lane.b32.xlu0 %v6563_v34, %s18101_s2  ;;  %s18104_s2 = smov 126   ;;  %v7043_v34 = vpack.i.b16 %v13712_v36, %v13712_v36 }
0x1297   : > { %v6273_v14 = vpop.permute.xlu0 %6272 }
0x1298   : > { %v6278_v57 = vsel %vm6276_vm14, 0, %v6273_v14  ;;  %v16746_v14 = vpop.permute.xlu1 %6759 }
0x1299   : > { %v16716_v8 = vsel %vm6281_vm13, %v6278_v57, 0 }
0x129a   : > { %v6313_v18 = vmul.bf16 %v16710_v9, %v16716_v8  ;;  %v6471_v55 = vmul.bf16 %v16720_v58, %v16716_v8  ;;  %v6762_v36 = vmul.bf16 %v16746_v14, %v16716_v8 }
0x129b   : > { %v6275_v12 = vpop.permute.xlu0 %6274 }
0x129c   : > { %v6280_v4 = vsel %vm6276_vm14, 0, %v6275_v12  ;;  %6332 = vrot.lane.b32.xlu0 %v6313_v18, %s17981_s22  ;;  %v7048_v18 = vrot.slane %v7043_v34, %v15846_v15 }
0x129d   : > { %v16725_v2 = vsel %vm6281_vm13, %v6280_v4, 0  ;;  %v16756_v4 = vpop.permute.xlu1 %6856 }
0x129e   : > { %v6314_v46 = vmul.bf16 %v16710_v9, %v16725_v2  ;;  %v6472_v7 = vmul.bf16 %v16720_v58, %v16725_v2  ;;  %v6666_v57 = vmul.bf16 %v16734_v1, %v16725_v2  ;;  %v6763_v12 = vmul.bf16 %v16746_v14, %v16725_v2 }
0x129f   : > { %v16729_v10 = vpop.permute.xlu0 %6565  ;;  %v6859_v34 = vmul.bf16 %v16756_v4, %v16716_v8 }
0x12a0   : > { %6334 = vrot.lane.b32.xlu0 %v6314_v46, %s17981_s22  ;;  %v6568_v31 = vmul.bf16 %v16729_v10, %v16716_v8  ;;  %v6569_v41 = vmul.bf16 %v16729_v10, %v16725_v2  ;;  %v6665_v46 = vmul.bf16 %v16734_v1, %v16716_v8  ;;  %s18109_s22 = sld [smem:[#allocation20_spill]] }
0x12a2   : > { %6587 = vrot.lane.b32.xlu1 %v6568_v31, %s18104_s2  ;;  %v6860_v31 = vmul.bf16 %v16756_v4, %v16725_v2 }
0x12a4   : > { %6490 = vrot.lane.b32.xlu0 %v6471_v55, %s18104_s2  ;;  %v16767_v55 = vpop.permute.xlu1 %6953 }
0x12a6   : > { %6589 = vrot.lane.b32.xlu1 %v6569_v41, %s18104_s2  ;;  %v6957_v41 = vmul.bf16 %v16767_v55, %v16725_v2 }
0x12a8   : > { %6492 = vrot.lane.b32.xlu0 %v6472_v7, %s18104_s2  ;;  %v6956_v7 = vmul.bf16 %v16767_v55, %v16716_v8 }
0x12aa   : > { %6686 = vrot.lane.b32.xlu1 %v6666_v57, %s17979_s15  ;;  %v6286_v57 = vld [vmem:[%s18099_s11] sm:$0x1]  ;;  %s18118_s11 = smov 119  }
0x12ac   : > { %7050 = vrot.lane.b32.xlu0 %v7048_v18, %s18105_s0  ;;  %s18106_s0 = smov 123   ;;  %v6288_v18 = vpack.i.b16 %v6286_v57, %v6286_v57 }
0x12ae   : > { %6783 = vrot.lane.b32.xlu1 %v6763_v12, %s17974_s16 }
0x12b0   : > { %6684 = vrot.lane.b32.xlu0 %v6665_v46, %s17979_s15  ;;  %v16781_v46 = vrot.slane %v6288_v18, %v15846_v15  ;;  %v15433_v15 = vld [vmem:[%s18103_s23 + $0x8] sm:$0xff]   ;;  %s18108_s15 = smov 122  }
0x12b2   : > { %6880 = vrot.lane.b32.xlu1 %v6860_v31, %s17974_s16  ;;  %v6295_v57 = vmul.bf16 %v16781_v46, %v16725_v2 }
0x12b4   : > { %6781 = vrot.lane.b32.xlu0 %v6762_v36, %s17974_s16  ;;  %v6294_v36 = vmul.bf16 %v16781_v46, %v16716_v8 }
0x12b6   : > { %6977 = vrot.lane.b32.xlu1 %v6957_v41, %s18106_s0  ;;  %v15431_v41 = vld [vmem:[%s18103_s23 + $0x18] sm:$0xff]  }
0x12b8   : > { %6878 = vrot.lane.b32.xlu0 %v6859_v34, %s17974_s16  ;;  %v15432_v34 = vld [vmem:[%s18103_s23] sm:$0xff]   ;;  %s18107_s16 = sld [smem:[#allocation19_spill]] }
0x12bc   : > { %6975 = vrot.lane.b32.xlu0 %v6956_v7, %s18106_s0 }
0x130e   : > { %v6333_v12 = vpop.permute.xlu0 %6332 }
0x130f   : > { %14622 = vmatprep.subr.bf16.mxu1 %v6333_v12 }
0x1310   : > { %14623 = vmatpush3.bf16.msra.mxu1 %v6333_v12 }
0x1312   : > { %v6335_v31 = vpop.permute.xlu0 %6334 }
0x1313   : > { %14624 = vmatprep.subr.bf16.mxu1 %v6335_v31 }
0x1314   : > { %14625 = vmatpush3.bf16.msra.mxu1 %v6335_v31 }
0x1315   : > { %14630 = vmatprep.subr.bf16.mxu1 %v6294_v36 }
0x1316   : > { %v6491_v7 = vpop.permute.xlu0 %6490 }
0x1317   : > { %14627 = vmatmul.mubr.msk.bf16.vlgmr.msra.gmra.mrb[88].mxu1 %vm2075_vm7, %v15431_v41 }
0x1318   : > { %14631 = vmatpush3.bf16.msra.mxu1 %v6294_v36  ;;  %14634 = vmatprep.mubr.msk.bf16.mxu1 %vm2075_vm7, %v15432_v34  ;;  %v7138_v36 = vld [vmem:[%s18107_s16 + $0x8] sm:$0xff]  ;;  %v7137_v34 = vld [vmem:[%s18107_s16] sm:$0xff] }
0x1319   : > { %14632 = vmatprep.subr.bf16.mxu1 %v6295_v57 }
0x131a   : > { %v6493_v18 = vpop.permute.xlu0 %6492 }
0x131c   : > { %14633 = vmatpush3.bf16.msra.mxu1 %v6295_v57  ;;  %v6588_v57 = vpop.permute.xlu1 %6587 }
0x131d   : > { %14638 = vmatprep.subr.bf16.mxu1 %v6491_v7 }
0x131e   : > { %v16791_v12 = vpop.permute.xlu0 %7050 }
0x131f   : > { %v7054_v31 = vmul.bf16 %v16791_v12, %v16725_v2  ;;  %v7053_v41 = vmul.bf16 %v16791_v12, %v16716_v8  ;;  %v7140_v2 = vld [vmem:[%s18107_s16 + $0x18] sm:$0xff]  ;;  %v7139_v8 = vld [vmem:[%s18107_s16 + $0x10] sm:$0xff] }
0x1321   : > { %7074 = vrot.lane.b32.xlu1 %v7054_v31, %s18108_s15  ;;  %7072 = vrot.lane.b32.xlu0 %v7053_v41, %s18108_s15  ;;  %v15435_v31 = vld [vmem:[%s18103_s23 + $0x28] sm:$0xff]   ;;  %v15436_v41 = vld [vmem:[%s18103_s23 + $0x30] sm:$0xff]  }
0x1323   : > { %14635 = vmatmul.mubr.msk.bf16.vlgmr.msra.gmra.mrb[88].mxu1 %vm2075_vm7, %v15433_v15  ;;  %v6590_v15 = vpop.permute.xlu1 %6589 }
0x1324   : > { %14639 = vmatpush3.bf16.msra.mxu1 %v6491_v7  ;;  %14642 = vmatprep.mubr.msk.bf16.mxu1 %vm2075_vm7, %v15434_v0  ;;  %v6685_v0 = vpop.permute.xlu0 %6684  ;;  %v15437_v7 = vld [vmem:[%s18103_s23 + $0x38] sm:$0xff]  }
0x1325   : > { %14640 = vmatprep.subr.bf16.mxu1 %v6493_v18  ;;  %7148 = vperm.xlu1 %15354, %v7138_v36   ;;  %v15438_v36 = vld [vmem:[%s18103_s23 + $0x40] sm:$0xff]  }
0x1326   : > { %7143 = vperm.xlu0 %15353, %v7137_v34  }
0x1328   : > { %14641 = vmatpush3.bf16.msra.mxu1 %v6493_v18  ;;  %v6687_v18 = vpop.permute.xlu1 %6686  ;;  %v6782_v34 = vpop.permute.xlu0 %6781 }
0x1329   : > { %14646 = vmatprep.subr.bf16.mxu1 %v6588_v57  ;;  %7158 = vperm.xlu1 %15354, %v7140_v2   ;;  %v15439_v2 = vld [vmem:[%s18103_s23 + $0x48] sm:$0xff]  }
0x132a   : > { %7153 = vperm.xlu0 %15353, %v7139_v8   ;;  %v15440_v8 = vld [vmem:[%s18103_s23 + $0x50] sm:$0xff]  }
0x132f   : > { %14643 = vmatmul.mubr.msk.bf16.vlgmr.msra.gmra.mrb[88].mxu1 %vm2075_vm7, %v15435_v31  ;;  %v6879_v31 = vpop.permute.xlu0 %6878 }
0x1330   : > { %14647 = vmatpush3.bf16.msra.mxu1 %v6588_v57  ;;  %14650 = vmatprep.mubr.msk.bf16.mxu1 %vm2075_vm7, %v15436_v41  ;;  %v6784_v57 = vpop.permute.xlu1 %6783  ;;  %v15441_v41 = vld [vmem:[%s18103_s23 + $0x58] sm:$0xff]  }
0x1331   : > { %14648 = vmatprep.subr.bf16.mxu1 %v6590_v15 }
0x1334   : > { %14649 = vmatpush3.bf16.msra.mxu1 %v6590_v15  ;;  %v15442_v15 = vld [vmem:[%s18103_s23 + $0x60] sm:$0xff]  }
0x1335   : > { %14654 = vmatprep.subr.bf16.mxu1 %v6685_v0 }
0x133b   : > { %14651 = vmatmul.mubr.msk.bf16.vlgmr.msra.gmra.mrb[88].mxu1 %vm2075_vm7, %v15437_v7  ;;  %v6976_v7 = vpop.permute.xlu0 %6975 }
0x133c   : > { %14655 = vmatpush3.bf16.msra.mxu1 %v6685_v0  ;;  %14658 = vmatprep.mubr.msk.bf16.mxu1 %vm2075_vm7, %v15438_v36  ;;  %v6881_v0 = vpop.permute.xlu1 %6880  ;;  %v15443_v36 = vld [vmem:[%s18103_s23 + $0x68] sm:$0xff]  }
0x133d   : > { %14656 = vmatprep.subr.bf16.mxu1 %v6687_v18 }
0x1340   : > { %14657 = vmatpush3.bf16.msra.mxu1 %v6687_v18  ;;  %v15444_v18 = vld [vmem:[%s18103_s23 + $0x70] sm:$0xff]  }
0x1341   : > { %14662 = vmatprep.subr.bf16.mxu1 %v6782_v34 }
0x1347   : > { %14659 = vmatmul.mubr.msk.bf16.vlgmr.msra.gmra.mrb[88].mxu1 %vm2075_vm7, %v15439_v2  ;;  %v15445_v2 = vld [vmem:[%s18103_s23 + $0x78] sm:$0xff]  }
0x1348   : > { %14663 = vmatpush3.bf16.msra.mxu1 %v6782_v34  ;;  %14666 = vmatprep.mubr.msk.bf16.mxu1 %vm2075_vm7, %v15440_v8  ;;  %v6978_v34 = vpop.permute.xlu1 %6977  ;;  %v15446_v8 = vld [vmem:[%s18103_s23 + $0x80] sm:$0xff]  }
0x1349   : > { %14664 = vmatprep.subr.bf16.mxu1 %v6784_v57 }
0x134c   : > { %14665 = vmatpush3.bf16.msra.mxu1 %v6784_v57 }
0x134d   : > { %14670 = vmatprep.subr.bf16.mxu1 %v6879_v31 }
0x1353   : > { %14667 = vmatmul.mubr.msk.bf16.vlgmr.msra.gmra.mrb[88].mxu1 %vm2075_vm7, %v15441_v41  ;;  %v15447_v41 = vld [vmem:[%s18103_s23 + $0x88] sm:$0xff]  }
0x1354   : > { %14671 = vmatpush3.bf16.msra.mxu1 %v6879_v31  ;;  %14674 = vmatprep.mubr.msk.bf16.mxu1 %vm2075_vm7, %v15442_v15 }
0x1355   : > { %14672 = vmatprep.subr.bf16.mxu1 %v6881_v0 }
0x1358   : > { %14673 = vmatpush3.bf16.msra.mxu1 %v6881_v0 }
0x1359   : > { %14678 = vmatprep.subr.bf16.mxu1 %v6976_v7 }
0x135f   : > { %14675 = vmatmul.mubr.msk.bf16.vlgmr.msra.gmra.mrb[88].mxu1 %vm2075_vm7, %v15443_v36 }
0x1360   : > { %14679 = vmatpush3.bf16.msra.mxu1 %v6976_v7  ;;  %14682 = vmatprep.mubr.msk.bf16.mxu1 %vm2075_vm7, %v15444_v18 }
0x1361   : > { %14680 = vmatprep.subr.bf16.mxu1 %v6978_v34 }
0x1364   : > { %14681 = vmatpush3.bf16.msra.mxu1 %v6978_v34 }
0x136b   : > { %14683 = vmatmul.mubr.msk.bf16.vlgmr.msra.gmra.mrb[88].mxu1 %vm2075_vm7, %v15445_v2 }
0x136c   : > { %14690 = vmatprep.mubr.msk.bf16.mxu1 %vm2075_vm7, %v15446_v8 }
0x1393   : > { %v7073_v57 = vpop.permute.xlu0 %7072  ;;  %v7075_v31 = vpop.permute.xlu1 %7074 }
0x1394   : > { %14686 = vmatprep.subr.bf16.mxu1 %v7073_v57 }
0x1395   : > { %14687 = vmatpush3.bf16.msra.mxu1 %v7073_v57 }
0x1396   : > { %14688 = vmatprep.subr.bf16.mxu1 %v7075_v31 }
0x1399   : > { %14689 = vmatpush3.bf16.msra.mxu1 %v7075_v31 }
0x139c   : > { %14691 = vmatmul.mubr.msk.bf16.vlgmr.msra.gmra.mrb[88].mxu1 %vm2075_vm7, %v15447_v41  ;;  %v15448_v41 = vld [vmem:[%s18109_s22 + $0x10] sm:$0xff]  }
0x139d   : > { %14698 = vmatprep.mubr.msk.bf16.mxu0 %vm2075_vm7, %v15448_v41 }
0x13a4   : > { %v7149_v0 = vpop.permute.xlu1 %7148 }
0x13a5   : > { %v7144_v15 = vpop.permute.xlu0 %7143 }
0x13a8   : > { %v7159_v6 = vpop.permute.xlu1 %7158 }
0x13a9   : > { %v7154_v7 = vpop.permute.xlu0 %7153 }
0x146f   : > { %v14692_v36 = vpop.f32.mrb[88].mxu1 }
0x1470   : > { %v7163_v18 = vadd.f32 %v14692_v36, %v7154_v7  ;;  %v7118_v34 = vpop.f32.mrb[89].mxu1 }
0x1471   : > { %v7161_v2 = vadd.f32 %v7144_v15, %v7118_v34  ;;  %v14693_v61 = vpop.f32.mrb[90].mxu1 }
0x1472   : > { %v7164_v8 = vadd.f32 %v14693_v61, %v7159_v6  ;;  %v7121_v56 = vpop.f32.mrb[91].mxu1  ;;  %v7167_v24 = vmax.f32 %v7163_v18, 0.0 }
0x1473   : > { %v7162_v53 = vadd.f32 %v7149_v0, %v7121_v56  ;;  %v7165_v22 = vmax.f32 %v7161_v2, 0.0 }
0x1474   : > { %v7168_v57 = vmax.f32 %v7164_v8, 0.0  ;;  %v7924_v8 = vld [vmem:[%s18112_s5] sm:$0xff] }
0x1475   : > { %v7166_v49 = vmax.f32 %v7162_v53, 0.0 }
0x1476   : > { %v7170_v31 = vpack.c.bf16 %v7168_v57, %v7167_v24  ;;  %v7927_v57 = vld [vmem:[%s18112_s5 + $0x18] sm:$0xff] }
0x1477   : > { %v7169_v48 = vpack.c.bf16 %v7166_v49, %v7165_v22 }
0x1478   : > { %7175 = vrot.lane.b32.xlu1 %v7170_v31, %s15598_s7 }
0x1479   : > { %7173 = vrot.lane.b32.xlu0 %v7169_v48, %s15598_s7  ;;  %s18111_s7 = smov 125  }
0x14ea   : > { %v7176_v7 = vpop.permute.xlu1 %7175 }
0x14eb   : > { %v7180_v36 = vsel %vm6276_vm14, 0, %v7176_v7  ;;  %v7174_v43 = vpop.permute.xlu0 %7173 }
0x14ec   : > { %v7183_v61 = vsel %vm6281_vm13, %v7180_v36, 0  ;;  %v7178_v56 = vsel %vm6276_vm14, 0, %v7174_v43  ;;  %v15449_v36 = vld [vmem:[%s18109_s22 + $0x18] sm:$0xff]   ;;  %vm7959_vm14 = vcmask 31744  }
0x14ed   : > { %v7181_v6 = vsel %vm6281_vm13, %v7178_v56, 0  ;;  %v7192_v24 = vmul.bf16 %v7183_v61, %v16710_v9  ;;  %v7337_v48 = vmul.bf16 %v7183_v61, %v16720_v58  ;;  %v7421_v43 = vmul.bf16 %v7183_v61, %v16729_v10  ;;  %v15450_v56 = vld [vmem:[%s18109_s22] sm:$0xff]  }
0x14ee   : > { %v7191_v22 = vmul.bf16 %v7181_v6, %v16710_v9  ;;  %v7336_v49 = vmul.bf16 %v7181_v6, %v16720_v58  ;;  %v7420_v53 = vmul.bf16 %v7181_v6, %v16729_v10  ;;  %v7505_v9 = vmul.bf16 %v7183_v61, %v16734_v1 }
0x14ef   : > { %7212 = vrot.lane.b32.xlu1 %v7192_v24, %s18110_s4  ;;  %v7504_v15 = vmul.bf16 %v7181_v6, %v16734_v1  ;;  %v7589_v58 = vmul.bf16 %v7183_v61, %v16746_v14  ;;  %v7588_v0 = vmul.bf16 %v7181_v6, %v16746_v14  ;;  %v7673_v10 = vmul.bf16 %v7183_v61, %v16756_v4 }
0x14f0   : > { %7210 = vrot.lane.b32.xlu0 %v7191_v22, %s18110_s4  ;;  %v7672_v18 = vmul.bf16 %v7181_v6, %v16756_v4  ;;  %v7757_v1 = vmul.bf16 %v7183_v61, %v16767_v55  ;;  %v7756_v34 = vmul.bf16 %v7181_v6, %v16767_v55  ;;  %v7841_v14 = vmul.bf16 %v7183_v61, %v16791_v12  ;;  %v7925_v4 = vld [vmem:[%s18112_s5 + $0x8] sm:$0xff]  ;;  %v7926_v55 = vld [vmem:[%s18112_s5 + $0x10] sm:$0xff]  ;;  %s18115_s5 = smov 120  }
0x14f1   : > { %v7840_v2 = vmul.bf16 %v7181_v6, %v16791_v12  ;;  %v7185_v7 = vmul.bf16 %v7181_v6, %v16781_v46  ;;  %v15451_v22 = vld [vmem:[%s18109_s22 + $0x8] sm:$0xff]   ;;  %v15452_v6 = vld [vmem:[%s18109_s22 + $0x20] sm:$0xff]   ;;  %vm7966_vm13 = vcmask 1041408  }
0x14f3   : > { %7357 = vrot.lane.b32.xlu1 %v7337_v48, %s18104_s2 }
0x14f4   : > { %7355 = vrot.lane.b32.xlu0 %v7336_v49, %s18104_s2 }
0x14f7   : > { %7441 = vrot.lane.b32.xlu1 %v7421_v43, %s18104_s2  ;;  %v15454_v43 = vld [vmem:[%s18109_s22 + $0x30] sm:$0xff]  }
0x14f8   : > { %7439 = vrot.lane.b32.xlu0 %v7420_v53, %s18104_s2 }
0x14fb   : > { %7525 = vrot.lane.b32.xlu1 %v7505_v9, %s18111_s7 }
0x14fc   : > { %7523 = vrot.lane.b32.xlu0 %v7504_v15, %s18111_s7  ;;  %s18114_s7 = smov 5  }
0x14ff   : > { %7609 = vrot.lane.b32.xlu1 %v7589_v58, %s18113_s6  ;;  %v15455_v58 = vld [vmem:[%s18109_s22 + $0x38] sm:$0xff]  }
0x1500   : > { %7607 = vrot.lane.b32.xlu0 %v7588_v0, %s18113_s6  ;;  %v15456_v0 = vld [vmem:[%s18109_s22 + $0x40] sm:$0xff]  }
0x1503   : > { %7693 = vrot.lane.b32.xlu1 %v7673_v10, %s18113_s6 }
0x1504   : > { %7691 = vrot.lane.b32.xlu0 %v7672_v18, %s18113_s6 }
0x1507   : > { %7777 = vrot.lane.b32.xlu1 %v7757_v1, %s18106_s0 }
0x1508   : > { %7775 = vrot.lane.b32.xlu0 %v7756_v34, %s18106_s0 }
0x150b   : > { %7861 = vrot.lane.b32.xlu1 %v7841_v14, %s18108_s15  ;;  %v15457_v14 = vld [vmem:[%s18109_s22 + $0x48] sm:$0xff]  }
0x150c   : > { %7859 = vrot.lane.b32.xlu0 %v7840_v2, %s18108_s15 }
0x150f   : > { %7935 = vperm.xlu1 %15354, %v7925_v4  }
0x1510   : > { %7930 = vperm.xlu0 %15353, %v7924_v8   ;;  %v15458_v8 = vld [vmem:[%s18109_s22 + $0x50] sm:$0xff]  }
0x1513   : > { %7945 = vperm.xlu1 %15354, %v7927_v57  }
0x1514   : > { %7940 = vperm.xlu0 %15353, %v7926_v55  }
0x1518   : > { %8023 = vrot.lane.b32.xlu0 %v16670_v16, %s18114_s7  ;;  %v7186_v16 = vmul.bf16 %v7183_v61, %v16781_v46  ;;  %v15453_v61 = vld [vmem:[%s18109_s22 + $0x28] sm:$0xff]  }
0x151c   : > { %8025 = vrot.lane.b32.xlu0 %v16668_v54, %s18114_s7 }
0x1561   : > { %v7213_v31 = vpop.permute.xlu1 %7212 }
0x1562   : > { %v7211_v12 = vpop.permute.xlu0 %7210 }
0x1563   : > { %14694 = vmatprep.subr.bf16.mxu0 %v7211_v12 }
0x1564   : > { %14695 = vmatpush3.bf16.msra.mxu0 %v7211_v12 }
0x1565   : > { %14696 = vmatprep.subr.bf16.mxu0 %v7213_v31  ;;  %v7358_v48 = vpop.permute.xlu1 %7357 }
0x1566   : > { %v7356_v41 = vpop.permute.xlu0 %7355 }
0x1568   : > { %14697 = vmatpush3.bf16.msra.mxu0 %v7213_v31 }
0x1569   : > { %14702 = vmatprep.subr.bf16.mxu0 %v7185_v7  ;;  %v7442_v53 = vpop.permute.xlu1 %7441 }
0x156a   : > { %v7440_v54 = vpop.permute.xlu0 %7439 }
0x156b   : > { %14699 = vmatmul.mubr.msk.bf16.vlgmr.msra.gmra.mrb[76].mxu0 %vm2075_vm7, %v15449_v36 }
0x156c   : > { %14703 = vmatpush3.bf16.msra.mxu0 %v7185_v7  ;;  %14706 = vmatprep.mubr.msk.bf16.mxu0 %vm2075_vm7, %v15450_v56  ;;  %v15459_v56 = vld [vmem:[%s18109_s22 + $0x58] sm:$0xff]  }
0x156d   : > { %14704 = vmatprep.subr.bf16.mxu0 %v7186_v16  ;;  %v7526_v18 = vpop.permute.xlu1 %7525 }
0x156e   : > { %v7524_v24 = vpop.permute.xlu0 %7523 }
0x1570   : > { %14705 = vmatpush3.bf16.msra.mxu0 %v7186_v16  ;;  %v15460_v16 = vld [vmem:[%s18109_s22 + $0x60] sm:$0xff]  }
0x1571   : > { %14710 = vmatprep.subr.bf16.mxu0 %v7356_v41  ;;  %v7610_v12 = vpop.permute.xlu1 %7609 }
0x1572   : > { %v7608_v49 = vpop.permute.xlu0 %7607 }
0x1576   : > { %v7692_v46 = vpop.permute.xlu0 %7691 }
0x1577   : > { %14707 = vmatmul.mubr.msk.bf16.vlgmr.msra.gmra.mrb[76].mxu0 %vm2075_vm7, %v15451_v22 }
0x1578   : > { %14711 = vmatpush3.bf16.msra.mxu0 %v7356_v41  ;;  %14714 = vmatprep.mubr.msk.bf16.mxu0 %vm2075_vm7, %v15452_v6 }
0x1579   : > { %14712 = vmatprep.subr.bf16.mxu0 %v7358_v48 }
0x157a   : > { %v7776_v9 = vpop.permute.xlu0 %7775 }
0x157c   : > { %14713 = vmatpush3.bf16.msra.mxu0 %v7358_v48  ;;  %v15461_v48 = vld [vmem:[%s18109_s22 + $0x68] sm:$0xff]  }
0x157d   : > { %14718 = vmatprep.subr.bf16.mxu0 %v7440_v54 }
0x157e   : > { %v16895_v15 = vpop.permute.xlu0 %7859 }
0x1583   : > { %14715 = vmatmul.mubr.msk.bf16.vlgmr.msra.gmra.mrb[76].mxu0 %vm2075_vm7, %v15453_v61 }
0x1584   : > { %14719 = vmatpush3.bf16.msra.mxu0 %v7440_v54  ;;  %14722 = vmatprep.mubr.msk.bf16.mxu0 %vm2075_vm7, %v15454_v43 }
0x1585   : > { %14720 = vmatprep.subr.bf16.mxu0 %v7442_v53 }
0x1588   : > { %14721 = vmatpush3.bf16.msra.mxu0 %v7442_v53 }
0x1589   : > { %14726 = vmatprep.subr.bf16.mxu0 %v7524_v24 }
0x158f   : > { %v16899_v10 = vpop.permute.xlu0 %7930  ;;  %14723 = vmatmul.mubr.msk.bf16.vlgmr.msra.gmra.mrb[76].mxu0 %vm2075_vm7, %v15455_v58  ;;  %v15463_v58 = vld [vmem:[%s18109_s22 + $0x78] sm:$0xff]  }
0x1590   : > { %14727 = vmatpush3.bf16.msra.mxu0 %v7524_v24  ;;  %14730 = vmatprep.mubr.msk.bf16.mxu0 %vm2075_vm7, %v15456_v0  ;;  %v7694_v24 = vpop.permute.xlu1 %7693 }
0x1591   : > { %14728 = vmatprep.subr.bf16.mxu0 %v7526_v18 }
0x1593   : > { %v16903_v1 = vpop.permute.xlu0 %7940 }
0x1594   : > { %14729 = vmatpush3.bf16.msra.mxu0 %v7526_v18  ;;  %v7778_v61 = vpop.permute.xlu1 %7777 }
0x1595   : > { %14734 = vmatprep.subr.bf16.mxu0 %v7608_v49 }
0x1597   : > { %v8024_v34 = vpop.permute.xlu0 %8023 }
0x1598   : > { %v8028_v2 = vsel %vm4539_vm3, 0, %v8024_v34  ;;  %v7862_v18 = vpop.permute.xlu1 %7861 }
0x1599   : > { %v16908_v4 = vsel %vm4542_vm15, %v8028_v2, 0  ;;  %v15465_v2 = vld [vmem:[%s18109_s22 + $0x88] sm:$0xff]  }
0x159a   : > { %v8155_v57 = vmul.bf16 %v16908_v4, %v16503_v50  ;;  %v8283_v36 = vmul.bf16 %v16908_v4, %v16509_v45  ;;  %v8411_v22 = vmul.bf16 %v16908_v4, %v16514_v30  ;;  %v8667_v53 = vmul.bf16 %v16908_v4, %v16528_v11 }
0x159b   : > { %v8026_v55 = vpop.permute.xlu0 %8025  ;;  %14731 = vmatmul.mubr.msk.bf16.vlgmr.msra.gmra.mrb[76].mxu0 %vm2075_vm7, %v15457_v14  ;;  %v8795_v34 = vmul.bf16 %v16908_v4, %v16540_v35 }
0x159c   : > { %v8030_v31 = vsel %vm4539_vm3, 0, %v8026_v55  ;;  %14735 = vmatpush3.bf16.msra.mxu0 %v7608_v49  ;;  %8167 = vrot.lane.b32.xlu0 %v8155_v57, %s18110_s4  ;;  %v15462_v49 = vld [vmem:[%s18109_s22 + $0x70] sm:$0xff]   ;;  %v9051_v57 = vmul.bf16 %v16908_v4, %v16550_v26 }
0x159d   : > { %v16917_v41 = vsel %vm4542_vm15, %v8030_v31, 0  ;;  %14736 = vmatprep.subr.bf16.mxu0 %v7610_v12  ;;  %14738 = vmatprep.mubr.msk.bf16.mxu0 %vm2075_vm7, %v15458_v8  ;;  %v7958_v31 = vld [vmem:[%s18117_s10] sm:$0x3]  ;;  %s18120_s10 = sld [smem:[#allocation22_spill]] }
0x159e   : > { %v8156_v7 = vmul.bf16 %v16917_v41, %v16503_v50  ;;  %v8284_v54 = vmul.bf16 %v16917_v41, %v16509_v45  ;;  %v8412_v6 = vmul.bf16 %v16917_v41, %v16514_v30  ;;  %v8540_v43 = vmul.bf16 %v16917_v41, %v16521_v3  ;;  %15266 = vmatprep.subr.msk.bf16.mxu1 %vm7966_vm13, %v7958_v31 }
0x159f   : > { %v8668_v0 = vmul.bf16 %v16917_v41, %v16528_v11  ;;  %v8796_v14 = vmul.bf16 %v16917_v41, %v16540_v35  ;;  %v8924_v8 = vmul.bf16 %v16917_v41, %v16546_v44  ;;  %v9052_v55 = vmul.bf16 %v16917_v41, %v16550_v26 }
0x15a0   : > { %14737 = vmatpush3.bf16.msra.mxu0 %v7610_v12  ;;  %8169 = vrot.lane.b32.xlu0 %v8156_v7, %s18110_s4  ;;  %v9179_v12 = vld [vmem:[%s18116_s9] sm:$0xff]  ;;  %v7968_v7 = vsel %vm7966_vm13, %v7958_v31, 0  ;;  %vm18172_vm13 = vcmask 777216  }
0x15a1   : > { %14742 = vmatprep.subr.bf16.mxu0 %v7692_v46  ;;  %14767 = vmatpush3.bf16.msra.mxu1 %v7968_v7 }
0x15a2   : > { %14780 = vmatprep.subr.bf16.mxu1 %v18092_v39 }
0x15a4   : > { %8295 = vrot.lane.b32.xlu0 %v8283_v36, %s18104_s2  ;;  %v7936_v36 = vpop.permute.xlu1 %7935 }
0x15a7   : > { %14739 = vmatmul.mubr.msk.bf16.vlgmr.msra.gmra.mrb[76].mxu0 %vm2075_vm7, %v15459_v56 }
0x15a8   : > { %14743 = vmatpush3.bf16.msra.mxu0 %v7692_v46  ;;  %8297 = vrot.lane.b32.xlu0 %v8284_v54, %s18104_s2  ;;  %v8539_v46 = vmul.bf16 %v16908_v4, %v16521_v3 }
0x15a9   : > { %14744 = vmatprep.subr.bf16.mxu0 %v7694_v24  ;;  %14746 = vmatprep.mubr.msk.bf16.mxu0 %vm2075_vm7, %v15460_v16 }
0x15ac   : > { %14745 = vmatpush3.bf16.msra.mxu0 %v7694_v24  ;;  %8423 = vrot.lane.b32.xlu0 %v8411_v22, %s18113_s6  ;;  %v7946_v24 = vpop.permute.xlu1 %7945 }
0x15ad   : > { %14750 = vmatprep.subr.bf16.mxu0 %v7776_v9 }
0x15b0   : > { %8425 = vrot.lane.b32.xlu0 %v8412_v6, %s18113_s6 }
0x15b3   : > { %14747 = vmatmul.mubr.msk.bf16.vlgmr.msra.gmra.mrb[76].mxu0 %vm2075_vm7, %v15461_v48 }
0x15b4   : > { %14751 = vmatpush3.bf16.msra.mxu0 %v7776_v9  ;;  %8551 = vrot.lane.b32.xlu0 %v8539_v46, %s18106_s0  ;;  %v15464_v9 = vld [vmem:[%s18109_s22 + $0x80] sm:$0xff]  }
0x15b5   : > { %14752 = vmatprep.subr.bf16.mxu0 %v7778_v61  ;;  %14754 = vmatprep.mubr.msk.bf16.mxu0 %vm2075_vm7, %v15462_v49 }
0x15b8   : > { %14753 = vmatpush3.bf16.msra.mxu0 %v7778_v61  ;;  %8553 = vrot.lane.b32.xlu0 %v8540_v43, %s18106_s0 }
0x15b9   : > { %14758 = vmatprep.subr.bf16.mxu0 %v16895_v15 }
0x15bc   : > { %8679 = vrot.lane.b32.xlu0 %v8667_v53, %s18108_s15 }
0x15bf   : > { %14755 = vmatmul.mubr.msk.bf16.vlgmr.msra.gmra.mrb[76].mxu0 %vm2075_vm7, %v15463_v58 }
0x15c0   : > { %14759 = vmatpush3.bf16.msra.mxu0 %v16895_v15  ;;  %8681 = vrot.lane.b32.xlu0 %v8668_v0, %s18108_s15  ;;  %v8923_v15 = vmul.bf16 %v16908_v4, %v16546_v44 }
0x15c1   : > { %14760 = vmatprep.subr.bf16.mxu0 %v7862_v18  ;;  %14762 = vmatprep.mubr.msk.bf16.mxu0 %vm2075_vm7, %v15464_v9 }
0x15c4   : > { %14761 = vmatpush3.bf16.msra.mxu0 %v7862_v18  ;;  %8807 = vrot.lane.b32.xlu0 %v8795_v34, %s18115_s5  ;;  %v8049_v18 = vmul.bf16 %v16908_v4, %v16535_v51 }
0x15c5   : > { %14772 = vmatprep.subr.bf16.mxu0 %v18092_v39 }
0x15c8   : > { %8809 = vrot.lane.b32.xlu0 %v8796_v14, %s18115_s5 }
0x15cb   : > { %14763 = vmatmul.mubr.msk.bf16.vlgmr.msra.gmra.mrb[76].mxu0 %vm2075_vm7, %v15465_v2 }
0x15cc   : > { %8935 = vrot.lane.b32.xlu0 %v8923_v15, %s18118_s11  ;;  %14776 = vmatprep.mubr.msk.bf16.mxu0 %vm15588_vm6, %v18092_v39 }
0x15d0   : > { %8937 = vrot.lane.b32.xlu0 %v8924_v8, %s18118_s11  ;;  %v15474_v8 = vld [vmem:[%s18120_s10] sm:$0xff]  }
0x15d4   : > { %9063 = vrot.lane.b32.xlu0 %v9051_v57, %s18119_s12 }
0x15d8   : > { %9065 = vrot.lane.b32.xlu0 %v9052_v55, %s18119_s12 }
0x15dc   : > { %9183 = vperm.xlu0 %15353, %v9179_v12  }
0x169e   : > { %v14764_v56 = vpop.f32.mrb[76].mxu0 }
0x169f   : > { %v7950_v16 = vadd.f32 %v14764_v56, %v16903_v1  ;;  %v7905_v54 = vpop.f32.mrb[77].mxu0 }
0x16a0   : > { %v7948_v22 = vadd.f32 %v16899_v10, %v7905_v54  ;;  %v14765_v6 = vpop.f32.mrb[78].mxu0  ;;  %v8050_v10 = vmul.bf16 %v16917_v41, %v16535_v51  ;;  %v8168_v41 = vpop.permute.xlu0 %8167 }
0x16a1   : > { %v7951_v48 = vadd.f32 %v14765_v6, %v7946_v24  ;;  %v7908_v49 = vpop.f32.mrb[79].mxu0  ;;  %v7954_v61 = vmax.f32 %v7950_v16, 0.0 }
0x16a2   : > { %v7949_v46 = vadd.f32 %v7936_v36, %v7908_v49  ;;  %v7952_v53 = vmax.f32 %v7948_v22, 0.0 }
0x16a3   : > { %v7955_v43 = vmax.f32 %v7951_v48, 0.0 }
0x16a4   : > { %v7953_v58 = vmax.f32 %v7949_v46, 0.0  ;;  %v8170_v57 = vpop.permute.xlu0 %8169  ;;  %v15466_v46 = vld [vmem:[%s18121_s13] sm:$0xff]  }
0x16a5   : > { %v7957_v9 = vpack.c.bf16 %v7955_v43, %v7954_v61 }
0x16a6   : > { %v7956_v0 = vpack.c.bf16 %v7953_v58, %v7952_v53  ;;  %v15467_v58 = vld [vmem:[%s18120_s10 + $0x8] sm:$0xff]  }
0x16a8   : > { %14768 = vmatprep.mubr.msk.bf16.mxu1 %vm7959_vm14, %v7956_v0  ;;  %v8296_v55 = vpop.permute.xlu0 %8295 }
0x16a9   : > { %14769 = vmatmul.mubr.msk.bf16.vlgmr.msra.gmra.mrb[92].mxu1 %vm7959_vm14, %v7957_v9  ;;  %vm18173_vm14 = vmmov %vm18172_vm13 }
0x16aa   : > { %14781 = vmatpush3.bf16.msra.mxu1 %v8049_v18  ;;  %14784 = vmatprep.mubr.msk.bf16.mxu1 %vm15588_vm6, %v18092_v39 }
0x16ab   : > { %14782 = vmatprep.subr.bf16.mxu1 %v18092_v39 }
0x16ac   : > { %v8298_v12 = vpop.permute.xlu0 %8297 }
0x16ae   : > { %14783 = vmatpush3.bf16.msra.mxu1 %v8050_v10 }
0x16af   : > { %14796 = vmatprep.subr.bf16.mxu1 %v18092_v39 }
0x16b0   : > { %v8424_v22 = vpop.permute.xlu0 %8423 }
0x16b1   : > { %14785 = vmatmul.mubr.msk.bf16.vlgmr.msra.gmra.mrb[96].mxu1 %vm2075_vm7, %v15474_v8 }
0x16b2   : > { %14800 = vmatprep.mubr.msk.bf16.mxu1 %vm15588_vm6, %v18092_v39 }
0x16b4   : > { %v8426_v43 = vpop.permute.xlu0 %8425 }
0x16b8   : > { %v8552_v9 = vpop.permute.xlu0 %8551 }
0x16bc   : > { %v8554_v10 = vpop.permute.xlu0 %8553 }
0x177c   : > { %v14770_v1 = vpop.f32.mrb[92].mxu1 }
0x177d   : > { %v8004_v34 = vpop.f32.mrb[93].mxu1 }
0x177e   : > { %v14771_v14 = vpop.f32.mrb[94].mxu1 }
0x177f   : > { %v8020_v2 = vpack.c.bf16 %v14771_v14, %v14770_v1  ;;  %v8007_v15 = vpop.f32.mrb[95].mxu1  ;;  %v15468_v1 = vld [vmem:[%s18120_s10 + $0x10] sm:$0xff]   ;;  %v8680_v14 = vpop.permute.xlu0 %8679 }
0x1780   : > { %v8019_v4 = vpack.c.bf16 %v8007_v15, %v8004_v34  ;;  %v15469_v15 = vld [vmem:[%s18120_s10 + $0x18] sm:$0xff]  }
0x1782   : > { %8037 = vrot.lane.b32.xlu1 %v8019_v4, %s18114_s7 }
0x1783   : > { %v8682_v8 = vpop.permute.xlu0 %8681 }
0x1786   : > { %8039 = vrot.lane.b32.xlu1 %v8020_v2, %s18114_s7 }
0x17f4   : > { %v8038_v31 = vpop.permute.xlu1 %8037 }
0x17f5   : > { %v8042_v7 = vsel %vm4539_vm3, 0, %v8038_v31 }
0x17f6   : > { %v17005_v36 = vsel %vm4542_vm15, %v8042_v7, 0 }
0x17f7   : > { %v8219_v56 = vmul.bf16 %v17005_v36, %v16503_v50  ;;  %v8053_v16 = vmul.bf16 %v17005_v36, %v16535_v51  ;;  %v8347_v61 = vmul.bf16 %v17005_v36, %v16509_v45  ;;  %v8475_v0 = vmul.bf16 %v17005_v36, %v16514_v30 }
0x17f8   : > { %v8040_v54 = vpop.permute.xlu1 %8039  ;;  %v8603_v34 = vmul.bf16 %v17005_v36, %v16521_v3  ;;  %v8731_v4 = vmul.bf16 %v17005_v36, %v16528_v11 }
0x17f9   : > { %v8044_v24 = vsel %vm4539_vm3, 0, %v8040_v54  ;;  %8231 = vrot.lane.b32.xlu1 %v8219_v56, %s18110_s4  ;;  %14773 = vmatpush3.bf16.msra.mxu0 %v8053_v16  ;;  %v15471_v56 = vld [vmem:[%s18120_s10 + $0x28] sm:$0xff]   ;;  %v8987_v16 = vmul.bf16 %v17005_v36, %v16546_v44 }
0x17fa   : > { %v17014_v6 = vsel %vm4542_vm15, %v8044_v24, 0  ;;  %14774 = vmatprep.subr.bf16.mxu0 %v18092_v39 }
0x17fb   : > { %v8220_v48 = vmul.bf16 %v17014_v6, %v16503_v50  ;;  %v8054_v49 = vmul.bf16 %v17014_v6, %v16535_v51  ;;  %v8348_v53 = vmul.bf16 %v17014_v6, %v16509_v45  ;;  %v8476_v18 = vmul.bf16 %v17014_v6, %v16514_v30 }
0x17fc   : > { %v8604_v2 = vmul.bf16 %v17014_v6, %v16521_v3  ;;  %v8860_v31 = vmul.bf16 %v17014_v6, %v16540_v35  ;;  %v8988_v24 = vmul.bf16 %v17014_v6, %v16546_v44 }
0x17fd   : > { %8233 = vrot.lane.b32.xlu1 %v8220_v48, %s18110_s4  ;;  %14775 = vmatpush3.bf16.msra.mxu0 %v8054_v49  ;;  %v9115_v48 = vmul.bf16 %v17005_v36, %v16550_v26 }
0x17fe   : > { %14788 = vmatprep.subr.bf16.mxu0 %v18092_v39 }
0x1800   : > { %14777 = vmatmul.mubr.msk.bf16.vlgmr.msra.gmra.mrb[80].mxu0 %vm2075_vm7, %v15466_v46  ;;  %v9116_v46 = vmul.bf16 %v17014_v6, %v16550_v26 }
0x1801   : > { %8359 = vrot.lane.b32.xlu1 %v8347_v61, %s18104_s2  ;;  %14789 = vmatpush3.bf16.msra.mxu0 %v8168_v41  ;;  %v8732_v41 = vmul.bf16 %v17014_v6, %v16528_v11  ;;  %v15473_v61 = vld [vmem:[%s18120_s10 + $0x38] sm:$0xff]   ;;  %v15482_v6 = vld [vmem:[%s18120_s10 + $0x40] sm:$0xff]  }
0x1802   : > { %14790 = vmatprep.subr.bf16.mxu0 %v18092_v39  ;;  %14792 = vmatprep.mubr.msk.bf16.mxu0 %vm15588_vm6, %v18092_v39 }
0x1805   : > { %8361 = vrot.lane.b32.xlu1 %v8348_v53, %s18104_s2  ;;  %14791 = vmatpush3.bf16.msra.mxu0 %v8170_v57  ;;  %v15470_v57 = vld [vmem:[%s18120_s10 + $0x20] sm:$0xff]  }
0x1806   : > { %14804 = vmatprep.subr.bf16.mxu0 %v18092_v39 }
0x1808   : > { %14793 = vmatmul.mubr.msk.bf16.vlgmr.msra.gmra.mrb[84].mxu0 %vm2075_vm7, %v15467_v58 }
0x1809   : > { %8487 = vrot.lane.b32.xlu1 %v8475_v0, %s18113_s6  ;;  %14805 = vmatpush3.bf16.msra.mxu0 %v8296_v55  ;;  %v8808_v55 = vpop.permute.xlu0 %8807  ;;  %v15475_v0 = vld [vmem:[%s18121_s13 + $0x8] sm:$0xff]  }
0x180a   : > { %14806 = vmatprep.subr.bf16.mxu0 %v18092_v39  ;;  %14808 = vmatprep.mubr.msk.bf16.mxu0 %vm15588_vm6, %v18092_v39 }
0x180d   : > { %8489 = vrot.lane.b32.xlu1 %v8476_v18, %s18113_s6  ;;  %14807 = vmatpush3.bf16.msra.mxu0 %v8298_v12  ;;  %v8859_v12 = vmul.bf16 %v17005_v36, %v16540_v35  ;;  %v8810_v7 = vpop.permute.xlu0 %8809 }
0x180e   : > { %14820 = vmatprep.subr.bf16.mxu0 %v18092_v39 }
0x1810   : > { %14809 = vmatmul.mubr.msk.bf16.vlgmr.msra.gmra.mrb[88].mxu0 %vm2075_vm7, %v15468_v1  ;;  %v15476_v1 = vld [vmem:[%s18121_s13 + $0x10] sm:$0xff]  }
0x1811   : > { %8615 = vrot.lane.b32.xlu1 %v8603_v34, %s18106_s0  ;;  %14821 = vmatpush3.bf16.msra.mxu0 %v8424_v22  ;;  %v8936_v54 = vpop.permute.xlu0 %8935  ;;  %v15472_v22 = vld [vmem:[%s18120_s10 + $0x30] sm:$0xff]   ;;  %s18123_s10 = sld [smem:[#allocation26_spill]] }
0x1812   : > { %14822 = vmatprep.subr.bf16.mxu0 %v18092_v39  ;;  %14824 = vmatprep.mubr.msk.bf16.mxu0 %vm15588_vm6, %v18092_v39 }
0x1815   : > { %8617 = vrot.lane.b32.xlu1 %v8604_v2, %s18106_s0  ;;  %14823 = vmatpush3.bf16.msra.mxu0 %v8426_v43  ;;  %v8938_v49 = vpop.permute.xlu0 %8937  ;;  %v9180_v43 = vld [vmem:[%s18116_s9 + $0x8] sm:$0xff]  ;;  %v15477_v2 = vld [vmem:[%s18121_s13 + $0x18] sm:$0xff]   ;;  %s18122_s9 = sld [smem:[#allocation25_spill]] }
0x1816   : > { %14836 = vmatprep.subr.bf16.mxu0 %v18092_v39 }
0x1818   : > { %14825 = vmatmul.mubr.msk.bf16.vlgmr.msra.gmra.mrb[92].mxu0 %vm2075_vm7, %v15469_v15 }
0x1819   : > { %8743 = vrot.lane.b32.xlu1 %v8731_v4, %s18108_s15  ;;  %14837 = vmatpush3.bf16.msra.mxu0 %v8552_v9  ;;  %v9064_v36 = vpop.permute.xlu0 %9063 }
0x181a   : > { %14838 = vmatprep.subr.bf16.mxu0 %v18092_v39  ;;  %14840 = vmatprep.mubr.msk.bf16.mxu0 %vm15588_vm6, %v18092_v39 }
0x181d   : > { %8745 = vrot.lane.b32.xlu1 %v8732_v41, %s18108_s15  ;;  %14839 = vmatpush3.bf16.msra.mxu0 %v8554_v10  ;;  %v9066_v53 = vpop.permute.xlu0 %9065 }
0x181e   : > { %14852 = vmatprep.subr.bf16.mxu0 %v18092_v39 }
0x1820   : > { %14841 = vmatmul.mubr.msk.bf16.vlgmr.msra.gmra.mrb[96].mxu0 %vm2075_vm7, %v15470_v57 }
0x1821   : > { %8871 = vrot.lane.b32.xlu1 %v8859_v12, %s18115_s5  ;;  %14853 = vmatpush3.bf16.msra.mxu0 %v8680_v14  ;;  %v8148_v12 = vpop.f32.mrb[96].mxu1 }
0x1822   : > { %14854 = vmatprep.subr.bf16.mxu0 %v18092_v39  ;;  %14856 = vmatprep.mubr.msk.bf16.mxu0 %vm15588_vm6, %v18092_v39 }
0x1825   : > { %8873 = vrot.lane.b32.xlu1 %v8860_v31, %s18115_s5  ;;  %14855 = vmatpush3.bf16.msra.mxu0 %v8682_v8  ;;  %v15478_v8 = vld [vmem:[%s18121_s13 + $0x20] sm:$0xff]  }
0x1826   : > { %14868 = vmatprep.subr.bf16.mxu0 %v18092_v39 }
0x1828   : > { %14857 = vmatmul.mubr.msk.bf16.vlgmr.msra.gmra.mrb[100].mxu0 %vm2075_vm7, %v15471_v56 }
0x1829   : > { %8999 = vrot.lane.b32.xlu1 %v8987_v16, %s18118_s11  ;;  %14869 = vmatpush3.bf16.msra.mxu0 %v8808_v55  ;;  %v15479_v55 = vld [vmem:[%s18121_s13 + $0x28] sm:$0xff]  }
0x182a   : > { %14870 = vmatprep.subr.bf16.mxu0 %v18092_v39  ;;  %14872 = vmatprep.mubr.msk.bf16.mxu0 %vm15588_vm6, %v18092_v39 }
0x182d   : > { %9001 = vrot.lane.b32.xlu1 %v8988_v24, %s18118_s11  ;;  %14871 = vmatpush3.bf16.msra.mxu0 %v8810_v7  ;;  %v14786_v7 = vpop.f32.mrb[97].mxu1  ;;  %v15480_v24 = vld [vmem:[%s18121_s13 + $0x30] sm:$0xff]  }
0x182e   : > { %14884 = vmatprep.subr.bf16.mxu0 %v18092_v39  ;;  %v8151_v56 = vpop.f32.mrb[98].mxu1 }
0x182f   : > { %v14787_v16 = vpop.f32.mrb[99].mxu1 }
0x1830   : > { %14873 = vmatmul.mubr.msk.bf16.vlgmr.msra.gmra.mrb[104].mxu0 %vm2075_vm7, %v15472_v22 }
0x1831   : > { %9127 = vrot.lane.b32.xlu1 %v9115_v48, %s18119_s12  ;;  %14885 = vmatpush3.bf16.msra.mxu0 %v8936_v54 }
0x1832   : > { %14886 = vmatprep.subr.bf16.mxu0 %v18092_v39  ;;  %14888 = vmatprep.mubr.msk.bf16.mxu0 %vm15588_vm6, %v18092_v39 }
0x1835   : > { %9129 = vrot.lane.b32.xlu1 %v9116_v46, %s18119_s12  ;;  %14887 = vmatpush3.bf16.msra.mxu0 %v8938_v49  ;;  %v15481_v49 = vld [vmem:[%s18121_s13 + $0x38] sm:$0xff]  }
0x1836   : > { %14900 = vmatprep.subr.bf16.mxu0 %v18092_v39 }
0x1838   : > { %14889 = vmatmul.mubr.msk.bf16.vlgmr.msra.gmra.mrb[108].mxu0 %vm2075_vm7, %v15473_v61 }
0x1839   : > { %9188 = vperm.xlu1 %15354, %v9180_v43   ;;  %14901 = vmatpush3.bf16.msra.mxu0 %v9064_v36  ;;  %v15483_v36 = vld [vmem:[%s18121_s13 + $0x40] sm:$0xff]   ;;  %s18162_s13 = sld [smem:[#allocation34_spill]] }
0x183a   : > { %14902 = vmatprep.subr.bf16.mxu0 %v18092_v39  ;;  %14904 = vmatprep.mubr.msk.bf16.mxu0 %vm15588_vm6, %v18092_v39 }
0x183d   : > { %14903 = vmatpush3.bf16.msra.mxu0 %v9066_v53 }
0x183e   : > { %14916 = vmatprep.subr.bf16.mxu0 %v18092_v39 }
0x1840   : > { %14905 = vmatmul.mubr.msk.bf16.vlgmr.msra.gmra.mrb[112].mxu0 %vm2075_vm7, %v15482_v6 }
0x1841   : > { %14918 = vmatprep.mubr.msk.bf16.mxu0 %vm15588_vm6, %v18092_v39 }
0x186b   : > { %v8232_v58 = vpop.permute.xlu1 %8231 }
0x186c   : > { %14797 = vmatpush3.bf16.msra.mxu1 %v8232_v58 }
0x186d   : > { %14798 = vmatprep.subr.bf16.mxu1 %v18092_v39 }
0x186f   : > { %v8234_v9 = vpop.permute.xlu1 %8233 }
0x1870   : > { %14799 = vmatpush3.bf16.msra.mxu1 %v8234_v9 }
0x1871   : > { %14812 = vmatprep.subr.bf16.mxu1 %v18092_v39 }
0x1873   : > { %14801 = vmatmul.mubr.msk.bf16.vlgmr.msra.gmra.mrb[100].mxu1 %vm2075_vm7, %v15475_v0  ;;  %v8360_v18 = vpop.permute.xlu1 %8359 }
0x1874   : > { %14813 = vmatpush3.bf16.msra.mxu1 %v8360_v18  ;;  %14816 = vmatprep.mubr.msk.bf16.mxu1 %vm15588_vm6, %v18092_v39 }
0x1875   : > { %14814 = vmatprep.subr.bf16.mxu1 %v18092_v39 }
0x1877   : > { %v8362_v10 = vpop.permute.xlu1 %8361 }
0x1878   : > { %14815 = vmatpush3.bf16.msra.mxu1 %v8362_v10 }
0x1879   : > { %14828 = vmatprep.subr.bf16.mxu1 %v18092_v39 }
0x187b   : > { %14817 = vmatmul.mubr.msk.bf16.vlgmr.msra.gmra.mrb[104].mxu1 %vm2075_vm7, %v15476_v1  ;;  %v8488_v34 = vpop.permute.xlu1 %8487 }
0x187c   : > { %14829 = vmatpush3.bf16.msra.mxu1 %v8488_v34  ;;  %14832 = vmatprep.mubr.msk.bf16.mxu1 %vm15588_vm6, %v18092_v39 }
0x187d   : > { %14830 = vmatprep.subr.bf16.mxu1 %v18092_v39 }
0x187f   : > { %v8490_v14 = vpop.permute.xlu1 %8489 }
0x1880   : > { %14831 = vmatpush3.bf16.msra.mxu1 %v8490_v14 }
0x1881   : > { %14844 = vmatprep.subr.bf16.mxu1 %v18092_v39 }
0x1883   : > { %14833 = vmatmul.mubr.msk.bf16.vlgmr.msra.gmra.mrb[108].mxu1 %vm2075_vm7, %v15477_v2  ;;  %v8616_v15 = vpop.permute.xlu1 %8615 }
0x1884   : > { %14845 = vmatpush3.bf16.msra.mxu1 %v8616_v15  ;;  %14848 = vmatprep.mubr.msk.bf16.mxu1 %vm15588_vm6, %v18092_v39 }
0x1885   : > { %14846 = vmatprep.subr.bf16.mxu1 %v18092_v39 }
0x1887   : > { %v8618_v4 = vpop.permute.xlu1 %8617 }
0x1888   : > { %14847 = vmatpush3.bf16.msra.mxu1 %v8618_v4 }
0x1889   : > { %14860 = vmatprep.subr.bf16.mxu1 %v18092_v39 }
0x188b   : > { %14849 = vmatmul.mubr.msk.bf16.vlgmr.msra.gmra.mrb[112].mxu1 %vm2075_vm7, %v15478_v8  ;;  %v8744_v41 = vpop.permute.xlu1 %8743 }
0x188c   : > { %14861 = vmatpush3.bf16.msra.mxu1 %v8744_v41  ;;  %14864 = vmatprep.mubr.msk.bf16.mxu1 %vm15588_vm6, %v18092_v39 }
0x188d   : > { %14862 = vmatprep.subr.bf16.mxu1 %v18092_v39 }
0x188f   : > { %v8746_v57 = vpop.permute.xlu1 %8745 }
0x1890   : > { %14863 = vmatpush3.bf16.msra.mxu1 %v8746_v57 }
0x1891   : > { %14876 = vmatprep.subr.bf16.mxu1 %v18092_v39 }
0x1893   : > { %14865 = vmatmul.mubr.msk.bf16.vlgmr.msra.gmra.mrb[116].mxu1 %vm2075_vm7, %v15479_v55  ;;  %v8872_v31 = vpop.permute.xlu1 %8871 }
0x1894   : > { %14877 = vmatpush3.bf16.msra.mxu1 %v8872_v31  ;;  %14880 = vmatprep.mubr.msk.bf16.mxu1 %vm15588_vm6, %v18092_v39 }
0x1895   : > { %14878 = vmatprep.subr.bf16.mxu1 %v18092_v39 }
0x1897   : > { %v8874_v54 = vpop.permute.xlu1 %8873 }
0x1898   : > { %14879 = vmatpush3.bf16.msra.mxu1 %v8874_v54 }
0x1899   : > { %14892 = vmatprep.subr.bf16.mxu1 %v18092_v39 }
0x189b   : > { %14881 = vmatmul.mubr.msk.bf16.vlgmr.msra.gmra.mrb[120].mxu1 %vm2075_vm7, %v15480_v24  ;;  %v9000_v22 = vpop.permute.xlu1 %8999 }
0x189c   : > { %14893 = vmatpush3.bf16.msra.mxu1 %v9000_v22  ;;  %14896 = vmatprep.mubr.msk.bf16.mxu1 %vm15588_vm6, %v18092_v39 }
0x189d   : > { %14894 = vmatprep.subr.bf16.mxu1 %v18092_v39 }
0x189f   : > { %v9002_v48 = vpop.permute.xlu1 %9001 }
0x18a0   : > { %14895 = vmatpush3.bf16.msra.mxu1 %v9002_v48 }
0x18a1   : > { %14908 = vmatprep.subr.bf16.mxu1 %v18092_v39 }
0x18a3   : > { %14897 = vmatmul.mubr.msk.bf16.vlgmr.msra.gmra.mrb[124].mxu1 %vm2075_vm7, %v15481_v49  ;;  %v9128_v46 = vpop.permute.xlu1 %9127 }
0x18a4   : > { %14909 = vmatpush3.bf16.msra.mxu1 %v9128_v46  ;;  %14912 = vmatprep.mubr.msk.bf16.mxu1 %vm15588_vm6, %v18092_v39 }
0x18a5   : > { %14910 = vmatprep.subr.bf16.mxu1 %v18092_v39 }
0x18a7   : > { %v9130_v61 = vpop.permute.xlu1 %9129 }
0x18a8   : > { %14911 = vmatpush3.bf16.msra.mxu1 %v9130_v61 }
0x18a9   : > { %14922 = vmatprep.subr.bf16.mxu1 %v18092_v39 }
0x18ab   : > { %14913 = vmatmul.mubr.msk.bf16.vlgmr.msra.gmra.mrb[128].mxu1 %vm2075_vm7, %v15483_v36 }
0x18ac   : > { %14924 = vmatprep.mubr.msk.bf16.mxu1 %vm15588_vm6, %v18092_v39 }
0x18d3   : > { %v8099_v43 = vpop.f32.mrb[80].mxu0 }
0x18d4   : > { %v14778_v53 = vpop.f32.mrb[81].mxu0  ;;  %v8149_v6 = vadd.f32 %v8148_v12, %v8099_v43 }
0x18d5   : > { %v8102_v58 = vpop.f32.mrb[82].mxu0 }
0x18d6   : > { %v14779_v9 = vpop.f32.mrb[83].mxu0  ;;  %v8152_v0 = vadd.f32 %v8151_v56, %v8102_v58 }
0x18db   : > { %v8210_v18 = vpop.f32.mrb[84].mxu0 }
0x18dc   : > { %v8217_v10 = vadd.f32 %v8210_v18, %v8149_v6  ;;  %v14794_v1 = vpop.f32.mrb[85].mxu0 }
0x18dd   : > { %v8213_v34 = vpop.f32.mrb[86].mxu0 }
0x18de   : > { %v8218_v14 = vadd.f32 %v8213_v34, %v8152_v0  ;;  %v14795_v2 = vpop.f32.mrb[87].mxu0 }
0x18e3   : > { %v8338_v15 = vpop.f32.mrb[88].mxu0 }
0x18e4   : > { %v14810_v4 = vpop.f32.mrb[89].mxu0 }
0x18e5   : > { %v8341_v8 = vpop.f32.mrb[90].mxu0 }
0x18e6   : > { %v14811_v41 = vpop.f32.mrb[91].mxu0 }
0x18eb   : > { %v8466_v57 = vpop.f32.mrb[92].mxu0 }
0x18ec   : > { %v14826_v55 = vpop.f32.mrb[93].mxu0 }
0x18ed   : > { %v8469_v31 = vpop.f32.mrb[94].mxu0 }
0x18ee   : > { %v14827_v7 = vpop.f32.mrb[95].mxu0 }
0x18f3   : > { %v8594_v16 = vpop.f32.mrb[96].mxu0 }
0x18f4   : > { %v14842_v54 = vpop.f32.mrb[97].mxu0 }
0x18f5   : > { %v8597_v12 = vpop.f32.mrb[98].mxu0 }
0x18f6   : > { %v14843_v24 = vpop.f32.mrb[99].mxu0 }
0x18fb   : > { %v8722_v22 = vpop.f32.mrb[100].mxu0 }
0x18fc   : > { %v14858_v56 = vpop.f32.mrb[101].mxu0 }
0x18fd   : > { %v8725_v48 = vpop.f32.mrb[102].mxu0 }
0x18fe   : > { %v14859_v49 = vpop.f32.mrb[103].mxu0 }
0x1903   : > { %v8850_v46 = vpop.f32.mrb[104].mxu0 }
0x1904   : > { %v14874_v61 = vpop.f32.mrb[105].mxu0 }
0x1905   : > { %v8853_v36 = vpop.f32.mrb[106].mxu0 }
0x1906   : > { %v14875_v43 = vpop.f32.mrb[107].mxu0 }
0x190b   : > { %v8978_v53 = vpop.f32.mrb[108].mxu0 }
0x190c   : > { %v14890_v6 = vpop.f32.mrb[109].mxu0 }
0x190d   : > { %v8981_v58 = vpop.f32.mrb[110].mxu0 }
0x190e   : > { %v14891_v9 = vpop.f32.mrb[111].mxu0 }
0x1913   : > { %v9106_v0 = vpop.f32.mrb[112].mxu0 }
0x1914   : > { %v14906_v18 = vpop.f32.mrb[113].mxu0 }
0x1915   : > { %v9109_v1 = vpop.f32.mrb[114].mxu0 }
0x1916   : > { %v14907_v34 = vpop.f32.mrb[115].mxu0 }
0x1946   : > { %v8274_v2 = vpop.f32.mrb[100].mxu1 }
0x1947   : > { %v8281_v4 = vadd.f32 %v8274_v2, %v8217_v10  ;;  %v14802_v41 = vpop.f32.mrb[101].mxu1 }
0x1948   : > { %v8277_v55 = vpop.f32.mrb[102].mxu1 }
0x1949   : > { %v8282_v7 = vadd.f32 %v8277_v55, %v8218_v14  ;;  %v8345_v54 = vadd.f32 %v8338_v15, %v8281_v4  ;;  %v14803_v24 = vpop.f32.mrb[103].mxu1 }
0x194b   : > { %v8346_v56 = vadd.f32 %v8341_v8, %v8282_v7 }
0x194e   : > { %v8402_v49 = vpop.f32.mrb[104].mxu1 }
0x194f   : > { %v8409_v61 = vadd.f32 %v8402_v49, %v8345_v54  ;;  %v14818_v42 = vpop.f32.mrb[105].mxu1 }
0x1950   : > { %v8405_v43 = vpop.f32.mrb[106].mxu1 }
0x1951   : > { %v8410_v5 = vadd.f32 %v8405_v43, %v8346_v56  ;;  %v8473_v6 = vadd.f32 %v8466_v57, %v8409_v61  ;;  %v14819_v38 = vpop.f32.mrb[107].mxu1 }
0x1953   : > { %v8474_v9 = vadd.f32 %v8469_v31, %v8410_v5 }
0x1956   : > { %v8530_v59 = vpop.f32.mrb[108].mxu1 }
0x1957   : > { %v8537_v18 = vadd.f32 %v8530_v59, %v8473_v6  ;;  %v14834_v37 = vpop.f32.mrb[109].mxu1 }
0x1958   : > { %v8533_v34 = vpop.f32.mrb[110].mxu1 }
0x1959   : > { %v8538_v60 = vadd.f32 %v8533_v34, %v8474_v9  ;;  %v8601_v10 = vadd.f32 %v8594_v16, %v8537_v18  ;;  %v14835_v2 = vpop.f32.mrb[111].mxu1 }
0x195b   : > { %v8602_v41 = vadd.f32 %v8597_v12, %v8538_v60 }
0x195e   : > { %v8658_v14 = vpop.f32.mrb[112].mxu1 }
0x195f   : > { %v8665_v15 = vadd.f32 %v8658_v14, %v8601_v10  ;;  %v14850_v4 = vpop.f32.mrb[113].mxu1 }
0x1960   : > { %v8661_v8 = vpop.f32.mrb[114].mxu1 }
0x1961   : > { %v8666_v55 = vadd.f32 %v8661_v8, %v8602_v41  ;;  %v8729_v7 = vadd.f32 %v8722_v22, %v8665_v15  ;;  %v14851_v42 = vpop.f32.mrb[115].mxu1 }
0x1963   : > { %v8730_v54 = vadd.f32 %v8725_v48, %v8666_v55 }
0x1966   : > { %v8786_v24 = vpop.f32.mrb[116].mxu1 }
0x1967   : > { %v8793_v57 = vadd.f32 %v8786_v24, %v8729_v7  ;;  %v14866_v38 = vpop.f32.mrb[117].mxu1 }
0x1968   : > { %v8789_v5 = vpop.f32.mrb[118].mxu1 }
0x1969   : > { %v8794_v31 = vadd.f32 %v8789_v5, %v8730_v54  ;;  %v8857_v59 = vadd.f32 %v8850_v46, %v8793_v57  ;;  %v14867_v37 = vpop.f32.mrb[119].mxu1 }
0x196a   : > { %v15484_v37 = vld [vmem:[%s18122_s9] sm:$0xff]  }
0x196b   : > { %v8858_v56 = vadd.f32 %v8853_v36, %v8794_v31  ;;  %v9184_v36 = vpop.permute.xlu0 %9183 }
0x196e   : > { %v8914_v49 = vpop.f32.mrb[120].mxu1 }
0x196f   : > { %v8921_v16 = vadd.f32 %v8914_v49, %v8857_v59  ;;  %v14882_v61 = vpop.f32.mrb[121].mxu1 }
0x1970   : > { %v8917_v60 = vpop.f32.mrb[122].mxu1  ;;  %v15486_v61 = vld [vmem:[%s18122_s9 + $0x18] sm:$0xff]  }
0x1971   : > { %v8922_v12 = vadd.f32 %v8917_v60, %v8858_v56  ;;  %v8985_v43 = vadd.f32 %v8978_v53, %v8921_v16  ;;  %v14883_v6 = vpop.f32.mrb[123].mxu1  ;;  %v9189_v53 = vpop.permute.xlu1 %9188  ;;  %v15485_v16 = vld [vmem:[%s18122_s9 + $0x8] sm:$0xff]   ;;  %v15487_v60 = vld [vmem:[%s18122_s9 + $0x10] sm:$0xff]  }
0x1973   : > { %v8986_v9 = vadd.f32 %v8981_v58, %v8922_v12 }
0x1976   : > { %v9042_v18 = vpop.f32.mrb[124].mxu1 }
0x1977   : > { %v9049_v22 = vadd.f32 %v9042_v18, %v8985_v43  ;;  %v14898_v34 = vpop.f32.mrb[125].mxu1  ;;  %v15488_v43 = vld [vmem:[%s18122_s9 + $0x28] sm:$0xff]  }
0x1978   : > { %v9045_v48 = vpop.f32.mrb[126].mxu1  ;;  %v15490_v34 = vld [vmem:[%s18122_s9 + $0x30] sm:$0xff]  }
0x1979   : > { %v9050_v10 = vadd.f32 %v9045_v48, %v8986_v9  ;;  %v9113_v2 = vadd.f32 %v9106_v0, %v9049_v22  ;;  %v14899_v41 = vpop.f32.mrb[127].mxu1  ;;  %v15489_v9 = vld [vmem:[%s18122_s9 + $0x20] sm:$0xff]   ;;  %v15491_v22 = vld [vmem:[%s18122_s9 + $0x38] sm:$0xff]  }
0x197b   : > { %v9114_v14 = vadd.f32 %v9109_v1, %v9050_v10 }
0x197e   : > { %v9170_v15 = vpop.f32.mrb[128].mxu1 }
0x197f   : > { %v9177_v46 = vadd.f32 %v9170_v15, %v9113_v2  ;;  %v14914_v4 = vpop.f32.mrb[129].mxu1  ;;  %v15492_v2 = vld [vmem:[%s18122_s9 + $0x40] sm:$0xff]   ;;  %s18128_s9 = smov 111  }
0x1980   : > { %v9173_v8 = vpop.f32.mrb[130].mxu1 }
0x1981   : > { %v9191_v55 = vadd.f32 %v9184_v36, %v9177_v46  ;;  %v9178_v7 = vadd.f32 %v9173_v8, %v9114_v14  ;;  %v14915_v42 = vpop.f32.mrb[131].mxu1 }
0x1983   : > { %v9192_v54 = vadd.f32 %v9189_v53, %v9178_v7  ;;  %v9193_v58 = vmax.f32 %v9191_v55, 0.0 }
0x1985   : > { %v9194_v24 = vmax.f32 %v9192_v54, 0.0 }
0x1987   : > { %v9195_v57 = vpack.c.bf16 %v9194_v24, %v9193_v58 }
0x1989   : > { %9197 = vrot.lane.b32.xlu0 %v9195_v57, %s18114_s7  ;;  %s18127_s7 = smov 112  }
0x19fb   : > { %v9198_v38 = vpop.permute.xlu0 %9197 }
0x19fc   : > { %v9200_v0 = vsel %vm4539_vm3, 0, %v9198_v38 }
0x19fd   : > { %v9201_v1 = vsel %vm4542_vm15, %v9200_v0, 0  ;;  %vm18166_vm15 = vcmask 900096  }
0x19fe   : > { %v9312_v5 = vmul.bf16 %v9201_v1, %v16509_v45  ;;  %v9206_v31 = vmul.bf16 %v9201_v1, %v16503_v50  ;;  %v9203_v59 = vmul.bf16 %v9201_v1, %v16535_v51  ;;  %v9430_v56 = vmul.bf16 %v9201_v1, %v16521_v3  ;;  %v9726_v51 = vld [vmem:[%s18123_s10 + $0x8] sm:$0xff]  ;;  %vm18167_vm3 = vmmov %vm18166_vm15 }
0x19ff   : > { %v9371_v49 = vmul.bf16 %v9201_v1, %v16514_v30  ;;  %v9548_v50 = vmul.bf16 %v9201_v1, %v16540_v35  ;;  %v9489_v45 = vmul.bf16 %v9201_v1, %v16528_v11  ;;  %v9666_v30 = vmul.bf16 %v9201_v1, %v16550_v26  ;;  %v9725_v35 = vld [vmem:[%s18123_s10] sm:$0xff]  ;;  %s18129_s10 = smov 110  }
0x1a00   : > { %9322 = vrot.lane.b32.xlu0 %v9312_v5, %s18104_s2  ;;  %9216 = vrot.lane.b32.xlu1 %v9206_v31, %s18110_s4  ;;  %v9607_v3 = vmul.bf16 %v9201_v1, %v16546_v44 }
0x1a01   : > { %14923 = vmatpush3.bf16.msra.mxu1 %v9203_v59 }
0x1a02   : > { %14934 = vmatprep.subr.bf16.mxu1 %v18092_v39 }
0x1a04   : > { %9440 = vrot.lane.b32.xlu0 %v9430_v56, %s18106_s0  ;;  %9381 = vrot.lane.b32.xlu1 %v9371_v49, %s18113_s6  ;;  %s18124_s6 = smov 9   ;;  %s18126_s0 = sld [smem:[#allocation9_spill]] }
0x1a05   : > { %14925 = vmatmul.mubr.msk.bf16.vlgmr.msra.gmra.mrb[132].mxu1 %vm1719_vm5, %v15484_v37 }
0x1a06   : > { %14936 = vmatprep.mubr.msk.bf16.mxu1 %vm15588_vm6, %v18092_v39 }
0x1a08   : > { %9558 = vrot.lane.b32.xlu0 %v9548_v50, %s18115_s5  ;;  %9499 = vrot.lane.b32.xlu1 %v9489_v45, %s18108_s15  ;;  %s18125_s15 = sld [smem:[#allocation29_spill]] }
0x1a0a   : > { %v15493_v0 = vld [vmem:[%s18126_s0] sm:$0xff]   ;;  %s18131_s0 = sld [smem:[#allocation28_spill]] }
0x1a0c   : > { %9676 = vrot.lane.b32.xlu0 %v9666_v30, %s18119_s12  ;;  %9617 = vrot.lane.b32.xlu1 %v9607_v3, %s18118_s11 }
0x1a0e   : > { %v10715_v54 = vld [vmem:[%s18125_s15] sm:$0xff]  ;;  %s18130_s15 = sld [smem:[#allocation27_spill]] }
0x1a10   : > { %9734 = vperm.xlu0 %15353, %v9726_v51   ;;  %9729 = vperm.xlu1 %15354, %v9725_v35  }
0x1a14   : > { %9796 = vrot.lane.b32.xlu1 %v16472_v23, %s18124_s6 }
0x1a72   : > { %v9217_v11 = vpop.permute.xlu1 %9216  ;;  %v9323_v26 = vpop.permute.xlu0 %9322 }
0x1a73   : > { %14917 = vmatpush3.bf16.msra.mxu0 %v9217_v11 }
0x1a74   : > { %14928 = vmatprep.subr.bf16.mxu0 %v18092_v39 }
0x1a76   : > { %14919 = vmatmul.mubr.msk.bf16.vlgmr.msra.gmra.mrb[116].mxu0 %vm1719_vm5, %v15485_v16  ;;  %v9382_v44 = vpop.permute.xlu1 %9381  ;;  %v9441_v12 = vpop.permute.xlu0 %9440 }
0x1a77   : > { %14929 = vmatpush3.bf16.msra.mxu0 %v9323_v26  ;;  %14935 = vmatpush3.bf16.msra.mxu1 %v9382_v44 }
0x1a78   : > { %14946 = vmatprep.subr.bf16.mxu1 %v18092_v39  ;;  %14930 = vmatprep.mubr.msk.bf16.mxu0 %vm15588_vm6, %v18092_v39 }
0x1a79   : > { %14940 = vmatprep.subr.bf16.mxu0 %v18092_v39 }
0x1a7a   : > { %v9500_v23 = vpop.permute.xlu1 %9499  ;;  %14937 = vmatmul.mubr.msk.bf16.vlgmr.msra.gmra.mrb[136].mxu1 %vm1719_vm5, %v15486_v61  ;;  %v9559_v18 = vpop.permute.xlu0 %9558 }
0x1a7b   : > { %14947 = vmatpush3.bf16.msra.mxu1 %v9500_v23  ;;  %14948 = vmatprep.mubr.msk.bf16.mxu1 %vm15588_vm6, %v18092_v39 }
0x1a7c   : > { %14958 = vmatprep.subr.bf16.mxu1 %v18092_v39 }
0x1a7e   : > { %14931 = vmatmul.mubr.msk.bf16.vlgmr.msra.gmra.mrb[120].mxu0 %vm1719_vm5, %v15487_v60  ;;  %v9618_v6 = vpop.permute.xlu1 %9617  ;;  %v9677_v48 = vpop.permute.xlu0 %9676 }
0x1a7f   : > { %14941 = vmatpush3.bf16.msra.mxu0 %v9441_v12  ;;  %14942 = vmatprep.mubr.msk.bf16.mxu0 %vm15588_vm6, %v18092_v39 }
0x1a80   : > { %14952 = vmatprep.subr.bf16.mxu0 %v18092_v39 }
0x1a82   : > { %14949 = vmatmul.mubr.msk.bf16.vlgmr.msra.gmra.mrb[140].mxu1 %vm1719_vm5, %v15488_v43 }
0x1a83   : > { %14959 = vmatpush3.bf16.msra.mxu1 %v9618_v6  ;;  %14960 = vmatprep.mubr.msk.bf16.mxu1 %vm15588_vm6, %v18092_v39 }
0x1a84   : > { %14970 = vmatprep.subr.bf16.mxu1 %v18092_v39 }
0x1a86   : > { %14943 = vmatmul.mubr.msk.bf16.vlgmr.msra.gmra.mrb[124].mxu0 %vm1719_vm5, %v15489_v9 }
0x1a87   : > { %14953 = vmatpush3.bf16.msra.mxu0 %v9559_v18  ;;  %14954 = vmatprep.mubr.msk.bf16.mxu0 %vm15588_vm6, %v18092_v39 }
0x1a88   : > { %14964 = vmatprep.subr.bf16.mxu0 %v18092_v39 }
0x1a8a   : > { %14961 = vmatmul.mubr.msk.bf16.vlgmr.msra.gmra.mrb[144].mxu1 %vm1719_vm5, %v15491_v22 }
0x1a8b   : > { %14972 = vmatprep.mubr.msk.bf16.mxu1 %vm15588_vm6, %v18092_v39  ;;  %14971 = vmatpush3.bf16.msra.mxu1 %v15493_v0 }
0x1a8c   : > { %14982 = vmatprep.subr.bf16.mxu1 %v18092_v39 }
0x1a8e   : > { %14955 = vmatmul.mubr.msk.bf16.vlgmr.msra.gmra.mrb[128].mxu0 %vm1719_vm5, %v15490_v34 }
0x1a8f   : > { %14965 = vmatpush3.bf16.msra.mxu0 %v9677_v48  ;;  %v17228_v10 = vpop.permute.xlu1 %9729  ;;  %14966 = vmatprep.mubr.msk.bf16.mxu0 %vm15588_vm6, %v18092_v39 }
0x1a90   : > { %14976 = vmatprep.subr.bf16.mxu0 %v18092_v39 }
0x1a93   : > { %v9797_v41 = vpop.permute.xlu1 %9796 }
0x1a94   : > { %v9799_v14 = vsel %vm3221_vm8, 0, %v9797_v41 }
0x1a95   : > { %v17236_v15 = vsel %vm3224_vm9, %v9799_v14, 0 }
0x1a96   : > { %14967 = vmatmul.mubr.msk.bf16.vlgmr.msra.gmra.mrb[132].mxu0 %vm1719_vm5, %v15492_v2  ;;  %v9899_v46 = vmul.bf16 %v17236_v15, %v16305_v62  ;;  %v10001_v4 = vmul.bf16 %v17236_v15, %v16316_v13  ;;  %v10103_v36 = vmul.bf16 %v17236_v15, %v16311_v63  ;;  %v10205_v8 = vmul.bf16 %v17236_v15, %v16324_v21 }
0x1a97   : > { %14978 = vmatprep.mubr.msk.bf16.mxu0 %vm15588_vm6, %v18092_v39  ;;  %v10307_v55 = vmul.bf16 %v17236_v15, %v16320_v19  ;;  %v10409_v7 = vmul.bf16 %v17236_v15, %v16332_v29  ;;  %v10511_v42 = vmul.bf16 %v17236_v15, %v16330_v27  ;;  %v10613_v53 = vmul.bf16 %v17236_v15, %v16338_v28 }
0x1a98   : > { %9903 = vrot.lane.b32.xlu1 %v9899_v46, %s18110_s4 }
0x1a9c   : > { %10005 = vrot.lane.b32.xlu1 %v10001_v4, %s18104_s2 }
0x1aa0   : > { %10107 = vrot.lane.b32.xlu1 %v10103_v36, %s18115_s5 }
0x1aa4   : > { %10209 = vrot.lane.b32.xlu1 %v10205_v8, %s18118_s11 }
0x1aa8   : > { %10311 = vrot.lane.b32.xlu1 %v10307_v55, %s18119_s12 }
0x1aac   : > { %10413 = vrot.lane.b32.xlu1 %v10409_v7, %s18127_s7 }
0x1ab0   : > { %10515 = vrot.lane.b32.xlu1 %v10511_v42, %s18128_s9 }
0x1ab4   : > { %10617 = vrot.lane.b32.xlu1 %v10613_v53, %s18129_s10 }
0x1ab8   : > { %10718 = vperm.xlu1 %15354, %v10715_v54  }
0x1ad8   : > { %v9305_v58 = vpop.f32.mrb[132].mxu1 }
0x1ad9   : > { %v14926_v24 = vpop.f32.mrb[133].mxu1 }
0x1ada   : > { %v9308_v57 = vpop.f32.mrb[134].mxu1 }
0x1adb   : > { %v14927_v38 = vpop.f32.mrb[135].mxu1 }
0x1b49   : > { %v9256_v1 = vpop.f32.mrb[116].mxu0 }
0x1b4a   : > { %v14920_v5 = vpop.f32.mrb[117].mxu0  ;;  %v9306_v31 = vadd.f32 %v9305_v58, %v9256_v1 }
0x1b4b   : > { %v9259_v59 = vpop.f32.mrb[118].mxu0 }
0x1b4c   : > { %v14921_v37 = vpop.f32.mrb[119].mxu0  ;;  %v9309_v56 = vadd.f32 %v9308_v57, %v9259_v59 }
0x1b4d   : > { %v9421_v49 = vpop.f32.mrb[136].mxu1  ;;  %v9735_v37 = vpop.permute.xlu0 %9734 }
0x1b4e   : > { %v14938_v50 = vpop.f32.mrb[137].mxu1 }
0x1b4f   : > { %v9424_v45 = vpop.f32.mrb[138].mxu1 }
0x1b50   : > { %v14939_v30 = vpop.f32.mrb[139].mxu1 }
0x1b51   : > { %v9362_v3 = vpop.f32.mrb[120].mxu0  ;;  %v9809_v30 = vmul.bf16 %v17236_v15, %v16347_v40 }
0x1b52   : > { %v9369_v51 = vadd.f32 %v9362_v3, %v9306_v31  ;;  %v14932_v35 = vpop.f32.mrb[121].mxu0 }
0x1b53   : > { %v9365_v11 = vpop.f32.mrb[122].mxu0 }
0x1b54   : > { %v9370_v16 = vadd.f32 %v9365_v11, %v9309_v56  ;;  %v9428_v26 = vadd.f32 %v9421_v49, %v9369_v51  ;;  %v14933_v44 = vpop.f32.mrb[123].mxu0 }
0x1b55   : > { %v9539_v61 = vpop.f32.mrb[140].mxu1 }
0x1b56   : > { %v9429_v23 = vadd.f32 %v9424_v45, %v9370_v16  ;;  %v14950_v60 = vpop.f32.mrb[141].mxu1  ;;  %v9810_v16 = vld [vmem:[%s18130_s15] sm:$0xf] }
0x1b57   : > { %v9542_v12 = vpop.f32.mrb[142].mxu1  ;;  %v9812_v60 = vld [vmem:[%s18131_s0] sm:$0xf] }
0x1b58   : > { %v14951_v43 = vpop.f32.mrb[143].mxu1 }
0x1b59   : > { %v9480_v6 = vpop.f32.mrb[124].mxu0  ;;  %v9904_v43 = vpop.permute.xlu1 %9903 }
0x1b5a   : > { %v9487_v9 = vadd.f32 %v9480_v6, %v9428_v26  ;;  %v14944_v18 = vpop.f32.mrb[125].mxu0 }
0x1b5b   : > { %v9483_v22 = vpop.f32.mrb[126].mxu0 }
0x1b5c   : > { %v9488_v34 = vadd.f32 %v9483_v22, %v9429_v23  ;;  %v9546_v48 = vadd.f32 %v9539_v61, %v9487_v9  ;;  %v14945_v2 = vpop.f32.mrb[127].mxu0  ;;  %v13897_v9 = vld [vmem:[%s18130_s15 + $0x4] sm:$0xf] }
0x1b5d   : > { %v9657_v41 = vpop.f32.mrb[144].mxu1  ;;  %v10006_v22 = vpop.permute.xlu1 %10005 }
0x1b5e   : > { %v9547_v14 = vadd.f32 %v9542_v12, %v9488_v34  ;;  %v14962_v46 = vpop.f32.mrb[145].mxu1 }
0x1b5f   : > { %v9660_v4 = vpop.f32.mrb[146].mxu1  ;;  %v13905_v46 = vld [vmem:[%s18130_s15 + $0xc] sm:$0xf] }
0x1b60   : > { %v14963_v36 = vpop.f32.mrb[147].mxu1 }
0x1b61   : > { %v9598_v8 = vpop.f32.mrb[128].mxu0 }
0x1b62   : > { %v9605_v55 = vadd.f32 %v9598_v8, %v9546_v48  ;;  %v14956_v7 = vpop.f32.mrb[129].mxu0  ;;  %v13901_v48 = vld [vmem:[%s18130_s15 + $0x8] sm:$0xf]  ;;  %v13909_v8 = vld [vmem:[%s18130_s15 + $0x10] sm:$0xf] }
0x1b63   : > { %v9601_v42 = vpop.f32.mrb[130].mxu0  ;;  %v13913_v7 = vld [vmem:[%s18130_s15 + $0x14] sm:$0xf] }
0x1b64   : > { %v9606_v53 = vadd.f32 %v9601_v42, %v9547_v14  ;;  %v9664_v54 = vadd.f32 %v9657_v41, %v9605_v55  ;;  %v14957_v58 = vpop.f32.mrb[131].mxu0  ;;  %v10108_v41 = vpop.permute.xlu1 %10107 }
0x1b65   : > { %v13921_v58 = vld [vmem:[%s18130_s15 + $0x1c] sm:$0xf] }
0x1b66   : > { %v9665_v24 = vadd.f32 %v9660_v4, %v9606_v53  ;;  %v13917_v53 = vld [vmem:[%s18130_s15 + $0x18] sm:$0xf] }
0x1b68   : > { %v10210_v36 = vpop.permute.xlu1 %10209 }
0x1b69   : > { %v9716_v57 = vpop.f32.mrb[132].mxu0 }
0x1b6a   : > { %v9723_v38 = vadd.f32 %v9716_v57, %v9664_v54  ;;  %v14968_v0 = vpop.f32.mrb[133].mxu0  ;;  %v13925_v57 = vld [vmem:[%s18130_s15 + $0x20] sm:$0xf] }
0x1b6b   : > { %v9719_v1 = vpop.f32.mrb[134].mxu0  ;;  %v13899_v0 = vld [vmem:[%s18131_s0 + $0x4] sm:$0xf] }
0x1b6c   : > { %v9737_v5 = vadd.f32 %v17228_v10, %v9723_v38  ;;  %v9724_v31 = vadd.f32 %v9719_v1, %v9665_v24  ;;  %v14969_v59 = vpop.f32.mrb[135].mxu0  ;;  %v10312_v55 = vpop.permute.xlu1 %10311 }
0x1b6d   : > { %v13907_v59 = vld [vmem:[%s18131_s0 + $0xc] sm:$0xf] }
0x1b6e   : > { %v9738_v56 = vadd.f32 %v9735_v37, %v9724_v31  ;;  %v9739_v49 = vmax.f32 %v9737_v5, 0.0  ;;  %v13903_v5 = vld [vmem:[%s18131_s0 + $0x8] sm:$0xf] }
0x1b70   : > { %v9740_v50 = vmax.f32 %v9738_v56, 0.0  ;;  %v10414_v42 = vpop.permute.xlu1 %10413  ;;  %v13911_v56 = vld [vmem:[%s18131_s0 + $0x10] sm:$0xf] }
0x1b72   : > { %v9741_v45 = vpack.c.bf16 %v9740_v50, %v9739_v49 }
0x1b74   : > { %14973 = vmatmul.mubr.msk.bf16.vlgmr.msra.gmra.mrb[148].mxu1 %vm1719_vm5, %v9741_v45  ;;  %v10516_v54 = vpop.permute.xlu1 %10515 }
0x1b75   : > { %14983 = vmatpush3.bf16.msra.mxu1 %v9809_v30  ;;  %14984 = vmatprep.mubr.msk.bf16.mxu1 %vm15588_vm6, %v18092_v39 }
0x1b76   : > { %14994 = vmatprep.subr.bf16.mxu1 %v18092_v39 }
0x1b78   : > { %v10618_v24 = vpop.permute.xlu1 %10617 }
0x1b7c   : > { %14985 = vmatmul.mubr.msk.bf16.vlgmr.msra.gmra.mrb[152].mxu1 %vm1719_vm5, %v9810_v16  ;;  %v13923_v16 = vld [vmem:[%s18131_s0 + $0x1c] sm:$0xf] }
0x1b7d   : > { %14996 = vmatprep.mubr.msk.bf16.mxu1 %vm15588_vm6, %v18092_v39 }
0x1c47   : > { %v9787_v10 = vpop.f32.mrb[148].mxu1 }
0x1c48   : > { %v14974_v3 = vpop.f32.mrb[149].mxu1 }
0x1c49   : > { %v9790_v51 = vpop.f32.mrb[150].mxu1 }
0x1c4a   : > { %v9794_v35 = vpack.c.bf16 %v9790_v51, %v9787_v10  ;;  %v14975_v11 = vpop.f32.mrb[151].mxu1  ;;  %v13915_v10 = vld [vmem:[%s18131_s0 + $0x14] sm:$0xf] }
0x1c4c   : > { %9803 = vrot.lane.b32.xlu0 %v9794_v35, %s18124_s6  ;;  %v13919_v35 = vld [vmem:[%s18131_s0 + $0x18] sm:$0xf] }
0x1c4f   : > { %v9893_v50 = vpop.f32.mrb[152].mxu1 }
0x1c50   : > { %v14986_v45 = vpop.f32.mrb[153].mxu1 }
0x1c51   : > { %v9896_v30 = vpop.f32.mrb[154].mxu1 }
0x1c52   : > { %v14987_v3 = vpop.f32.mrb[155].mxu1 }
0x1cbe   : > { %v9804_v15 = vpop.permute.xlu0 %9803 }
0x1cbf   : > { %v9806_v26 = vsel %vm3221_vm8, 0, %v9804_v15 }
0x1cc0   : > { %v9807_v44 = vsel %vm3224_vm9, %v9806_v26, 0  ;;  %v13927_v26 = vld [vmem:[%s18131_s0 + $0x20] sm:$0xf]  ;;  %s18132_s0 = sld [smem:[#allocation30_spill]] }
0x1cc1   : > { %v9950_v61 = vmul.bf16 %v9807_v44, %v16305_v62  ;;  %v9811_v23 = vmul.bf16 %v9807_v44, %v16347_v40  ;;  %v10052_v12 = vmul.bf16 %v9807_v44, %v16316_v13  ;;  %v10154_v6 = vmul.bf16 %v9807_v44, %v16311_v63 }
0x1cc2   : > { %v10256_v18 = vmul.bf16 %v9807_v44, %v16324_v21  ;;  %v10358_v34 = vmul.bf16 %v9807_v44, %v16320_v19  ;;  %v10460_v2 = vmul.bf16 %v9807_v44, %v16332_v29  ;;  %v10562_v14 = vmul.bf16 %v9807_v44, %v16330_v27 }
0x1cc3   : > { %9954 = vrot.lane.b32.xlu0 %v9950_v61, %s18110_s4  ;;  %14977 = vmatpush3.bf16.msra.mxu0 %v9811_v23  ;;  %v10664_v4 = vmul.bf16 %v9807_v44, %v16338_v28 }
0x1cc4   : > { %14988 = vmatprep.subr.bf16.mxu0 %v18092_v39 }
0x1cc6   : > { %14979 = vmatmul.mubr.msk.bf16.vlgmr.msra.gmra.mrb[136].mxu0 %vm1719_vm5, %v9812_v60 }
0x1cc7   : > { %10056 = vrot.lane.b32.xlu0 %v10052_v12, %s18104_s2  ;;  %14989 = vmatpush3.bf16.msra.mxu0 %v9904_v43 }
0x1cc8   : > { %14990 = vmatprep.mubr.msk.bf16.mxu0 %vm15588_vm6, %v18092_v39  ;;  %15000 = vmatprep.subr.bf16.mxu0 %v18092_v39 }
0x1ccb   : > { %10158 = vrot.lane.b32.xlu0 %v10154_v6, %s18115_s5 }
0x1cce   : > { %14991 = vmatmul.mubr.msk.bf16.vlgmr.msra.gmra.mrb[140].mxu0 %vm1719_vm5, %v13897_v9 }
0x1ccf   : > { %15001 = vmatpush3.bf16.msra.mxu0 %v10006_v22  ;;  %10260 = vrot.lane.b32.xlu0 %v10256_v18, %s18118_s11 }
0x1cd0   : > { %15002 = vmatprep.mubr.msk.bf16.mxu0 %vm15588_vm6, %v18092_v39  ;;  %15012 = vmatprep.subr.bf16.mxu0 %v18092_v39 }
0x1cd3   : > { %10362 = vrot.lane.b32.xlu0 %v10358_v34, %s18119_s12 }
0x1cd6   : > { %15003 = vmatmul.mubr.msk.bf16.vlgmr.msra.gmra.mrb[144].mxu0 %vm1719_vm5, %v13901_v48 }
0x1cd7   : > { %15013 = vmatpush3.bf16.msra.mxu0 %v10108_v41  ;;  %10464 = vrot.lane.b32.xlu0 %v10460_v2, %s18127_s7 }
0x1cd8   : > { %15014 = vmatprep.mubr.msk.bf16.mxu0 %vm15588_vm6, %v18092_v39  ;;  %15024 = vmatprep.subr.bf16.mxu0 %v18092_v39 }
0x1cdb   : > { %10566 = vrot.lane.b32.xlu0 %v10562_v14, %s18128_s9 }
0x1cde   : > { %15015 = vmatmul.mubr.msk.bf16.vlgmr.msra.gmra.mrb[148].mxu0 %vm1719_vm5, %v13905_v46 }
0x1cdf   : > { %15025 = vmatpush3.bf16.msra.mxu0 %v10210_v36  ;;  %10668 = vrot.lane.b32.xlu0 %v10664_v4, %s18129_s10 }
0x1ce0   : > { %15026 = vmatprep.mubr.msk.bf16.mxu0 %vm15588_vm6, %v18092_v39  ;;  %15036 = vmatprep.subr.bf16.mxu0 %v18092_v39 }
0x1ce6   : > { %15027 = vmatmul.mubr.msk.bf16.vlgmr.msra.gmra.mrb[152].mxu0 %vm1719_vm5, %v13909_v8 }
0x1ce7   : > { %15037 = vmatpush3.bf16.msra.mxu0 %v10312_v55  ;;  %15038 = vmatprep.mubr.msk.bf16.mxu0 %vm15588_vm6, %v18092_v39 }
0x1ce8   : > { %15048 = vmatprep.subr.bf16.mxu0 %v18092_v39 }
0x1cee   : > { %15039 = vmatmul.mubr.msk.bf16.vlgmr.msra.gmra.mrb[156].mxu0 %vm1719_vm5, %v13913_v7 }
0x1cef   : > { %15049 = vmatpush3.bf16.msra.mxu0 %v10414_v42  ;;  %15050 = vmatprep.mubr.msk.bf16.mxu0 %vm15588_vm6, %v18092_v39 }
0x1cf0   : > { %15060 = vmatprep.subr.bf16.mxu0 %v18092_v39 }
0x1cf6   : > { %15051 = vmatmul.mubr.msk.bf16.vlgmr.msra.gmra.mrb[160].mxu0 %vm1719_vm5, %v13917_v53 }
0x1cf7   : > { %15061 = vmatpush3.bf16.msra.mxu0 %v10516_v54  ;;  %15062 = vmatprep.mubr.msk.bf16.mxu0 %vm15588_vm6, %v18092_v39 }
0x1cf8   : > { %15072 = vmatprep.subr.bf16.mxu0 %v18092_v39 }
0x1cfe   : > { %15063 = vmatmul.mubr.msk.bf16.vlgmr.msra.gmra.mrb[164].mxu0 %vm1719_vm5, %v13921_v58 }
0x1cff   : > { %15073 = vmatpush3.bf16.msra.mxu0 %v10618_v24  ;;  %15074 = vmatprep.mubr.msk.bf16.mxu0 %vm15588_vm6, %v18092_v39 }
0x1d00   : > { %15084 = vmatprep.subr.bf16.mxu0 %v18092_v39 }
0x1d06   : > { %15075 = vmatmul.mubr.msk.bf16.vlgmr.msra.gmra.mrb[168].mxu0 %vm1719_vm5, %v13925_v57 }
0x1d07   : > { %15086 = vmatprep.mubr.msk.bf16.mxu0 %vm15588_vm6, %v18092_v39 }
0x1d35   : > { %v9955_v38 = vpop.permute.xlu0 %9954 }
0x1d36   : > { %14995 = vmatpush3.bf16.msra.mxu1 %v9955_v38 }
0x1d37   : > { %15006 = vmatprep.subr.bf16.mxu1 %v18092_v39 }
0x1d39   : > { %14997 = vmatmul.mubr.msk.bf16.vlgmr.msra.gmra.mrb[156].mxu1 %vm1719_vm5, %v13899_v0  ;;  %v10057_v1 = vpop.permute.xlu0 %10056 }
0x1d3a   : > { %15007 = vmatpush3.bf16.msra.mxu1 %v10057_v1  ;;  %15008 = vmatprep.mubr.msk.bf16.mxu1 %vm15588_vm6, %v18092_v39 }
0x1d3b   : > { %15018 = vmatprep.subr.bf16.mxu1 %v18092_v39 }
0x1d3d   : > { %v10159_v31 = vpop.permute.xlu0 %10158 }
0x1d41   : > { %15009 = vmatmul.mubr.msk.bf16.vlgmr.msra.gmra.mrb[160].mxu1 %vm1719_vm5, %v13903_v5  ;;  %v10261_v37 = vpop.permute.xlu0 %10260 }
0x1d42   : > { %15019 = vmatpush3.bf16.msra.mxu1 %v10159_v31  ;;  %15020 = vmatprep.mubr.msk.bf16.mxu1 %vm15588_vm6, %v18092_v39 }
0x1d43   : > { %15030 = vmatprep.subr.bf16.mxu1 %v18092_v39 }
0x1d45   : > { %v10363_v49 = vpop.permute.xlu0 %10362 }
0x1d49   : > { %15021 = vmatmul.mubr.msk.bf16.vlgmr.msra.gmra.mrb[164].mxu1 %vm1719_vm5, %v13907_v59  ;;  %v10465_v51 = vpop.permute.xlu0 %10464 }
0x1d4a   : > { %15031 = vmatpush3.bf16.msra.mxu1 %v10261_v37  ;;  %15032 = vmatprep.mubr.msk.bf16.mxu1 %vm15588_vm6, %v18092_v39 }
0x1d4b   : > { %15042 = vmatprep.subr.bf16.mxu1 %v18092_v39 }
0x1d4d   : > { %v10567_v11 = vpop.permute.xlu0 %10566 }
0x1d51   : > { %15033 = vmatmul.mubr.msk.bf16.vlgmr.msra.gmra.mrb[168].mxu1 %vm1719_vm5, %v13911_v56  ;;  %v10669_v15 = vpop.permute.xlu0 %10668 }
0x1d52   : > { %15043 = vmatpush3.bf16.msra.mxu1 %v10363_v49  ;;  %15044 = vmatprep.mubr.msk.bf16.mxu1 %vm15588_vm6, %v18092_v39 }
0x1d53   : > { %15054 = vmatprep.subr.bf16.mxu1 %v18092_v39 }
0x1d59   : > { %15045 = vmatmul.mubr.msk.bf16.vlgmr.msra.gmra.mrb[172].mxu1 %vm1719_vm5, %v13915_v10 }
0x1d5a   : > { %15055 = vmatpush3.bf16.msra.mxu1 %v10465_v51  ;;  %15056 = vmatprep.mubr.msk.bf16.mxu1 %vm15588_vm6, %v18092_v39 }
0x1d5b   : > { %15066 = vmatprep.subr.bf16.mxu1 %v18092_v39 }
0x1d61   : > { %15057 = vmatmul.mubr.msk.bf16.vlgmr.msra.gmra.mrb[176].mxu1 %vm1719_vm5, %v13919_v35 }
0x1d62   : > { %15067 = vmatpush3.bf16.msra.mxu1 %v10567_v11  ;;  %15068 = vmatprep.mubr.msk.bf16.mxu1 %vm15588_vm6, %v18092_v39 }
0x1d63   : > { %15078 = vmatprep.subr.bf16.mxu1 %v18092_v39 }
0x1d69   : > { %15069 = vmatmul.mubr.msk.bf16.vlgmr.msra.gmra.mrb[180].mxu1 %vm1719_vm5, %v13923_v16 }
0x1d6a   : > { %15079 = vmatpush3.bf16.msra.mxu1 %v10669_v15  ;;  %15080 = vmatprep.mubr.msk.bf16.mxu1 %vm15588_vm6, %v18092_v39 }
0x1d6b   : > { %15090 = vmatprep.subr.bf16.mxu1 %v18092_v39 }
0x1d71   : > { %15081 = vmatmul.mubr.msk.bf16.vlgmr.msra.gmra.mrb[184].mxu1 %vm1719_vm5, %v13927_v26  ;;  %vm18155_vm5 = vcmask 908288  }
0x1d72   : > { %15092 = vmatprep.mubr.msk.bf16.mxu1 %vm15588_vm6, %v18092_v39  ;;  %vm18157_vm7 = vmmov %vm18155_vm5 }
0x1d99   : > { %v9850_v44 = vpop.f32.mrb[136].mxu0 }
0x1d9a   : > { %v14980_v61 = vpop.f32.mrb[137].mxu0  ;;  %v9894_v23 = vadd.f32 %v9893_v50, %v9850_v44 }
0x1d9b   : > { %v9853_v60 = vpop.f32.mrb[138].mxu0 }
0x1d9c   : > { %v14981_v12 = vpop.f32.mrb[139].mxu0 }
0x1da1   : > { %v9943_v43 = vpop.f32.mrb[140].mxu0 }
0x1da2   : > { %v9949_v6 = vadd.f32 %v9943_v43, %v9894_v23  ;;  %v14992_v9 = vpop.f32.mrb[141].mxu0 }
0x1da3   : > { %v9946_v18 = vpop.f32.mrb[142].mxu0 }
0x1da4   : > { %v14993_v22 = vpop.f32.mrb[143].mxu0 }
0x1da9   : > { %v10045_v34 = vpop.f32.mrb[144].mxu0 }
0x1daa   : > { %v15004_v48 = vpop.f32.mrb[145].mxu0 }
0x1dab   : > { %v10048_v2 = vpop.f32.mrb[146].mxu0 }
0x1dac   : > { %v15005_v41 = vpop.f32.mrb[147].mxu0 }
0x1db1   : > { %v10147_v14 = vpop.f32.mrb[148].mxu0 }
0x1db2   : > { %v15016_v46 = vpop.f32.mrb[149].mxu0 }
0x1db3   : > { %v10150_v4 = vpop.f32.mrb[150].mxu0 }
0x1db4   : > { %v15017_v36 = vpop.f32.mrb[151].mxu0 }
0x1db9   : > { %v10249_v8 = vpop.f32.mrb[152].mxu0 }
0x1dba   : > { %v15028_v55 = vpop.f32.mrb[153].mxu0 }
0x1dbb   : > { %v10252_v7 = vpop.f32.mrb[154].mxu0 }
0x1dbc   : > { %v15029_v42 = vpop.f32.mrb[155].mxu0 }
0x1dc1   : > { %v10351_v53 = vpop.f32.mrb[156].mxu0 }
0x1dc2   : > { %v15040_v54 = vpop.f32.mrb[157].mxu0 }
0x1dc3   : > { %v10354_v58 = vpop.f32.mrb[158].mxu0 }
0x1dc4   : > { %v15041_v24 = vpop.f32.mrb[159].mxu0 }
0x1dc9   : > { %v10453_v57 = vpop.f32.mrb[160].mxu0 }
0x1dca   : > { %v15052_v38 = vpop.f32.mrb[161].mxu0 }
0x1dcb   : > { %v10456_v0 = vpop.f32.mrb[162].mxu0 }
0x1dcc   : > { %v15053_v1 = vpop.f32.mrb[163].mxu0 }
0x1dd1   : > { %v10555_v5 = vpop.f32.mrb[164].mxu0 }
0x1dd2   : > { %v15064_v31 = vpop.f32.mrb[165].mxu0 }
0x1dd3   : > { %v10558_v59 = vpop.f32.mrb[166].mxu0 }
0x1dd4   : > { %v15065_v37 = vpop.f32.mrb[167].mxu0 }
0x1dd9   : > { %v10657_v56 = vpop.f32.mrb[168].mxu0 }
0x1dda   : > { %v15076_v49 = vpop.f32.mrb[169].mxu0 }
0x1ddb   : > { %v10660_v50 = vpop.f32.mrb[170].mxu0 }
0x1ddc   : > { %v15077_v45 = vpop.f32.mrb[171].mxu0 }
0x1e0c   : > { %v9994_v30 = vpop.f32.mrb[156].mxu1 }
0x1e0d   : > { %v10000_v10 = vadd.f32 %v9994_v30, %v9949_v6  ;;  %v14998_v3 = vpop.f32.mrb[157].mxu1 }
0x1e0e   : > { %v9997_v51 = vpop.f32.mrb[158].mxu1 }
0x1e0f   : > { %v10051_v35 = vadd.f32 %v10045_v34, %v10000_v10  ;;  %v14999_v11 = vpop.f32.mrb[159].mxu1  ;;  %v10719_v10 = vpop.permute.xlu1 %10718 }
0x1e14   : > { %v10096_v16 = vpop.f32.mrb[160].mxu1 }
0x1e15   : > { %v10102_v15 = vadd.f32 %v10096_v16, %v10051_v35  ;;  %v15010_v26 = vpop.f32.mrb[161].mxu1 }
0x1e16   : > { %v10099_v44 = vpop.f32.mrb[162].mxu1 }
0x1e17   : > { %v10153_v61 = vadd.f32 %v10147_v14, %v10102_v15  ;;  %v15011_v23 = vpop.f32.mrb[163].mxu1 }
0x1e1c   : > { %v10198_v60 = vpop.f32.mrb[164].mxu1 }
0x1e1d   : > { %v10204_v12 = vadd.f32 %v10198_v60, %v10153_v61  ;;  %v15022_v43 = vpop.f32.mrb[165].mxu1 }
0x1e1e   : > { %v10201_v9 = vpop.f32.mrb[166].mxu1 }
0x1e1f   : > { %v10255_v18 = vadd.f32 %v10249_v8, %v10204_v12  ;;  %v15023_v22 = vpop.f32.mrb[167].mxu1  ;;  %v10732_v12 = vld [vmem:[%s18132_s0] sm:$0xf] }
0x1e24   : > { %v10300_v48 = vpop.f32.mrb[168].mxu1 }
0x1e25   : > { %v10306_v2 = vadd.f32 %v10300_v48, %v10255_v18  ;;  %v15034_v41 = vpop.f32.mrb[169].mxu1 }
0x1e26   : > { %v10303_v6 = vpop.f32.mrb[170].mxu1 }
0x1e27   : > { %v10357_v46 = vadd.f32 %v10351_v53, %v10306_v2  ;;  %v15035_v4 = vpop.f32.mrb[171].mxu1  ;;  %v13932_v2 = vld [vmem:[%s18132_s0 + $0x8] sm:$0xf] }
0x1e2c   : > { %v10402_v34 = vpop.f32.mrb[172].mxu1 }
0x1e2d   : > { %v10408_v36 = vadd.f32 %v10402_v34, %v10357_v46  ;;  %v15046_v55 = vpop.f32.mrb[173].mxu1  ;;  %v13938_v46 = vld [vmem:[%s18132_s0 + $0x14] sm:$0xf] }
0x1e2e   : > { %v10405_v7 = vpop.f32.mrb[174].mxu1 }
0x1e2f   : > { %v10459_v42 = vadd.f32 %v10453_v57, %v10408_v36  ;;  %v15047_v54 = vpop.f32.mrb[175].mxu1  ;;  %v13936_v36 = vld [vmem:[%s18132_s0 + $0x10] sm:$0xf]  ;;  %v13942_v7 = vld [vmem:[%s18132_s0 + $0x1c] sm:$0xf] }
0x1e30   : > { %v13940_v54 = vld [vmem:[%s18132_s0 + $0x18] sm:$0xf] }
0x1e34   : > { %v10504_v14 = vpop.f32.mrb[176].mxu1 }
0x1e35   : > { %v10510_v58 = vadd.f32 %v10504_v14, %v10459_v42  ;;  %v15058_v24 = vpop.f32.mrb[177].mxu1  ;;  %v18136_v14 = vmov 0  }
0x1e36   : > { %v10507_v38 = vpop.f32.mrb[178].mxu1  ;;  %v13944_v24 = vld [vmem:[%s18132_s0 + $0x20] sm:$0xf] }
0x1e37   : > { %v10561_v0 = vadd.f32 %v10555_v5, %v10510_v58  ;;  %v15059_v1 = vpop.f32.mrb[179].mxu1 }
0x1e3c   : > { %v10606_v8 = vpop.f32.mrb[180].mxu1 }
0x1e3d   : > { %v10612_v31 = vadd.f32 %v10606_v8, %v10561_v0  ;;  %v15070_v59 = vpop.f32.mrb[181].mxu1 }
0x1e3e   : > { %v10609_v37 = vpop.f32.mrb[182].mxu1 }
0x1e3f   : > { %v10663_v49 = vadd.f32 %v10657_v56, %v10612_v31  ;;  %v15071_v50 = vpop.f32.mrb[183].mxu1 }
0x1e44   : > { %v10708_v53 = vpop.f32.mrb[184].mxu1 }
0x1e45   : > { %v10714_v45 = vadd.f32 %v10708_v53, %v10663_v49  ;;  %v15082_v30 = vpop.f32.mrb[185].mxu1 }
0x1e46   : > { %v10711_v3 = vpop.f32.mrb[186].mxu1 }
0x1e47   : > { %v10721_v51 = vadd.f32 %v10719_v10, %v10714_v45  ;;  %v15083_v57 = vpop.f32.mrb[187].mxu1 }
0x1e49   : > { %v10722_v35 = vmax.f32 %v10721_v51, 0.0 }
0x1e4b   : > { %v10723_v11 = vpack.c.bf16 %v10722_v35, %v10722_v35 }
0x1e4d   : > { %10725 = vrot.lane.b32.xlu0 %v10723_v11, %s18124_s6  ;;  %s18133_s6 = sld [smem:[#allocation31_spill]] }
0x1ebf   : > { %v10726_v5 = vpop.permute.xlu0 %10725 }
0x1ec0   : > { %v10728_v16 = vsel %vm3221_vm8, 0, %v10726_v5  ;;  %vm18170_vm8 = vmmov %vm18155_vm5 }
0x1ec1   : > { %v10729_v15 = vsel %vm3224_vm9, %v10728_v16, 0  ;;  %vm18171_vm9 = vmmov %vm18155_vm5 }
0x1ec2   : > { %v10831_v56 = vmul.bf16 %v10729_v15, %v16316_v13  ;;  %v10733_v26 = vmul.bf16 %v10729_v15, %v16305_v62  ;;  %v10731_v44 = vmul.bf16 %v10729_v15, %v16347_v40  ;;  %v10937_v23 = vmul.bf16 %v10729_v15, %v16324_v21  ;;  %v11202_v40 = vld [vmem:[%s18133_s6] sm:$0xff]  ;;  %s18149_s6 = sld [smem:[#allocation32_spill]] }
0x1ec3   : > { %v10884_v60 = vmul.bf16 %v10729_v15, %v16311_v63  ;;  %v11043_v62 = vmul.bf16 %v10729_v15, %v16332_v29  ;;  %v10990_v13 = vmul.bf16 %v10729_v15, %v16320_v19  ;;  %v11149_v63 = vmul.bf16 %v10729_v15, %v16338_v28  ;;  %v13929_v28 = vld [vmem:[%s18132_s0 + $0x4] sm:$0xf] }
0x1ec4   : > { %10835 = vrot.lane.b32.xlu0 %v10831_v56, %s18104_s2  ;;  %10737 = vrot.lane.b32.xlu1 %v10733_v26, %s18110_s4  ;;  %v10789_v61 = vsel %vm1457_vm1, %v10731_v44, 0  ;;  %v11096_v21 = vmul.bf16 %v10729_v15, %v16330_v27 }
0x1ec5   : > { %15091 = vmatpush3.bf16.msra.mxu1 %v10789_v61 }
0x1ec6   : > { %15102 = vmatprep.subr.bf16.mxu1 %v18092_v39 }
0x1ec8   : > { %10941 = vrot.lane.b32.xlu0 %v10937_v23, %s18118_s11  ;;  %10888 = vrot.lane.b32.xlu1 %v10884_v60, %s18115_s5  ;;  %s18134_s5 = smov 17   ;;  %s18146_s11 = sld [smem:[#allocation33_spill]] }
0x1ec9   : > { %15093 = vmatmul.mubr.msk.bf16.vlgmr.msra.gmra.mrb[188].mxu1 %vm1453_vm2, %v10732_v12 }
0x1eca   : > { %15104 = vmatprep.mubr.msk.bf16.mxu1 %vm15588_vm6, %v18092_v39 }
0x1ecc   : > { %11047 = vrot.lane.b32.xlu0 %v11043_v62, %s18127_s7  ;;  %10994 = vrot.lane.b32.xlu1 %v10990_v13, %s18119_s12  ;;  %s18135_s12 = sld [smem:[#allocation10_spill]] }
0x1ed0   : > { %11153 = vrot.lane.b32.xlu0 %v11149_v63, %s18129_s10  ;;  %11100 = vrot.lane.b32.xlu1 %v11096_v21, %s18128_s9 }
0x1ed2   : > { %v15494_v31 = vld [vmem:[%s18135_s12] ss:$8 sps:$4 sm:$0xff]   ;;  %v15496_v59 = vld [vmem:[%s18135_s12 + $0x4] ss:$8 sps:$4 sm:$0xff]   ;;  %v15499_v37 = vld [vmem:[%s18135_s12 + $0x14] ss:$8 sps:$4 sm:$0xff]  }
0x1ed3   : > { %v15497_v49 = vld [vmem:[%s18135_s12 + $0x10] ss:$8 sps:$4 sm:$0xff]   ;;  %v15500_v50 = vld [vmem:[%s18135_s12 + $0x20] ss:$8 sps:$4 sm:$0xff]   ;;  %v15505_v45 = vld [vmem:[%s18135_s12 + $0x34] ss:$8 sps:$4 sm:$0xff]  }
0x1ed4   : > { %11305 = vrot.lane.b32.xlu0 %v16254_v20, %s18134_s5  ;;  %11205 = vperm.xlu1 %15354, %v11202_v40   ;;  %v13934_v20 = vld [vmem:[%s18132_s0 + $0xc] sm:$0xf]  ;;  %v15503_v53 = vld [vmem:[%s18135_s12 + $0x30] ss:$8 sps:$4 sm:$0xff]   ;;  %s18152_s0 = smov 96  }
0x1ed8   : > { %11307 = vrot.lane.b32.xlu1 %v16248_v17, %s18134_s5 }
0x1f36   : > { %v10738_v19 = vpop.permute.xlu1 %10737  ;;  %v10836_v43 = vpop.permute.xlu0 %10835 }
0x1f37   : > { %v10743_v29 = vsel %vm1457_vm1, %v10738_v19, 0  ;;  %v10841_v9 = vsel %vm1457_vm1, %v10836_v43, 0 }
0x1f38   : > { %15085 = vmatpush3.bf16.msra.mxu0 %v10743_v29 }
0x1f39   : > { %15096 = vmatprep.subr.bf16.mxu0 %v18092_v39 }
0x1f3a   : > { %v10889_v27 = vpop.permute.xlu1 %10888  ;;  %v10942_v48 = vpop.permute.xlu0 %10941 }
0x1f3b   : > { %v10894_v18 = vsel %vm1457_vm1, %v10889_v27, 0  ;;  %15087 = vmatmul.mubr.msk.bf16.vlgmr.msra.gmra.mrb[172].mxu0 %vm1453_vm2, %v13929_v28  ;;  %v10947_v41 = vsel %vm1457_vm1, %v10942_v48, 0 }
0x1f3c   : > { %15097 = vmatpush3.bf16.msra.mxu0 %v10841_v9  ;;  %15103 = vmatpush3.bf16.msra.mxu1 %v10894_v18 }
0x1f3d   : > { %15114 = vmatprep.subr.bf16.mxu1 %v18092_v39  ;;  %15098 = vmatprep.mubr.msk.bf16.mxu0 %vm15588_vm6, %v18092_v39 }
0x1f3e   : > { %v10995_v17 = vpop.permute.xlu1 %10994  ;;  %15108 = vmatprep.subr.bf16.mxu0 %v18092_v39  ;;  %v11048_v34 = vpop.permute.xlu0 %11047 }
0x1f3f   : > { %v11000_v22 = vsel %vm1457_vm1, %v10995_v17, 0  ;;  %15105 = vmatmul.mubr.msk.bf16.vlgmr.msra.gmra.mrb[192].mxu1 %vm1453_vm2, %v13934_v20  ;;  %v11053_v55 = vsel %vm1457_vm1, %v11048_v34, 0 }
0x1f40   : > { %15115 = vmatpush3.bf16.msra.mxu1 %v11000_v22  ;;  %15116 = vmatprep.mubr.msk.bf16.mxu1 %vm15588_vm6, %v18092_v39 }
0x1f41   : > { %15126 = vmatprep.subr.bf16.mxu1 %v18092_v39 }
0x1f42   : > { %v11101_v6 = vpop.permute.xlu1 %11100  ;;  %v11154_v42 = vpop.permute.xlu0 %11153 }
0x1f43   : > { %15099 = vmatmul.mubr.msk.bf16.vlgmr.msra.gmra.mrb[176].mxu0 %vm1453_vm2, %v13932_v2  ;;  %v11106_v4 = vsel %vm1457_vm1, %v11101_v6, 0  ;;  %v11159_v58 = vsel %vm1457_vm1, %v11154_v42, 0 }
0x1f44   : > { %15109 = vmatpush3.bf16.msra.mxu0 %v10947_v41  ;;  %15110 = vmatprep.mubr.msk.bf16.mxu0 %vm15588_vm6, %v18092_v39 }
0x1f45   : > { %15120 = vmatprep.subr.bf16.mxu0 %v18092_v39 }
0x1f47   : > { %15117 = vmatmul.mubr.msk.bf16.vlgmr.msra.gmra.mrb[196].mxu1 %vm1453_vm2, %v13938_v46 }
0x1f48   : > { %15127 = vmatpush3.bf16.msra.mxu1 %v11106_v4  ;;  %15128 = vmatprep.mubr.msk.bf16.mxu1 %vm15588_vm6, %v18092_v39 }
0x1f49   : > { %11262 = vmatprep.subr.bf16.mxu1 %v15496_v59 }
0x1f4b   : > { %15111 = vmatmul.mubr.msk.bf16.vlgmr.msra.gmra.mrb[180].mxu0 %vm1453_vm2, %v13936_v36 }
0x1f4c   : > { %15121 = vmatpush3.bf16.msra.mxu0 %v11053_v55  ;;  %15122 = vmatprep.mubr.msk.bf16.mxu0 %vm15588_vm6, %v18092_v39 }
0x1f4d   : > { %15132 = vmatprep.subr.bf16.mxu0 %v18092_v39 }
0x1f4f   : > { %15129 = vmatmul.mubr.msk.bf16.vlgmr.msra.gmra.mrb[200].mxu1 %vm1453_vm2, %v13942_v7 }
0x1f50   : > { %11294 = vmatprep.mubr.bf16.mxu1 %v18136_v14  ;;  %11263 = vmatpush1.bf16.msra.mxu1 %v15494_v31 }
0x1f51   : > { %11264 = vmatprep.subr.bf16.mxu1 %v15499_v37 }
0x1f53   : > { %15123 = vmatmul.mubr.msk.bf16.vlgmr.msra.gmra.mrb[184].mxu0 %vm1453_vm2, %v13940_v54  ;;  %v11206_v34 = vpop.permute.xlu1 %11205 }
0x1f54   : > { %15133 = vmatpush3.bf16.msra.mxu0 %v11159_v58  ;;  %15134 = vmatprep.mubr.msk.bf16.mxu0 %vm15588_vm6, %v18092_v39  ;;  %v15502_v39 = vld [vmem:[%s18135_s12 + $0x24] ss:$8 sps:$4 sm:$0xff]   ;;  %v11306_v58 = vpop.permute.xlu0 %11305  ;;  %s18158_s12 = smov 95  }
0x1f55   : > { %11265 = vmatpush1.bf16.msra.mxu1 %v15497_v49 }
0x1f56   : > { %11266 = vmatprep.subr.bf16.mxu1 %v15502_v39 }
0x1f59   : > { %11267 = vmatpush1.bf16.msra.mxu1 %v15500_v50 }
0x1f5a   : > { %11268 = vmatprep.subr.bf16.mxu1 %v15505_v45 }
0x1f5b   : > { %15135 = vmatmul.mubr.msk.bf16.vlgmr.msra.gmra.mrb[188].mxu0 %vm1453_vm2, %v13944_v24  ;;  %v11308_v24 = vpop.permute.xlu1 %11307 }
0x1f5c   : > { %11378 = vmatprep.mubr.bf16.mxu0 %v18136_v14  ;;  %v17473_v37 = vsel %vm1334_vm0, %v11306_v58, %v11308_v24  ;;  %v17480_v50 = vsel %vm1334_vm0, %v11308_v24, 0 }
0x1f5d   : > { %11269 = vmatpush1.bf16.msra.mxu1 %v15503_v53  ;;  %v11438_v53 = vmul.bf16 %v17473_v37, %v15961_v47  ;;  %v11439_v45 = vmul.bf16 %v17480_v50, %v15924_v32 }
0x1f9c   : > { %v10825_v38 = vpop.f32.mrb[188].mxu1 }
0x1f9d   : > { %v15094_v0 = vpop.f32.mrb[189].mxu1 }
0x1f9e   : > { %v10828_v1 = vpop.f32.mrb[190].mxu1 }
0x1f9f   : > { %v15095_v8 = vpop.f32.mrb[191].mxu1 }
0x1fa0   : > { %v17470_v8 = vsel %vm1334_vm0, 0, %v11306_v58 }
0x1fa1   : > { %v11437_v39 = vmul.bf16 %v17470_v8, %v15909_v25 }
0x200e   : > { %v10779_v30 = vpop.f32.mrb[172].mxu0 }
0x200f   : > { %v15088_v10 = vpop.f32.mrb[173].mxu0  ;;  %v10826_v3 = vadd.f32 %v10825_v38, %v10779_v30  ;;  %v11574_v30 = vmul.bf16 %v17473_v37, %v15977_v52 }
0x2010   : > { %v10782_v51 = vpop.f32.mrb[174].mxu0  ;;  %v11573_v10 = vmul.bf16 %v17470_v8, %v15927_v33 }
0x2011   : > { %v15089_v57 = vpop.f32.mrb[175].mxu0 }
0x2012   : > { %v10930_v35 = vpop.f32.mrb[192].mxu1  ;;  %v18138_v57 = vld [vmem:[#allocation40_spill] sm:$0xff] }
0x2013   : > { %v15106_v11 = vpop.f32.mrb[193].mxu1 }
0x2014   : > { %v10933_v5 = vpop.f32.mrb[194].mxu1  ;;  %v18139_v11 = vld [vmem:[#allocation48_spill] sm:$0xff] }
0x2015   : > { %v15107_v16 = vpop.f32.mrb[195].mxu1  ;;  %v11846_v5 = vmul.bf16 %v17473_v37, %v18139_v11 }
0x2016   : > { %v10877_v15 = vpop.f32.mrb[176].mxu0  ;;  %v18140_v16 = vld [vmem:[#allocation41_spill] sm:$0xff] }
0x2017   : > { %v10883_v56 = vadd.f32 %v10877_v15, %v10826_v3  ;;  %v15100_v26 = vpop.f32.mrb[177].mxu0  ;;  %v18137_v3 = vld [vmem:[#allocation49_spill] sm:$0xff]  ;;  %v11709_v15 = vmul.bf16 %v17470_v8, %v18140_v16 }
0x2018   : > { %v10880_v44 = vpop.f32.mrb[178].mxu0  ;;  %v11710_v51 = vmul.bf16 %v17473_v37, %v18137_v3 }
0x2019   : > { %v10936_v61 = vadd.f32 %v10930_v35, %v10883_v56  ;;  %v15101_v23 = vpop.f32.mrb[179].mxu0  ;;  %v11575_v35 = vmul.bf16 %v17480_v50, %v18138_v57  ;;  %v18141_v56 = vld [vmem:[#allocation53_spill] sm:$0xff]  ;;  %v18142_v44 = vld [vmem:[#allocation42_spill] sm:$0xff] }
0x201a   : > { %v11036_v60 = vpop.f32.mrb[196].mxu1  ;;  %v11982_v26 = vmul.bf16 %v17473_v37, %v18141_v56  ;;  %v18143_v23 = vld [vmem:[#allocation43_spill] sm:$0xff] }
0x201b   : > { %v15118_v12 = vpop.f32.mrb[197].mxu1 }
0x201c   : > { %v11039_v62 = vpop.f32.mrb[198].mxu1  ;;  %v18144_v12 = vld [vmem:[#allocation44_spill] sm:$0xff] }
0x201d   : > { %v15119_v13 = vpop.f32.mrb[199].mxu1  ;;  %v11847_v62 = vmul.bf16 %v17480_v50, %v18144_v12 }
0x201e   : > { %v10983_v63 = vpop.f32.mrb[180].mxu0  ;;  %v18145_v13 = vld [vmem:[#allocation45_spill] sm:$0xff] }
0x201f   : > { %v10989_v21 = vadd.f32 %v10983_v63, %v10936_v61  ;;  %v15112_v40 = vpop.f32.mrb[181].mxu0  ;;  %v11711_v61 = vmul.bf16 %v17480_v50, %v18142_v44  ;;  %v11981_v63 = vmul.bf16 %v17470_v8, %v18145_v13 }
0x2020   : > { %v10986_v19 = vpop.f32.mrb[182].mxu0 }
0x2021   : > { %v11042_v29 = vadd.f32 %v11036_v60, %v10989_v21  ;;  %v15113_v43 = vpop.f32.mrb[183].mxu0  ;;  %v11845_v60 = vmul.bf16 %v17470_v8, %v18143_v23 }
0x2022   : > { %v11142_v28 = vpop.f32.mrb[200].mxu1 }
0x2023   : > { %v15130_v27 = vpop.f32.mrb[201].mxu1 }
0x2024   : > { %v11145_v9 = vpop.f32.mrb[202].mxu1 }
0x2025   : > { %v15131_v18 = vpop.f32.mrb[203].mxu1 }
0x2026   : > { %v11089_v20 = vpop.f32.mrb[184].mxu0  ;;  %v18148_v18 = vld [vmem:[#allocation39_spill] sm:$0xff] }
0x2027   : > { %v11095_v17 = vadd.f32 %v11089_v20, %v11042_v29  ;;  %v15124_v22 = vpop.f32.mrb[185].mxu0 }
0x2028   : > { %v11092_v48 = vpop.f32.mrb[186].mxu0 }
0x2029   : > { %v11148_v2 = vadd.f32 %v11142_v28, %v11095_v17  ;;  %v15125_v41 = vpop.f32.mrb[187].mxu0  ;;  %v18147_v28 = vld [vmem:[#allocation38_spill] sm:$0xff] }
0x202a   : > { %v11331_v41 = vmul.bf16 %v17470_v8, %v18147_v28 }
0x202e   : > { %v11195_v6 = vpop.f32.mrb[188].mxu0 }
0x202f   : > { %v11201_v46 = vadd.f32 %v11195_v6, %v11148_v2  ;;  %v15136_v4 = vpop.f32.mrb[189].mxu0  ;;  %v11332_v2 = vmul.bf16 %v17473_v37, %v18148_v18 }
0x2030   : > { %v11198_v36 = vpop.f32.mrb[190].mxu0 }
0x2031   : > { %v11208_v55 = vadd.f32 %v11206_v34, %v11201_v46  ;;  %v15137_v7 = vpop.f32.mrb[191].mxu0  ;;  %v11336_v46 = vld [vmem:[%s18146_s11] sm:$0xf]  ;;  %v18150_v34 = vld [vmem:[#allocation46_spill] sm:$0xff] }
0x2032   : > { %v11983_v36 = vmul.bf16 %v17480_v50, %v18150_v34 }
0x2033   : > { %v11209_v42 = vmax.f32 %v11208_v55, 0.0 }
0x2035   : > { %v11210_v54 = vpack.c.bf16 %v11209_v42, %v11209_v42  ;;  %v11391_v42 = vsel %vm1457_vm1, %v11331_v41, 0 }
0x2037   : > { %13954 = vmatmul.mubr.msk.bf16.vlgmr.msra.gmra.mrb[204].mxu1 %vm4444_vm4, %v11210_v54  ;;  %vm18168_vm4 = vcmask 785408  }
0x2038   : > { %11494 = vmatprep.mubr.bf16.mxu1 %v18136_v14  ;;  %vm18169_vm6 = vmmov %vm18168_vm4 }
0x210a   : > { %v11296_v38 = vpop.f32.mrb[204].mxu1 }
0x210b   : > { %v11303_v0 = vpack.c.bf16 %v11296_v38, %v11296_v38  ;;  %v11298_v1 = vpop.f32.mrb[205].mxu1  ;;  %v13959_v38 = vld [vmem:[%s18149_s6 + $0x4] sm:$0xf] }
0x210c   : > { %v11304_v31 = vpack.c.bf16 %v11298_v1, %v11298_v1  ;;  %v11300_v59 = vpop.f32.mrb[206].mxu1 }
0x210d   : > { %11319 = vrot.lane.b32.xlu0 %v11303_v0, %s18134_s5  ;;  %v11301_v49 = vpop.f32.mrb[207].mxu1  ;;  %v11333_v59 = vld [vmem:[%s18149_s6] sm:$0xf] }
0x210e   : > { %11321 = vrot.lane.b32.xlu1 %v11304_v31, %s18134_s5 }
0x2111   : > { %11445 = vrot.lane.b32.xlu0 %v11437_v39, %s18110_s4 }
0x2112   : > { %11447 = vrot.lane.b32.xlu1 %v11438_v53, %s18110_s4  ;;  %v18151_v53 = vld [vmem:[#allocation47_spill] sm:$0xff] }
0x2115   : > { %11449 = vrot.lane.b32.xlu0 %v11439_v45, %s18110_s4  ;;  %v12117_v45 = vmul.bf16 %v17470_v8, %v18151_v53 }
0x2116   : > { %11583 = vrot.lane.b32.xlu1 %v11574_v30, %s18104_s2 }
0x2119   : > { %11581 = vrot.lane.b32.xlu0 %v11573_v10, %s18104_s2 }
0x211a   : > { %11719 = vrot.lane.b32.xlu1 %v11710_v51, %s18127_s7 }
0x211d   : > { %11585 = vrot.lane.b32.xlu0 %v11575_v35, %s18104_s2 }
0x211e   : > { %11855 = vrot.lane.b32.xlu1 %v11846_v5, %s18128_s9 }
0x2121   : > { %11717 = vrot.lane.b32.xlu0 %v11709_v15, %s18127_s7  ;;  %v13965_v15 = vld [vmem:[%s18149_s6 + $0x8] sm:$0xf] }
0x2122   : > { %11991 = vrot.lane.b32.xlu1 %v11982_v26, %s18129_s10 }
0x2125   : > { %11721 = vrot.lane.b32.xlu0 %v11711_v61, %s18127_s7 }
0x2129   : > { %11853 = vrot.lane.b32.xlu0 %v11845_v60, %s18128_s9 }
0x212d   : > { %11857 = vrot.lane.b32.xlu0 %v11847_v62, %s18128_s9 }
0x2131   : > { %11989 = vrot.lane.b32.xlu0 %v11981_v63, %s18129_s10  ;;  %v18153_v63 = vld [vmem:[#allocation50_spill] sm:$0xff] }
0x217f   : > { %v11320_v21 = vpop.permute.xlu0 %11319 }
0x2180   : > { %v17523_v40 = vsel %vm1334_vm0, 0, %v11320_v21  ;;  %v11322_v19 = vpop.permute.xlu1 %11321 }
0x2181   : > { %v17526_v29 = vsel %vm1334_vm0, %v11320_v21, %v11322_v19  ;;  %v11505_v43 = vmul.bf16 %v17523_v40, %v15909_v25  ;;  %v11334_v27 = vmul.bf16 %v17523_v40, %v18147_v28  ;;  %v11641_v6 = vmul.bf16 %v17523_v40, %v15927_v33 }
0x2182   : > { %v11506_v9 = vmul.bf16 %v17526_v29, %v15961_v47  ;;  %v11335_v20 = vmul.bf16 %v17526_v29, %v18148_v18  ;;  %v11777_v58 = vmul.bf16 %v17523_v40, %v18140_v16  ;;  %v11642_v24 = vmul.bf16 %v17526_v29, %v15977_v52 }
0x2183   : > { %v11446_v17 = vpop.permute.xlu0 %11445  ;;  %11513 = vrot.lane.b32.xlu1 %v11505_v43, %s18110_s4  ;;  %v11341_v22 = vsel %vm1457_vm1, %v11334_v27, 0  ;;  %v11913_v31 = vmul.bf16 %v17523_v40, %v18143_v23  ;;  %v17571_v49 = vsel %vm1334_vm0, %v11322_v19, 0  ;;  %v11778_v5 = vmul.bf16 %v17526_v29, %v18137_v3 }
0x2184   : > { %11515 = vrot.lane.b32.xlu0 %v11506_v9, %s18110_s4  ;;  %13955 = vmatprep.subr.msk.bf16.mxu0 %vm1457_vm1, %v11335_v20  ;;  %v11448_v48 = vpop.permute.xlu1 %11447  ;;  %v11507_v35 = vmul.bf16 %v17571_v49, %v15924_v32  ;;  %v12049_v60 = vmul.bf16 %v17523_v40, %v18145_v13  ;;  %v12119_v21 = vmul.bf16 %v17480_v50, %v18153_v63 }
0x2185   : > { %11347 = vmatpush1.bf16.msra.mxu0 %v11341_v22  ;;  %v11451_v4 = vsel %vm1450_vm10, %v11446_v17, %v11448_v48  ;;  %v11643_v9 = vmul.bf16 %v17571_v49, %v18138_v57  ;;  %v11914_v20 = vmul.bf16 %v17526_v29, %v18139_v11  ;;  %v13971_v17 = vld [vmem:[%s18149_s6 + $0xc] sm:$0xf] }
0x2186   : > { %13957 = vmatprep.subr.msk.bf16.mxu0 %vm1457_vm1, %v11332_v2  ;;  %v11457_v54 = vsel %vm1457_vm1, %v11451_v4, 0  ;;  %v18154_v2 = vld [vmem:[#allocation54_spill] sm:$0xff] }
0x2187   : > { %v11450_v55 = vpop.permute.xlu0 %11449  ;;  %11649 = vrot.lane.b32.xlu1 %v11641_v6, %s18104_s2  ;;  %v12118_v41 = vmul.bf16 %v17473_v37, %v18154_v2 }
0x2188   : > { %v11452_v7 = vsel %vm1450_vm10, %v11448_v48, %v11450_v55  ;;  %11993 = vrot.lane.b32.xlu0 %v11983_v36, %s18129_s10  ;;  %13956 = vmatmul.mubr.msk.bf16.vlgmr.msra.gmra.mrb[192].mxu0 %vm1453_vm2, %v11336_v46  ;;  %v11584_v1 = vpop.permute.xlu1 %11583  ;;  %v18156_v46 = vld [vmem:[#allocation51_spill] sm:$0xff] }
0x2189   : > { %11397 = vmatpush1.bf16.msra.mxu0 %v11391_v42  ;;  %13960 = vmatprep.subr.msk.bf16.mxu1 %vm1457_vm1, %v11452_v7  ;;  %v12253_v4 = vmul.bf16 %v17470_v8, %v18156_v46  ;;  %v11779_v42 = vmul.bf16 %v17571_v49, %v18142_v44 }
0x218a   : > { %11463 = vmatpush1.bf16.msra.mxu1 %v11457_v54  ;;  %11428 = vmatprep.mubr.bf16.mxu0 %v18136_v14  ;;  %v12050_v54 = vmul.bf16 %v17526_v29, %v18141_v56 }
0x218b   : > { %v11582_v0 = vpop.permute.xlu0 %11581  ;;  %11785 = vrot.lane.b32.xlu1 %v11777_v58, %s18127_s7  ;;  %v13977_v58 = vld [vmem:[%s18149_s6 + $0x10] sm:$0xf] }
0x218c   : > { %11651 = vrot.lane.b32.xlu0 %v11642_v24, %s18104_s2  ;;  %v11587_v39 = vsel %vm1619_vm11, %v11582_v0, %v11584_v1  ;;  %v11720_v61 = vpop.permute.xlu1 %11719  ;;  %v12185_v24 = vmul.bf16 %v17523_v40, %v18151_v53 }
0x218d   : > { %13961 = vmatmul.mubr.msk.bf16.vlgmr.msra.gmra.mrb[208].mxu1 %vm1453_vm2, %v13959_v38  ;;  %v11593_v51 = vsel %vm1457_vm1, %v11587_v39, 0  ;;  %v18159_v38 = vld [vmem:[#allocation52_spill] sm:$0xff] }
0x218e   : > { %11630 = vmatprep.mubr.bf16.mxu1 %v18136_v14  ;;  %v12255_v0 = vmul.bf16 %v17480_v50, %v18159_v38 }
0x218f   : > { %v11586_v30 = vpop.permute.xlu0 %11585  ;;  %11921 = vrot.lane.b32.xlu1 %v11913_v31, %s18128_s9  ;;  %v12186_v31 = vmul.bf16 %v17526_v29, %v18154_v2 }
0x2190   : > { %v11588_v10 = vsel %vm1619_vm11, %v11584_v1, %v11586_v30  ;;  %12125 = vrot.lane.b32.xlu0 %v12117_v45, %s18152_s0  ;;  %13958 = vmatmul.mubr.msk.bf16.vlgmr.msra.gmra.mrb[196].mxu0 %vm1453_vm2, %v11333_v59  ;;  %v11856_v48 = vpop.permute.xlu1 %11855  ;;  %v11915_v1 = vmul.bf16 %v17571_v49, %v18144_v12  ;;  %v18160_v59 = vld [vmem:[#allocation57_spill] sm:$0xff]  ;;  %v18161_v45 = vld [vmem:[#allocation55_spill] sm:$0xff] }
0x2191   : > { %13966 = vmatprep.subr.msk.bf16.mxu1 %vm1457_vm1, %v11588_v10  ;;  %11562 = vmatprep.mubr.bf16.mxu0 %v18136_v14  ;;  %v12254_v39 = vmul.bf16 %v17473_v37, %v18160_v59  ;;  %v12389_v30 = vmul.bf16 %v17470_v8, %v18161_v45  ;;  %v12051_v10 = vmul.bf16 %v17571_v49, %v18150_v34 }
0x2192   : > { %11599 = vmatpush1.bf16.msra.mxu1 %v11593_v51  ;;  %v12322_v51 = vmul.bf16 %v17526_v29, %v18160_v59 }
0x2193   : > { %v11718_v26 = vpop.permute.xlu0 %11717  ;;  %11517 = vrot.lane.b32.xlu1 %v11507_v35, %s18110_s4  ;;  %v12321_v35 = vmul.bf16 %v17523_v40, %v18156_v46 }
0x2194   : > { %11787 = vrot.lane.b32.xlu0 %v11778_v5, %s18127_s7  ;;  %v11723_v62 = vsel %vm1738_vm12, %v11718_v26, %v11720_v61  ;;  %v18164_v5 = vld [vmem:[#allocation56_spill] sm:$0xff]  ;;  %v18165_v26 = vld [vmem:[#allocation58_spill] sm:$0xff] }
0x2195   : > { %13967 = vmatmul.mubr.msk.bf16.vlgmr.msra.gmra.mrb[212].mxu1 %vm1453_vm2, %v13965_v15  ;;  %v11729_v27 = vsel %vm1457_vm1, %v11723_v62, 0  ;;  %v12391_v8 = vmul.bf16 %v17480_v50, %v18164_v5  ;;  %v12187_v15 = vmul.bf16 %v17571_v49, %v18153_v63  ;;  %v12525_v62 = vld [vmem:[%s18162_s13] sm:$0xff]  ;;  %v12323_v50 = vmul.bf16 %v17571_v49, %v18159_v38  ;;  %s18184_s13 = sld [smem:[#allocation35_spill]] }
0x2196   : > { %11766 = vmatprep.mubr.bf16.mxu1 %v18136_v14 }
0x2197   : > { %v11722_v19 = vpop.permute.xlu0 %11721  ;;  %12057 = vrot.lane.b32.xlu1 %v12049_v60, %s18129_s10  ;;  %v12390_v60 = vmul.bf16 %v17473_v37, %v18165_v26  ;;  %v11992_v37 = vpop.permute.xlu1 %11991 }
0x2198   : > { %v11724_v43 = vsel %vm1738_vm12, %v11720_v61, %v11722_v19  ;;  %12129 = vrot.lane.b32.xlu0 %v12119_v21, %s18152_s0  ;;  %v12458_v61 = vmul.bf16 %v17526_v29, %v18165_v26  ;;  %v12457_v21 = vmul.bf16 %v17523_v40, %v18161_v45  ;;  %v12459_v29 = vmul.bf16 %v17571_v49, %v18164_v5  ;;  %v13983_v49 = vld [vmem:[%s18149_s6 + $0x14] sm:$0xf] }
0x2199   : > { %13972 = vmatprep.subr.msk.bf16.mxu1 %vm1457_vm1, %v11724_v43 }
0x219a   : > { %11735 = vmatpush1.bf16.msra.mxu1 %v11729_v27 }
0x219b   : > { %v11854_v22 = vpop.permute.xlu0 %11853  ;;  %11653 = vrot.lane.b32.xlu1 %v11643_v9, %s18104_s2 }
0x219c   : > { %11923 = vrot.lane.b32.xlu0 %v11914_v20, %s18128_s9  ;;  %v11859_v6 = vsel %vm18155_vm5, %v11854_v22, %v11856_v48  ;;  %vm18174_vm5 = vmmov %vm18167_vm3 }
0x219d   : > { %13973 = vmatmul.mubr.msk.bf16.vlgmr.msra.gmra.mrb[216].mxu1 %vm1453_vm2, %v13971_v17  ;;  %v11865_v7 = vsel %vm1457_vm1, %v11859_v6, 0 }
0x219e   : > { %11902 = vmatprep.mubr.bf16.mxu1 %v18136_v14 }
0x219f   : > { %v11858_v36 = vpop.permute.xlu0 %11857  ;;  %12127 = vrot.lane.b32.xlu1 %v12118_v41, %s18152_s0 }
0x21a0   : > { %v11860_v55 = vsel %vm18157_vm7, %v11856_v48, %v11858_v36  ;;  %12261 = vrot.lane.b32.xlu0 %v12253_v4, %s18158_s12  ;;  %vm18175_vm7 = vmmov %vm18167_vm3 }
0x21a1   : > { %13978 = vmatprep.subr.msk.bf16.mxu1 %vm1457_vm1, %v11860_v55 }
0x21a2   : > { %11871 = vmatpush1.bf16.msra.mxu1 %v11865_v7 }
0x21a3   : > { %11789 = vrot.lane.b32.xlu1 %v11779_v42, %s18127_s7  ;;  %v11990_v19 = vpop.permute.xlu0 %11989 }
0x21a4   : > { %12059 = vrot.lane.b32.xlu0 %v12050_v54, %s18129_s10  ;;  %v11995_v9 = vsel %vm18166_vm15, %v11990_v19, %v11992_v37  ;;  %vm18176_vm15 = vmmov %vm18168_vm4 }
0x21a5   : > { %13979 = vmatmul.mubr.msk.bf16.vlgmr.msra.gmra.mrb[220].mxu1 %vm1453_vm2, %v13977_v58  ;;  %v12001_v40 = vsel %vm1457_vm1, %v11995_v9, 0  ;;  %v13962_v58 = vld [vmem:[%s18146_s11 + $0x4] sm:$0xf] }
0x21a6   : > { %12038 = vmatprep.mubr.bf16.mxu1 %v18136_v14 }
0x21a7   : > { %12193 = vrot.lane.b32.xlu1 %v12185_v24, %s18152_s0 }
0x21a8   : > { %12265 = vrot.lane.b32.xlu0 %v12255_v0, %s18158_s12 }
0x21ab   : > { %11925 = vrot.lane.b32.xlu1 %v11915_v1, %s18128_s9 }
0x21ac   : > { %12195 = vrot.lane.b32.xlu0 %v12186_v31, %s18152_s0 }
0x21af   : > { %12263 = vrot.lane.b32.xlu1 %v12254_v39, %s18158_s12 }
0x21b0   : > { %12397 = vrot.lane.b32.xlu0 %v12389_v30, %s18163_s14 }
0x21b3   : > { %12061 = vrot.lane.b32.xlu1 %v12051_v10, %s18129_s10 }
0x21b4   : > { %12331 = vrot.lane.b32.xlu0 %v12322_v51, %s18158_s12  ;;  %v13968_v51 = vld [vmem:[%s18146_s11 + $0x8] sm:$0xf] }
0x21b7   : > { %12329 = vrot.lane.b32.xlu1 %v12321_v35, %s18158_s12 }
0x21b8   : > { %12401 = vrot.lane.b32.xlu0 %v12391_v8, %s18163_s14 }
0x21bb   : > { %12197 = vrot.lane.b32.xlu1 %v12187_v15, %s18152_s0 }
0x21bc   : > { %12467 = vrot.lane.b32.xlu0 %v12458_v61, %s18163_s14 }
0x21bf   : > { %12399 = vrot.lane.b32.xlu1 %v12390_v60, %s18163_s14 }
0x21c0   : > { %12528 = vperm.xlu0 %15353, %v12525_v62  }
0x21c3   : > { %12333 = vrot.lane.b32.xlu1 %v12323_v50, %s18158_s12  ;;  %v13989_v50 = vld [vmem:[%s18149_s6 + $0x18] sm:$0xf] }
0x21c7   : > { %12465 = vrot.lane.b32.xlu1 %v12457_v21, %s18163_s14 }
0x21cb   : > { %12469 = vrot.lane.b32.xlu1 %v12459_v29, %s18163_s14 }
0x21f5   : > { %v11514_v43 = vpop.permute.xlu1 %11513 }
0x21f6   : > { %v11516_v27 = vpop.permute.xlu0 %11515 }
0x21f7   : > { %v11519_v36 = vsel %vm1450_vm10, %v11514_v43, %v11516_v27  ;;  %v13974_v43 = vld [vmem:[%s18146_s11 + $0xc] sm:$0xf] }
0x21f8   : > { %v11525_v54 = vsel %vm1457_vm1, %v11519_v36, 0 }
0x21f9   : > { %v11650_v20 = vpop.permute.xlu1 %11649 }
0x21fa   : > { %v11994_v17 = vpop.permute.xlu0 %11993 }
0x21fb   : > { %v11996_v22 = vsel %vm18167_vm3, %v11992_v37, %v11994_v17  ;;  %vm18177_vm3 = vmmov %vm18168_vm4 }
0x21fc   : > { %13984 = vmatprep.subr.msk.bf16.mxu1 %vm1457_vm1, %v11996_v22 }
0x21fd   : > { %12007 = vmatpush1.bf16.msra.mxu1 %v12001_v40  ;;  %v11786_v48 = vpop.permute.xlu1 %11785 }
0x21fe   : > { %v11652_v41 = vpop.permute.xlu0 %11651 }
0x21ff   : > { %v11655_v1 = vsel %vm1619_vm11, %v11650_v20, %v11652_v41 }
0x2200   : > { %13985 = vmatmul.mubr.msk.bf16.vlgmr.msra.gmra.mrb[224].mxu1 %vm1453_vm2, %v13983_v49  ;;  %v11661_v10 = vsel %vm1457_vm1, %v11655_v1, 0  ;;  %v13980_v49 = vld [vmem:[%s18146_s11 + $0x10] sm:$0xf]  ;;  %v13986_v1 = vld [vmem:[%s18146_s11 + $0x14] sm:$0xf] }
0x2201   : > { %v11922_v6 = vpop.permute.xlu1 %11921  ;;  %12174 = vmatprep.mubr.bf16.mxu1 %v18136_v14 }
0x2202   : > { %v12126_v4 = vpop.permute.xlu0 %12125 }
0x2205   : > { %v11518_v55 = vpop.permute.xlu1 %11517 }
0x2206   : > { %v11520_v7 = vsel %vm1450_vm10, %v11516_v27, %v11518_v55  ;;  %v11788_v42 = vpop.permute.xlu0 %11787 }
0x2207   : > { %13963 = vmatprep.subr.msk.bf16.mxu0 %vm1457_vm1, %v11520_v7  ;;  %v11791_v62 = vsel %vm1738_vm12, %v11786_v48, %v11788_v42  ;;  %v13995_v7 = vld [vmem:[%s18149_s6 + $0x1c] sm:$0xf] }
0x2208   : > { %11531 = vmatpush1.bf16.msra.mxu0 %v11525_v54  ;;  %v11797_v19 = vsel %vm1457_vm1, %v11791_v62, 0 }
0x2209   : > { %v12058_v24 = vpop.permute.xlu1 %12057 }
0x220a   : > { %v12130_v0 = vpop.permute.xlu0 %12129 }
0x220b   : > { %13964 = vmatmul.mubr.msk.bf16.vlgmr.msra.gmra.mrb[200].mxu0 %vm1453_vm2, %v13962_v58 }
0x220c   : > { %11698 = vmatprep.mubr.bf16.mxu0 %v18136_v14 }
0x220d   : > { %v11654_v31 = vpop.permute.xlu1 %11653 }
0x220e   : > { %v11656_v39 = vsel %vm1619_vm11, %v11652_v41, %v11654_v31  ;;  %v11924_v30 = vpop.permute.xlu0 %11923 }
0x220f   : > { %13969 = vmatprep.subr.msk.bf16.mxu0 %vm1457_vm1, %v11656_v39  ;;  %v11927_v20 = vsel %vm18170_vm8, %v11922_v6, %v11924_v30  ;;  %vm18180_vm8 = vmmov %vm18172_vm13 }
0x2210   : > { %11667 = vmatpush1.bf16.msra.mxu0 %v11661_v10  ;;  %v11933_v40 = vsel %vm1457_vm1, %v11927_v20, 0 }
0x2211   : > { %v12128_v35 = vpop.permute.xlu1 %12127 }
0x2212   : > { %v12131_v8 = vsel %vm18168_vm4, %v12126_v4, %v12128_v35  ;;  %v12132_v15 = vsel %vm18169_vm6, %v12128_v35, %v12130_v0  ;;  %v12262_v61 = vpop.permute.xlu0 %12261  ;;  %v13992_v35 = vld [vmem:[%s18146_s11 + $0x18] sm:$0xf]  ;;  %vm18178_vm4 = vcmask 769024  }
0x2213   : > { %v12137_v60 = vsel %vm1457_vm1, %v12131_v8, 0  ;;  %13970 = vmatmul.mubr.msk.bf16.vlgmr.msra.gmra.mrb[204].mxu0 %vm1453_vm2, %v13968_v51  ;;  %13990 = vmatprep.subr.msk.bf16.mxu1 %vm1457_vm1, %v12132_v15  ;;  %vm18179_vm6 = vmmov %vm18178_vm4 }
0x2214   : > { %12143 = vmatpush1.bf16.msra.mxu1 %v12137_v60  ;;  %11834 = vmatprep.mubr.bf16.mxu0 %v18136_v14 }
0x2215   : > { %v11790_v21 = vpop.permute.xlu1 %11789 }
0x2216   : > { %v11792_v29 = vsel %vm1738_vm12, %v11788_v42, %v11790_v21  ;;  %v12060_v37 = vpop.permute.xlu0 %12059  ;;  %v14001_v21 = vld [vmem:[%s18149_s6 + $0x20] sm:$0xf] }
0x2217   : > { %13975 = vmatprep.subr.msk.bf16.mxu0 %vm1457_vm1, %v11792_v29  ;;  %13991 = vmatmul.mubr.msk.bf16.vlgmr.msra.gmra.mrb[228].mxu1 %vm1453_vm2, %v13989_v50  ;;  %v12063_v55 = vsel %vm18174_vm5, %v12058_v24, %v12060_v37 }
0x2218   : > { %11803 = vmatpush1.bf16.msra.mxu0 %v11797_v19  ;;  %12310 = vmatprep.mubr.bf16.mxu1 %v18136_v14  ;;  %v12069_v0 = vsel %vm1457_vm1, %v12063_v55, 0 }
0x2219   : > { %v12194_v27 = vpop.permute.xlu1 %12193 }
0x221a   : > { %v12266_v9 = vpop.permute.xlu0 %12265 }
0x221b   : > { %13976 = vmatmul.mubr.msk.bf16.vlgmr.msra.gmra.mrb[208].mxu0 %vm1453_vm2, %v13974_v43  ;;  %v13998_v43 = vld [vmem:[%s18146_s11 + $0x1c] sm:$0xf] }
0x221c   : > { %11970 = vmatprep.mubr.bf16.mxu0 %v18136_v14 }
0x221d   : > { %v11926_v17 = vpop.permute.xlu1 %11925 }
0x221e   : > { %v11928_v22 = vsel %vm18171_vm9, %v11924_v30, %v11926_v17  ;;  %v12196_v48 = vpop.permute.xlu0 %12195  ;;  %vm18181_vm9 = vmmov %vm18180_vm8 }
0x221f   : > { %13981 = vmatprep.subr.msk.bf16.mxu0 %vm1457_vm1, %v11928_v22  ;;  %v12199_v39 = vsel %vm18176_vm15, %v12194_v27, %v12196_v48  ;;  %vm18191_vm15 = vmmov %vm18180_vm8 }
0x2220   : > { %11939 = vmatpush1.bf16.msra.mxu0 %v11933_v40  ;;  %v12205_v51 = vsel %vm1457_vm1, %v12199_v39, 0 }
0x2221   : > { %v12264_v41 = vpop.permute.xlu1 %12263 }
0x2222   : > { %v12267_v4 = vsel %vm18172_vm13, %v12262_v61, %v12264_v41  ;;  %v12268_v36 = vsel %vm18173_vm14, %v12264_v41, %v12266_v9  ;;  %v12398_v42 = vpop.permute.xlu0 %12397  ;;  %vm18182_vm13 = vmmov %vm18178_vm4 }
0x2223   : > { %v12273_v6 = vsel %vm1457_vm1, %v12267_v4, 0  ;;  %13982 = vmatmul.mubr.msk.bf16.vlgmr.msra.gmra.mrb[212].mxu0 %vm1453_vm2, %v13980_v49  ;;  %13996 = vmatprep.subr.msk.bf16.mxu1 %vm1457_vm1, %v12268_v36  ;;  %vm18183_vm14 = vmmov %vm18178_vm4 }
0x2224   : > { %12279 = vmatpush1.bf16.msra.mxu1 %v12273_v6  ;;  %12106 = vmatprep.mubr.bf16.mxu0 %v18136_v14 }
0x2225   : > { %v12062_v54 = vpop.permute.xlu1 %12061 }
0x2226   : > { %v12064_v58 = vsel %vm18175_vm7, %v12060_v37, %v12062_v54  ;;  %v12332_v31 = vpop.permute.xlu0 %12331  ;;  %vm18190_vm7 = vmmov %vm18177_vm3 }
0x2227   : > { %13987 = vmatprep.subr.msk.bf16.mxu0 %vm1457_vm1, %v12064_v58  ;;  %13997 = vmatmul.mubr.msk.bf16.vlgmr.msra.gmra.mrb[232].mxu1 %vm1453_vm2, %v13995_v7 }
0x2228   : > { %12075 = vmatpush1.bf16.msra.mxu0 %v12069_v0  ;;  %12446 = vmatprep.mubr.bf16.mxu1 %v18136_v14 }
0x2229   : > { %v12330_v24 = vpop.permute.xlu1 %12329 }
0x222a   : > { %v12402_v8 = vpop.permute.xlu0 %12401  ;;  %v12335_v50 = vsel %vm18180_vm8, %v12330_v24, %v12332_v31 }
0x222b   : > { %13988 = vmatmul.mubr.msk.bf16.vlgmr.msra.gmra.mrb[216].mxu0 %vm1453_vm2, %v13986_v1  ;;  %v12341_v19 = vsel %vm1457_vm1, %v12335_v50, 0 }
0x222c   : > { %12242 = vmatprep.mubr.bf16.mxu0 %v18136_v14 }
0x222d   : > { %v12198_v30 = vpop.permute.xlu1 %12197 }
0x222e   : > { %v12200_v10 = vsel %vm18177_vm3, %v12196_v48, %v12198_v30  ;;  %v12468_v9 = vpop.permute.xlu0 %12467  ;;  %v14004_v48 = vld [vmem:[%s18146_s11 + $0x20] sm:$0xf] }
0x222f   : > { %13993 = vmatprep.subr.msk.bf16.mxu0 %vm1457_vm1, %v12200_v10 }
0x2230   : > { %12211 = vmatpush1.bf16.msra.mxu0 %v12205_v51 }
0x2231   : > { %v12400_v15 = vpop.permute.xlu1 %12399 }
0x2232   : > { %v12403_v61 = vsel %vm18178_vm4, %v12398_v42, %v12400_v15  ;;  %v12404_v60 = vsel %vm18179_vm6, %v12400_v15, %v12402_v8  ;;  %vm18193_vm6 = vmmov %vm18178_vm4 }
0x2233   : > { %v12409_v62 = vsel %vm1457_vm1, %v12403_v61, 0  ;;  %13994 = vmatmul.mubr.msk.bf16.vlgmr.msra.gmra.mrb[220].mxu0 %vm1453_vm2, %v13992_v35  ;;  %14002 = vmatprep.subr.msk.bf16.mxu1 %vm1457_vm1, %v12404_v60 }
0x2234   : > { %12415 = vmatpush1.bf16.msra.mxu1 %v12409_v62  ;;  %12378 = vmatprep.mubr.bf16.mxu0 %v18136_v14 }
0x2235   : > { %v12334_v29 = vpop.permute.xlu1 %12333 }
0x2236   : > { %v12336_v37 = vsel %vm18181_vm9, %v12332_v31, %v12334_v29 }
0x2237   : > { %13999 = vmatprep.subr.msk.bf16.mxu0 %vm1457_vm1, %v12336_v37  ;;  %14003 = vmatmul.mubr.msk.bf16.vlgmr.msra.gmra.mrb[236].mxu1 %vm1453_vm2, %v14001_v21 }
0x2238   : > { %12347 = vmatpush1.bf16.msra.mxu0 %v12341_v19  ;;  %12611 = vmatprep.mubr.bf16.mxu1 %v18136_v14 }
0x2239   : > { %v12466_v27 = vpop.permute.xlu1 %12465 }
0x223a   : > { %v12471_v20 = vsel %vm18182_vm13, %v12466_v27, %v12468_v9 }
0x223b   : > { %14000 = vmatmul.mubr.msk.bf16.vlgmr.msra.gmra.mrb[224].mxu0 %vm1453_vm2, %v13998_v43  ;;  %v12477_v40 = vsel %vm1457_vm1, %v12471_v20, 0 }
0x223c   : > { %12514 = vmatprep.mubr.bf16.mxu0 %v18136_v14 }
0x223d   : > { %v12470_v17 = vpop.permute.xlu1 %12469 }
0x223e   : > { %v12472_v22 = vsel %vm18183_vm14, %v12468_v9, %v12470_v17 }
0x223f   : > { %14005 = vmatprep.subr.msk.bf16.mxu0 %vm1457_vm1, %v12472_v22 }
0x2240   : > { %12483 = vmatpush1.bf16.msra.mxu0 %v12477_v40 }
0x2243   : > { %14006 = vmatmul.mubr.msk.bf16.vlgmr.msra.gmra.mrb[228].mxu0 %vm1453_vm2, %v14004_v48 }
0x2244   : > { %12661 = vmatprep.mubr.bf16.mxu0 %v18136_v14 }
0x225b   : > { %v11380_v49 = vpop.f32.mrb[192].mxu0 }
0x225c   : > { %v11382_v41 = vpop.f32.mrb[193].mxu0 }
0x225d   : > { %v11384_v4 = vpop.f32.mrb[194].mxu0 }
0x225e   : > { %v11385_v36 = vpop.f32.mrb[195].mxu0 }
0x2260   : > { %v11496_v6 = vpop.f32.mrb[208].mxu1 }
0x2261   : > { %v11498_v55 = vpop.f32.mrb[209].mxu1 }
0x2262   : > { %v11500_v7 = vpop.f32.mrb[210].mxu1 }
0x2263   : > { %v11430_v42 = vpop.f32.mrb[196].mxu0  ;;  %v11501_v54 = vpop.f32.mrb[211].mxu1 }
0x2264   : > { %v11431_v58 = vadd.f32 %v11430_v42, %v11380_v49  ;;  %v11432_v0 = vpop.f32.mrb[197].mxu0 }
0x2265   : > { %v11433_v1 = vadd.f32 %v11432_v0, %v11382_v41  ;;  %v11434_v24 = vpop.f32.mrb[198].mxu0 }
0x2266   : > { %v11503_v31 = vadd.f32 %v11496_v6, %v11431_v58  ;;  %v11435_v39 = vpop.f32.mrb[199].mxu0 }
0x2267   : > { %v11504_v30 = vadd.f32 %v11498_v55, %v11433_v1 }
0x2268   : > { %v11632_v10 = vpop.f32.mrb[212].mxu1 }
0x2269   : > { %v11634_v51 = vpop.f32.mrb[213].mxu1 }
0x226a   : > { %v11636_v35 = vpop.f32.mrb[214].mxu1 }
0x226b   : > { %v11637_v8 = vpop.f32.mrb[215].mxu1 }
0x2270   : > { %v11768_v15 = vpop.f32.mrb[216].mxu1 }
0x2271   : > { %v11770_v61 = vpop.f32.mrb[217].mxu1 }
0x2272   : > { %v11772_v60 = vpop.f32.mrb[218].mxu1 }
0x2273   : > { %v11773_v62 = vpop.f32.mrb[219].mxu1 }
0x2278   : > { %v11904_v50 = vpop.f32.mrb[220].mxu1 }
0x2279   : > { %v11906_v21 = vpop.f32.mrb[221].mxu1 }
0x227a   : > { %v11908_v29 = vpop.f32.mrb[222].mxu1 }
0x227b   : > { %v11909_v37 = vpop.f32.mrb[223].mxu1 }
0x22d3   : > { %v12040_v19 = vpop.f32.mrb[224].mxu1 }
0x22d4   : > { %v12042_v43 = vpop.f32.mrb[225].mxu1 }
0x22d5   : > { %v12044_v27 = vpop.f32.mrb[226].mxu1 }
0x22d6   : > { %v12045_v9 = vpop.f32.mrb[227].mxu1 }
0x22de   : > { %v11564_v20 = vpop.f32.mrb[200].mxu0 }
0x22df   : > { %v11571_v17 = vadd.f32 %v11564_v20, %v11503_v31  ;;  %v11566_v22 = vpop.f32.mrb[201].mxu0 }
0x22e0   : > { %v11572_v40 = vadd.f32 %v11566_v22, %v11504_v30  ;;  %v11568_v48 = vpop.f32.mrb[202].mxu0 }
0x22e1   : > { %v11639_v49 = vadd.f32 %v11632_v10, %v11571_v17  ;;  %v11569_v41 = vpop.f32.mrb[203].mxu0 }
0x22e2   : > { %v11640_v4 = vadd.f32 %v11634_v51, %v11572_v40 }
0x22e6   : > { %v11700_v36 = vpop.f32.mrb[204].mxu0 }
0x22e7   : > { %v11707_v6 = vadd.f32 %v11700_v36, %v11639_v49  ;;  %v11702_v55 = vpop.f32.mrb[205].mxu0 }
0x22e8   : > { %v11708_v7 = vadd.f32 %v11702_v55, %v11640_v4  ;;  %v11704_v42 = vpop.f32.mrb[206].mxu0 }
0x22e9   : > { %v11775_v54 = vadd.f32 %v11768_v15, %v11707_v6  ;;  %v11705_v58 = vpop.f32.mrb[207].mxu0 }
0x22ea   : > { %v11776_v0 = vadd.f32 %v11770_v61, %v11708_v7  ;;  %v12176_v1 = vpop.f32.mrb[228].mxu1 }
0x22eb   : > { %v12178_v24 = vpop.f32.mrb[229].mxu1 }
0x22ec   : > { %v12180_v39 = vpop.f32.mrb[230].mxu1 }
0x22ed   : > { %v12181_v35 = vpop.f32.mrb[231].mxu1 }
0x22ee   : > { %v11836_v8 = vpop.f32.mrb[208].mxu0 }
0x22ef   : > { %v11843_v31 = vadd.f32 %v11836_v8, %v11775_v54  ;;  %v11838_v60 = vpop.f32.mrb[209].mxu0 }
0x22f0   : > { %v11844_v30 = vadd.f32 %v11838_v60, %v11776_v0  ;;  %v11840_v62 = vpop.f32.mrb[210].mxu0 }
0x22f1   : > { %v11911_v10 = vadd.f32 %v11904_v50, %v11843_v31  ;;  %v11841_v29 = vpop.f32.mrb[211].mxu0 }
0x22f2   : > { %v11912_v51 = vadd.f32 %v11906_v21, %v11844_v30 }
0x22f6   : > { %v11972_v37 = vpop.f32.mrb[212].mxu0 }
0x22f7   : > { %v11979_v27 = vadd.f32 %v11972_v37, %v11911_v10  ;;  %v11974_v9 = vpop.f32.mrb[213].mxu0 }
0x22f8   : > { %v11980_v20 = vadd.f32 %v11974_v9, %v11912_v51  ;;  %v11976_v17 = vpop.f32.mrb[214].mxu0 }
0x22f9   : > { %v12047_v15 = vadd.f32 %v12040_v19, %v11979_v27  ;;  %v11977_v22 = vpop.f32.mrb[215].mxu0 }
0x22fa   : > { %v12048_v61 = vadd.f32 %v12042_v43, %v11980_v20  ;;  %v12312_v40 = vpop.f32.mrb[232].mxu1  ;;  %v12529_v22 = vpop.permute.xlu0 %12528 }
0x22fb   : > { %v12314_v48 = vpop.f32.mrb[233].mxu1 }
0x22fc   : > { %v12316_v49 = vpop.f32.mrb[234].mxu1 }
0x22fd   : > { %v12317_v41 = vpop.f32.mrb[235].mxu1 }
0x22fe   : > { %v12108_v4 = vpop.f32.mrb[216].mxu0 }
0x22ff   : > { %v12115_v36 = vadd.f32 %v12108_v4, %v12047_v15  ;;  %v12110_v6 = vpop.f32.mrb[217].mxu0 }
0x2300   : > { %v12116_v55 = vadd.f32 %v12110_v6, %v12048_v61  ;;  %v12112_v7 = vpop.f32.mrb[218].mxu0 }
0x2301   : > { %v12183_v50 = vadd.f32 %v12176_v1, %v12115_v36  ;;  %v12113_v42 = vpop.f32.mrb[219].mxu0 }
0x2302   : > { %v12184_v21 = vadd.f32 %v12178_v24, %v12116_v55 }
0x2306   : > { %v12244_v54 = vpop.f32.mrb[220].mxu0 }
0x2307   : > { %v12251_v58 = vadd.f32 %v12244_v54, %v12183_v50  ;;  %v12246_v0 = vpop.f32.mrb[221].mxu0 }
0x2308   : > { %v12252_v39 = vadd.f32 %v12246_v0, %v12184_v21  ;;  %v12248_v35 = vpop.f32.mrb[222].mxu0 }
0x2309   : > { %v12319_v19 = vadd.f32 %v12312_v40, %v12251_v58  ;;  %v12249_v8 = vpop.f32.mrb[223].mxu0 }
0x230a   : > { %v12320_v43 = vadd.f32 %v12314_v48, %v12252_v39  ;;  %v12448_v31 = vpop.f32.mrb[236].mxu1  ;;  %v12553_v8 = vld [vmem:[%s18184_s13] sm:$0xf] }
0x230b   : > { %v12450_v60 = vpop.f32.mrb[237].mxu1 }
0x230c   : > { %v12452_v30 = vpop.f32.mrb[238].mxu1 }
0x230d   : > { %v12453_v62 = vpop.f32.mrb[239].mxu1 }
0x230e   : > { %v12380_v10 = vpop.f32.mrb[224].mxu0 }
0x230f   : > { %v12387_v29 = vadd.f32 %v12380_v10, %v12319_v19  ;;  %v12382_v51 = vpop.f32.mrb[225].mxu0 }
0x2310   : > { %v12388_v37 = vadd.f32 %v12382_v51, %v12320_v43  ;;  %v12384_v27 = vpop.f32.mrb[226].mxu0 }
0x2311   : > { %v12455_v1 = vadd.f32 %v12448_v31, %v12387_v29  ;;  %v12385_v9 = vpop.f32.mrb[227].mxu0 }
0x2312   : > { %v12456_v24 = vadd.f32 %v12450_v60, %v12388_v37 }
0x2316   : > { %v12516_v20 = vpop.f32.mrb[228].mxu0 }
0x2317   : > { %v12523_v17 = vadd.f32 %v12516_v20, %v12455_v1  ;;  %v12518_v15 = vpop.f32.mrb[229].mxu0  ;;  %v14007_v1 = vld [vmem:[%s18184_s13 + $0x4] sm:$0xf] }
0x2318   : > { %v12524_v61 = vadd.f32 %v12518_v15, %v12456_v24  ;;  %v12520_v40 = vpop.f32.mrb[230].mxu0 }
0x2319   : > { %v12531_v49 = vadd.f32 %v12529_v22, %v12523_v17  ;;  %v12521_v48 = vpop.f32.mrb[231].mxu0  ;;  %v14012_v40 = vld [vmem:[%s18184_s13 + $0x8] sm:$0xf] }
0x231a   : > { %v12532_v41 = vadd.f32 %v12529_v22, %v12524_v61 }
0x231b   : > { %v12533_v4 = vmax.f32 %v12531_v49, 0.0 }
0x231c   : > { %v12534_v36 = vmax.f32 %v12532_v41, 0.0 }
0x231d   : > { %v12535_v6 = vpack.c.bf16 %v12533_v4, %v12533_v4 }
0x231e   : > { %v12536_v55 = vpack.c.bf16 %v12534_v36, %v12534_v36 }
0x231f   : > { %12539 = vrot.lane.b32.xlu1 %v12535_v6, %s18134_s5  ;;  %v14015_v6 = vld [vmem:[%s18184_s13 + $0xc] sm:$0xf] }
0x2320   : > { %12541 = vrot.lane.b32.xlu0 %v12536_v55, %s18134_s5 }
0x2391   : > { %v12540_v7 = vpop.permute.xlu1 %12539 }
0x2392   : > { %v12546_v50 = vsel %vm1334_vm0, 0, %v12540_v7  ;;  %v12542_v42 = vpop.permute.xlu0 %12541 }
0x2393   : > { %v12543_v21 = vsel %vm1334_vm0, %v12540_v7, %v12542_v42  ;;  %v12554_v54 = vmul.bf16 %v12546_v50, %v15909_v25  ;;  %v12670_v58 = vmul.bf16 %v12546_v50, %v15927_v33  ;;  %v12551_v39 = vmul.bf16 %v12546_v50, %v18147_v28 }
0x2394   : > { %v12552_v0 = vmul.bf16 %v12543_v21, %v18148_v18  ;;  %v12738_v19 = vmul.bf16 %v12546_v50, %v18140_v16  ;;  %v12806_v25 = vmul.bf16 %v12546_v50, %v18143_v23  ;;  %v12874_v33 = vmul.bf16 %v12546_v50, %v18145_v13 }
0x2395   : > { %12562 = vrot.lane.b32.xlu1 %v12554_v54, %s18110_s4  ;;  %12678 = vrot.lane.b32.xlu0 %v12670_v58, %s18104_s2  ;;  %v12624_v35 = vsel %vm1457_vm1, %v12551_v39, 0  ;;  %v12942_v28 = vmul.bf16 %v12546_v50, %v18151_v53  ;;  %v12549_v18 = vsel %vm1334_vm0, %v12542_v42, 0  ;;  %v12555_v23 = vmul.bf16 %v12543_v21, %v15961_v47  ;;  %v14018_v54 = vld [vmem:[%s18184_s13 + $0x10] sm:$0xf] }
0x2396   : > { %14010 = vmatprep.subr.msk.bf16.mxu0 %vm1457_vm1, %v12552_v0  ;;  %v12556_v16 = vmul.bf16 %v12549_v18, %v15924_v32  ;;  %v13010_v13 = vmul.bf16 %v12546_v50, %v18156_v46  ;;  %v13078_v53 = vmul.bf16 %v12546_v50, %v18161_v45  ;;  %v12671_v43 = vmul.bf16 %v12543_v21, %v15977_v52 }
0x2397   : > { %12630 = vmatpush1.bf16.msra.mxu0 %v12624_v35  ;;  %v12672_v32 = vmul.bf16 %v12549_v18, %v18138_v57  ;;  %v12740_v47 = vmul.bf16 %v12549_v18, %v18142_v44  ;;  %v12739_v31 = vmul.bf16 %v12543_v21, %v18137_v3  ;;  %v12807_v46 = vmul.bf16 %v12543_v21, %v18139_v11 }
0x2398   : > { %v12808_v45 = vmul.bf16 %v12549_v18, %v18144_v12  ;;  %v12876_v52 = vmul.bf16 %v12549_v18, %v18150_v34  ;;  %v12875_v57 = vmul.bf16 %v12543_v21, %v18141_v56  ;;  %v12943_v3 = vmul.bf16 %v12543_v21, %v18154_v2  ;;  %v13160_v2 = vld [vmem:[%s15818_s3] sm:$0xff] }
0x2399   : > { %12746 = vrot.lane.b32.xlu1 %v12738_v19, %s18127_s7  ;;  %12814 = vrot.lane.b32.xlu0 %v12806_v25, %s18128_s9  ;;  %v12944_v11 = vmul.bf16 %v12549_v18, %v18153_v63  ;;  %v13012_v44 = vmul.bf16 %v12549_v18, %v18159_v38  ;;  %v13011_v12 = vmul.bf16 %v12543_v21, %v18160_v59  ;;  %v13146_v63 = vld [vmem:[%s15813_s21] sm:$0xff]  ;;  %vm18185_vm0 = vcmask 908288   ;;  %v14021_v25 = vld [vmem:[%s18184_s13 + $0x14] sm:$0xf] }
0x239a   : > { %14011 = vmatmul.mubr.msk.bf16.vlgmr.msra.gmra.mrb[232].mxu0 %vm1453_vm2, %v12553_v8  ;;  %v13079_v56 = vmul.bf16 %v12543_v21, %v18165_v26  ;;  %v13080_v34 = vmul.bf16 %v12549_v18, %v18164_v5  ;;  %v13180_v38 = vld [vmem:[#allocation2] sm:$0x1] }
0x239b   : > { %12795 = vmatprep.mubr.bf16.mxu0 %v18136_v14 }
0x239d   : > { %12882 = vrot.lane.b32.xlu1 %v12874_v33, %s18129_s10  ;;  %12950 = vrot.lane.b32.xlu0 %v12942_v28, %s18152_s0 }
0x23a1   : > { %12566 = vrot.lane.b32.xlu1 %v12556_v16, %s18110_s4  ;;  %12564 = vrot.lane.b32.xlu0 %v12555_v23, %s18110_s4  ;;  %v14024_v23 = vld [vmem:[%s18184_s13 + $0x18] sm:$0xf] }
0x23a5   : > { %13018 = vrot.lane.b32.xlu1 %v13010_v13, %s18158_s12  ;;  %13086 = vrot.lane.b32.xlu0 %v13078_v53, %s18163_s14 }
0x23a9   : > { %12680 = vrot.lane.b32.xlu1 %v12671_v43, %s18104_s2  ;;  %12682 = vrot.lane.b32.xlu0 %v12672_v32, %s18104_s2 }
0x23ad   : > { %12750 = vrot.lane.b32.xlu1 %v12740_v47, %s18127_s7  ;;  %12748 = vrot.lane.b32.xlu0 %v12739_v31, %s18127_s7  ;;  %v14027_v31 = vld [vmem:[%s18184_s13 + $0x1c] sm:$0xf] }
0x23b1   : > { %12816 = vrot.lane.b32.xlu1 %v12807_v46, %s18128_s9  ;;  %12818 = vrot.lane.b32.xlu0 %v12808_v45, %s18128_s9  ;;  %s13331_s9 = sshll.u32 %s18198_s1, 1 }
0x23b2   : > { %s1322_s4 = scalar_lea.vmem %s15826_s8, %s13331_s9 }
0x23b5   : > { %12886 = vrot.lane.b32.xlu1 %v12876_v52, %s18129_s10  ;;  %12884 = vrot.lane.b32.xlu0 %v12875_v57, %s18129_s10 }
0x23b9   : > { %12952 = vrot.lane.b32.xlu1 %v12943_v3, %s18152_s0  ;;  %12954 = vrot.lane.b32.xlu0 %v12944_v11, %s18152_s0  ;;  %v14030_v11 = vld [vmem:[%s18184_s13 + $0x20] sm:$0xf] }
0x23bd   : > { %13022 = vrot.lane.b32.xlu1 %v13012_v44, %s18158_s12  ;;  %13020 = vrot.lane.b32.xlu0 %v13011_v12, %s18158_s12 }
0x23c1   : > { %13088 = vrot.lane.b32.xlu1 %v13079_v56, %s18163_s14  ;;  %13090 = vrot.lane.b32.xlu0 %v13080_v34, %s18163_s14 }
0x23c5   : > { %13149 = vperm.xlu1 %15354, %v13146_v63   ;;  %13163 = vperm.xlu0 %15353, %v13160_v2  }
0x23c9   : > { %13183 = vperm.xlu1 %15354, %v13180_v38  }
0x2407   : > { %v12563_v59 = vpop.permute.xlu1 %12562  ;;  %v12679_v60 = vpop.permute.xlu0 %12678 }
0x240b   : > { %v12747_v30 = vpop.permute.xlu1 %12746  ;;  %v12815_v62 = vpop.permute.xlu0 %12814 }
0x240f   : > { %v12883_v10 = vpop.permute.xlu1 %12882  ;;  %v12951_v29 = vpop.permute.xlu0 %12950 }
0x2413   : > { %v12567_v26 = vpop.permute.xlu1 %12566  ;;  %v12565_v51 = vpop.permute.xlu0 %12564 }
0x2414   : > { %v12568_v5 = vsel %vm1450_vm10, %v12563_v59, %v12565_v51  ;;  %v12569_v37 = vsel %vm1450_vm10, %v12565_v51, %v12567_v26  ;;  %vm18186_vm10 = vmmov %vm18185_vm0 }
0x2415   : > { %v12574_v27 = vsel %vm1457_vm1, %v12568_v5, 0  ;;  %14008 = vmatprep.subr.msk.bf16.mxu1 %vm1457_vm1, %v12569_v37 }
0x2416   : > { %12580 = vmatpush1.bf16.msra.mxu1 %v12574_v27 }
0x2417   : > { %v13019_v9 = vpop.permute.xlu1 %13018  ;;  %v17831_v24 = vpop.permute.xlu0 %13086 }
0x2419   : > { %14009 = vmatmul.mubr.msk.bf16.vlgmr.msra.gmra.mrb[240].mxu1 %vm1453_vm2, %v14007_v1 }
0x241a   : > { %12727 = vmatprep.mubr.bf16.mxu1 %v18136_v14 }
0x241b   : > { %v12681_v20 = vpop.permute.xlu1 %12680  ;;  %v12683_v17 = vpop.permute.xlu0 %12682 }
0x241c   : > { %v12684_v15 = vsel %vm1619_vm11, %v12679_v60, %v12681_v20  ;;  %v12685_v22 = vsel %vm1619_vm11, %v12681_v20, %v12683_v17  ;;  %vm18187_vm11 = vmmov %vm18174_vm5 }
0x241d   : > { %v12690_v61 = vsel %vm1457_vm1, %v12684_v15, 0  ;;  %14013 = vmatprep.subr.msk.bf16.mxu1 %vm1457_vm1, %v12685_v22 }
0x241e   : > { %12696 = vmatpush1.bf16.msra.mxu1 %v12690_v61 }
0x241f   : > { %v12751_v49 = vpop.permute.xlu1 %12750  ;;  %v12749_v48 = vpop.permute.xlu0 %12748 }
0x2420   : > { %v12752_v41 = vsel %vm1738_vm12, %v12747_v30, %v12749_v48  ;;  %v12753_v4 = vsel %vm1738_vm12, %v12749_v48, %v12751_v49  ;;  %vm18188_vm12 = vmmov %vm18174_vm5 }
0x2421   : > { %v12758_v36 = vsel %vm1457_vm1, %v12752_v41, 0  ;;  %14014 = vmatmul.mubr.msk.bf16.vlgmr.msra.gmra.mrb[244].mxu1 %vm1453_vm2, %v14012_v40  ;;  %14016 = vmatprep.subr.msk.bf16.mxu0 %vm1457_vm1, %v12753_v4  ;;  %vm18189_vm5 = vmmov %vm18177_vm3 }
0x2422   : > { %12764 = vmatpush1.bf16.msra.mxu0 %v12758_v36  ;;  %12863 = vmatprep.mubr.bf16.mxu1 %v18136_v14  ;;  %vm18192_vm3 = vmmov %vm18180_vm8 }
0x2423   : > { %v12817_v55 = vpop.permute.xlu1 %12816  ;;  %v12819_v7 = vpop.permute.xlu0 %12818 }
0x2424   : > { %v12820_v50 = vsel %vm18185_vm0, %v12815_v62, %v12817_v55  ;;  %v12821_v42 = vsel %vm18186_vm10, %v12817_v55, %v12819_v7 }
0x2425   : > { %v12826_v21 = vsel %vm1457_vm1, %v12820_v50, 0  ;;  %14017 = vmatmul.mubr.msk.bf16.vlgmr.msra.gmra.mrb[236].mxu0 %vm1453_vm2, %v14015_v6  ;;  %14019 = vmatprep.subr.msk.bf16.mxu1 %vm1457_vm1, %v12821_v42 }
0x2426   : > { %12832 = vmatpush1.bf16.msra.mxu1 %v12826_v21  ;;  %12931 = vmatprep.mubr.bf16.mxu0 %v18136_v14 }
0x2427   : > { %v12887_v58 = vpop.permute.xlu1 %12886  ;;  %v12885_v0 = vpop.permute.xlu0 %12884 }
0x2428   : > { %v12888_v39 = vsel %vm18187_vm11, %v12883_v10, %v12885_v0  ;;  %v12889_v35 = vsel %vm18188_vm12, %v12885_v0, %v12887_v58 }
0x2429   : > { %v12894_v19 = vsel %vm1457_vm1, %v12888_v39, 0  ;;  %14020 = vmatmul.mubr.msk.bf16.vlgmr.msra.gmra.mrb[248].mxu1 %vm1453_vm2, %v14018_v54  ;;  %14022 = vmatprep.subr.msk.bf16.mxu0 %vm1457_vm1, %v12889_v35 }
0x242a   : > { %12900 = vmatpush1.bf16.msra.mxu0 %v12894_v19  ;;  %12999 = vmatprep.mubr.bf16.mxu1 %v18136_v14 }
0x242b   : > { %v12953_v33 = vpop.permute.xlu1 %12952  ;;  %v12955_v28 = vpop.permute.xlu0 %12954 }
0x242c   : > { %v12956_v18 = vsel %vm18189_vm5, %v12951_v29, %v12953_v33  ;;  %v12957_v8 = vsel %vm18190_vm7, %v12953_v33, %v12955_v28 }
0x242d   : > { %v12962_v16 = vsel %vm1457_vm1, %v12956_v18, 0  ;;  %14023 = vmatmul.mubr.msk.bf16.vlgmr.msra.gmra.mrb[240].mxu0 %vm1453_vm2, %v14021_v25  ;;  %14025 = vmatprep.subr.msk.bf16.mxu1 %vm1457_vm1, %v12957_v8 }
0x242e   : > { %12968 = vmatpush1.bf16.msra.mxu1 %v12962_v16  ;;  %13067 = vmatprep.mubr.bf16.mxu0 %v18136_v14 }
0x242f   : > { %v13023_v13 = vpop.permute.xlu1 %13022  ;;  %v13021_v53 = vpop.permute.xlu0 %13020 }
0x2430   : > { %v13024_v43 = vsel %vm18191_vm15, %v13019_v9, %v13021_v53  ;;  %v13025_v32 = vsel %vm18192_vm3, %v13021_v53, %v13023_v13 }
0x2431   : > { %v13030_v47 = vsel %vm1457_vm1, %v13024_v43, 0  ;;  %14026 = vmatmul.mubr.msk.bf16.vlgmr.msra.gmra.mrb[252].mxu1 %vm1453_vm2, %v14024_v23  ;;  %14028 = vmatprep.subr.msk.bf16.mxu0 %vm1457_vm1, %v13025_v32 }
0x2432   : > { %13036 = vmatpush1.bf16.msra.mxu0 %v13030_v47  ;;  %13135 = vmatprep.mubr.bf16.mxu1 %v18136_v14 }
0x2433   : > { %v13089_v46 = vpop.permute.xlu1 %13088  ;;  %v13091_v45 = vpop.permute.xlu0 %13090 }
0x2434   : > { %v13092_v52 = vsel %vm18178_vm4, %v17831_v24, %v13089_v46  ;;  %v13093_v57 = vsel %vm18193_vm6, %v13089_v46, %v13091_v45 }
0x2435   : > { %v13098_v3 = vsel %vm1457_vm1, %v13092_v52, 0  ;;  %14029 = vmatmul.mubr.msk.bf16.vlgmr.msra.gmra.mrb[244].mxu0 %vm1453_vm2, %v14027_v31  ;;  %14031 = vmatprep.subr.msk.bf16.mxu1 %vm1457_vm1, %v13093_v57 }
0x2436   : > { %13104 = vmatpush1.bf16.msra.mxu1 %v13098_v3 }
0x2439   : > { %14032 = vmatmul.mubr.msk.bf16.vlgmr.msra.gmra.mrb[0].mxu1 %vm1453_vm2, %v14030_v11 }
0x2444   : > { %v13150_v8 = vpop.permute.xlu1 %13149  ;;  %v13164_v52 = vpop.permute.xlu0 %13163 }
0x246d   : > { %v12663_v44 = vpop.f32.mrb[232].mxu0 }
0x246e   : > { %v12665_v12 = vpop.f32.mrb[233].mxu0 }
0x246f   : > { %v12667_v14 = vpop.f32.mrb[234].mxu0 }
0x2470   : > { %v12668_v56 = vpop.f32.mrb[235].mxu0 }
0x24ec   : > { %v12613_v34 = vpop.f32.mrb[240].mxu1 }
0x24ed   : > { %v12615_v63 = vpop.f32.mrb[241].mxu1  ;;  %v12664_v2 = vadd.f32 %v12663_v44, %v12613_v34 }
0x24ee   : > { %v12617_v38 = vpop.f32.mrb[242].mxu1  ;;  %v12666_v59 = vadd.f32 %v12665_v12, %v12615_v63 }
0x24ef   : > { %v12618_v60 = vpop.f32.mrb[243].mxu1  ;;  %v13184_v38 = vpop.permute.xlu1 %13183 }
0x24f4   : > { %v12729_v30 = vpop.f32.mrb[244].mxu1 }
0x24f5   : > { %v12736_v62 = vadd.f32 %v12729_v30, %v12664_v2  ;;  %v12731_v10 = vpop.f32.mrb[245].mxu1 }
0x24f6   : > { %v12737_v29 = vadd.f32 %v12731_v10, %v12666_v59  ;;  %v12733_v26 = vpop.f32.mrb[246].mxu1 }
0x24f7   : > { %v12734_v51 = vpop.f32.mrb[247].mxu1 }
0x24f8   : > { %v12797_v5 = vpop.f32.mrb[236].mxu0 }
0x24f9   : > { %v12804_v37 = vadd.f32 %v12797_v5, %v12736_v62  ;;  %v12799_v27 = vpop.f32.mrb[237].mxu0  ;;  %v18194_v62 = vld [vmem:[#allocation37_spill] sm:$0xff] }
0x24fa   : > { %v12805_v1 = vadd.f32 %v12799_v27, %v12737_v29  ;;  %v12801_v9 = vpop.f32.mrb[238].mxu0  ;;  %v13189_v10 = vrot.slane %v13184_v38, %v18194_v62 }
0x24fb   : > { %v12802_v24 = vpop.f32.mrb[239].mxu0 }
0x24fc   : > { %v12865_v20 = vpop.f32.mrb[248].mxu1 }
0x24fd   : > { %v12872_v17 = vadd.f32 %v12865_v20, %v12804_v37  ;;  %v12867_v15 = vpop.f32.mrb[249].mxu1 }
0x24fe   : > { %v12873_v22 = vadd.f32 %v12867_v15, %v12805_v1  ;;  %v12869_v61 = vpop.f32.mrb[250].mxu1 }
0x24ff   : > { %v12870_v40 = vpop.f32.mrb[251].mxu1  ;;  %v18195_v61 = vld [vmem:[#allocation36_spill] sm:$0xff] }
0x2500   : > { %v12933_v49 = vpop.f32.mrb[240].mxu0 }
0x2501   : > { %v12940_v48 = vadd.f32 %v12933_v49, %v12872_v17  ;;  %v12935_v41 = vpop.f32.mrb[241].mxu0  ;;  %v18196_v49 = vlaneseq }
0x2502   : > { %v12941_v4 = vadd.f32 %v12935_v41, %v12873_v22  ;;  %v12937_v36 = vpop.f32.mrb[242].mxu0 }
0x2503   : > { %v12938_v6 = vpop.f32.mrb[243].mxu0  ;;  %vm13224_vm1 = vcmp.lt.s32.totalorder %v18196_v49, 256 }
0x2504   : > { %v13001_v55 = vpop.f32.mrb[252].mxu1 }
0x2505   : > { %v13008_v7 = vadd.f32 %v13001_v55, %v12940_v48  ;;  %v13003_v50 = vpop.f32.mrb[253].mxu1 }
0x2506   : > { %v13009_v42 = vadd.f32 %v13003_v50, %v12941_v4  ;;  %v13005_v21 = vpop.f32.mrb[254].mxu1 }
0x2507   : > { %v13006_v54 = vpop.f32.mrb[255].mxu1 }
0x2508   : > { %v13069_v58 = vpop.f32.mrb[244].mxu0 }
0x2509   : > { %v13076_v0 = vadd.f32 %v13069_v58, %v13008_v7  ;;  %v13071_v39 = vpop.f32.mrb[245].mxu0 }
0x250a   : > { %v13077_v35 = vadd.f32 %v13071_v39, %v13009_v42  ;;  %v13073_v19 = vpop.f32.mrb[246].mxu0 }
0x250b   : > { %v13074_v25 = vpop.f32.mrb[247].mxu0 }
0x250c   : > { %v13137_v33 = vpop.f32.mrb[0].mxu1 }
0x250d   : > { %v13144_v28 = vadd.f32 %v13137_v33, %v13076_v0  ;;  %v13139_v18 = vpop.f32.mrb[1].mxu1 }
0x250e   : > { %v13145_v16 = vadd.f32 %v13139_v18, %v13077_v35  ;;  %v13141_v23 = vpop.f32.mrb[2].mxu1 }
0x250f   : > { %v13152_v13 = vadd.f32 %v13150_v8, %v13144_v28  ;;  %v13142_v53 = vpop.f32.mrb[3].mxu1 }
0x2510   : > { %v13153_v43 = vadd.f32 %v13150_v8, %v13145_v16 }
0x2511   : > { %v13154_v32 = vmax.f32 %v13152_v13, 0.0 }
0x2512   : > { %v13155_v47 = vmax.f32 %v13153_v43, 0.0 }
0x2513   : > { %v13156_v31 = vpack.c.bf16 %v13154_v32, %v13154_v32 }
0x2514   : > { %v13157_v46 = vpack.c.bf16 %v13155_v47, %v13155_v47 }
0x2515   : > { %v13158_v45 = vunpack.c.l.bf16 %v13156_v31 }
0x2516   : > { %v13159_v57 = vunpack.c.l.bf16 %v13157_v46 }
0x2517   : > { %v13166_v3 = vmul.f32 %v13164_v52, %v13158_v45 }
0x2518   : > { %v13167_v11 = vmul.f32 %v13164_v52, %v13159_v57 }
0x2519   : > { %v13168_v44 = vrot.slane %v13166_v3, 4 }
0x251a   : > { %v13174_v12 = vrot.slane %v13167_v11, 4 }
0x251b   : > { %v13169_v14 = vadd.f32 %v13168_v44, %v13166_v3 }
0x251c   : > { %v13175_v56 = vadd.f32 %v13174_v12, %v13167_v11 }
0x251d   : > { %v13170_v34 = vrot.slane %v13169_v14, 2 }
0x251e   : > { %v13176_v63 = vrot.slane %v13175_v56, 2 }
0x251f   : > { %v13171_v2 = vadd.f32 %v13170_v34, %v13169_v14 }
0x2520   : > { %v13177_v59 = vadd.f32 %v13176_v63, %v13175_v56 }
0x2521   : > { %v13172_v60 = vrot.slane %v13171_v2, 1 }
0x2522   : > { %v13178_v30 = vrot.slane %v13177_v59, 1 }
0x2523   : > { %v13173_v29 = vadd.f32 %v13172_v60, %v13171_v2 }
0x2524   : > { %v13179_v26 = vadd.f32 %v13178_v30, %v13177_v59 }
0x2525   : > { %v13190_v51 = vadd.f32 %v13189_v10, %v13173_v29 }
0x2526   : > { %v13191_v5 = vadd.f32 %v13189_v10, %v13179_v26 }
0x2527   : > { %v14033_v37 = vmul.f32 -1.442695, %v13190_v51 }
0x2528   : > { %v14034_v27 = vmul.f32 -1.442695, %v13191_v5 }
0x2529   : > { %15506 = vpow2.f32 %v14033_v37 }
0x252a   : > { %15508 = vpow2.f32 %v14034_v27 }
0x2533   : > { %v15507_v1 = vpop.eup %15506 }
0x2534   : > { %v15509_v9 = vpop.eup %15508  ;;  %v13198_v24 = vadd.f32 1.0, %v15507_v1 }
0x2535   : > { %v13199_v20 = vadd.f32 1.0, %v15509_v9 }
0x2536   : > { %15510 = vrcp.f32 %v13198_v24 }
0x2537   : > { %15512 = vrcp.f32 %v13199_v20 }
0x2540   : > { %v15511_v17 = vpop.eup %15510 }
0x2541   : > { %v15513_v15 = vpop.eup %15512 }
0x2542   : > { %v13206_v22 = vcombine.low %v15511_v17, %v15513_v15 }
0x2544   : > { %v13213_v40 = vrot.slane %v13206_v22, %v18195_v61 }
0x2546   : > { %v13220_v48 = vrot.slane %v13213_v40, %v18195_v61 }
0x2548   : > { %13226 = vst.msk [vmem:[%s1322_s4] sm:$0x3] %vm13224_vm1, %v13220_v48 }
0x2549 PF: > { %s101_s28 = sadd.s32 1, %s15520_s28  }
0x254a   : > { %p98_p4 = scmp.ge.s32.totalorder %s101_s28, 4  }
0x254c   :  { %100 = sbr.rel (!%p98_p4) target bundleno = 90 (0x5a), region = 438 }

</bundles_post_ra>
